<compile_context>
chip_gen: v7x
topology: tpu7x:2x2x1
jax: 0.10.0
libtpu: 0.0.40
codegen_flags: <defaults>
</compile_context>

<pallas_src>
import jax
import jax.numpy as jnp
from jax.experimental import pallas as pl
from jax.experimental.pallas import tpu as pltpu

# Logical (PyTorch) dims
IN_DIM = 4
HID = 1000
OUT_DIM = 400

# Lane-aligned padded dims (multiples of 128)
IN_PAD = 128
HID_PAD = 1024
OUT_PAD = 512

MAX_BATCH_TILE = 512   # rows per grid step on the throughput path
MIN_BATCH_TILE = 16    # native bf16 (16,128) sublane packing for the x tile


def mlp_kernel(x_ref, w1, b1, w2, b2, w3, b3, w4, b4, w5, b5, o_ref):
    """Fused 5-layer MLP tile: bf16 matmuls on the MXU with f32 accumulation,
    bias-add + ReLU on the VPU, lane-dense f32 output store."""

    def layer(h, w, b, relu):
        acc = jnp.dot(h, w[...], preferred_element_type=jnp.float32) + b[...]
        if relu:
            return jnp.maximum(acc, 0.0).astype(jnp.bfloat16)
        return acc

    h = layer(x_ref[...], w1, b1, True)
    h = layer(h, w2, b2, True)
    h = layer(h, w3, b3, True)
    h = layer(h, w4, b4, True)
    o_ref[...] = layer(h, w5, b5, False)


def init_params(key):
    """Deterministic init mimicking PyTorch's default Linear init
    (uniform +-1/sqrt(fan_in)).  Returns [(W, b), ...] with W:[in,out],
    b:[1,out], both float32 (module semantics)."""
    dims = [(IN_DIM, HID), (HID, HID), (HID, HID), (HID, HID), (HID, OUT_DIM)]
    params = []
    for (fan_in, fan_out) in dims:
        key, kw, kb = jax.random.split(key, 3)
        bound = 1.0 / (fan_in ** 0.5)
        w = jax.random.uniform(kw, (fan_in, fan_out), jnp.float32, -bound, bound)
        b = jax.random.uniform(kb, (1, fan_out), jnp.float32, -bound, bound)
        params.append((w, b))
    return params


def _pad2(a, rows, cols):
    return jnp.zeros((rows, cols), a.dtype).at[: a.shape[0], : a.shape[1]].set(a)


def prepare_params(params):
    """Zero-pad weights/biases to lane-aligned shapes; cast weights to bf16
    (biases stay f32 and add into the f32 accumulator).  Call ONCE at init
    and reuse the result for every forward call."""
    pads = [(IN_PAD, HID_PAD), (HID_PAD, HID_PAD), (HID_PAD, HID_PAD),
            (HID_PAD, HID_PAD), (HID_PAD, OUT_PAD)]
    prepared = []
    for (w, b), (ri, ci) in zip(params, pads):
        prepared.append((_pad2(w, ri, ci).astype(jnp.bfloat16),
                         _pad2(b, 1, ci)))
    return prepared


def _round_up(v, m):
    return ((v + m - 1) // m) * m


def _choose_batch_tile(B):
    """Batch tile that is a multiple of 16, never exceeds MAX_BATCH_TILE, and
    avoids ~2x row padding at awkward sizes (e.g. B=700 -> tile=352, not 512)."""
    n_tiles = max(1, -(-B // MAX_BATCH_TILE))
    tile = _round_up(-(-B // n_tiles), MIN_BATCH_TILE)
    return max(MIN_BATCH_TILE, min(MAX_BATCH_TILE, tile))


def _vmem_limit_bytes(tile):
    w = 2 * (IN_PAD * HID_PAD + 3 * HID_PAD * HID_PAD + HID_PAD * OUT_PAD)  # bf16, single-buffered
    b = 4 * (4 * HID_PAD + OUT_PAD)                                         # f32 biases
    x = 2 * tile * IN_PAD * 2        # double-buffered bf16 input tiles
    o = 2 * tile * OUT_PAD * 4       # double-buffered f32 output tiles
    act = 4 * tile * HID_PAD * 4     # in-kernel intermediates (generous)
    return max(16 << 20, int((w + b + x + o + act) * 1.5))


def predict_forward(x, prepared_params):
    """x: [B, 4] float32, prepared_params = prepare_params(params) computed
    once at init.  Returns [B, 400] float32."""
    B = x.shape[0]
    tile = _choose_batch_tile(B)
    grid_n = -(-B // tile)
    B_pad = grid_n * tile

    # Pad batch + feature dims with exact zeros; activations in bf16.
    x_pad = jnp.zeros((B_pad, IN_PAD), jnp.bfloat16).at[:B, :IN_DIM].set(
        x.astype(jnp.bfloat16))

    def weight_spec(shape):
        # Whole-array block, constant index_map -> identical block every grid
        # step, so single-buffer it (the 2nd pipeline buffer is pure waste).
        return pl.BlockSpec(shape, lambda i: (0, 0),
                            pipeline_mode=pl.Buffered(1))

    in_specs = [pl.BlockSpec((tile, IN_PAD), lambda i: (i, 0))]
    flat_params = []
    for (w, b) in prepared_params:
        in_specs.append(weight_spec(w.shape))
        in_specs.append(weight_spec(b.shape))
        flat_params += [w, b]

    layer_flops = IN_PAD * HID_PAD + 3 * HID_PAD * HID_PAD + HID_PAD * OUT_PAD
    cost = pl.CostEstimate(
        flops=2 * B_pad * layer_flops,
        transcendentals=0,
        bytes_accessed=(2 * layer_flops                   # bf16 weights
                        + 4 * (4 * HID_PAD + OUT_PAD)     # f32 biases
                        + B_pad * IN_PAD * 2              # bf16 input
                        + B_pad * OUT_PAD * 4))           # f32 output

    # Only shard the batch axis across v7x's 2 TensorCores when there are
    # enough tiles to amortize the per-core weight fetch; otherwise keep the
    # grid sequential so the 7.25 MiB weight read happens exactly once.
    semantics = ("parallel",) if grid_n >= 4 else ("arbitrary",)

    out = pl.pallas_call(
        mlp_kernel,
        out_shape=jax.ShapeDtypeStruct((B_pad, OUT_PAD), jnp.float32),
        grid=(grid_n,),
        in_specs=in_specs,
        out_specs=pl.BlockSpec((tile, OUT_PAD), lambda i: (i, 0)),
        compiler_params=pltpu.CompilerParams(
            dimension_semantics=semantics,
            vmem_limit_bytes=_vmem_limit_bytes(tile),
        ),
        cost_estimate=cost,
    )(x_pad, *flat_params)
    return out[:B, :OUT_DIM]


def predict_reference(x, params, emulate_bf16=True):
    """Pure-JAX reference.  With emulate_bf16=True it mirrors the kernel's
    bf16-inputs / f32-accumulation numerics (up to summation order)."""
    h = x
    n = len(params)
    for li, (w, b) in enumerate(params):
        if emulate_bf16:
            h = jnp.dot(h.astype(jnp.bfloat16), w.astype(jnp.bfloat16),
                        preferred_element_type=jnp.float32) + b
        else:
            h = h @ w + b
        if li < n - 1:
            h = jnp.maximum(h, 0.0)
    return h


def _check(out, ref, tol=1e-2):
    # Relative error scaled by output magnitude (robust to summation-order
    # differences in 1024-length dot products).
    err = float(jnp.max(jnp.abs(out - ref)) / (jnp.max(jnp.abs(ref)) + 1e-6))
    assert err < tol, err


if __name__ == "__main__":
    key = jax.random.PRNGKey(0)
    key, kx, kx2, kx3 = jax.random.split(key, 4)

    params = init_params(key)            # f32 params (PyTorch-Linear-like init)
    prepared = prepare_params(params)    # pad + bf16 cast, done ONCE at init

    predict = jax.jit(predict_forward)

    # Small-batch latency path: tile=16, grid=1.
    x = jax.random.normal(kx, (2, IN_DIM), jnp.float32)
    out = jax.block_until_ready(predict(x, prepared))
    assert out.shape == (2, OUT_DIM), out.shape
    _check(out, predict_reference(x, params))

    # Awkward batch size: tile=352, grid=2 (sequential grid, minimal padding).
    xb = jax.random.normal(kx2, (700, IN_DIM), jnp.float32)
    outb = jax.block_until_ready(predict(xb, prepared))
    assert outb.shape == (700, OUT_DIM), outb.shape
    _check(outb, predict_reference(xb, params))

    # Throughput path: tile=512, grid=4 ("parallel" batch axis).
    xc = jax.random.normal(kx3, (2048, IN_DIM), jnp.float32)
    outc = jax.block_until_ready(predict(xc, prepared))
    assert outc.shape == (2048, OUT_DIM), outc.shape
    _check(outc, predict_reference(xc, params))

    print("KERNEL_OK")
</pallas_src>

<mosaic_0001>
module attributes {stable_mosaic.version = 11 : i64} {
  func.func @mlp_kernel(%arg0: i32, %arg1: memref<16x128xbf16, #tpu.memory_space<vmem>>, %arg2: memref<128x1024xbf16, #tpu.memory_space<vmem>>, %arg3: memref<1x1024xf32, #tpu.memory_space<vmem>>, %arg4: memref<1024x1024xbf16, #tpu.memory_space<vmem>>, %arg5: memref<1x1024xf32, #tpu.memory_space<vmem>>, %arg6: memref<1024x1024xbf16, #tpu.memory_space<vmem>>, %arg7: memref<1x1024xf32, #tpu.memory_space<vmem>>, %arg8: memref<1024x1024xbf16, #tpu.memory_space<vmem>>, %arg9: memref<1x1024xf32, #tpu.memory_space<vmem>>, %arg10: memref<1024x512xbf16, #tpu.memory_space<vmem>>, %arg11: memref<1x512xf32, #tpu.memory_space<vmem>>, %arg12: memref<16x512xf32, #tpu.memory_space<vmem>>) attributes {dimension_semantics = [#tpu.dimension_semantics<arbitrary>], iteration_bounds = array<i64: 1>, scalar_prefetch = 0 : i64, scratch_operands = 0 : i64, tpu.core_type = #tpu.core_type<tc>, window_params = [{transform_indices = @transform_0, window_bounds = array<i64: 16, 128>}, {pipeline_mode = #tpu.pipeline_mode<synchronous>, transform_indices = @transform_1, window_bounds = array<i64: 128, 1024>}, {pipeline_mode = #tpu.pipeline_mode<synchronous>, transform_indices = @transform_2, window_bounds = array<i64: 1, 1024>}, {pipeline_mode = #tpu.pipeline_mode<synchronous>, transform_indices = @transform_3, window_bounds = array<i64: 1024, 1024>}, {pipeline_mode = #tpu.pipeline_mode<synchronous>, transform_indices = @transform_4, window_bounds = array<i64: 1, 1024>}, {pipeline_mode = #tpu.pipeline_mode<synchronous>, transform_indices = @transform_5, window_bounds = array<i64: 1024, 1024>}, {pipeline_mode = #tpu.pipeline_mode<synchronous>, transform_indices = @transform_6, window_bounds = array<i64: 1, 1024>}, {pipeline_mode = #tpu.pipeline_mode<synchronous>, transform_indices = @transform_7, window_bounds = array<i64: 1024, 1024>}, {pipeline_mode = #tpu.pipeline_mode<synchronous>, transform_indices = @transform_8, window_bounds = array<i64: 1, 1024>}, {pipeline_mode = #tpu.pipeline_mode<synchronous>, transform_indices = @transform_9, window_bounds = array<i64: 1024, 512>}, {pipeline_mode = #tpu.pipeline_mode<synchronous>, transform_indices = @transform_10, window_bounds = array<i64: 1, 512>}, {transform_indices = @transform_11, window_bounds = array<i64: 16, 512>}]} {
    %c0 = arith.constant 0 : index
    %c0_0 = arith.constant 0 : index
    %0 = vector.load %arg1[%c0, %c0_0] : memref<16x128xbf16, #tpu.memory_space<vmem>>, vector<16x128xbf16>
    %c0_1 = arith.constant 0 : index
    %c0_2 = arith.constant 0 : index
    %1 = vector.load %arg2[%c0_1, %c0_2] : memref<128x1024xbf16, #tpu.memory_space<vmem>>, vector<128x1024xbf16>
    %cst = arith.constant dense<0.000000e+00> : vector<16x1024xf32>
    %2 = tpu.matmul %0, %1, %cst {dimension_numbers = #tpu.dot_dimension_numbers<[1], [0], [0], [1], [0, 0, 1, 1], [], []>} : vector<16x128xbf16>, vector<128x1024xbf16>, vector<16x1024xf32> -> vector<16x1024xf32>
    %c0_3 = arith.constant 0 : index
    %c0_4 = arith.constant 0 : index
    %3 = vector.load %arg3[%c0_3, %c0_4] : memref<1x1024xf32, #tpu.memory_space<vmem>>, vector<1x1024xf32>
    %4 = vector.broadcast %3 : vector<1x1024xf32> to vector<16x1024xf32>
    %5 = arith.addf %2, %4 : vector<16x1024xf32>
    %cst_5 = arith.constant 0.000000e+00 : f32
    %6 = vector.broadcast %cst_5 : f32 to vector<16x1024xf32>
    %7 = arith.maximumf %5, %6 : vector<16x1024xf32>
    %8 = arith.truncf %7 : vector<16x1024xf32> to vector<16x1024xbf16>
    %c0_6 = arith.constant 0 : index
    %c0_7 = arith.constant 0 : index
    %9 = vector.load %arg4[%c0_6, %c0_7] : memref<1024x1024xbf16, #tpu.memory_space<vmem>>, vector<1024x1024xbf16>
    %cst_8 = arith.constant dense<0.000000e+00> : vector<16x1024xf32>
    %10 = tpu.matmul %8, %9, %cst_8 {dimension_numbers = #tpu.dot_dimension_numbers<[1], [0], [0], [1], [0, 0, 1, 1], [], []>} : vector<16x1024xbf16>, vector<1024x1024xbf16>, vector<16x1024xf32> -> vector<16x1024xf32>
    %c0_9 = arith.constant 0 : index
    %c0_10 = arith.constant 0 : index
    %11 = vector.load %arg5[%c0_9, %c0_10] : memref<1x1024xf32, #tpu.memory_space<vmem>>, vector<1x1024xf32>
    %12 = vector.broadcast %11 : vector<1x1024xf32> to vector<16x1024xf32>
    %13 = arith.addf %10, %12 : vector<16x1024xf32>
    %cst_11 = arith.constant 0.000000e+00 : f32
    %14 = vector.broadcast %cst_11 : f32 to vector<16x1024xf32>
    %15 = arith.maximumf %13, %14 : vector<16x1024xf32>
    %16 = arith.truncf %15 : vector<16x1024xf32> to vector<16x1024xbf16>
    %c0_12 = arith.constant 0 : index
    %c0_13 = arith.constant 0 : index
    %17 = vector.load %arg6[%c0_12, %c0_13] : memref<1024x1024xbf16, #tpu.memory_space<vmem>>, vector<1024x1024xbf16>
    %cst_14 = arith.constant dense<0.000000e+00> : vector<16x1024xf32>
    %18 = tpu.matmul %16, %17, %cst_14 {dimension_numbers = #tpu.dot_dimension_numbers<[1], [0], [0], [1], [0, 0, 1, 1], [], []>} : vector<16x1024xbf16>, vector<1024x1024xbf16>, vector<16x1024xf32> -> vector<16x1024xf32>
    %c0_15 = arith.constant 0 : index
    %c0_16 = arith.constant 0 : index
    %19 = vector.load %arg7[%c0_15, %c0_16] : memref<1x1024xf32, #tpu.memory_space<vmem>>, vector<1x1024xf32>
    %20 = vector.broadcast %19 : vector<1x1024xf32> to vector<16x1024xf32>
    %21 = arith.addf %18, %20 : vector<16x1024xf32>
    %cst_17 = arith.constant 0.000000e+00 : f32
    %22 = vector.broadcast %cst_17 : f32 to vector<16x1024xf32>
    %23 = arith.maximumf %21, %22 : vector<16x1024xf32>
    %24 = arith.truncf %23 : vector<16x1024xf32> to vector<16x1024xbf16>
    %c0_18 = arith.constant 0 : index
    %c0_19 = arith.constant 0 : index
    %25 = vector.load %arg8[%c0_18, %c0_19] : memref<1024x1024xbf16, #tpu.memory_space<vmem>>, vector<1024x1024xbf16>
    %cst_20 = arith.constant dense<0.000000e+00> : vector<16x1024xf32>
    %26 = tpu.matmul %24, %25, %cst_20 {dimension_numbers = #tpu.dot_dimension_numbers<[1], [0], [0], [1], [0, 0, 1, 1], [], []>} : vector<16x1024xbf16>, vector<1024x1024xbf16>, vector<16x1024xf32> -> vector<16x1024xf32>
    %c0_21 = arith.constant 0 : index
    %c0_22 = arith.constant 0 : index
    %27 = vector.load %arg9[%c0_21, %c0_22] : memref<1x1024xf32, #tpu.memory_space<vmem>>, vector<1x1024xf32>
    %28 = vector.broadcast %27 : vector<1x1024xf32> to vector<16x1024xf32>
    %29 = arith.addf %26, %28 : vector<16x1024xf32>
    %cst_23 = arith.constant 0.000000e+00 : f32
    %30 = vector.broadcast %cst_23 : f32 to vector<16x1024xf32>
    %31 = arith.maximumf %29, %30 : vector<16x1024xf32>
    %32 = arith.truncf %31 : vector<16x1024xf32> to vector<16x1024xbf16>
    %c0_24 = arith.constant 0 : index
    %c0_25 = arith.constant 0 : index
    %33 = vector.load %arg10[%c0_24, %c0_25] : memref<1024x512xbf16, #tpu.memory_space<vmem>>, vector<1024x512xbf16>
    %cst_26 = arith.constant dense<0.000000e+00> : vector<16x512xf32>
    %34 = tpu.matmul %32, %33, %cst_26 {dimension_numbers = #tpu.dot_dimension_numbers<[1], [0], [0], [1], [0, 0, 1, 1], [], []>} : vector<16x1024xbf16>, vector<1024x512xbf16>, vector<16x512xf32> -> vector<16x512xf32>
    %c0_27 = arith.constant 0 : index
    %c0_28 = arith.constant 0 : index
    %35 = vector.load %arg11[%c0_27, %c0_28] : memref<1x512xf32, #tpu.memory_space<vmem>>, vector<1x512xf32>
    %36 = vector.broadcast %35 : vector<1x512xf32> to vector<16x512xf32>
    %37 = arith.addf %34, %36 : vector<16x512xf32>
    %c0_29 = arith.constant 0 : index
    %c0_30 = arith.constant 0 : index
    %38 = vector.load %arg12[%c0_29, %c0_30] : memref<16x512xf32, #tpu.memory_space<vmem>>, vector<16x512xf32>
    tpu.vector_store %arg12[%c0_29, %c0_30], %37 {strides = array<i32>} : memref<16x512xf32, #tpu.memory_space<vmem>>, vector<16x512xf32>,
    return
  }
  func.func @transform_0(%arg0: i32) -> (i32, i32) {
    %c0_i32 = arith.constant 0 : i32
    %c0_i32_0 = arith.constant 0 : i32
    return %arg0, %c0_i32 : i32, i32
  }
  func.func @transform_1(%arg0: i32) -> (i32, i32) {
    %c0_i32 = arith.constant 0 : i32
    %c0_i32_0 = arith.constant 0 : i32
    %c0_i32_1 = arith.constant 0 : i32
    return %c0_i32, %c0_i32_0 : i32, i32
  }
  func.func @transform_2(%arg0: i32) -> (i32, i32) {
    %c0_i32 = arith.constant 0 : i32
    %c0_i32_0 = arith.constant 0 : i32
    %c0_i32_1 = arith.constant 0 : i32
    return %c0_i32, %c0_i32_0 : i32, i32
  }
  func.func @transform_3(%arg0: i32) -> (i32, i32) {
    %c0_i32 = arith.constant 0 : i32
    %c0_i32_0 = arith.constant 0 : i32
    %c0_i32_1 = arith.constant 0 : i32
    return %c0_i32, %c0_i32_0 : i32, i32
  }
  func.func @transform_4(%arg0: i32) -> (i32, i32) {
    %c0_i32 = arith.constant 0 : i32
    %c0_i32_0 = arith.constant 0 : i32
    %c0_i32_1 = arith.constant 0 : i32
    return %c0_i32, %c0_i32_0 : i32, i32
  }
  func.func @transform_5(%arg0: i32) -> (i32, i32) {
    %c0_i32 = arith.constant 0 : i32
    %c0_i32_0 = arith.constant 0 : i32
    %c0_i32_1 = arith.constant 0 : i32
    return %c0_i32, %c0_i32_0 : i32, i32
  }
  func.func @transform_6(%arg0: i32) -> (i32, i32) {
    %c0_i32 = arith.constant 0 : i32
    %c0_i32_0 = arith.constant 0 : i32
    %c0_i32_1 = arith.constant 0 : i32
    return %c0_i32, %c0_i32_0 : i32, i32
  }
  func.func @transform_7(%arg0: i32) -> (i32, i32) {
    %c0_i32 = arith.constant 0 : i32
    %c0_i32_0 = arith.constant 0 : i32
    %c0_i32_1 = arith.constant 0 : i32
    return %c0_i32, %c0_i32_0 : i32, i32
  }
  func.func @transform_8(%arg0: i32) -> (i32, i32) {
    %c0_i32 = arith.constant 0 : i32
    %c0_i32_0 = arith.constant 0 : i32
    %c0_i32_1 = arith.constant 0 : i32
    return %c0_i32, %c0_i32_0 : i32, i32
  }
  func.func @transform_9(%arg0: i32) -> (i32, i32) {
    %c0_i32 = arith.constant 0 : i32
    %c0_i32_0 = arith.constant 0 : i32
    %c0_i32_1 = arith.constant 0 : i32
    return %c0_i32, %c0_i32_0 : i32, i32
  }
  func.func @transform_10(%arg0: i32) -> (i32, i32) {
    %c0_i32 = arith.constant 0 : i32
    %c0_i32_0 = arith.constant 0 : i32
    %c0_i32_1 = arith.constant 0 : i32
    return %c0_i32, %c0_i32_0 : i32, i32
  }
  func.func @transform_11(%arg0: i32) -> (i32, i32) {
    %c0_i32 = arith.constant 0 : i32
    %c0_i32_0 = arith.constant 0 : i32
    return %arg0, %c0_i32 : i32, i32
  }
}

</mosaic_0001>

<bundles_post_ra>
// kernel: predict_forward.1
= control target key start
LH: loop header
LB: loop body
LE: loop exit
PB: predicated region body
PF: predicated region fallthrough
CT: control target
= control target key end

     0   :  { %16 = vsyncpa [#allocation3], 0  ;;  %s17437_s0 = inlined_call_operand.vmem [shape: bf16[16,128], index: 0, kind: input, shape index: {}]   ;;  %s17438_s1 = inlined_call_operand.hbm [shape: bf16[128,1024], index: 1, kind: input, shape index: {}]   ;;  %s17439_s2 = inlined_call_operand.hbm [shape: f32[1,1024], index: 2, kind: input, shape index: {}]   ;;  %s17440_s3 = inlined_call_operand.hbm [shape: bf16[1024,1024], index: 3, kind: input, shape index: {}]   ;;  %s17441_s4 = inlined_call_operand.hbm [shape: f32[1,1024], index: 4, kind: input, shape index: {}]   ;;  %s17442_s5 = inlined_call_operand.hbm [shape: bf16[1024,1024], index: 5, kind: input, shape index: {}]   ;;  %s17443_s6 = inlined_call_operand.hbm [shape: f32[1,1024], index: 6, kind: input, shape index: {}]   ;;  %s17444_s7 = inlined_call_operand.hbm [shape: bf16[1024,1024], index: 7, kind: input, shape index: {}]   ;;  %s17445_s8 = inlined_call_operand.hbm [shape: f32[1,1024], index: 8, kind: input, shape index: {}]   ;;  %s17446_s9 = inlined_call_operand.hbm [shape: bf16[1024,512], index: 9, kind: input, shape index: {}]   ;;  %s17447_s10 = inlined_call_operand.hbm [shape: f32[1,512], index: 10, kind: input, shape index: {}]   ;;  %s17448_s11 = inlined_call_operand.vmem [shape: f32[16,512], index: 11, kind: output, shape index: {}]  }
   0x1   :  { %17 = vsyncpa [#allocation5], 0 }
   0x2   :  { %18 = vsyncpa [#allocation8], 0 }
   0x3   :  { %19 = vsyncpa [#allocation11], 0 }
   0x4   :  { %20 = vsyncpa [#allocation14], 0 }
   0x5   :  { %21 = vsyncpa [#allocation17], 0  ;;  %s16909_s17 = smov [#allocation4]   ;;  %s16910_s19 = smov [#allocation7]  }
   0x6   :  { %s42_s18 = sshll.u32 %s16909_s17, 4  ;;  %s64_s20 = sshll.u32 %s16910_s19, 4  ;;  %s43_s18 = int_to_ptr.vmem [resolvable:$true] %s42_s18  ;;  %s65_s20 = int_to_ptr.vmem [resolvable:$true] %s64_s20 }
   0x7   :  { %s16677_s23 = scalar_lea.hbm %s17439_s2, 128 }
   0x8   :  { %p16678_p0 = scmp.ne.s32.totalorder %s17439_s2, %s16677_s23  ;;  %p16681_p1 = scmp.lt.u32.totalorder %s16677_s23, %s17439_s2 }
   0xa   :  { %p16683_p2 = pnand %p16681_p1, %p16678_p0 }
   0xc   :  { %16686 = shalt.err (!%p16683_p2)
}
   0xd   :  { %s16687_s28 = scalar_lea.vmem %s43_s18, 128  ;;  %p16692_p4 = scmp.lt.s32.totalorder %s43_s18, %s43_s18 }
   0xe   :  { %p16688_p3 = scmp.ne.s32.totalorder %s43_s18, %s16687_s28  ;;  %p16693_p5 = scmp.lt.s32.totalorder %s16687_s28, %s16687_s28 }
  0x10   :  { %p16694_p6 = por %p16693_p5, %p16692_p4 }
  0x12   :  { %p16695_p7 = pnand %p16694_p6, %p16688_p3 }
  0x14   :  { %16698 = shalt.err (!%p16695_p7)
}
  0x15   :  { %45 = dma.hbm_to_vmem [thread:$0]  %s17439_s2, 128, %s43_s18, [#allocation5]  }
  0x16   :  { %s16699_s14 = scalar_lea.hbm %s17441_s4, 128 }
  0x17   :  { %p16700_p8 = scmp.ne.s32.totalorder %s17441_s4, %s16699_s14  ;;  %p16703_p9 = scmp.lt.u32.totalorder %s16699_s14, %s17441_s4 }
  0x19   :  { %p16705_p10 = pnand %p16703_p9, %p16700_p8 }
  0x1b   :  { %16708 = shalt.err (!%p16705_p10)
}
  0x1c   :  { %s16709_s21 = scalar_lea.vmem %s65_s20, 128  ;;  %p16714_p12 = scmp.lt.s32.totalorder %s65_s20, %s65_s20 }
  0x1d   :  { %p16710_p11 = scmp.ne.s32.totalorder %s65_s20, %s16709_s21  ;;  %p16715_p13 = scmp.lt.s32.totalorder %s16709_s21, %s16709_s21 }
  0x1f   :  { %p16716_p0 = por %p16715_p13, %p16714_p12 }
  0x21   :  { %p16717_p1 = pnand %p16716_p0, %p16710_p11 }
  0x23   :  { %16720 = shalt.err (!%p16717_p1)
}
  0x24   :  { %67 = dma.hbm_to_vmem [thread:$0]  %s17441_s4, 128, %s65_s20, [#allocation8]  }
  0x25   :  { %s16911_s22 = smov [#allocation10]   ;;  %s16912_s24 = smov [#allocation13]  }
  0x26   :  { %s86_s23 = sshll.u32 %s16911_s22, 4  ;;  %s108_s25 = sshll.u32 %s16912_s24, 4  ;;  %s87_s23 = int_to_ptr.vmem [resolvable:$true] %s86_s23  ;;  %s109_s25 = int_to_ptr.vmem [resolvable:$true] %s108_s25 }
  0x27   :  { %s16721_s28 = scalar_lea.hbm %s17443_s6, 128 }
  0x28   :  { %p16722_p2 = scmp.ne.s32.totalorder %s17443_s6, %s16721_s28  ;;  %p16725_p3 = scmp.lt.u32.totalorder %s16721_s28, %s17443_s6 }
  0x2a   :  { %p16727_p4 = pnand %p16725_p3, %p16722_p2 }
  0x2c   :  { %16730 = shalt.err (!%p16727_p4)
}
  0x2d   :  { %s16731_s4 = scalar_lea.vmem %s87_s23, 128  ;;  %p16736_p6 = scmp.lt.s32.totalorder %s87_s23, %s87_s23 }
  0x2e   :  { %p16732_p5 = scmp.ne.s32.totalorder %s87_s23, %s16731_s4  ;;  %p16737_p7 = scmp.lt.s32.totalorder %s16731_s4, %s16731_s4 }
  0x30   :  { %p16738_p8 = por %p16737_p7, %p16736_p6 }
  0x32   :  { %p16739_p9 = pnand %p16738_p8, %p16732_p5 }
  0x34   :  { %16742 = shalt.err (!%p16739_p9)
}
  0x35   :  { %89 = dma.hbm_to_vmem [thread:$0]  %s17443_s6, 128, %s87_s23, [#allocation11]  }
  0x36   :  { %s16743_s17 = scalar_lea.hbm %s17445_s8, 128 }
  0x37   :  { %p16744_p10 = scmp.ne.s32.totalorder %s17445_s8, %s16743_s17  ;;  %p16747_p11 = scmp.lt.u32.totalorder %s16743_s17, %s17445_s8 }
  0x39   :  { %p16749_p12 = pnand %p16747_p11, %p16744_p10 }
  0x3b   :  { %16752 = shalt.err (!%p16749_p12)
}
  0x3c   :  { %s16753_s22 = scalar_lea.vmem %s109_s25, 128  ;;  %p16758_p0 = scmp.lt.s32.totalorder %s109_s25, %s109_s25 }
  0x3d   :  { %p16754_p13 = scmp.ne.s32.totalorder %s109_s25, %s16753_s22  ;;  %p16759_p1 = scmp.lt.s32.totalorder %s16753_s22, %s16753_s22 }
  0x3f   :  { %p16760_p2 = por %p16759_p1, %p16758_p0 }
  0x41   :  { %p16761_p3 = pnand %p16760_p2, %p16754_p13 }
  0x43   :  { %16764 = shalt.err (!%p16761_p3)
}
  0x44   :  { %111 = dma.hbm_to_vmem [thread:$0]  %s17445_s8, 128, %s109_s25, [#allocation14]  }
  0x45   :  { %s16913_s24 = smov [#allocation2]   ;;  %s16765_s29 = scalar_lea.hbm %s17438_s1, 8192 }
  0x46   :  { %s29_s26 = sshll.u32 %s16913_s24, 4  ;;  %p16766_p4 = scmp.ne.s32.totalorder %s17438_s1, %s16765_s29  ;;  %s30_s26 = int_to_ptr.vmem [resolvable:$true] %s29_s26 }
  0x47   :  { %p16769_p5 = scmp.lt.u32.totalorder %s16765_s29, %s17438_s1 }
  0x49   :  { %p16771_p6 = pnand %p16769_p5, %p16766_p4 }
  0x4b   :  { %16774 = shalt.err (!%p16771_p6)
}
  0x4c   :  { %s16775_s20 = scalar_lea.vmem %s30_s26, 8192  ;;  %p16780_p8 = scmp.lt.s32.totalorder %s30_s26, %s30_s26 }
  0x4d   :  { %p16776_p7 = scmp.ne.s32.totalorder %s30_s26, %s16775_s20  ;;  %p16781_p9 = scmp.lt.s32.totalorder %s16775_s20, %s16775_s20 }
  0x4f   :  { %p16782_p10 = por %p16781_p9, %p16780_p8 }
  0x51   :  { %p16783_p11 = pnand %p16782_p10, %p16776_p7 }
  0x53   :  { %16786 = shalt.err (!%p16783_p11)
}
  0x54   :  { %s16914_s8 = smov 512   ;;  %s16915_s25 = smov 32  }
  0x55   :  { %35 = dma.hbm_to_vmem [thread:$0]  %s17438_s1, 8192, %s30_s26, [#allocation3], %s16914_s8, %s16914_s8, %s16915_s25  }
  0x56   :  { %s16916_s16 = smov [#allocation6]   ;;  %s16917_s19 = smov [#allocation9]  }
  0x57   :  { %s51_s17 = sshll.u32 %s16916_s16, 4  ;;  %s73_s21 = sshll.u32 %s16917_s19, 4  ;;  %s52_s17 = int_to_ptr.vmem [resolvable:$true] %s51_s17  ;;  %s74_s21 = int_to_ptr.vmem [resolvable:$true] %s73_s21 }
  0x58   :  { %s16787_s22 = scalar_lea.hbm %s17440_s3, 65536 }
  0x59   :  { %p16788_p12 = scmp.ne.s32.totalorder %s17440_s3, %s16787_s22  ;;  %p16791_p13 = scmp.lt.u32.totalorder %s16787_s22, %s17440_s3 }
  0x5b   :  { %p16793_p0 = pnand %p16791_p13, %p16788_p12 }
  0x5d   :  { %16796 = shalt.err (!%p16793_p0)
}
  0x5e   :  { %s16797_s1 = scalar_lea.vmem %s52_s17, 65536  ;;  %p16802_p2 = scmp.lt.s32.totalorder %s52_s17, %s52_s17 }
  0x5f   :  { %p16798_p1 = scmp.ne.s32.totalorder %s52_s17, %s16797_s1  ;;  %p16803_p3 = scmp.lt.s32.totalorder %s16797_s1, %s16797_s1 }
  0x61   :  { %p16804_p4 = por %p16803_p3, %p16802_p2 }
  0x63   :  { %p16805_p5 = pnand %p16804_p4, %p16798_p1 }
  0x65   :  { %16808 = shalt.err (!%p16805_p5)
}
  0x66   :  { %57 = dma.hbm_to_vmem [thread:$0]  %s17440_s3, 65536, %s52_s17, [#allocation5], %s16914_s8, %s16914_s8, %s16915_s25  }
  0x67   :  { %s16809_s12 = scalar_lea.hbm %s17442_s5, 65536 }
  0x68   :  { %p16810_p6 = scmp.ne.s32.totalorder %s17442_s5, %s16809_s12  ;;  %p16813_p7 = scmp.lt.u32.totalorder %s16809_s12, %s17442_s5 }
  0x6a   :  { %p16815_p8 = pnand %p16813_p7, %p16810_p6 }
  0x6c   :  { %16818 = shalt.err (!%p16815_p8)
}
  0x6d   :  { %s16819_s15 = scalar_lea.vmem %s74_s21, 65536  ;;  %p16824_p10 = scmp.lt.s32.totalorder %s74_s21, %s74_s21 }
  0x6e   :  { %p16820_p9 = scmp.ne.s32.totalorder %s74_s21, %s16819_s15  ;;  %p16825_p11 = scmp.lt.s32.totalorder %s16819_s15, %s16819_s15 }
  0x70   :  { %p16826_p12 = por %p16825_p11, %p16824_p10 }
  0x72   :  { %p16827_p13 = pnand %p16826_p12, %p16820_p9 }
  0x74   :  { %16830 = shalt.err (!%p16827_p13)
}
  0x75   :  { %79 = dma.hbm_to_vmem [thread:$0]  %s17442_s5, 65536, %s74_s21, [#allocation8], %s16914_s8, %s16914_s8, %s16915_s25  }
  0x76   :  { %s16918_s17 = smov [#allocation12]   ;;  %s16919_s2 = smov [#allocation15]  }
  0x77   :  { %s95_s19 = sshll.u32 %s16918_s17, 4  ;;  %s117_s18 = sshll.u32 %s16919_s2, 4  ;;  %s96_s19 = int_to_ptr.vmem [resolvable:$true] %s95_s19  ;;  %s118_s18 = int_to_ptr.vmem [resolvable:$true] %s117_s18 }
  0x78   :  { %s16831_s23 = scalar_lea.hbm %s17444_s7, 65536 }
  0x79   :  { %p16832_p0 = scmp.ne.s32.totalorder %s17444_s7, %s16831_s23  ;;  %p16835_p1 = scmp.lt.u32.totalorder %s16831_s23, %s17444_s7 }
  0x7b   :  { %p16837_p2 = pnand %p16835_p1, %p16832_p0 }
  0x7d   :  { %16840 = shalt.err (!%p16837_p2)
}
  0x7e   :  { %s16841_s5 = scalar_lea.vmem %s96_s19, 65536  ;;  %p16846_p4 = scmp.lt.s32.totalorder %s96_s19, %s96_s19 }
  0x7f   :  { %p16842_p3 = scmp.ne.s32.totalorder %s96_s19, %s16841_s5  ;;  %p16847_p5 = scmp.lt.s32.totalorder %s16841_s5, %s16841_s5 }
  0x81   :  { %p16848_p6 = por %p16847_p5, %p16846_p4 }
  0x83   :  { %p16849_p7 = pnand %p16848_p6, %p16842_p3 }
  0x85   :  { %16852 = shalt.err (!%p16849_p7)
}
  0x86   :  { %101 = dma.hbm_to_vmem [thread:$0]  %s17444_s7, 65536, %s96_s19, [#allocation11], %s16914_s8, %s16914_s8, %s16915_s25  }
  0x87   :  { %s16853_s12 = scalar_lea.hbm %s17446_s9, 32768 }
  0x88   :  { %p16854_p8 = scmp.ne.s32.totalorder %s17446_s9, %s16853_s12  ;;  %p16857_p9 = scmp.lt.u32.totalorder %s16853_s12, %s17446_s9 }
  0x8a   :  { %p16859_p10 = pnand %p16857_p9, %p16854_p8 }
  0x8c   :  { %16862 = shalt.err (!%p16859_p10)
}
  0x8d   :  { %s16863_s15 = scalar_lea.vmem %s118_s18, 32768  ;;  %p16868_p12 = scmp.lt.s32.totalorder %s118_s18, %s118_s18 }
  0x8e   :  { %p16864_p11 = scmp.ne.s32.totalorder %s118_s18, %s16863_s15  ;;  %p16869_p13 = scmp.lt.s32.totalorder %s16863_s15, %s16863_s15 }
  0x90   :  { %p16870_p0 = por %p16869_p13, %p16868_p12 }
  0x92   :  { %p16871_p1 = pnand %p16870_p0, %p16864_p11 }
  0x94   :  { %16874 = shalt.err (!%p16871_p1)
}
  0x95   :  { %s16920_s7 = smov 256   ;;  %s16921_s8 = smov 16  }
  0x96   :  { %123 = dma.hbm_to_vmem [thread:$0]  %s17446_s9, 32768, %s118_s18, [#allocation14], %s16920_s7, %s16920_s7, %s16921_s8  }
  0x97   :  { %s16922_s16 = smov [#allocation16]   ;;  %s16875_s22 = scalar_lea.hbm %s17447_s10, 64 }
  0x98   :  { %s130_s17 = sshll.u32 %s16922_s16, 4  ;;  %p16876_p2 = scmp.ne.s32.totalorder %s17447_s10, %s16875_s22  ;;  %s131_s17 = int_to_ptr.vmem [resolvable:$true] %s130_s17 }
  0x99   :  { %p16879_p3 = scmp.lt.u32.totalorder %s16875_s22, %s17447_s10 }
  0x9b   :  { %p16881_p4 = pnand %p16879_p3, %p16876_p2 }
  0x9d   :  { %16884 = shalt.err (!%p16881_p4)
}
  0x9e   :  { %s16885_s1 = scalar_lea.vmem %s131_s17, 64  ;;  %p16890_p6 = scmp.lt.s32.totalorder %s131_s17, %s131_s17 }
  0x9f   :  { %p16886_p5 = scmp.ne.s32.totalorder %s131_s17, %s16885_s1  ;;  %p16891_p7 = scmp.lt.s32.totalorder %s16885_s1, %s16885_s1 }
  0xa1   :  { %p16892_p8 = por %p16891_p7, %p16890_p6 }
  0xa3   :  { %p16893_p9 = pnand %p16892_p8, %p16886_p5 }
  0xa5   :  { %16896 = shalt.err (!%p16893_p9)
}
  0xa6   :  { %133 = dma.hbm_to_vmem [thread:$0]  %s17447_s10, 64, %s131_s17, [#allocation17]  }
  0xa7   :  { %16897 = dma.done.wait [#allocation3], 8192  }
  0xa8   :  { %16898 = vsyncadd [#allocation3], 4294959104 }
  0xa9   :  { %16899 = dma.done.wait [#allocation5], 65664  }
  0xaa   :  { %16900 = vsyncadd [#allocation5], 4294901632 }
  0xab   :  { %16901 = dma.done.wait [#allocation8], 65664  }
  0xac   :  { %16902 = vsyncadd [#allocation8], 4294901632 }
  0xad   :  { %16903 = dma.done.wait [#allocation11], 65664  }
  0xae   :  { %16904 = vsyncadd [#allocation11], 4294901632 }
  0xaf   :  { %16905 = dma.done.wait [#allocation14], 32896  }
  0xb0   :  { %16906 = vsyncadd [#allocation14], 4294934400 }
  0xb1   :  { %16907 = dma.done.wait [#allocation17], 64  }
  0xb2   :  { %16908 = vsyncadd [#allocation17], 4294967232  ;;  %v16923_v0 = vmov 0   ;;  %v167_v1 = vld [vmem:[#allocation2] sm:$0xff]  ;;  %v168_v14 = vld [vmem:[#allocation2 + $0x8] sm:$0xff] }
  0xb3   :  { %631 = vmatprep.mubr.bf16.mxu0 %v16923_v0  ;;  %674 = vmatprep.mubr.bf16.mxu1 %v16923_v0  ;;  %v171_v2 = vld [vmem:[#allocation2 + $0x20] sm:$0xff]  ;;  %v172_v15 = vld [vmem:[#allocation2 + $0x28] sm:$0xff]  ;;  %v169_v58 = vld [vmem:[#allocation2 + $0x10] sm:$0xff] }
  0xb4   :  { %v175_v3 = vld [vmem:[#allocation2 + $0x40] sm:$0xff]  ;;  %v14195_v4 = vcombine.high %v167_v1, %v171_v2  ;;  %v14194_v5 = vcombine.low %v167_v1, %v171_v2  ;;  %v14197_v16 = vcombine.high %v168_v14, %v172_v15  ;;  %v14196_v17 = vcombine.low %v168_v14, %v172_v15  ;;  %v176_v18 = vld [vmem:[#allocation2 + $0x48] sm:$0xff]  ;;  %v173_v59 = vld [vmem:[#allocation2 + $0x30] sm:$0xff] }
  0xb5   :  { %v179_v6 = vld [vmem:[#allocation2 + $0x60] sm:$0xff]  ;;  %v180_v19 = vld [vmem:[#allocation2 + $0x68] sm:$0xff]  ;;  %v14199_v1 = vcombine.high %v169_v58, %v173_v59 }
  0xb6   :  { %v14203_v7 = vcombine.high %v175_v3, %v179_v6  ;;  %v183_v8 = vld [vmem:[#allocation2 + $0x80] sm:$0xff]  ;;  %599 = vmatprep.subr.bf16.mxu0 %v14195_v4  ;;  %v14202_v10 = vcombine.low %v175_v3, %v179_v6  ;;  %v14205_v21 = vcombine.high %v176_v18, %v180_v19  ;;  %v184_v22 = vld [vmem:[#allocation2 + $0x88] sm:$0xff]  ;;  %642 = vmatprep.subr.bf16.mxu1 %v14197_v16  ;;  %v177_v3 = vld [vmem:[#allocation2 + $0x50] sm:$0xff] }
  0xb7   :  { %v187_v9 = vld [vmem:[#allocation2 + $0xa0] sm:$0xff]  ;;  %600 = vmatpush1.bf16.msra.mxu0 %v14194_v5  ;;  %v188_v23 = vld [vmem:[#allocation2 + $0xa8] sm:$0xff]  ;;  %643 = vmatpush1.bf16.msra.mxu1 %v14196_v17  ;;  %v14204_v27 = vcombine.low %v176_v18, %v180_v19  ;;  %v181_v4 = vld [vmem:[#allocation2 + $0x70] sm:$0xff] }
  0xb8   :  { %601 = vmatprep.subr.bf16.mxu0 %v14203_v7  ;;  %v14211_v11 = vcombine.high %v183_v8, %v187_v9  ;;  %v191_v12 = vld [vmem:[#allocation2 + $0xc0] sm:$0xff]  ;;  %v14210_v20 = vcombine.low %v183_v8, %v187_v9  ;;  %644 = vmatprep.subr.bf16.mxu1 %v14205_v21  ;;  %v14213_v28 = vcombine.high %v184_v22, %v188_v23  ;;  %v192_v30 = vld [vmem:[#allocation2 + $0xc8] sm:$0xff]  ;;  %v170_v8 = vld [vmem:[#allocation2 + $0x18] sm:$0xff] }
  0xb9   :  { %v195_v13 = vld [vmem:[#allocation2 + $0xe0] sm:$0xff]  ;;  %v196_v31 = vld [vmem:[#allocation2 + $0xe8] sm:$0xff]  ;;  %v14212_v35 = vcombine.low %v184_v22, %v188_v23  ;;  %v14198_v7 = vcombine.low %v169_v58, %v173_v59  ;;  %v174_v9 = vld [vmem:[#allocation2 + $0x38] sm:$0xff]  ;;  %v14206_v15 = vcombine.low %v177_v3, %v181_v4 }
  0xba   :  { %v14219_v24 = vcombine.high %v191_v12, %v195_v13  ;;  %v199_v25 = vld [vmem:[#allocation2 + $0x100] sm:$0xff]  ;;  %v14218_v29 = vcombine.low %v191_v12, %v195_v13  ;;  %v14221_v36 = vcombine.high %v192_v30, %v196_v31  ;;  %v200_v38 = vld [vmem:[#allocation2 + $0x108] sm:$0xff]  ;;  %v14220_v43 = vcombine.low %v192_v30, %v196_v31  ;;  %v185_v12 = vld [vmem:[#allocation2 + $0x90] sm:$0xff] }
  0xbb   :  { %602 = vmatpush1.bf16.msra.mxu0 %v14202_v10  ;;  %v203_v26 = vld [vmem:[#allocation2 + $0x120] sm:$0xff]  ;;  %645 = vmatpush1.bf16.msra.mxu1 %v14204_v27  ;;  %v204_v39 = vld [vmem:[#allocation2 + $0x128] sm:$0xff]  ;;  %v14207_v10 = vcombine.high %v177_v3, %v181_v4  ;;  %v189_v13 = vld [vmem:[#allocation2 + $0xb0] sm:$0xff]  ;;  %v14201_v14 = vcombine.high %v170_v8, %v174_v9  ;;  %v14200_v21 = vcombine.low %v170_v8, %v174_v9 }
  0xbc   :  { %603 = vmatprep.subr.bf16.mxu0 %v14211_v11  ;;  %v14227_v32 = vcombine.high %v199_v25, %v203_v26  ;;  %v207_v33 = vld [vmem:[#allocation2 + $0x140] sm:$0xff]  ;;  %646 = vmatprep.subr.bf16.mxu1 %v14213_v28  ;;  %v14226_v37 = vcombine.low %v199_v25, %v203_v26  ;;  %v14229_v44 = vcombine.high %v200_v38, %v204_v39  ;;  %v208_v46 = vld [vmem:[#allocation2 + $0x148] sm:$0xff]  ;;  %v178_v16 = vld [vmem:[#allocation2 + $0x58] sm:$0xff] }
  0xbd   :  { %v211_v34 = vld [vmem:[#allocation2 + $0x160] sm:$0xff]  ;;  %v212_v47 = vld [vmem:[#allocation2 + $0x168] sm:$0xff]  ;;  %v14228_v51 = vcombine.low %v200_v38, %v204_v39  ;;  %v182_v17 = vld [vmem:[#allocation2 + $0x78] sm:$0xff]  ;;  %v14215_v18 = vcombine.high %v185_v12, %v189_v13  ;;  %v14214_v23 = vcombine.low %v185_v12, %v189_v13 }
  0xbe   :  { %v14235_v40 = vcombine.high %v207_v33, %v211_v34  ;;  %v215_v41 = vld [vmem:[#allocation2 + $0x180] sm:$0xff]  ;;  %v14234_v45 = vcombine.low %v207_v33, %v211_v34  ;;  %v14237_v52 = vcombine.high %v208_v46, %v212_v47  ;;  %v216_v54 = vld [vmem:[#allocation2 + $0x188] sm:$0xff]  ;;  %v14236_v57 = vcombine.low %v208_v46, %v212_v47  ;;  %v193_v19 = vld [vmem:[#allocation2 + $0xd0] sm:$0xff] }
  0xbf   :  { %604 = vmatpush1.bf16.msra.mxu0 %v14210_v20  ;;  %v219_v42 = vld [vmem:[#allocation2 + $0x1a0] sm:$0xff]  ;;  %647 = vmatpush1.bf16.msra.mxu1 %v14212_v35  ;;  %v220_v55 = vld [vmem:[#allocation2 + $0x1a8] sm:$0xff]  ;;  %v197_v20 = vld [vmem:[#allocation2 + $0xf0] sm:$0xff]  ;;  %v14209_v22 = vcombine.high %v178_v16, %v182_v17 }
  0xc0   :  { %605 = vmatprep.subr.bf16.mxu0 %v14219_v24  ;;  %648 = vmatprep.subr.bf16.mxu1 %v14221_v36  ;;  %v14243_v48 = vcombine.high %v215_v41, %v219_v42  ;;  %v223_v49 = vld [vmem:[#allocation2 + $0x1c0] sm:$0xff]  ;;  %v14242_v53 = vcombine.low %v215_v41, %v219_v42  ;;  %v14245_v60 = vcombine.high %v216_v54, %v220_v55  ;;  %v224_v62 = vld [vmem:[#allocation2 + $0x1c8] sm:$0xff]  ;;  %v201_v24 = vld [vmem:[#allocation2 + $0x110] sm:$0xff] }
  0xc1   :  { %v227_v50 = vld [vmem:[#allocation2 + $0x1e0] sm:$0xff]  ;;  %v228_v63 = vld [vmem:[#allocation2 + $0x1e8] sm:$0xff]  ;;  %v14244_v2 = vcombine.low %v216_v54, %v220_v55  ;;  %v186_v25 = vld [vmem:[#allocation2 + $0x98] sm:$0xff]  ;;  %v14223_v27 = vcombine.high %v193_v19, %v197_v20  ;;  %v14222_v33 = vcombine.low %v193_v19, %v197_v20 }
  0xc2   :  { %v14251_v56 = vcombine.high %v223_v49, %v227_v50  ;;  %v14250_v61 = vcombine.low %v223_v49, %v227_v50  ;;  %v17121_v5 = vld [vmem:[%s17437_s0] sm:$0xff]   ;;  %v14253_v6 = vcombine.high %v224_v62, %v228_v63  ;;  %v14252_v11 = vcombine.low %v224_v62, %v228_v63  ;;  %v190_v26 = vld [vmem:[#allocation2 + $0xb8] sm:$0xff]  ;;  %v205_v28 = vld [vmem:[#allocation2 + $0x130] sm:$0xff] }
  0xc3   :  { %606 = vmatpush1.bf16.msra.mxu0 %v14218_v29  ;;  %649 = vmatpush1.bf16.msra.mxu1 %v14220_v43  ;;  %v14208_v29 = vcombine.low %v178_v16, %v182_v17  ;;  %v194_v30 = vld [vmem:[#allocation2 + $0xd8] sm:$0xff]  ;;  %v209_v34 = vld [vmem:[#allocation2 + $0x150] sm:$0xff]  ;;  %v14231_v36 = vcombine.high %v201_v24, %v205_v28  ;;  %v14230_v41 = vcombine.low %v201_v24, %v205_v28  ;;  %v799_v58 = vld [vmem:[#allocation6 + $0x20] sm:$0xff] }
  0xc4   :  { %607 = vmatprep.subr.bf16.mxu0 %v14227_v32  ;;  %650 = vmatprep.subr.bf16.mxu1 %v14229_v44  ;;  %v198_v31 = vld [vmem:[#allocation2 + $0xf8] sm:$0xff]  ;;  %v14217_v32 = vcombine.high %v186_v25, %v190_v26  ;;  %v213_v35 = vld [vmem:[#allocation2 + $0x170] sm:$0xff]  ;;  %v807_v3 = vld [vmem:[#allocation6 + $0x60] sm:$0xff] }
  0xc5   :  { %v202_v38 = vld [vmem:[#allocation2 + $0x118] sm:$0xff]  ;;  %v217_v42 = vld [vmem:[#allocation2 + $0x190] sm:$0xff]  ;;  %v14224_v44 = vcombine.low %v194_v30, %v198_v31  ;;  %v815_v12 = vld [vmem:[#allocation6 + $0xa0] sm:$0xff] }
  0xc6   :  { %v206_v39 = vld [vmem:[#allocation2 + $0x138] sm:$0xff]  ;;  %v221_v43 = vld [vmem:[#allocation2 + $0x1b0] sm:$0xff]  ;;  %v819_v19 = vld [vmem:[#allocation6 + $0xc0] sm:$0xff] }
  0xc7   :  { %608 = vmatpush1.bf16.msra.mxu0 %v14226_v37  ;;  %651 = vmatpush1.bf16.msra.mxu1 %v14228_v51  ;;  %v14216_v37 = vcombine.low %v186_v25, %v190_v26  ;;  %v214_v46 = vld [vmem:[#allocation2 + $0x178] sm:$0xff]  ;;  %v14233_v47 = vcombine.high %v202_v38, %v206_v39  ;;  %v225_v49 = vld [vmem:[#allocation2 + $0x1d0] sm:$0xff]  ;;  %v14247_v51 = vcombine.high %v217_v42, %v221_v43  ;;  %v823_v20 = vld [vmem:[#allocation6 + $0xe0] sm:$0xff] }
  0xc8   :  { %609 = vmatprep.subr.bf16.mxu0 %v14235_v40  ;;  %652 = vmatprep.subr.bf16.mxu1 %v14237_v52  ;;  %v14225_v40 = vcombine.high %v194_v30, %v198_v31  ;;  %v229_v50 = vld [vmem:[#allocation2 + $0x1f0] sm:$0xff]  ;;  %v14232_v52 = vcombine.low %v202_v38, %v206_v39  ;;  %v222_v54 = vld [vmem:[#allocation2 + $0x1b8] sm:$0xff]  ;;  %v831_v28 = vld [vmem:[#allocation6 + $0x120] sm:$0xff] }
  0xc9   :  { %v14255_v59 = vcombine.high %v225_v49, %v229_v50  ;;  %v230_v62 = vld [vmem:[#allocation2 + $0x1f8] sm:$0xff]  ;;  %v800_v8 = vld [vmem:[#allocation6 + $0x28] sm:$0xff] }
  0xca   :  { %v808_v16 = vld [vmem:[#allocation6 + $0x68] sm:$0xff] }
  0xcb   :  { %610 = vmatpush1.bf16.msra.mxu0 %v14234_v45  ;;  %653 = vmatpush1.bf16.msra.mxu1 %v14236_v57  ;;  %v210_v45 = vld [vmem:[#allocation2 + $0x158] sm:$0xff]  ;;  %v795_v57 = vld [vmem:[#allocation6] sm:$0xff]  ;;  %v816_v24 = vld [vmem:[#allocation6 + $0xa8] sm:$0xff] }
  0xcc   :  { %611 = vmatprep.subr.bf16.mxu0 %v14243_v48  ;;  %654 = vmatprep.subr.bf16.mxu1 %v14245_v60  ;;  %v14238_v48 = vcombine.low %v209_v34, %v213_v35  ;;  %v14241_v55 = vcombine.high %v210_v45, %v214_v46  ;;  %v14240_v60 = vcombine.low %v210_v45, %v214_v46  ;;  %v820_v31 = vld [vmem:[#allocation6 + $0xc8] sm:$0xff] }
  0xcd   :  { %v14259_v4 = vcombine.high %v795_v57, %v799_v58  ;;  %v828_v39 = vld [vmem:[#allocation6 + $0x108] sm:$0xff] }
  0xce   :  { %v836_v45 = vld [vmem:[#allocation6 + $0x148] sm:$0xff] }
  0xcf   :  { %612 = vmatpush1.bf16.msra.mxu0 %v14242_v53  ;;  %655 = vmatpush1.bf16.msra.mxu1 %v14244_v2  ;;  %v218_v53 = vld [vmem:[#allocation2 + $0x198] sm:$0xff]  ;;  %v803_v2 = vld [vmem:[#allocation6 + $0x40] sm:$0xff]  ;;  %v840_v46 = vld [vmem:[#allocation6 + $0x168] sm:$0xff] }
  0xd0   :  { %613 = vmatprep.subr.bf16.mxu0 %v14251_v56  ;;  %656 = vmatprep.subr.bf16.mxu1 %v14253_v6  ;;  %v14246_v56 = vcombine.low %v217_v42, %v221_v43  ;;  %v14249_v63 = vcombine.high %v218_v53, %v222_v54  ;;  %v14248_v6 = vcombine.low %v218_v53, %v222_v54  ;;  %v843_v42 = vld [vmem:[#allocation6 + $0x180] sm:$0xff]  ;;  %v844_v53 = vld [vmem:[#allocation6 + $0x188] sm:$0xff] }
  0xd1   :  { %v14267_v13 = vcombine.high %v803_v2, %v807_v3  ;;  %v847_v43 = vld [vmem:[#allocation6 + $0x1a0] sm:$0xff]  ;;  %v848_v54 = vld [vmem:[#allocation6 + $0x1a8] sm:$0xff] }
  0xd3   :  { %614 = vmatpush1.bf16.msra.mxu0 %v14250_v61  ;;  %657 = vmatpush1.bf16.msra.mxu1 %v14252_v11  ;;  %v226_v61 = vld [vmem:[#allocation2 + $0x1d8] sm:$0xff]  ;;  %v811_v11 = vld [vmem:[#allocation6 + $0x80] sm:$0xff] }
  0xd4   :  { %685 = vmatprep.subr.bf16.mxu0 %v14199_v1  ;;  %728 = vmatprep.subr.bf16.mxu1 %v14201_v14  ;;  %v14254_v1 = vcombine.low %v225_v49, %v229_v50  ;;  %v14257_v9 = vcombine.high %v226_v61, %v230_v62  ;;  %v14256_v14 = vcombine.low %v226_v61, %v230_v62  ;;  %v851_v49 = vld [vmem:[#allocation6 + $0x1c0] sm:$0xff]  ;;  %v852_v61 = vld [vmem:[#allocation6 + $0x1c8] sm:$0xff] }
  0xd5   :  { %v14274_v26 = vcombine.low %v811_v11, %v815_v12  ;;  %v855_v50 = vld [vmem:[#allocation6 + $0x1e0] sm:$0xff]  ;;  %v856_v62 = vld [vmem:[#allocation6 + $0x1e8] sm:$0xff] }
  0xd6   :  { %632 = vmatmul.mubr.bf16.vlgmr.msra.gmra.mrb[0].mxu0 %v17121_v5  ;;  %675 = vmatmul.mubr.bf16.vlgmr.msra.gmra.mrb[0].mxu1 %v17121_v5 }
  0xd7   :  { %686 = vmatpush1.bf16.msra.mxu0 %v14198_v7  ;;  %717 = vmatprep.mubr.bf16.mxu0 %v16923_v0  ;;  %v796_v7 = vld [vmem:[#allocation6 + $0x8] sm:$0xff] }
  0xd8   :  { %687 = vmatprep.subr.bf16.mxu0 %v14207_v10  ;;  %729 = vmatpush1.bf16.msra.mxu1 %v14200_v21  ;;  %v14258_v10 = vcombine.low %v795_v57, %v799_v58  ;;  %v14261_v17 = vcombine.high %v796_v7, %v800_v8  ;;  %v14275_v21 = vcombine.high %v811_v11, %v815_v12  ;;  %v859_v57 = vld [vmem:[#allocation6 + $0x200] sm:$0xff] }
  0xd9   :  { %760 = vmatprep.mubr.bf16.mxu1 %v16923_v0  ;;  %730 = vmatprep.subr.bf16.mxu1 %v14209_v22  ;;  %v14239_v0 = vcombine.high %v209_v34, %v213_v35  ;;  %v14260_v22 = vcombine.low %v796_v7, %v800_v8  ;;  %v14282_v34 = vcombine.low %v819_v19, %v823_v20  ;;  %v835_v35 = vld [vmem:[#allocation6 + $0x140] sm:$0xff]  ;;  %v860_v7 = vld [vmem:[#allocation6 + $0x208] sm:$0xff] }
  0xda   :  { %v863_v58 = vld [vmem:[#allocation6 + $0x220] sm:$0xff]  ;;  %v864_v8 = vld [vmem:[#allocation6 + $0x228] sm:$0xff] }
  0xdb   :  { %688 = vmatpush1.bf16.msra.mxu0 %v14206_v15  ;;  %v804_v15 = vld [vmem:[#allocation6 + $0x48] sm:$0xff]  ;;  %v875_v11 = vld [vmem:[#allocation6 + $0x280] sm:$0xff] }
  0xdc   :  { %689 = vmatprep.subr.bf16.mxu0 %v14215_v18  ;;  %731 = vmatpush1.bf16.msra.mxu1 %v14208_v29  ;;  %v14266_v18 = vcombine.low %v803_v2, %v807_v3  ;;  %v14269_v25 = vcombine.high %v804_v15, %v808_v16  ;;  %v14283_v29 = vcombine.high %v819_v19, %v823_v20  ;;  %v867_v2 = vld [vmem:[#allocation6 + $0x240] sm:$0xff] }
  0xdd   :  { %732 = vmatprep.subr.bf16.mxu1 %v14217_v32  ;;  %v14268_v30 = vcombine.low %v804_v15, %v808_v16  ;;  %v824_v32 = vld [vmem:[#allocation6 + $0xe8] sm:$0xff]  ;;  %v871_v3 = vld [vmem:[#allocation6 + $0x260] sm:$0xff] }
  0xde   :  { %v879_v12 = vld [vmem:[#allocation6 + $0x2a0] sm:$0xff]  ;;  %v868_v15 = vld [vmem:[#allocation6 + $0x248] sm:$0xff] }
  0xdf   :  { %690 = vmatpush1.bf16.msra.mxu0 %v14214_v23  ;;  %v812_v23 = vld [vmem:[#allocation6 + $0x88] sm:$0xff]  ;;  %v883_v19 = vld [vmem:[#allocation6 + $0x2c0] sm:$0xff] }
  0xe0   :  { %691 = vmatprep.subr.bf16.mxu0 %v14223_v27  ;;  %733 = vmatpush1.bf16.msra.mxu1 %v14216_v37  ;;  %v827_v27 = vld [vmem:[#allocation6 + $0x100] sm:$0xff]  ;;  %v14276_v38 = vcombine.low %v812_v23, %v816_v24  ;;  %v872_v16 = vld [vmem:[#allocation6 + $0x268] sm:$0xff] }
  0xe1   :  { %734 = vmatprep.subr.bf16.mxu1 %v14225_v40  ;;  %v14291_v37 = vcombine.high %v827_v27, %v831_v28  ;;  %v832_v40 = vld [vmem:[#allocation6 + $0x128] sm:$0xff]  ;;  %v887_v20 = vld [vmem:[#allocation6 + $0x2e0] sm:$0xff] }
  0xe3   :  { %692 = vmatpush1.bf16.msra.mxu0 %v14222_v33  ;;  %v14277_v33 = vcombine.high %v812_v23, %v816_v24  ;;  %v876_v23 = vld [vmem:[#allocation6 + $0x288] sm:$0xff] }
  0xe4   :  { %693 = vmatprep.subr.bf16.mxu0 %v14231_v36  ;;  %735 = vmatpush1.bf16.msra.mxu1 %v14224_v44  ;;  %v839_v36 = vld [vmem:[#allocation6 + $0x160] sm:$0xff]  ;;  %v14284_v44 = vcombine.low %v820_v31, %v824_v32  ;;  %v880_v24 = vld [vmem:[#allocation6 + $0x2a8] sm:$0xff] }
  0xe5   :  { %736 = vmatprep.subr.bf16.mxu1 %v14233_v47  ;;  %v14293_v47 = vcombine.high %v828_v39, %v832_v40 }
  0xe7   :  { %694 = vmatpush1.bf16.msra.mxu0 %v14230_v41  ;;  %v14290_v41 = vcombine.low %v827_v27, %v831_v28  ;;  %v891_v27 = vld [vmem:[#allocation6 + $0x300] sm:$0xff] }
  0xe8   :  { %695 = vmatprep.subr.bf16.mxu0 %v14239_v0  ;;  %737 = vmatpush1.bf16.msra.mxu1 %v14232_v52  ;;  %v14299_v0 = vcombine.high %v835_v35, %v839_v36  ;;  %v14292_v52 = vcombine.low %v828_v39, %v832_v40  ;;  %v895_v28 = vld [vmem:[#allocation6 + $0x320] sm:$0xff]  ;;  %v892_v39 = vld [vmem:[#allocation6 + $0x308] sm:$0xff] }
  0xe9   :  { %738 = vmatprep.subr.bf16.mxu1 %v14241_v55  ;;  %v14301_v55 = vcombine.high %v836_v45, %v840_v46  ;;  %v896_v40 = vld [vmem:[#allocation6 + $0x328] sm:$0xff] }
  0xeb   :  { %696 = vmatpush1.bf16.msra.mxu0 %v14238_v48  ;;  %v14298_v48 = vcombine.low %v835_v35, %v839_v36  ;;  %v899_v35 = vld [vmem:[#allocation6 + $0x340] sm:$0xff] }
  0xec   :  { %697 = vmatprep.subr.bf16.mxu0 %v14247_v51  ;;  %739 = vmatpush1.bf16.msra.mxu1 %v14240_v60  ;;  %v14307_v51 = vcombine.high %v843_v42, %v847_v43  ;;  %v14300_v60 = vcombine.low %v836_v45, %v840_v46  ;;  %v903_v36 = vld [vmem:[#allocation6 + $0x360] sm:$0xff]  ;;  %v14357_v45 = vcombine.high %v892_v39, %v896_v40 }
  0xed   :  { %740 = vmatprep.subr.bf16.mxu1 %v14249_v63  ;;  %v14309_v63 = vcombine.high %v844_v53, %v848_v54  ;;  %v14362_v46 = vcombine.low %v899_v35, %v903_v36 }
  0xef   :  { %698 = vmatpush1.bf16.msra.mxu0 %v14246_v56  ;;  %v14306_v56 = vcombine.low %v843_v42, %v847_v43  ;;  %v14363_v42 = vcombine.high %v899_v35, %v903_v36  ;;  %v935_v36 = vld [vmem:[#allocation6 + $0x460] sm:$0xff] }
  0xf0   :  { %699 = vmatprep.subr.bf16.mxu0 %v14255_v59  ;;  %741 = vmatpush1.bf16.msra.mxu1 %v14248_v6  ;;  %v14315_v59 = vcombine.high %v851_v49, %v855_v50  ;;  %v14308_v6 = vcombine.low %v844_v53, %v848_v54 }
  0xf1   :  { %742 = vmatprep.subr.bf16.mxu1 %v14257_v9  ;;  %v14317_v9 = vcombine.high %v852_v61, %v856_v62 }
  0xf3   :  { %700 = vmatpush1.bf16.msra.mxu0 %v14254_v1  ;;  %v14314_v1 = vcombine.low %v851_v49, %v855_v50  ;;  %v14356_v49 = vcombine.low %v892_v39, %v896_v40 }
  0xf4   :  { %3909 = vmatprep.subr.bf16.mxu0 %v14259_v4  ;;  %743 = vmatpush1.bf16.msra.mxu1 %v14256_v14  ;;  %v14323_v4 = vcombine.high %v859_v57, %v863_v58  ;;  %v14316_v14 = vcombine.low %v852_v61, %v856_v62 }
  0xf5   :  { %4081 = vmatprep.subr.bf16.mxu1 %v14261_v17  ;;  %v14325_v17 = vcombine.high %v860_v7, %v864_v8 }
  0xf6   :  { %718 = vmatmul.mubr.bf16.vlgmr.msra.gmra.mrb[4].mxu0 %v17121_v5 }
  0xf7   :  { %3910 = vmatpush1.bf16.msra.mxu0 %v14258_v10  ;;  %761 = vmatmul.mubr.bf16.vlgmr.msra.gmra.mrb[4].mxu1 %v17121_v5  ;;  %v14285_v5 = vcombine.high %v820_v31, %v824_v32  ;;  %v14322_v10 = vcombine.low %v859_v57, %v863_v58  ;;  %v884_v31 = vld [vmem:[#allocation6 + $0x2c8] sm:$0xff] }
  0xf8   :  { %3911 = vmatprep.subr.bf16.mxu0 %v14267_v13  ;;  %4082 = vmatpush1.bf16.msra.mxu1 %v14260_v22  ;;  %v14331_v13 = vcombine.high %v867_v2, %v871_v3  ;;  %v14324_v22 = vcombine.low %v860_v7, %v864_v8  ;;  %v888_v32 = vld [vmem:[#allocation6 + $0x2e8] sm:$0xff] }
  0xf9   :  { %4083 = vmatprep.subr.bf16.mxu1 %v14269_v25  ;;  %v14333_v25 = vcombine.high %v868_v15, %v872_v16  ;;  %v14348_v43 = vcombine.low %v884_v31, %v888_v32 }
  0xfb   :  { %3912 = vmatpush1.bf16.msra.mxu0 %v14266_v18  ;;  %v14330_v18 = vcombine.low %v867_v2, %v871_v3  ;;  %v17133_v2 = vld [vmem:[#allocation6 + $0x408] sm:$0xff] }
  0xfc   :  { %3913 = vmatprep.subr.bf16.mxu0 %v14275_v21  ;;  %4084 = vmatpush1.bf16.msra.mxu1 %v14268_v30  ;;  %v14339_v21 = vcombine.high %v875_v11, %v879_v12  ;;  %v14332_v30 = vcombine.low %v868_v15, %v872_v16  ;;  %v17150_v15 = vld [vmem:[#allocation4] sm:$0xff] }
  0xfd   :  { %4085 = vmatprep.subr.bf16.mxu1 %v14277_v33  ;;  %v14341_v33 = vcombine.high %v876_v23, %v880_v24 }
  0xff   :  { %3914 = vmatpush1.bf16.msra.mxu0 %v14274_v26  ;;  %v14338_v26 = vcombine.low %v875_v11, %v879_v12  ;;  %v233_v12 = vlaneseq }
 0x100   :  { %3915 = vmatprep.subr.bf16.mxu0 %v14283_v29  ;;  %4086 = vmatpush1.bf16.msra.mxu1 %v14276_v38  ;;  %v14347_v29 = vcombine.high %v883_v19, %v887_v20  ;;  %v14340_v38 = vcombine.low %v876_v23, %v880_v24 }
 0x101   :  { %4087 = vmatprep.subr.bf16.mxu1 %v14285_v5  ;;  %v14349_v5 = vcombine.high %v884_v31, %v888_v32 }
 0x103   :  { %3916 = vmatpush1.bf16.msra.mxu0 %v14282_v34  ;;  %v14346_v34 = vcombine.low %v883_v19, %v887_v20 }
 0x104   :  { %3917 = vmatprep.subr.bf16.mxu0 %v14291_v37  ;;  %4088 = vmatpush1.bf16.msra.mxu1 %v14284_v44  ;;  %v14355_v37 = vcombine.high %v891_v27, %v895_v28  ;;  %v904_v44 = vld [vmem:[#allocation6 + $0x368] sm:$0xff] }
 0x105   :  { %4089 = vmatprep.subr.bf16.mxu1 %v14293_v47  ;;  %v907_v47 = vld [vmem:[#allocation6 + $0x380] sm:$0xff] }
 0x107   :  { %3918 = vmatpush1.bf16.msra.mxu0 %v14290_v41  ;;  %v14354_v41 = vcombine.low %v891_v27, %v895_v28 }
 0x108   :  { %3919 = vmatprep.subr.bf16.mxu0 %v14299_v0  ;;  %4090 = vmatpush1.bf16.msra.mxu1 %v14292_v52  ;;  %v900_v0 = vld [vmem:[#allocation6 + $0x348] sm:$0xff] }
 0x109   :  { %4091 = vmatprep.subr.bf16.mxu1 %v14301_v55  ;;  %v912_v52 = vld [vmem:[#allocation6 + $0x3a8] sm:$0xff]  ;;  %v14365_v53 = vcombine.high %v900_v0, %v904_v44  ;;  %v915_v55 = vld [vmem:[#allocation6 + $0x3c0] sm:$0xff]  ;;  %v14364_v57 = vcombine.low %v900_v0, %v904_v44 }
 0x10b   :  { %3920 = vmatpush1.bf16.msra.mxu0 %v14298_v48  ;;  %v911_v48 = vld [vmem:[#allocation6 + $0x3a0] sm:$0xff] }
 0x10c   :  { %3921 = vmatprep.subr.bf16.mxu0 %v14307_v51  ;;  %4092 = vmatpush1.bf16.msra.mxu1 %v14300_v60  ;;  %v14371_v50 = vcombine.high %v907_v47, %v911_v48  ;;  %v908_v51 = vld [vmem:[#allocation6 + $0x388] sm:$0xff]  ;;  %v14370_v54 = vcombine.low %v907_v47, %v911_v48 }
 0x10d   :  { %4093 = vmatprep.subr.bf16.mxu1 %v14309_v63  ;;  %v920_v60 = vld [vmem:[#allocation6 + $0x3e8] sm:$0xff]  ;;  %v14373_v61 = vcombine.high %v908_v51, %v912_v52  ;;  %v17129_v63 = vld [vmem:[#allocation6 + $0x400] sm:$0xff]  ;;  %v14372_v3 = vcombine.low %v908_v51, %v912_v52 }
 0x10e   :  { %v940_v51 = vld [vmem:[#allocation6 + $0x488] sm:$0xff] }
 0x10f   :  { %3922 = vmatpush1.bf16.msra.mxu0 %v14306_v56  ;;  %v919_v56 = vld [vmem:[#allocation6 + $0x3e0] sm:$0xff]  ;;  %v944_v52 = vld [vmem:[#allocation6 + $0x4a8] sm:$0xff] }
 0x110   :  { %3923 = vmatprep.subr.bf16.mxu0 %v14315_v59  ;;  %4094 = vmatpush1.bf16.msra.mxu1 %v14308_v6  ;;  %v14379_v58 = vcombine.high %v915_v55, %v919_v56  ;;  %v916_v59 = vld [vmem:[#allocation6 + $0x3c8] sm:$0xff]  ;;  %v14378_v62 = vcombine.low %v915_v55, %v919_v56 }
 0x111   :  { %4095 = vmatprep.subr.bf16.mxu1 %v14317_v9  ;;  %v17137_v6 = vld [vmem:[#allocation6 + $0x428] sm:$0xff]  ;;  %v14381_v7 = vcombine.high %v916_v59, %v920_v60 }
 0x112   :  { %v14388_v9 = vcombine.low %v17133_v2, %v17137_v6  ;;  %v14389_v11 = vcombine.high %v17133_v2, %v17137_v6  ;;  %v952_v2 = vld [vmem:[#allocation6 + $0x4e8] sm:$0xff]  ;;  %v14404_v6 = vcombine.low %v940_v51, %v944_v52 }
 0x113   :  { %3924 = vmatpush1.bf16.msra.mxu0 %v14314_v1  ;;  %v17131_v1 = vld [vmem:[#allocation6 + $0x420] sm:$0xff] }
 0x114   :  { %3925 = vmatprep.subr.bf16.mxu0 %v14323_v4  ;;  %4096 = vmatpush1.bf16.msra.mxu1 %v14316_v14  ;;  %v14387_v4 = vcombine.high %v17129_v63, %v17131_v1  ;;  %v14386_v8 = vcombine.low %v17129_v63, %v17131_v1  ;;  %v951_v63 = vld [vmem:[#allocation6 + $0x4e0] sm:$0xff]  ;;  %v948_v1 = vld [vmem:[#allocation6 + $0x4c8] sm:$0xff] }
 0x115   :  { %4097 = vmatprep.subr.bf16.mxu1 %v14325_v17 }
 0x117   :  { %3926 = vmatpush1.bf16.msra.mxu0 %v14322_v10  ;;  %v14380_v10 = vcombine.low %v916_v59, %v920_v60  ;;  %v14405_v60 = vcombine.high %v940_v51, %v944_v52  ;;  %v987_v52 = vld [vmem:[#allocation6 + $0x600] sm:$0xff] }
 0x118   :  { %3927 = vmatprep.subr.bf16.mxu0 %v14331_v13  ;;  %4098 = vmatpush1.bf16.msra.mxu1 %v14324_v22  ;;  %v17145_v13 = vshrl.u32 %v233_v12, 7  ;;  %v960_v12 = vld [vmem:[#allocation6 + $0x528] sm:$0xff] }
 0x119   :  { %4099 = vmatprep.subr.bf16.mxu1 %v14333_v25 }
 0x11a   :  { %v17148_v14 = vsub.s32 0, %v17145_v13  ;;  %v17153_v16 = vsub.s32 1, %v17145_v13  ;;  %v17160_v19 = vsub.s32 2, %v17145_v13 }
 0x11b   :  { %3928 = vmatpush1.bf16.msra.mxu0 %v14330_v18 }
 0x11c   :  { %3929 = vmatprep.subr.bf16.mxu0 %v14339_v21  ;;  %4100 = vmatpush1.bf16.msra.mxu1 %v14332_v30  ;;  %v236_v17 = vrot.slane %v17150_v15, %v17148_v14  ;;  %v240_v18 = vrot.slane %v17150_v15, %v17153_v16  ;;  %v17163_v21 = vsub.s32 3, %v17145_v13  ;;  %v244_v28 = vrot.slane %v17150_v15, %v17160_v19 }
 0x11d   :  { %4101 = vmatprep.subr.bf16.mxu1 %v14341_v33  ;;  %v931_v33 = vld [vmem:[#allocation6 + $0x440] sm:$0xff] }
 0x11e   :  { %v248_v30 = vrot.slane %v17150_v15, %v17163_v21  ;;  %v14395_v44 = vcombine.high %v931_v33, %v935_v36  ;;  %v14394_v56 = vcombine.low %v931_v33, %v935_v36  ;;  %v975_v33 = vld [vmem:[#allocation6 + $0x5a0] sm:$0xff]  ;;  %v17187_v36 = vsub.s32 5, %v17145_v13 }
 0x11f   :  { %3930 = vmatpush1.bf16.msra.mxu0 %v14338_v26 }
 0x120   :  { %3931 = vmatprep.subr.bf16.mxu0 %v14347_v29  ;;  %4102 = vmatpush1.bf16.msra.mxu1 %v14340_v38  ;;  %v936_v38 = vld [vmem:[#allocation6 + $0x468] sm:$0xff] }
 0x121   :  { %4103 = vmatprep.subr.bf16.mxu1 %v14349_v5 }
 0x123   :  { %3932 = vmatpush1.bf16.msra.mxu0 %v14346_v34 }
 0x124   :  { %3933 = vmatprep.subr.bf16.mxu0 %v14355_v37  ;;  %4104 = vmatpush1.bf16.msra.mxu1 %v14348_v43  ;;  %v932_v37 = vld [vmem:[#allocation6 + $0x448] sm:$0xff] }
 0x125   :  { %4105 = vmatprep.subr.bf16.mxu1 %v14357_v45  ;;  %v14397_v45 = vcombine.high %v932_v37, %v936_v38 }
 0x127   :  { %3934 = vmatpush1.bf16.msra.mxu0 %v14354_v41 }
 0x128   :  { %3935 = vmatprep.subr.bf16.mxu0 %v14363_v42  ;;  %4106 = vmatpush1.bf16.msra.mxu1 %v14356_v49 }
 0x129   :  { %4107 = vmatprep.subr.bf16.mxu1 %v14365_v53 }
 0x12b   :  { %3936 = vmatpush1.bf16.msra.mxu0 %v14362_v46  ;;  %v939_v46 = vld [vmem:[#allocation6 + $0x480] sm:$0xff] }
 0x12c   :  { %3937 = vmatprep.subr.bf16.mxu0 %v14371_v50  ;;  %4108 = vmatpush1.bf16.msra.mxu1 %v14364_v57  ;;  %v943_v50 = vld [vmem:[#allocation6 + $0x4a0] sm:$0xff]  ;;  %v14396_v57 = vcombine.low %v932_v37, %v936_v38 }
 0x12d   :  { %4109 = vmatprep.subr.bf16.mxu1 %v14373_v61  ;;  %v14403_v59 = vcombine.high %v939_v46, %v943_v50  ;;  %v947_v61 = vld [vmem:[#allocation6 + $0x4c0] sm:$0xff] }
 0x12f   :  { %3938 = vmatpush1.bf16.msra.mxu0 %v14370_v54 }
 0x130   :  { %3939 = vmatprep.subr.bf16.mxu0 %v14379_v58  ;;  %4110 = vmatpush1.bf16.msra.mxu1 %v14372_v3 }
 0x131   :  { %4111 = vmatprep.subr.bf16.mxu1 %v14381_v7  ;;  %v14411_v7 = vcombine.high %v947_v61, %v951_v63 }
 0x133   :  { %3940 = vmatpush1.bf16.msra.mxu0 %v14378_v62 }
 0x134   :  { %3952 = vmatprep.subr.bf16.mxu0 %v14387_v4  ;;  %4112 = vmatpush1.bf16.msra.mxu1 %v14380_v10  ;;  %v14402_v4 = vcombine.low %v939_v46, %v943_v50  ;;  %v959_v10 = vld [vmem:[#allocation6 + $0x520] sm:$0xff]  ;;  %v256_v46 = vrot.slane %v17150_v15, %v17187_v36 }
 0x135   :  { %4124 = vmatprep.subr.bf16.mxu1 %v14389_v11  ;;  %v956_v11 = vld [vmem:[#allocation6 + $0x508] sm:$0xff] }
 0x1a9   :  { %v633_v20 = vpop.f32.mrb[0].mxu0  ;;  %v676_v39 = vpop.f32.mrb[0].mxu1 }
 0x1aa   :  { %v634_v22 = vadd.f32 %v633_v20, %v236_v17  ;;  %v635_v23 = vpop.f32.mrb[1].mxu0  ;;  %v677_v5 = vadd.f32 %v676_v39, %v244_v28  ;;  %v678_v41 = vpop.f32.mrb[1].mxu1 }
 0x1ab   :  { %v636_v24 = vadd.f32 %v635_v23, %v240_v18  ;;  %v637_v25 = vpop.f32.mrb[2].mxu0  ;;  %v679_v43 = vadd.f32 %v678_v41, %v248_v30  ;;  %v680_v0 = vpop.f32.mrb[2].mxu1  ;;  %v963_v23 = vld [vmem:[#allocation6 + $0x540] sm:$0xff] }
 0x1ac   :  { %v638_v26 = vadd.f32 %v637_v25, %v236_v17  ;;  %v639_v27 = vpop.f32.mrb[3].mxu0  ;;  %v771_v31 = vmax.f32 %v634_v22, 0.0  ;;  %v773_v47 = vmax.f32 %v677_v5, 0.0  ;;  %v681_v48 = vadd.f32 %v680_v0, %v244_v28  ;;  %v682_v49 = vpop.f32.mrb[3].mxu1  ;;  %v964_v25 = vld [vmem:[#allocation6 + $0x548] sm:$0xff]  ;;  %v979_v41 = vld [vmem:[#allocation6 + $0x5c0] sm:$0xff] }
 0x1ad   :  { %v640_v29 = vadd.f32 %v639_v27, %v240_v18  ;;  %v772_v34 = vmax.f32 %v636_v24, 0.0  ;;  %v774_v53 = vmax.f32 %v679_v43, 0.0  ;;  %v683_v54 = vadd.f32 %v682_v49, %v248_v30  ;;  %v967_v24 = vld [vmem:[#allocation6 + $0x560] sm:$0xff] }
 0x1ae   :  { %v779_v32 = vmax.f32 %v638_v26, 0.0  ;;  %v781_v55 = vmax.f32 %v681_v48, 0.0  ;;  %v14410_v17 = vcombine.low %v947_v61, %v951_v63  ;;  %v14412_v18 = vcombine.low %v948_v1, %v952_v2  ;;  %v968_v26 = vld [vmem:[#allocation6 + $0x568] sm:$0xff]  ;;  %v983_v0 = vld [vmem:[#allocation6 + $0x5e0] sm:$0xff] }
 0x1af   :  { %v780_v35 = vmax.f32 %v640_v29, 0.0  ;;  %v782_v58 = vmax.f32 %v683_v54, 0.0  ;;  %v14421_v22 = vcombine.high %v956_v11, %v960_v12  ;;  %v14420_v28 = vcombine.low %v956_v11, %v960_v12  ;;  %v999_v11 = vld [vmem:[#allocation6 + $0x660] sm:$0xff]  ;;  %v996_v12 = vld [vmem:[#allocation6 + $0x648] sm:$0xff] }
 0x1b0   :  { %v17169_v40 = vpack.c.bf16 %v779_v32, %v771_v31  ;;  %v17177_v62 = vpack.c.bf16 %v781_v55, %v773_v47  ;;  %v14427_v29 = vcombine.high %v963_v23, %v967_v24  ;;  %v14429_v30 = vcombine.high %v964_v25, %v968_v26  ;;  %v971_v31 = vld [vmem:[#allocation6 + $0x580] sm:$0xff] }
 0x1b1   :  { %v17171_v42 = vpack.c.bf16 %v780_v35, %v772_v34  ;;  %v17179_v3 = vpack.c.bf16 %v782_v58, %v774_v53  ;;  %v17184_v32 = vsub.s32 4, %v17145_v13  ;;  %v972_v34 = vld [vmem:[#allocation6 + $0x588] sm:$0xff]  ;;  %v14426_v37 = vcombine.low %v963_v23, %v967_v24  ;;  %v991_v55 = vld [vmem:[#allocation6 + $0x620] sm:$0xff] }
 0x1b2   :  { %v976_v35 = vld [vmem:[#allocation6 + $0x5a8] sm:$0xff]  ;;  %v14428_v38 = vcombine.low %v964_v25, %v968_v26  ;;  %v14435_v39 = vcombine.high %v971_v31, %v975_v33  ;;  %v14434_v47 = vcombine.low %v971_v31, %v975_v33  ;;  %v14443_v50 = vcombine.high %v979_v41, %v983_v0 }
 0x1b3   :  { %3941 = vmatprep.mubr.bf16.mxu0 %v17171_v42  ;;  %4113 = vmatprep.mubr.bf16.mxu1 %v17171_v42  ;;  %v14437_v5 = vcombine.high %v972_v34, %v976_v35  ;;  %v252_v43 = vrot.slane %v17150_v15, %v17184_v32  ;;  %v14436_v48 = vcombine.low %v972_v34, %v976_v35 }
 0x1b4   :  { %3942 = vmatmul.mubr.bf16.vlgmr.msra.gmra.mrb[8].mxu0 %v17169_v40  ;;  %4114 = vmatmul.mubr.bf16.vlgmr.msra.gmra.mrb[8].mxu1 %v17169_v40 }
 0x1b5   :  { %3953 = vmatpush1.bf16.msra.mxu0 %v14386_v8  ;;  %4125 = vmatpush1.bf16.msra.mxu1 %v14388_v9  ;;  %v14413_v8 = vcombine.high %v948_v1, %v952_v2  ;;  %v955_v9 = vld [vmem:[#allocation6 + $0x500] sm:$0xff]  ;;  %v14442_v1 = vcombine.low %v979_v41, %v983_v0 }
 0x1b6   :  { %3954 = vmatprep.subr.bf16.mxu0 %v14395_v44  ;;  %4126 = vmatprep.subr.bf16.mxu1 %v14397_v45  ;;  %v14419_v20 = vcombine.high %v955_v9, %v959_v10  ;;  %v14418_v27 = vcombine.low %v955_v9, %v959_v10  ;;  %v980_v44 = vld [vmem:[#allocation6 + $0x5c8] sm:$0xff]  ;;  %v995_v9 = vld [vmem:[#allocation6 + $0x640] sm:$0xff] }
 0x1b7   :  { %3984 = vmatprep.mubr.bf16.mxu0 %v17179_v3  ;;  %4156 = vmatprep.mubr.bf16.mxu1 %v17179_v3  ;;  %v984_v45 = vld [vmem:[#allocation6 + $0x5e8] sm:$0xff]  ;;  %v14459_v25 = vcombine.high %v995_v9, %v999_v11  ;;  %v14458_v31 = vcombine.low %v995_v9, %v999_v11  ;;  %v17201_v9 = vsub.s32 7, %v17145_v13 }
 0x1b8   :  { %v14445_v51 = vcombine.high %v980_v44, %v984_v45  ;;  %v14444_v2 = vcombine.low %v980_v44, %v984_v45  ;;  %v1019_v45 = vld [vmem:[#allocation6 + $0x700] sm:$0xff] }
 0x1b9   :  { %3955 = vmatpush1.bf16.msra.mxu0 %v14394_v56  ;;  %4127 = vmatpush1.bf16.msra.mxu1 %v14396_v57  ;;  %v988_v56 = vld [vmem:[#allocation6 + $0x608] sm:$0xff] }
 0x1ba   :  { %3956 = vmatprep.subr.bf16.mxu0 %v14403_v59  ;;  %4128 = vmatprep.subr.bf16.mxu1 %v14405_v60  ;;  %v992_v57 = vld [vmem:[#allocation6 + $0x628] sm:$0xff] }
 0x1bb   :  { %v14452_v23 = vcombine.low %v988_v56, %v992_v57 }
 0x1bd   :  { %3957 = vmatpush1.bf16.msra.mxu0 %v14402_v4  ;;  %4129 = vmatpush1.bf16.msra.mxu1 %v14404_v6 }
 0x1be   :  { %3958 = vmatprep.subr.bf16.mxu0 %v14411_v7  ;;  %4130 = vmatprep.subr.bf16.mxu1 %v14413_v8  ;;  %v14451_v7 = vcombine.high %v987_v52, %v991_v55  ;;  %v14453_v8 = vcombine.high %v988_v56, %v992_v57  ;;  %v1032_v56 = vld [vmem:[#allocation6 + $0x768] sm:$0xff] }
 0x1c1   :  { %3959 = vmatpush1.bf16.msra.mxu0 %v14410_v17  ;;  %4131 = vmatpush1.bf16.msra.mxu1 %v14412_v18  ;;  %v1000_v17 = vld [vmem:[#allocation6 + $0x668] sm:$0xff] }
 0x1c2   :  { %3960 = vmatprep.subr.bf16.mxu0 %v14419_v20  ;;  %4132 = vmatprep.subr.bf16.mxu1 %v14421_v22  ;;  %v14450_v22 = vcombine.low %v987_v52, %v991_v55  ;;  %v14461_v26 = vcombine.high %v996_v12, %v1000_v17  ;;  %v14460_v33 = vcombine.low %v996_v12, %v1000_v17  ;;  %v1028_v55 = vld [vmem:[#allocation6 + $0x748] sm:$0xff]  ;;  %v1043_v12 = vld [vmem:[#allocation6 + $0x7c0] sm:$0xff] }
 0x1c5   :  { %3961 = vmatpush1.bf16.msra.mxu0 %v14418_v27  ;;  %4133 = vmatpush1.bf16.msra.mxu1 %v14420_v28  ;;  %v1003_v27 = vld [vmem:[#allocation6 + $0x680] sm:$0xff] }
 0x1c6   :  { %3962 = vmatprep.subr.bf16.mxu0 %v14427_v29  ;;  %4134 = vmatprep.subr.bf16.mxu1 %v14429_v30  ;;  %v1007_v28 = vld [vmem:[#allocation6 + $0x6a0] sm:$0xff]  ;;  %v1004_v29 = vld [vmem:[#allocation6 + $0x688] sm:$0xff] }
 0x1c7   :  { %v1008_v30 = vld [vmem:[#allocation6 + $0x6a8] sm:$0xff]  ;;  %v14467_v34 = vcombine.high %v1003_v27, %v1007_v28  ;;  %v14466_v41 = vcombine.low %v1003_v27, %v1007_v28 }
 0x1c8   :  { %v14469_v35 = vcombine.high %v1004_v29, %v1008_v30 }
 0x1c9   :  { %3963 = vmatpush1.bf16.msra.mxu0 %v14426_v37  ;;  %4135 = vmatpush1.bf16.msra.mxu1 %v14428_v38  ;;  %v719_v49 = vpop.f32.mrb[4].mxu0  ;;  %v1011_v37 = vld [vmem:[#allocation6 + $0x6c0] sm:$0xff] }
 0x1ca   :  { %3964 = vmatprep.subr.bf16.mxu0 %v14435_v39  ;;  %4136 = vmatprep.subr.bf16.mxu1 %v14437_v5  ;;  %v720_v53 = vadd.f32 %v719_v49, %v252_v43  ;;  %v721_v54 = vpop.f32.mrb[5].mxu0  ;;  %v1015_v38 = vld [vmem:[#allocation6 + $0x6e0] sm:$0xff]  ;;  %v1012_v39 = vld [vmem:[#allocation6 + $0x6c8] sm:$0xff] }
 0x1cb   :  { %v722_v58 = vadd.f32 %v721_v54, %v256_v46  ;;  %v723_v59 = vpop.f32.mrb[6].mxu0  ;;  %v1016_v5 = vld [vmem:[#allocation6 + $0x6e8] sm:$0xff]  ;;  %v14475_v0 = vcombine.high %v1011_v37, %v1015_v38  ;;  %v14474_v49 = vcombine.low %v1011_v37, %v1015_v38  ;;  %v1031_v54 = vld [vmem:[#allocation6 + $0x760] sm:$0xff] }
 0x1cc   :  { %v775_v60 = vmax.f32 %v720_v53, 0.0  ;;  %v724_v61 = vadd.f32 %v723_v59, %v252_v43  ;;  %v725_v63 = vpop.f32.mrb[7].mxu0  ;;  %v14468_v43 = vcombine.low %v1004_v29, %v1008_v30  ;;  %v14477_v44 = vcombine.high %v1012_v39, %v1016_v5  ;;  %v1027_v53 = vld [vmem:[#allocation6 + $0x740] sm:$0xff] }
 0x1cd   :  { %3965 = vmatpush1.bf16.msra.mxu0 %v14434_v47  ;;  %4137 = vmatpush1.bf16.msra.mxu1 %v14436_v48  ;;  %v776_v4 = vmax.f32 %v722_v58, 0.0  ;;  %v726_v6 = vadd.f32 %v725_v63, %v256_v46  ;;  %v1023_v46 = vld [vmem:[#allocation6 + $0x720] sm:$0xff]  ;;  %v1020_v47 = vld [vmem:[#allocation6 + $0x708] sm:$0xff]  ;;  %v14491_v59 = vcombine.high %v1027_v53, %v1031_v54 }
 0x1ce   :  { %3966 = vmatprep.subr.bf16.mxu0 %v14443_v50  ;;  %4138 = vmatprep.subr.bf16.mxu1 %v14445_v51  ;;  %v783_v10 = vmax.f32 %v724_v61, 0.0  ;;  %v1024_v48 = vld [vmem:[#allocation6 + $0x728] sm:$0xff]  ;;  %v14476_v50 = vcombine.low %v1012_v39, %v1016_v5  ;;  %v14483_v51 = vcombine.high %v1019_v45, %v1023_v46  ;;  %v14482_v57 = vcombine.low %v1019_v45, %v1023_v46  ;;  %v1035_v61 = vld [vmem:[#allocation6 + $0x780] sm:$0xff] }
 0x1cf   :  { %v784_v18 = vmax.f32 %v726_v6, 0.0  ;;  %v14485_v52 = vcombine.high %v1020_v47, %v1024_v48  ;;  %v14484_v58 = vcombine.low %v1020_v47, %v1024_v48  ;;  %v1039_v63 = vld [vmem:[#allocation6 + $0x7a0] sm:$0xff]  ;;  %v14492_v6 = vcombine.low %v1028_v55, %v1032_v56  ;;  %v1052_v5 = vld [vmem:[#allocation6 + $0x808] sm:$0xff] }
 0x1d0   :  { %v17193_v20 = vpack.c.bf16 %v783_v10, %v775_v60  ;;  %v14493_v60 = vcombine.high %v1028_v55, %v1032_v56  ;;  %v14499_v10 = vcombine.high %v1035_v61, %v1039_v63  ;;  %v14498_v28 = vcombine.low %v1035_v61, %v1039_v63  ;;  %v1051_v37 = vld [vmem:[#allocation6 + $0x800] sm:$0xff]  ;;  %v1068_v61 = vld [vmem:[#allocation6 + $0x888] sm:$0xff] }
 0x1d1   :  { %3967 = vmatpush1.bf16.msra.mxu0 %v14442_v1  ;;  %4139 = vmatpush1.bf16.msra.mxu1 %v14444_v2  ;;  %v17195_v24 = vpack.c.bf16 %v784_v18, %v776_v4  ;;  %v1036_v1 = vld [vmem:[#allocation6 + $0x788] sm:$0xff]  ;;  %v14490_v4 = vcombine.low %v1027_v53, %v1031_v54  ;;  %v1047_v18 = vld [vmem:[#allocation6 + $0x7e0] sm:$0xff] }
 0x1d2   :  { %3968 = vmatprep.subr.bf16.mxu0 %v14451_v7  ;;  %4140 = vmatprep.subr.bf16.mxu1 %v14453_v8  ;;  %v1040_v2 = vld [vmem:[#allocation6 + $0x7a8] sm:$0xff]  ;;  %v17198_v7 = vsub.s32 6, %v17145_v13  ;;  %v762_v8 = vpop.f32.mrb[4].mxu1  ;;  %v1055_v39 = vld [vmem:[#allocation6 + $0x820] sm:$0xff]  ;;  %v14506_v45 = vcombine.low %v1043_v12, %v1047_v18 }
 0x1d3   :  { %v14501_v11 = vcombine.high %v1036_v1, %v1040_v2  ;;  %v764_v17 = vpop.f32.mrb[5].mxu1  ;;  %v14500_v29 = vcombine.low %v1036_v1, %v1040_v2  ;;  %v14515_v48 = vcombine.high %v1051_v37, %v1055_v39  ;;  %v1060_v53 = vld [vmem:[#allocation6 + $0x848] sm:$0xff]  ;;  %v14514_v55 = vcombine.low %v1051_v37, %v1055_v39 }
 0x1d4   :  { %v766_v27 = vpop.f32.mrb[6].mxu1  ;;  %v1064_v54 = vld [vmem:[#allocation6 + $0x868] sm:$0xff] }
 0x1d5   :  { %3969 = vmatpush1.bf16.msra.mxu0 %v14450_v22  ;;  %4141 = vmatpush1.bf16.msra.mxu1 %v14452_v23  ;;  %v1044_v22 = vld [vmem:[#allocation6 + $0x7c8] sm:$0xff]  ;;  %v14524_v2 = vcombine.low %v1060_v53, %v1064_v54 }
 0x1d6   :  { %3970 = vmatprep.subr.bf16.mxu0 %v14459_v25  ;;  %4142 = vmatprep.subr.bf16.mxu1 %v14461_v26  ;;  %v1048_v23 = vld [vmem:[#allocation6 + $0x7e8] sm:$0xff]  ;;  %v260_v25 = vrot.slane %v17150_v15, %v17198_v7  ;;  %v264_v26 = vrot.slane %v17150_v15, %v17201_v9 }
 0x1d7   :  { %v14508_v46 = vcombine.low %v1044_v22, %v1048_v23  ;;  %v1072_v63 = vld [vmem:[#allocation6 + $0x8a8] sm:$0xff] }
 0x1d8   :  { %v763_v13 = vadd.f32 %v762_v8, %v260_v25  ;;  %v765_v30 = vadd.f32 %v764_v17, %v264_v26  ;;  %v1075_v8 = vld [vmem:[#allocation6 + $0x8c0] sm:$0xff]  ;;  %v1096_v37 = vld [vmem:[#allocation6 + $0x968] sm:$0xff] }
 0x1d9   :  { %3971 = vmatpush1.bf16.msra.mxu0 %v14458_v31  ;;  %4143 = vmatpush1.bf16.msra.mxu1 %v14460_v33  ;;  %v767_v31 = vadd.f32 %v766_v27, %v260_v25  ;;  %v768_v33 = vpop.f32.mrb[7].mxu1  ;;  %v1083_v25 = vld [vmem:[#allocation6 + $0x900] sm:$0xff]  ;;  %v1084_v27 = vld [vmem:[#allocation6 + $0x908] sm:$0xff] }
 0x1da   :  { %3972 = vmatprep.subr.bf16.mxu0 %v14467_v34  ;;  %4144 = vmatprep.subr.bf16.mxu1 %v14469_v35  ;;  %v14507_v34 = vcombine.high %v1043_v12, %v1047_v18  ;;  %v14509_v35 = vcombine.high %v1044_v22, %v1048_v23  ;;  %v769_v38 = vadd.f32 %v768_v33, %v264_v26  ;;  %v778_v15 = vmax.f32 %v765_v30, 0.0  ;;  %v1080_v12 = vld [vmem:[#allocation6 + $0x8e8] sm:$0xff]  ;;  %v1087_v26 = vld [vmem:[#allocation6 + $0x920] sm:$0xff] }
 0x1db   :  { %v14532_v18 = vcombine.low %v1068_v61, %v1072_v63  ;;  %v14547_v30 = vcombine.high %v1083_v25, %v1087_v26  ;;  %v1091_v33 = vld [vmem:[#allocation6 + $0x940] sm:$0xff] }
 0x1dd   :  { %3973 = vmatpush1.bf16.msra.mxu0 %v14466_v41  ;;  %4145 = vmatpush1.bf16.msra.mxu1 %v14468_v43  ;;  %v1056_v41 = vld [vmem:[#allocation6 + $0x828] sm:$0xff]  ;;  %v777_v43 = vmax.f32 %v763_v13, 0.0 }
 0x1de   :  { %3974 = vmatprep.subr.bf16.mxu0 %v14475_v0  ;;  %4146 = vmatprep.subr.bf16.mxu1 %v14477_v44  ;;  %v785_v0 = vmax.f32 %v767_v31, 0.0  ;;  %v786_v44 = vmax.f32 %v769_v38, 0.0  ;;  %v14516_v56 = vcombine.low %v1052_v5, %v1056_v41  ;;  %v14546_v38 = vcombine.low %v1083_v25, %v1087_v26  ;;  %v1131_v25 = vld [vmem:[#allocation6 + $0xa80] sm:$0xff] }
 0x1df   :  { %v1135_v26 = vld [vmem:[#allocation6 + $0xaa0] sm:$0xff] }
 0x1e0   :  { %v17207_v47 = vpack.c.bf16 %v785_v0, %v777_v43  ;;  %v1099_v43 = vld [vmem:[#allocation6 + $0x980] sm:$0xff]  ;;  %v1100_v0 = vld [vmem:[#allocation6 + $0x988] sm:$0xff] }
 0x1e1   :  { %3975 = vmatpush1.bf16.msra.mxu0 %v14474_v49  ;;  %4147 = vmatpush1.bf16.msra.mxu1 %v14476_v50  ;;  %v14517_v49 = vcombine.high %v1052_v5, %v1056_v41  ;;  %v1059_v50 = vld [vmem:[#allocation6 + $0x840] sm:$0xff] }
 0x1e2   :  { %3976 = vmatprep.subr.bf16.mxu0 %v14483_v51  ;;  %4148 = vmatprep.subr.bf16.mxu1 %v14485_v52  ;;  %v17209_v51 = vpack.c.bf16 %v786_v44, %v778_v15  ;;  %v1063_v52 = vld [vmem:[#allocation6 + $0x860] sm:$0xff]  ;;  %v1104_v44 = vld [vmem:[#allocation6 + $0x9a8] sm:$0xff] }
 0x1e3   :  { %v14522_v1 = vcombine.low %v1059_v50, %v1063_v52  ;;  %v1103_v15 = vld [vmem:[#allocation6 + $0x9a0] sm:$0xff] }
 0x1e5   :  { %3977 = vmatpush1.bf16.msra.mxu0 %v14482_v57  ;;  %4149 = vmatpush1.bf16.msra.mxu1 %v14484_v58  ;;  %v14523_v57 = vcombine.high %v1059_v50, %v1063_v52  ;;  %v14525_v58 = vcombine.high %v1060_v53, %v1064_v54  ;;  %v1107_v50 = vld [vmem:[#allocation6 + $0x9c0] sm:$0xff]  ;;  %v1108_v53 = vld [vmem:[#allocation6 + $0x9c8] sm:$0xff] }
 0x1e6   :  { %3978 = vmatprep.subr.bf16.mxu0 %v14491_v59  ;;  %4150 = vmatprep.subr.bf16.mxu1 %v14493_v60  ;;  %v1067_v59 = vld [vmem:[#allocation6 + $0x880] sm:$0xff]  ;;  %v1112_v54 = vld [vmem:[#allocation6 + $0x9e8] sm:$0xff] }
 0x1e7   :  { %v1071_v60 = vld [vmem:[#allocation6 + $0x8a0] sm:$0xff] }
 0x1e8   :  { %v14530_v17 = vcombine.low %v1067_v59, %v1071_v60  ;;  %v1111_v52 = vld [vmem:[#allocation6 + $0x9e0] sm:$0xff] }
 0x1e9   :  { %3979 = vmatpush1.bf16.msra.mxu0 %v14490_v4  ;;  %4151 = vmatpush1.bf16.msra.mxu1 %v14492_v6  ;;  %v14531_v4 = vcombine.high %v1067_v59, %v1071_v60  ;;  %v14533_v6 = vcombine.high %v1068_v61, %v1072_v63  ;;  %v1115_v59 = vld [vmem:[#allocation6 + $0xa00] sm:$0xff]  ;;  %v1116_v61 = vld [vmem:[#allocation6 + $0xa08] sm:$0xff] }
 0x1ea   :  { %3980 = vmatprep.subr.bf16.mxu0 %v14499_v10  ;;  %4152 = vmatprep.subr.bf16.mxu1 %v14501_v11  ;;  %v1079_v10 = vld [vmem:[#allocation6 + $0x8e0] sm:$0xff]  ;;  %v1076_v11 = vld [vmem:[#allocation6 + $0x8c8] sm:$0xff] }
 0x1eb   :  { %v14539_v22 = vcombine.high %v1075_v8, %v1079_v10  ;;  %v14541_v23 = vcombine.high %v1076_v11, %v1080_v12  ;;  %v14540_v13 = vcombine.low %v1076_v11, %v1080_v12  ;;  %v1119_v60 = vld [vmem:[#allocation6 + $0xa20] sm:$0xff]  ;;  %v1120_v63 = vld [vmem:[#allocation6 + $0xa28] sm:$0xff] }
 0x1ec   :  { %v1124_v11 = vld [vmem:[#allocation6 + $0xa48] sm:$0xff] }
 0x1ed   :  { %3981 = vmatpush1.bf16.msra.mxu0 %v14498_v28  ;;  %4153 = vmatpush1.bf16.msra.mxu1 %v14500_v29  ;;  %v1088_v28 = vld [vmem:[#allocation6 + $0x928] sm:$0xff]  ;;  %v14538_v29 = vcombine.low %v1075_v8, %v1079_v10  ;;  %v1123_v8 = vld [vmem:[#allocation6 + $0xa40] sm:$0xff] }
 0x1ee   :  { %3982 = vmatprep.subr.bf16.mxu0 %v14507_v34  ;;  %4154 = vmatprep.subr.bf16.mxu1 %v14509_v35  ;;  %v14549_v31 = vcombine.high %v1084_v27, %v1088_v28  ;;  %v1095_v34 = vld [vmem:[#allocation6 + $0x960] sm:$0xff]  ;;  %v1092_v35 = vld [vmem:[#allocation6 + $0x948] sm:$0xff]  ;;  %v14548_v39 = vcombine.low %v1084_v27, %v1088_v28 }
 0x1ef   :  { %v14555_v5 = vcombine.high %v1091_v33, %v1095_v34  ;;  %v14557_v41 = vcombine.high %v1092_v35, %v1096_v37  ;;  %v1127_v10 = vld [vmem:[#allocation6 + $0xa60] sm:$0xff]  ;;  %v1128_v12 = vld [vmem:[#allocation6 + $0xa68] sm:$0xff] }
 0x1f0   :  { %v1132_v27 = vld [vmem:[#allocation6 + $0xa88] sm:$0xff] }
 0x1f1   :  { %3983 = vmatpush1.bf16.msra.mxu0 %v14506_v45  ;;  %4155 = vmatpush1.bf16.msra.mxu1 %v14508_v46  ;;  %v14554_v45 = vcombine.low %v1091_v33, %v1095_v34  ;;  %v14556_v46 = vcombine.low %v1092_v35, %v1096_v37  ;;  %v1136_v28 = vld [vmem:[#allocation6 + $0xaa8] sm:$0xff]  ;;  %v1139_v33 = vld [vmem:[#allocation6 + $0xac0] sm:$0xff] }
 0x1f2   :  { %3995 = vmatprep.subr.bf16.mxu0 %v14515_v48  ;;  %4167 = vmatprep.subr.bf16.mxu1 %v14517_v49  ;;  %v14563_v48 = vcombine.high %v1099_v43, %v1103_v15  ;;  %v14565_v49 = vcombine.high %v1100_v0, %v1104_v44  ;;  %v1143_v34 = vld [vmem:[#allocation6 + $0xae0] sm:$0xff]  ;;  %v1140_v35 = vld [vmem:[#allocation6 + $0xac8] sm:$0xff] }
 0x1f3   :  { %v1144_v37 = vld [vmem:[#allocation6 + $0xae8] sm:$0xff] }
 0x1f4   :  { %3985 = vmatmul.mubr.bf16.vlgmr.msra.gmra.mrb[8].mxu0 %v17177_v62  ;;  %4157 = vmatmul.mubr.bf16.vlgmr.msra.gmra.mrb[8].mxu1 %v17177_v62 }
 0x1f5   :  { %3996 = vmatpush1.bf16.msra.mxu0 %v14514_v55  ;;  %4168 = vmatpush1.bf16.msra.mxu1 %v14516_v56  ;;  %v14562_v55 = vcombine.low %v1099_v43, %v1103_v15  ;;  %v14564_v56 = vcombine.low %v1100_v0, %v1104_v44  ;;  %v1147_v43 = vld [vmem:[#allocation6 + $0xb00] sm:$0xff]  ;;  %v1148_v0 = vld [vmem:[#allocation6 + $0xb08] sm:$0xff] }
 0x1f6   :  { %3997 = vmatprep.subr.bf16.mxu0 %v14523_v57  ;;  %4169 = vmatprep.subr.bf16.mxu1 %v14525_v58  ;;  %v14571_v57 = vcombine.high %v1107_v50, %v1111_v52  ;;  %v14573_v58 = vcombine.high %v1108_v53, %v1112_v54  ;;  %v1151_v15 = vld [vmem:[#allocation6 + $0xb20] sm:$0xff]  ;;  %v1152_v44 = vld [vmem:[#allocation6 + $0xb28] sm:$0xff] }
 0x1f7   :  { %4027 = vmatprep.mubr.bf16.mxu0 %v17195_v24  ;;  %4199 = vmatprep.mubr.bf16.mxu1 %v17195_v24 }
 0x1f9   :  { %3998 = vmatpush1.bf16.msra.mxu0 %v14522_v1  ;;  %4170 = vmatpush1.bf16.msra.mxu1 %v14524_v2  ;;  %v14570_v1 = vcombine.low %v1107_v50, %v1111_v52  ;;  %v14572_v2 = vcombine.low %v1108_v53, %v1112_v54  ;;  %v1155_v50 = vld [vmem:[#allocation6 + $0xb40] sm:$0xff]  ;;  %v1156_v53 = vld [vmem:[#allocation6 + $0xb48] sm:$0xff] }
 0x1fa   :  { %3999 = vmatprep.subr.bf16.mxu0 %v14531_v4  ;;  %4171 = vmatprep.subr.bf16.mxu1 %v14533_v6  ;;  %v14579_v4 = vcombine.high %v1115_v59, %v1119_v60  ;;  %v14581_v6 = vcombine.high %v1116_v61, %v1120_v63  ;;  %v1159_v52 = vld [vmem:[#allocation6 + $0xb60] sm:$0xff]  ;;  %v1160_v54 = vld [vmem:[#allocation6 + $0xb68] sm:$0xff] }
 0x1fd   :  { %4000 = vmatpush1.bf16.msra.mxu0 %v14530_v17  ;;  %4172 = vmatpush1.bf16.msra.mxu1 %v14532_v18  ;;  %v14578_v17 = vcombine.low %v1115_v59, %v1119_v60  ;;  %v14580_v18 = vcombine.low %v1116_v61, %v1120_v63  ;;  %v1163_v59 = vld [vmem:[#allocation6 + $0xb80] sm:$0xff]  ;;  %v1164_v61 = vld [vmem:[#allocation6 + $0xb88] sm:$0xff] }
 0x1fe   :  { %4001 = vmatprep.subr.bf16.mxu0 %v14539_v22  ;;  %4173 = vmatprep.subr.bf16.mxu1 %v14541_v23  ;;  %v14587_v22 = vcombine.high %v1123_v8, %v1127_v10  ;;  %v14589_v23 = vcombine.high %v1124_v11, %v1128_v12  ;;  %v1167_v60 = vld [vmem:[#allocation6 + $0xba0] sm:$0xff]  ;;  %v1168_v63 = vld [vmem:[#allocation6 + $0xba8] sm:$0xff] }
 0x201   :  { %4002 = vmatpush1.bf16.msra.mxu0 %v14538_v29  ;;  %4174 = vmatpush1.bf16.msra.mxu1 %v14540_v13  ;;  %v14586_v29 = vcombine.low %v1123_v8, %v1127_v10  ;;  %v14588_v13 = vcombine.low %v1124_v11, %v1128_v12  ;;  %v1171_v8 = vld [vmem:[#allocation6 + $0xbc0] sm:$0xff]  ;;  %v1172_v11 = vld [vmem:[#allocation6 + $0xbc8] sm:$0xff] }
 0x202   :  { %4003 = vmatprep.subr.bf16.mxu0 %v14547_v30  ;;  %4175 = vmatprep.subr.bf16.mxu1 %v14549_v31  ;;  %v14595_v30 = vcombine.high %v1131_v25, %v1135_v26  ;;  %v14597_v31 = vcombine.high %v1132_v27, %v1136_v28  ;;  %v1175_v10 = vld [vmem:[#allocation6 + $0xbe0] sm:$0xff]  ;;  %v1176_v12 = vld [vmem:[#allocation6 + $0xbe8] sm:$0xff] }
 0x205   :  { %4004 = vmatpush1.bf16.msra.mxu0 %v14546_v38  ;;  %4176 = vmatpush1.bf16.msra.mxu1 %v14548_v39  ;;  %v14594_v38 = vcombine.low %v1131_v25, %v1135_v26  ;;  %v14596_v39 = vcombine.low %v1132_v27, %v1136_v28  ;;  %v1179_v25 = vld [vmem:[#allocation6 + $0xc00] sm:$0xff]  ;;  %v1180_v27 = vld [vmem:[#allocation6 + $0xc08] sm:$0xff] }
 0x206   :  { %4005 = vmatprep.subr.bf16.mxu0 %v14555_v5  ;;  %4177 = vmatprep.subr.bf16.mxu1 %v14557_v41  ;;  %v14603_v5 = vcombine.high %v1139_v33, %v1143_v34  ;;  %v14605_v41 = vcombine.high %v1140_v35, %v1144_v37  ;;  %v1183_v26 = vld [vmem:[#allocation6 + $0xc20] sm:$0xff]  ;;  %v1184_v28 = vld [vmem:[#allocation6 + $0xc28] sm:$0xff] }
 0x209   :  { %4006 = vmatpush1.bf16.msra.mxu0 %v14554_v45  ;;  %4178 = vmatpush1.bf16.msra.mxu1 %v14556_v46  ;;  %v14602_v45 = vcombine.low %v1139_v33, %v1143_v34  ;;  %v14604_v46 = vcombine.low %v1140_v35, %v1144_v37  ;;  %v1187_v33 = vld [vmem:[#allocation6 + $0xc40] sm:$0xff]  ;;  %v1188_v35 = vld [vmem:[#allocation6 + $0xc48] sm:$0xff] }
 0x20a   :  { %4007 = vmatprep.subr.bf16.mxu0 %v14563_v48  ;;  %4179 = vmatprep.subr.bf16.mxu1 %v14565_v49  ;;  %v14611_v48 = vcombine.high %v1147_v43, %v1151_v15  ;;  %v14613_v49 = vcombine.high %v1148_v0, %v1152_v44  ;;  %v1191_v34 = vld [vmem:[#allocation6 + $0xc60] sm:$0xff]  ;;  %v1192_v37 = vld [vmem:[#allocation6 + $0xc68] sm:$0xff] }
 0x20d   :  { %4008 = vmatpush1.bf16.msra.mxu0 %v14562_v55  ;;  %4180 = vmatpush1.bf16.msra.mxu1 %v14564_v56  ;;  %v14610_v55 = vcombine.low %v1147_v43, %v1151_v15  ;;  %v14612_v56 = vcombine.low %v1148_v0, %v1152_v44  ;;  %v1195_v43 = vld [vmem:[#allocation6 + $0xc80] sm:$0xff]  ;;  %v1196_v0 = vld [vmem:[#allocation6 + $0xc88] sm:$0xff] }
 0x20e   :  { %4009 = vmatprep.subr.bf16.mxu0 %v14571_v57  ;;  %4181 = vmatprep.subr.bf16.mxu1 %v14573_v58  ;;  %v14619_v57 = vcombine.high %v1155_v50, %v1159_v52  ;;  %v14621_v58 = vcombine.high %v1156_v53, %v1160_v54  ;;  %v1199_v15 = vld [vmem:[#allocation6 + $0xca0] sm:$0xff]  ;;  %v1200_v44 = vld [vmem:[#allocation6 + $0xca8] sm:$0xff] }
 0x211   :  { %4010 = vmatpush1.bf16.msra.mxu0 %v14570_v1  ;;  %4182 = vmatpush1.bf16.msra.mxu1 %v14572_v2  ;;  %v14618_v1 = vcombine.low %v1155_v50, %v1159_v52  ;;  %v14620_v2 = vcombine.low %v1156_v53, %v1160_v54  ;;  %v1203_v50 = vld [vmem:[#allocation6 + $0xcc0] sm:$0xff]  ;;  %v1204_v53 = vld [vmem:[#allocation6 + $0xcc8] sm:$0xff] }
 0x212   :  { %4011 = vmatprep.subr.bf16.mxu0 %v14579_v4  ;;  %4183 = vmatprep.subr.bf16.mxu1 %v14581_v6  ;;  %v14627_v4 = vcombine.high %v1163_v59, %v1167_v60  ;;  %v14629_v6 = vcombine.high %v1164_v61, %v1168_v63  ;;  %v1207_v52 = vld [vmem:[#allocation6 + $0xce0] sm:$0xff]  ;;  %v1208_v54 = vld [vmem:[#allocation6 + $0xce8] sm:$0xff] }
 0x215   :  { %4012 = vmatpush1.bf16.msra.mxu0 %v14578_v17  ;;  %4184 = vmatpush1.bf16.msra.mxu1 %v14580_v18  ;;  %v14626_v17 = vcombine.low %v1163_v59, %v1167_v60  ;;  %v14628_v18 = vcombine.low %v1164_v61, %v1168_v63  ;;  %v1211_v59 = vld [vmem:[#allocation6 + $0xd00] sm:$0xff]  ;;  %v1212_v61 = vld [vmem:[#allocation6 + $0xd08] sm:$0xff] }
 0x216   :  { %4013 = vmatprep.subr.bf16.mxu0 %v14587_v22  ;;  %4185 = vmatprep.subr.bf16.mxu1 %v14589_v23  ;;  %v14635_v22 = vcombine.high %v1171_v8, %v1175_v10  ;;  %v14637_v23 = vcombine.high %v1172_v11, %v1176_v12  ;;  %v1215_v60 = vld [vmem:[#allocation6 + $0xd20] sm:$0xff]  ;;  %v1216_v63 = vld [vmem:[#allocation6 + $0xd28] sm:$0xff] }
 0x219   :  { %4014 = vmatpush1.bf16.msra.mxu0 %v14586_v29  ;;  %4186 = vmatpush1.bf16.msra.mxu1 %v14588_v13  ;;  %v14634_v29 = vcombine.low %v1171_v8, %v1175_v10  ;;  %v14636_v13 = vcombine.low %v1172_v11, %v1176_v12  ;;  %v1219_v8 = vld [vmem:[#allocation6 + $0xd40] sm:$0xff]  ;;  %v1220_v11 = vld [vmem:[#allocation6 + $0xd48] sm:$0xff] }
 0x21a   :  { %4015 = vmatprep.subr.bf16.mxu0 %v14595_v30  ;;  %4187 = vmatprep.subr.bf16.mxu1 %v14597_v31  ;;  %v14643_v30 = vcombine.high %v1179_v25, %v1183_v26  ;;  %v14645_v31 = vcombine.high %v1180_v27, %v1184_v28  ;;  %v1223_v10 = vld [vmem:[#allocation6 + $0xd60] sm:$0xff]  ;;  %v1224_v12 = vld [vmem:[#allocation6 + $0xd68] sm:$0xff] }
 0x21d   :  { %4016 = vmatpush1.bf16.msra.mxu0 %v14594_v38  ;;  %4188 = vmatpush1.bf16.msra.mxu1 %v14596_v39  ;;  %v14642_v38 = vcombine.low %v1179_v25, %v1183_v26  ;;  %v14644_v39 = vcombine.low %v1180_v27, %v1184_v28  ;;  %v1227_v25 = vld [vmem:[#allocation6 + $0xd80] sm:$0xff]  ;;  %v1228_v27 = vld [vmem:[#allocation6 + $0xd88] sm:$0xff] }
 0x21e   :  { %4017 = vmatprep.subr.bf16.mxu0 %v14603_v5  ;;  %4189 = vmatprep.subr.bf16.mxu1 %v14605_v41  ;;  %v14651_v5 = vcombine.high %v1187_v33, %v1191_v34  ;;  %v14653_v41 = vcombine.high %v1188_v35, %v1192_v37  ;;  %v1231_v26 = vld [vmem:[#allocation6 + $0xda0] sm:$0xff]  ;;  %v1232_v28 = vld [vmem:[#allocation6 + $0xda8] sm:$0xff] }
 0x221   :  { %4018 = vmatpush1.bf16.msra.mxu0 %v14602_v45  ;;  %4190 = vmatpush1.bf16.msra.mxu1 %v14604_v46  ;;  %v14650_v45 = vcombine.low %v1187_v33, %v1191_v34  ;;  %v14652_v46 = vcombine.low %v1188_v35, %v1192_v37  ;;  %v1235_v33 = vld [vmem:[#allocation6 + $0xdc0] sm:$0xff]  ;;  %v1236_v35 = vld [vmem:[#allocation6 + $0xdc8] sm:$0xff] }
 0x222   :  { %4019 = vmatprep.subr.bf16.mxu0 %v14611_v48  ;;  %4191 = vmatprep.subr.bf16.mxu1 %v14613_v49  ;;  %v14659_v48 = vcombine.high %v1195_v43, %v1199_v15  ;;  %v14661_v49 = vcombine.high %v1196_v0, %v1200_v44  ;;  %v1239_v34 = vld [vmem:[#allocation6 + $0xde0] sm:$0xff]  ;;  %v1240_v37 = vld [vmem:[#allocation6 + $0xde8] sm:$0xff] }
 0x225   :  { %4020 = vmatpush1.bf16.msra.mxu0 %v14610_v55  ;;  %4192 = vmatpush1.bf16.msra.mxu1 %v14612_v56  ;;  %v14658_v55 = vcombine.low %v1195_v43, %v1199_v15  ;;  %v14660_v56 = vcombine.low %v1196_v0, %v1200_v44  ;;  %v1243_v43 = vld [vmem:[#allocation6 + $0xe00] sm:$0xff]  ;;  %v1244_v0 = vld [vmem:[#allocation6 + $0xe08] sm:$0xff] }
 0x226   :  { %4021 = vmatprep.subr.bf16.mxu0 %v14619_v57  ;;  %4193 = vmatprep.subr.bf16.mxu1 %v14621_v58  ;;  %v14667_v57 = vcombine.high %v1203_v50, %v1207_v52  ;;  %v14669_v58 = vcombine.high %v1204_v53, %v1208_v54  ;;  %v1247_v15 = vld [vmem:[#allocation6 + $0xe20] sm:$0xff]  ;;  %v1248_v44 = vld [vmem:[#allocation6 + $0xe28] sm:$0xff] }
 0x229   :  { %4022 = vmatpush1.bf16.msra.mxu0 %v14618_v1  ;;  %4194 = vmatpush1.bf16.msra.mxu1 %v14620_v2  ;;  %v14666_v1 = vcombine.low %v1203_v50, %v1207_v52  ;;  %v14668_v2 = vcombine.low %v1204_v53, %v1208_v54  ;;  %v1251_v50 = vld [vmem:[#allocation6 + $0xe40] sm:$0xff]  ;;  %v1252_v53 = vld [vmem:[#allocation6 + $0xe48] sm:$0xff] }
 0x22a   :  { %4023 = vmatprep.subr.bf16.mxu0 %v14627_v4  ;;  %4195 = vmatprep.subr.bf16.mxu1 %v14629_v6  ;;  %v14675_v4 = vcombine.high %v1211_v59, %v1215_v60  ;;  %v14677_v6 = vcombine.high %v1212_v61, %v1216_v63  ;;  %v1255_v52 = vld [vmem:[#allocation6 + $0xe60] sm:$0xff]  ;;  %v1256_v54 = vld [vmem:[#allocation6 + $0xe68] sm:$0xff] }
 0x22d   :  { %4024 = vmatpush1.bf16.msra.mxu0 %v14626_v17  ;;  %4196 = vmatpush1.bf16.msra.mxu1 %v14628_v18  ;;  %v14674_v17 = vcombine.low %v1211_v59, %v1215_v60  ;;  %v14676_v18 = vcombine.low %v1212_v61, %v1216_v63  ;;  %v1259_v59 = vld [vmem:[#allocation6 + $0xe80] sm:$0xff]  ;;  %v1260_v61 = vld [vmem:[#allocation6 + $0xe88] sm:$0xff] }
 0x22e   :  { %4025 = vmatprep.subr.bf16.mxu0 %v14635_v22  ;;  %4197 = vmatprep.subr.bf16.mxu1 %v14637_v23  ;;  %v14683_v22 = vcombine.high %v1219_v8, %v1223_v10  ;;  %v14685_v23 = vcombine.high %v1220_v11, %v1224_v12  ;;  %v1263_v60 = vld [vmem:[#allocation6 + $0xea0] sm:$0xff]  ;;  %v1264_v63 = vld [vmem:[#allocation6 + $0xea8] sm:$0xff] }
 0x231   :  { %4026 = vmatpush1.bf16.msra.mxu0 %v14634_v29  ;;  %4198 = vmatpush1.bf16.msra.mxu1 %v14636_v13  ;;  %v14682_v29 = vcombine.low %v1219_v8, %v1223_v10  ;;  %v14684_v13 = vcombine.low %v1220_v11, %v1224_v12  ;;  %v1267_v8 = vld [vmem:[#allocation6 + $0xec0] sm:$0xff]  ;;  %v1268_v11 = vld [vmem:[#allocation6 + $0xec8] sm:$0xff] }
 0x232   :  { %4038 = vmatprep.subr.bf16.mxu0 %v14643_v30  ;;  %4210 = vmatprep.subr.bf16.mxu1 %v14645_v31  ;;  %v14691_v30 = vcombine.high %v1227_v25, %v1231_v26  ;;  %v14693_v31 = vcombine.high %v1228_v27, %v1232_v28  ;;  %v1271_v10 = vld [vmem:[#allocation6 + $0xee0] sm:$0xff]  ;;  %v1272_v12 = vld [vmem:[#allocation6 + $0xee8] sm:$0xff] }
 0x234   :  { %4028 = vmatmul.mubr.bf16.vlgmr.msra.gmra.mrb[8].mxu0 %v17193_v20  ;;  %4200 = vmatmul.mubr.bf16.vlgmr.msra.gmra.mrb[8].mxu1 %v17193_v20 }
 0x235   :  { %4039 = vmatpush1.bf16.msra.mxu0 %v14642_v38  ;;  %4211 = vmatpush1.bf16.msra.mxu1 %v14644_v39  ;;  %v14690_v38 = vcombine.low %v1227_v25, %v1231_v26  ;;  %v14692_v39 = vcombine.low %v1228_v27, %v1232_v28  ;;  %v1275_v25 = vld [vmem:[#allocation6 + $0xf00] sm:$0xff]  ;;  %v1276_v27 = vld [vmem:[#allocation6 + $0xf08] sm:$0xff] }
 0x236   :  { %4040 = vmatprep.subr.bf16.mxu0 %v14651_v5  ;;  %4212 = vmatprep.subr.bf16.mxu1 %v14653_v41  ;;  %v14699_v5 = vcombine.high %v1235_v33, %v1239_v34  ;;  %v14701_v41 = vcombine.high %v1236_v35, %v1240_v37  ;;  %v1279_v26 = vld [vmem:[#allocation6 + $0xf20] sm:$0xff]  ;;  %v1280_v28 = vld [vmem:[#allocation6 + $0xf28] sm:$0xff] }
 0x237   :  { %4070 = vmatprep.mubr.bf16.mxu0 %v17209_v51  ;;  %4242 = vmatprep.mubr.bf16.mxu1 %v17209_v51 }
 0x239   :  { %4041 = vmatpush1.bf16.msra.mxu0 %v14650_v45  ;;  %4213 = vmatpush1.bf16.msra.mxu1 %v14652_v46  ;;  %v14698_v45 = vcombine.low %v1235_v33, %v1239_v34  ;;  %v14700_v46 = vcombine.low %v1236_v35, %v1240_v37  ;;  %v1283_v33 = vld [vmem:[#allocation6 + $0xf40] sm:$0xff]  ;;  %v1284_v35 = vld [vmem:[#allocation6 + $0xf48] sm:$0xff] }
 0x23a   :  { %4042 = vmatprep.subr.bf16.mxu0 %v14659_v48  ;;  %4214 = vmatprep.subr.bf16.mxu1 %v14661_v49  ;;  %v14707_v48 = vcombine.high %v1243_v43, %v1247_v15  ;;  %v14709_v49 = vcombine.high %v1244_v0, %v1248_v44  ;;  %v1287_v34 = vld [vmem:[#allocation6 + $0xf60] sm:$0xff]  ;;  %v1288_v37 = vld [vmem:[#allocation6 + $0xf68] sm:$0xff] }
 0x23d   :  { %4043 = vmatpush1.bf16.msra.mxu0 %v14658_v55  ;;  %4215 = vmatpush1.bf16.msra.mxu1 %v14660_v56  ;;  %v14706_v55 = vcombine.low %v1243_v43, %v1247_v15  ;;  %v14708_v56 = vcombine.low %v1244_v0, %v1248_v44  ;;  %v1291_v43 = vld [vmem:[#allocation6 + $0xf80] sm:$0xff]  ;;  %v1292_v0 = vld [vmem:[#allocation6 + $0xf88] sm:$0xff] }
 0x23e   :  { %4044 = vmatprep.subr.bf16.mxu0 %v14667_v57  ;;  %4216 = vmatprep.subr.bf16.mxu1 %v14669_v58  ;;  %v14715_v57 = vcombine.high %v1251_v50, %v1255_v52  ;;  %v14717_v58 = vcombine.high %v1252_v53, %v1256_v54  ;;  %v1295_v15 = vld [vmem:[#allocation6 + $0xfa0] sm:$0xff]  ;;  %v1296_v44 = vld [vmem:[#allocation6 + $0xfa8] sm:$0xff] }
 0x241   :  { %4045 = vmatpush1.bf16.msra.mxu0 %v14666_v1  ;;  %4217 = vmatpush1.bf16.msra.mxu1 %v14668_v2  ;;  %v14714_v1 = vcombine.low %v1251_v50, %v1255_v52  ;;  %v14716_v2 = vcombine.low %v1252_v53, %v1256_v54  ;;  %v1299_v50 = vld [vmem:[#allocation6 + $0xfc0] sm:$0xff]  ;;  %v1300_v53 = vld [vmem:[#allocation6 + $0xfc8] sm:$0xff] }
 0x242   :  { %4046 = vmatprep.subr.bf16.mxu0 %v14675_v4  ;;  %4218 = vmatprep.subr.bf16.mxu1 %v14677_v6  ;;  %v14723_v4 = vcombine.high %v1259_v59, %v1263_v60  ;;  %v14725_v6 = vcombine.high %v1260_v61, %v1264_v63  ;;  %v1303_v52 = vld [vmem:[#allocation6 + $0xfe0] sm:$0xff]  ;;  %v1304_v54 = vld [vmem:[#allocation6 + $0xfe8] sm:$0xff] }
 0x245   :  { %4047 = vmatpush1.bf16.msra.mxu0 %v14674_v17  ;;  %4219 = vmatpush1.bf16.msra.mxu1 %v14676_v18  ;;  %v14722_v17 = vcombine.low %v1259_v59, %v1263_v60  ;;  %v14724_v18 = vcombine.low %v1260_v61, %v1264_v63  ;;  %v797_v59 = vld [vmem:[#allocation6 + $0x10] sm:$0xff]  ;;  %v798_v61 = vld [vmem:[#allocation6 + $0x18] sm:$0xff] }
 0x246   :  { %4048 = vmatprep.subr.bf16.mxu0 %v14683_v22  ;;  %4220 = vmatprep.subr.bf16.mxu1 %v14685_v23  ;;  %v14731_v22 = vcombine.high %v1267_v8, %v1271_v10  ;;  %v14733_v23 = vcombine.high %v1268_v11, %v1272_v12  ;;  %v801_v60 = vld [vmem:[#allocation6 + $0x30] sm:$0xff]  ;;  %v802_v63 = vld [vmem:[#allocation6 + $0x38] sm:$0xff] }
 0x249   :  { %4049 = vmatpush1.bf16.msra.mxu0 %v14682_v29  ;;  %4221 = vmatpush1.bf16.msra.mxu1 %v14684_v13  ;;  %v14730_v29 = vcombine.low %v1267_v8, %v1271_v10  ;;  %v14732_v13 = vcombine.low %v1268_v11, %v1272_v12  ;;  %v805_v8 = vld [vmem:[#allocation6 + $0x50] sm:$0xff]  ;;  %v806_v11 = vld [vmem:[#allocation6 + $0x58] sm:$0xff] }
 0x24a   :  { %4050 = vmatprep.subr.bf16.mxu0 %v14691_v30  ;;  %4222 = vmatprep.subr.bf16.mxu1 %v14693_v31  ;;  %v14739_v30 = vcombine.high %v1275_v25, %v1279_v26  ;;  %v14741_v31 = vcombine.high %v1276_v27, %v1280_v28  ;;  %v809_v10 = vld [vmem:[#allocation6 + $0x70] sm:$0xff]  ;;  %v810_v12 = vld [vmem:[#allocation6 + $0x78] sm:$0xff] }
 0x24d   :  { %4051 = vmatpush1.bf16.msra.mxu0 %v14690_v38  ;;  %4223 = vmatpush1.bf16.msra.mxu1 %v14692_v39  ;;  %v14738_v38 = vcombine.low %v1275_v25, %v1279_v26  ;;  %v14740_v39 = vcombine.low %v1276_v27, %v1280_v28  ;;  %v813_v25 = vld [vmem:[#allocation6 + $0x90] sm:$0xff]  ;;  %v814_v27 = vld [vmem:[#allocation6 + $0x98] sm:$0xff] }
 0x24e   :  { %4052 = vmatprep.subr.bf16.mxu0 %v14699_v5  ;;  %4224 = vmatprep.subr.bf16.mxu1 %v14701_v41  ;;  %v14747_v5 = vcombine.high %v1283_v33, %v1287_v34  ;;  %v14749_v41 = vcombine.high %v1284_v35, %v1288_v37  ;;  %v817_v26 = vld [vmem:[#allocation6 + $0xb0] sm:$0xff]  ;;  %v818_v28 = vld [vmem:[#allocation6 + $0xb8] sm:$0xff] }
 0x251   :  { %4053 = vmatpush1.bf16.msra.mxu0 %v14698_v45  ;;  %4225 = vmatpush1.bf16.msra.mxu1 %v14700_v46  ;;  %v14746_v45 = vcombine.low %v1283_v33, %v1287_v34  ;;  %v14748_v46 = vcombine.low %v1284_v35, %v1288_v37  ;;  %v821_v33 = vld [vmem:[#allocation6 + $0xd0] sm:$0xff]  ;;  %v822_v35 = vld [vmem:[#allocation6 + $0xd8] sm:$0xff] }
 0x252   :  { %4054 = vmatprep.subr.bf16.mxu0 %v14707_v48  ;;  %4226 = vmatprep.subr.bf16.mxu1 %v14709_v49  ;;  %v14755_v48 = vcombine.high %v1291_v43, %v1295_v15  ;;  %v14757_v49 = vcombine.high %v1292_v0, %v1296_v44  ;;  %v825_v34 = vld [vmem:[#allocation6 + $0xf0] sm:$0xff]  ;;  %v826_v37 = vld [vmem:[#allocation6 + $0xf8] sm:$0xff] }
 0x255   :  { %4055 = vmatpush1.bf16.msra.mxu0 %v14706_v55  ;;  %4227 = vmatpush1.bf16.msra.mxu1 %v14708_v56  ;;  %v14754_v55 = vcombine.low %v1291_v43, %v1295_v15  ;;  %v14756_v56 = vcombine.low %v1292_v0, %v1296_v44  ;;  %v829_v43 = vld [vmem:[#allocation6 + $0x110] sm:$0xff]  ;;  %v834_v0 = vld [vmem:[#allocation6 + $0x138] sm:$0xff]  ;;  %v14286_v44 = vcombine.low %v821_v33, %v825_v34 }
 0x256   :  { %4056 = vmatprep.subr.bf16.mxu0 %v14715_v57  ;;  %4228 = vmatprep.subr.bf16.mxu1 %v14717_v58  ;;  %v14763_v57 = vcombine.high %v1299_v50, %v1303_v52  ;;  %v14765_v58 = vcombine.high %v1300_v53, %v1304_v54  ;;  %v833_v15 = vld [vmem:[#allocation6 + $0x130] sm:$0xff] }
 0x259   :  { %4057 = vmatpush1.bf16.msra.mxu0 %v14714_v1  ;;  %4229 = vmatpush1.bf16.msra.mxu1 %v14716_v2  ;;  %v14762_v1 = vcombine.low %v1299_v50, %v1303_v52  ;;  %v14764_v2 = vcombine.low %v1300_v53, %v1304_v54  ;;  %v841_v50 = vld [vmem:[#allocation6 + $0x170] sm:$0xff]  ;;  %v838_v52 = vld [vmem:[#allocation6 + $0x158] sm:$0xff]  ;;  %v14294_v54 = vcombine.low %v829_v43, %v833_v15 }
 0x25a   :  { %4058 = vmatprep.subr.bf16.mxu0 %v14723_v4  ;;  %4230 = vmatprep.subr.bf16.mxu1 %v14725_v6  ;;  %v14263_v4 = vcombine.high %v797_v59, %v801_v60  ;;  %v14265_v6 = vcombine.high %v798_v61, %v802_v63  ;;  %v842_v53 = vld [vmem:[#allocation6 + $0x178] sm:$0xff] }
 0x25d   :  { %4059 = vmatpush1.bf16.msra.mxu0 %v14722_v17  ;;  %4231 = vmatpush1.bf16.msra.mxu1 %v14724_v18  ;;  %v14262_v17 = vcombine.low %v797_v59, %v801_v60  ;;  %v14264_v18 = vcombine.low %v798_v61, %v802_v63  ;;  %v849_v59 = vld [vmem:[#allocation6 + $0x1b0] sm:$0xff]  ;;  %v846_v60 = vld [vmem:[#allocation6 + $0x198] sm:$0xff] }
 0x25e   :  { %4060 = vmatprep.subr.bf16.mxu0 %v14731_v22  ;;  %4232 = vmatprep.subr.bf16.mxu1 %v14733_v23  ;;  %v14271_v22 = vcombine.high %v805_v8, %v809_v10  ;;  %v14273_v23 = vcombine.high %v806_v11, %v810_v12  ;;  %v850_v61 = vld [vmem:[#allocation6 + $0x1b8] sm:$0xff] }
 0x261   :  { %4061 = vmatpush1.bf16.msra.mxu0 %v14730_v29  ;;  %4233 = vmatpush1.bf16.msra.mxu1 %v14732_v13  ;;  %v14270_v29 = vcombine.low %v805_v8, %v809_v10  ;;  %v14272_v13 = vcombine.low %v806_v11, %v810_v12  ;;  %v857_v8 = vld [vmem:[#allocation6 + $0x1f0] sm:$0xff]  ;;  %v854_v10 = vld [vmem:[#allocation6 + $0x1d8] sm:$0xff] }
 0x262   :  { %4062 = vmatprep.subr.bf16.mxu0 %v14739_v30  ;;  %4234 = vmatprep.subr.bf16.mxu1 %v14741_v31  ;;  %v14279_v30 = vcombine.high %v813_v25, %v817_v26  ;;  %v14281_v31 = vcombine.high %v814_v27, %v818_v28  ;;  %v858_v11 = vld [vmem:[#allocation6 + $0x1f8] sm:$0xff] }
 0x265   :  { %4063 = vmatpush1.bf16.msra.mxu0 %v14738_v38  ;;  %4235 = vmatpush1.bf16.msra.mxu1 %v14740_v39  ;;  %v14278_v38 = vcombine.low %v813_v25, %v817_v26  ;;  %v14280_v39 = vcombine.low %v814_v27, %v818_v28  ;;  %v865_v25 = vld [vmem:[#allocation6 + $0x230] sm:$0xff]  ;;  %v862_v26 = vld [vmem:[#allocation6 + $0x218] sm:$0xff] }
 0x266   :  { %4064 = vmatprep.subr.bf16.mxu0 %v14747_v5  ;;  %4236 = vmatprep.subr.bf16.mxu1 %v14749_v41  ;;  %v14287_v5 = vcombine.high %v821_v33, %v825_v34  ;;  %v14289_v41 = vcombine.high %v822_v35, %v826_v37  ;;  %v866_v27 = vld [vmem:[#allocation6 + $0x238] sm:$0xff]  ;;  %v873_v33 = vld [vmem:[#allocation6 + $0x270] sm:$0xff] }
 0x267   :  { %v870_v34 = vld [vmem:[#allocation6 + $0x258] sm:$0xff] }
 0x269   :  { %4065 = vmatpush1.bf16.msra.mxu0 %v14746_v45  ;;  %4237 = vmatpush1.bf16.msra.mxu1 %v14748_v46  ;;  %v14288_v45 = vcombine.low %v822_v35, %v826_v37  ;;  %v14295_v46 = vcombine.high %v829_v43, %v833_v15  ;;  %v874_v35 = vld [vmem:[#allocation6 + $0x278] sm:$0xff]  ;;  %v881_v43 = vld [vmem:[#allocation6 + $0x2b0] sm:$0xff] }
 0x26a   :  { %4066 = vmatprep.subr.bf16.mxu0 %v14755_v48  ;;  %4238 = vmatprep.subr.bf16.mxu1 %v14757_v49  ;;  %v837_v49 = vld [vmem:[#allocation6 + $0x150] sm:$0xff]  ;;  %v878_v15 = vld [vmem:[#allocation6 + $0x298] sm:$0xff] }
 0x26b   :  { %v14302_v63 = vcombine.low %v837_v49, %v841_v50 }
 0x26d   :  { %4067 = vmatpush1.bf16.msra.mxu0 %v14754_v55  ;;  %4239 = vmatpush1.bf16.msra.mxu1 %v14756_v56  ;;  %v14303_v56 = vcombine.high %v837_v49, %v841_v50  ;;  %v889_v49 = vld [vmem:[#allocation6 + $0x2f0] sm:$0xff]  ;;  %v886_v50 = vld [vmem:[#allocation6 + $0x2d8] sm:$0xff] }
 0x26e   :  { %4068 = vmatprep.subr.bf16.mxu0 %v14763_v57  ;;  %4240 = vmatprep.subr.bf16.mxu1 %v14765_v58  ;;  %v14305_v57 = vcombine.high %v838_v52, %v842_v53  ;;  %v845_v58 = vld [vmem:[#allocation6 + $0x190] sm:$0xff] }
 0x26f   :  { %v14310_v12 = vcombine.low %v845_v58, %v849_v59 }
 0x271   :  { %4069 = vmatpush1.bf16.msra.mxu0 %v14762_v1  ;;  %4241 = vmatpush1.bf16.msra.mxu1 %v14764_v2  ;;  %v14304_v1 = vcombine.low %v838_v52, %v842_v53  ;;  %v14311_v2 = vcombine.high %v845_v58, %v849_v59  ;;  %v890_v52 = vld [vmem:[#allocation6 + $0x2f8] sm:$0xff]  ;;  %v897_v58 = vld [vmem:[#allocation6 + $0x330] sm:$0xff] }
 0x272   :  { %4253 = vmatprep.subr.bf16.mxu0 %v14263_v4  ;;  %4425 = vmatprep.subr.bf16.mxu1 %v14265_v6  ;;  %v14313_v4 = vcombine.high %v846_v60, %v850_v61  ;;  %v853_v6 = vld [vmem:[#allocation6 + $0x1d0] sm:$0xff]  ;;  %v894_v59 = vld [vmem:[#allocation6 + $0x318] sm:$0xff] }
 0x273   :  { %v14318_v28 = vcombine.low %v853_v6, %v857_v8 }
 0x274   :  { %4071 = vmatmul.mubr.bf16.vlgmr.msra.gmra.mrb[8].mxu0 %v17207_v47  ;;  %4243 = vmatmul.mubr.bf16.vlgmr.msra.gmra.mrb[8].mxu1 %v17207_v47 }
 0x275   :  { %4254 = vmatpush1.bf16.msra.mxu0 %v14262_v17  ;;  %4285 = vmatprep.mubr.bf16.mxu0 %v17171_v42  ;;  %v14312_v17 = vcombine.low %v846_v60, %v850_v61  ;;  %v898_v60 = vld [vmem:[#allocation6 + $0x338] sm:$0xff] }
 0x276   :  { %4426 = vmatpush1.bf16.msra.mxu1 %v14264_v18  ;;  %4457 = vmatprep.mubr.bf16.mxu1 %v17171_v42  ;;  %v830_v42 = vld [vmem:[#allocation6 + $0x118] sm:$0xff]  ;;  %v14319_v18 = vcombine.high %v853_v6, %v857_v8  ;;  %v905_v6 = vld [vmem:[#allocation6 + $0x370] sm:$0xff] }
 0x277   :  { %4255 = vmatprep.subr.bf16.mxu0 %v14271_v22  ;;  %4427 = vmatprep.subr.bf16.mxu1 %v14273_v23  ;;  %v14297_v48 = vcombine.high %v830_v42, %v834_v0  ;;  %v14296_v55 = vcombine.low %v830_v42, %v834_v0  ;;  %v14321_v22 = vcombine.high %v854_v10, %v858_v11  ;;  %v861_v23 = vld [vmem:[#allocation6 + $0x210] sm:$0xff]  ;;  %v882_v42 = vld [vmem:[#allocation6 + $0x2b8] sm:$0xff] }
 0x278   :  { %v14326_v37 = vcombine.low %v861_v23, %v865_v25  ;;  %v902_v8 = vld [vmem:[#allocation6 + $0x358] sm:$0xff] }
 0x279   :  { %4256 = vmatpush1.bf16.msra.mxu0 %v14270_v29  ;;  %v14320_v29 = vcombine.low %v854_v10, %v858_v11  ;;  %v906_v10 = vld [vmem:[#allocation6 + $0x378] sm:$0xff] }
 0x27a   :  { %4428 = vmatpush1.bf16.msra.mxu1 %v14272_v13  ;;  %4257 = vmatprep.subr.bf16.mxu0 %v14279_v30  ;;  %v14327_v13 = vcombine.high %v861_v23, %v865_v25  ;;  %v14329_v30 = vcombine.high %v862_v26, %v866_v27  ;;  %v913_v23 = vld [vmem:[#allocation6 + $0x3b0] sm:$0xff]  ;;  %v910_v25 = vld [vmem:[#allocation6 + $0x398] sm:$0xff] }
 0x27b   :  { %4429 = vmatprep.subr.bf16.mxu1 %v14281_v31  ;;  %v869_v31 = vld [vmem:[#allocation6 + $0x250] sm:$0xff] }
 0x27c   :  { %v14334_v0 = vcombine.low %v869_v31, %v873_v33 }
 0x27d   :  { %4258 = vmatpush1.bf16.msra.mxu0 %v14278_v38  ;;  %v14328_v38 = vcombine.low %v862_v26, %v866_v27  ;;  %v914_v26 = vld [vmem:[#allocation6 + $0x3b8] sm:$0xff] }
 0x27e   :  { %4430 = vmatpush1.bf16.msra.mxu1 %v14280_v39  ;;  %4259 = vmatprep.subr.bf16.mxu0 %v14287_v5  ;;  %v14335_v39 = vcombine.high %v869_v31, %v873_v33  ;;  %v14337_v5 = vcombine.high %v870_v34, %v874_v35  ;;  %v921_v31 = vld [vmem:[#allocation6 + $0x3f0] sm:$0xff]  ;;  %v918_v33 = vld [vmem:[#allocation6 + $0x3d8] sm:$0xff] }
 0x27f   :  { %4431 = vmatprep.subr.bf16.mxu1 %v14289_v41  ;;  %v877_v41 = vld [vmem:[#allocation6 + $0x290] sm:$0xff] }
 0x280   :  { %v14342_v53 = vcombine.low %v877_v41, %v881_v43 }
 0x281   :  { %4260 = vmatpush1.bf16.msra.mxu0 %v14286_v44  ;;  %v14336_v44 = vcombine.low %v870_v34, %v874_v35  ;;  %v922_v34 = vld [vmem:[#allocation6 + $0x3f8] sm:$0xff] }
 0x282   :  { %4432 = vmatpush1.bf16.msra.mxu1 %v14288_v45  ;;  %4261 = vmatprep.subr.bf16.mxu0 %v14295_v46  ;;  %v14343_v45 = vcombine.high %v877_v41, %v881_v43  ;;  %v14345_v46 = vcombine.high %v878_v15, %v882_v42  ;;  %v929_v41 = vld [vmem:[#allocation6 + $0x430] sm:$0xff]  ;;  %v926_v43 = vld [vmem:[#allocation6 + $0x418] sm:$0xff] }
 0x283   :  { %4433 = vmatprep.subr.bf16.mxu1 %v14297_v48  ;;  %v885_v48 = vld [vmem:[#allocation6 + $0x2d0] sm:$0xff] }
 0x284   :  { %v14350_v61 = vcombine.low %v885_v48, %v889_v49 }
 0x285   :  { %4262 = vmatpush1.bf16.msra.mxu0 %v14294_v54  ;;  %v14344_v54 = vcombine.low %v878_v15, %v882_v42  ;;  %v930_v15 = vld [vmem:[#allocation6 + $0x438] sm:$0xff] }
 0x286   :  { %4434 = vmatpush1.bf16.msra.mxu1 %v14296_v55  ;;  %4263 = vmatprep.subr.bf16.mxu0 %v14303_v56  ;;  %v14351_v55 = vcombine.high %v885_v48, %v889_v49  ;;  %v14353_v56 = vcombine.high %v886_v50, %v890_v52  ;;  %v937_v48 = vld [vmem:[#allocation6 + $0x470] sm:$0xff] }
 0x287   :  { %4435 = vmatprep.subr.bf16.mxu1 %v14305_v57  ;;  %v893_v57 = vld [vmem:[#allocation6 + $0x310] sm:$0xff] }
 0x288   :  { %v14358_v11 = vcombine.low %v893_v57, %v897_v58 }
 0x289   :  { %4264 = vmatpush1.bf16.msra.mxu0 %v14302_v63  ;;  %v14352_v63 = vcombine.low %v886_v50, %v890_v52  ;;  %v934_v50 = vld [vmem:[#allocation6 + $0x458] sm:$0xff] }
 0x28a   :  { %4436 = vmatpush1.bf16.msra.mxu1 %v14304_v1  ;;  %4265 = vmatprep.subr.bf16.mxu0 %v14311_v2  ;;  %v14359_v1 = vcombine.high %v893_v57, %v897_v58  ;;  %v14361_v2 = vcombine.high %v894_v59, %v898_v60  ;;  %v938_v52 = vld [vmem:[#allocation6 + $0x478] sm:$0xff] }
 0x28b   :  { %4437 = vmatprep.subr.bf16.mxu1 %v14313_v4  ;;  %v901_v4 = vld [vmem:[#allocation6 + $0x350] sm:$0xff]  ;;  %v14401_v57 = vcombine.high %v934_v50, %v938_v52  ;;  %v942_v58 = vld [vmem:[#allocation6 + $0x498] sm:$0xff] }
 0x28c   :  { %v14366_v27 = vcombine.low %v901_v4, %v905_v6 }
 0x28d   :  { %4266 = vmatpush1.bf16.msra.mxu0 %v14310_v12  ;;  %v14360_v12 = vcombine.low %v894_v59, %v898_v60  ;;  %v946_v59 = vld [vmem:[#allocation6 + $0x4b8] sm:$0xff] }
 0x28e   :  { %4438 = vmatpush1.bf16.msra.mxu1 %v14312_v17  ;;  %4267 = vmatprep.subr.bf16.mxu0 %v14319_v18  ;;  %v14367_v17 = vcombine.high %v901_v4, %v905_v6  ;;  %v14369_v18 = vcombine.high %v902_v8, %v906_v10  ;;  %v953_v4 = vld [vmem:[#allocation6 + $0x4f0] sm:$0xff]  ;;  %v950_v6 = vld [vmem:[#allocation6 + $0x4d8] sm:$0xff] }
 0x28f   :  { %4439 = vmatprep.subr.bf16.mxu1 %v14321_v22  ;;  %v909_v22 = vld [vmem:[#allocation6 + $0x390] sm:$0xff] }
 0x290   :  { %v14374_v35 = vcombine.low %v909_v22, %v913_v23 }
 0x291   :  { %4268 = vmatpush1.bf16.msra.mxu0 %v14318_v28  ;;  %v14368_v28 = vcombine.low %v902_v8, %v906_v10  ;;  %v954_v8 = vld [vmem:[#allocation6 + $0x4f8] sm:$0xff] }
 0x292   :  { %4440 = vmatpush1.bf16.msra.mxu1 %v14320_v29  ;;  %4269 = vmatprep.subr.bf16.mxu0 %v14327_v13  ;;  %v14375_v29 = vcombine.high %v909_v22, %v913_v23  ;;  %v14377_v13 = vcombine.high %v910_v25, %v914_v26  ;;  %v958_v22 = vld [vmem:[#allocation6 + $0x518] sm:$0xff] }
 0x293   :  { %4441 = vmatprep.subr.bf16.mxu1 %v14329_v30  ;;  %v917_v30 = vld [vmem:[#allocation6 + $0x3d0] sm:$0xff]  ;;  %v962_v23 = vld [vmem:[#allocation6 + $0x538] sm:$0xff] }
 0x294   :  { %v14382_v42 = vcombine.low %v917_v30, %v921_v31 }
 0x295   :  { %4270 = vmatpush1.bf16.msra.mxu0 %v14326_v37  ;;  %v14376_v37 = vcombine.low %v910_v25, %v914_v26  ;;  %v14416_v25 = vcombine.low %v950_v6, %v954_v8 }
 0x296   :  { %4442 = vmatpush1.bf16.msra.mxu1 %v14328_v38  ;;  %4271 = vmatprep.subr.bf16.mxu0 %v14335_v39  ;;  %v14383_v38 = vcombine.high %v917_v30, %v921_v31  ;;  %v14385_v39 = vcombine.high %v918_v33, %v922_v34  ;;  %v970_v30 = vld [vmem:[#allocation6 + $0x578] sm:$0xff] }
 0x297   :  { %4443 = vmatprep.subr.bf16.mxu1 %v14337_v5  ;;  %v925_v5 = vld [vmem:[#allocation6 + $0x410] sm:$0xff] }
 0x298   :  { %v14390_v49 = vcombine.low %v925_v5, %v929_v41 }
 0x299   :  { %4272 = vmatpush1.bf16.msra.mxu0 %v14334_v0  ;;  %v14384_v0 = vcombine.low %v918_v33, %v922_v34  ;;  %v14424_v33 = vcombine.low %v958_v22, %v962_v23 }
 0x29a   :  { %4444 = vmatpush1.bf16.msra.mxu1 %v14336_v44  ;;  %4273 = vmatprep.subr.bf16.mxu0 %v14343_v45  ;;  %v14391_v44 = vcombine.high %v925_v5, %v929_v41  ;;  %v14393_v45 = vcombine.high %v926_v43, %v930_v15  ;;  %v978_v5 = vld [vmem:[#allocation6 + $0x5b8] sm:$0xff] }
 0x29b   :  { %4445 = vmatprep.subr.bf16.mxu1 %v14345_v46  ;;  %v933_v46 = vld [vmem:[#allocation6 + $0x450] sm:$0xff] }
 0x29c   :  { %v14398_v60 = vcombine.low %v933_v46, %v937_v48 }
 0x29d   :  { %4274 = vmatpush1.bf16.msra.mxu0 %v14342_v53  ;;  %v14392_v53 = vcombine.low %v926_v43, %v930_v15 }
 0x29e   :  { %4446 = vmatpush1.bf16.msra.mxu1 %v14344_v54  ;;  %4275 = vmatprep.subr.bf16.mxu0 %v14351_v55  ;;  %v14399_v54 = vcombine.high %v933_v46, %v937_v48  ;;  %v941_v55 = vld [vmem:[#allocation6 + $0x490] sm:$0xff]  ;;  %v986_v46 = vld [vmem:[#allocation6 + $0x5f8] sm:$0xff] }
 0x29f   :  { %4447 = vmatprep.subr.bf16.mxu1 %v14353_v56  ;;  %v945_v56 = vld [vmem:[#allocation6 + $0x4b0] sm:$0xff] }
 0x2a0   :  { %v14406_v10 = vcombine.low %v941_v55, %v945_v56 }
 0x2a1   :  { %4276 = vmatpush1.bf16.msra.mxu0 %v14350_v61  ;;  %v14400_v61 = vcombine.low %v934_v50, %v938_v52 }
 0x2a2   :  { %4448 = vmatpush1.bf16.msra.mxu1 %v14352_v63  ;;  %4277 = vmatprep.subr.bf16.mxu0 %v14359_v1  ;;  %v14407_v63 = vcombine.high %v941_v55, %v945_v56  ;;  %v14409_v1 = vcombine.high %v942_v58, %v946_v59  ;;  %v990_v55 = vld [vmem:[#allocation6 + $0x618] sm:$0xff] }
 0x2a3   :  { %4449 = vmatprep.subr.bf16.mxu1 %v14361_v2  ;;  %v949_v2 = vld [vmem:[#allocation6 + $0x4d0] sm:$0xff]  ;;  %v994_v56 = vld [vmem:[#allocation6 + $0x638] sm:$0xff] }
 0x2a5   :  { %4278 = vmatpush1.bf16.msra.mxu0 %v14358_v11  ;;  %v14415_v11 = vcombine.high %v949_v2, %v953_v4 }
 0x2a6   :  { %4450 = vmatpush1.bf16.msra.mxu1 %v14360_v12  ;;  %4279 = vmatprep.subr.bf16.mxu0 %v14367_v17  ;;  %v14417_v12 = vcombine.high %v950_v6, %v954_v8  ;;  %v957_v17 = vld [vmem:[#allocation6 + $0x510] sm:$0xff]  ;;  %v14456_v6 = vcombine.low %v990_v55, %v994_v56 }
 0x2a7   :  { %4451 = vmatprep.subr.bf16.mxu1 %v14369_v18  ;;  %v961_v18 = vld [vmem:[#allocation6 + $0x530] sm:$0xff] }
 0x2a8   :  { %v14423_v26 = vcombine.high %v957_v17, %v961_v18  ;;  %v14422_v31 = vcombine.low %v957_v17, %v961_v18  ;;  %v1010_v17 = vld [vmem:[#allocation6 + $0x6b8] sm:$0xff] }
 0x2a9   :  { %4280 = vmatpush1.bf16.msra.mxu0 %v14366_v27  ;;  %v14425_v27 = vcombine.high %v958_v22, %v962_v23 }
 0x2aa   :  { %4452 = vmatpush1.bf16.msra.mxu1 %v14368_v28  ;;  %4281 = vmatprep.subr.bf16.mxu0 %v14375_v29  ;;  %v965_v28 = vld [vmem:[#allocation6 + $0x550] sm:$0xff] }
 0x2ab   :  { %4453 = vmatprep.subr.bf16.mxu1 %v14377_v13  ;;  %v969_v29 = vld [vmem:[#allocation6 + $0x570] sm:$0xff]  ;;  %v966_v13 = vld [vmem:[#allocation6 + $0x558] sm:$0xff] }
 0x2ac   :  { %v14431_v34 = vcombine.high %v965_v28, %v969_v29  ;;  %v14430_v41 = vcombine.low %v965_v28, %v969_v29  ;;  %v14432_v43 = vcombine.low %v966_v13, %v970_v30  ;;  %v1018_v28 = vld [vmem:[#allocation6 + $0x6f8] sm:$0xff] }
 0x2ad   :  { %4282 = vmatpush1.bf16.msra.mxu0 %v14374_v35  ;;  %v14433_v35 = vcombine.high %v966_v13, %v970_v30 }
 0x2ae   :  { %4454 = vmatpush1.bf16.msra.mxu1 %v14376_v37  ;;  %4283 = vmatprep.subr.bf16.mxu0 %v14383_v38  ;;  %v973_v37 = vld [vmem:[#allocation6 + $0x590] sm:$0xff] }
 0x2af   :  { %4455 = vmatprep.subr.bf16.mxu1 %v14385_v39  ;;  %v977_v38 = vld [vmem:[#allocation6 + $0x5b0] sm:$0xff]  ;;  %v974_v39 = vld [vmem:[#allocation6 + $0x598] sm:$0xff] }
 0x2b0   :  { %v14439_v15 = vcombine.high %v973_v37, %v977_v38  ;;  %v14438_v48 = vcombine.low %v973_v37, %v977_v38  ;;  %v1026_v37 = vld [vmem:[#allocation6 + $0x738] sm:$0xff] }
 0x2b1   :  { %4284 = vmatpush1.bf16.msra.mxu0 %v14382_v42  ;;  %v14441_v42 = vcombine.high %v974_v39, %v978_v5 }
 0x2b2   :  { %4456 = vmatpush1.bf16.msra.mxu1 %v14384_v0  ;;  %4296 = vmatprep.subr.bf16.mxu0 %v14391_v44  ;;  %v981_v0 = vld [vmem:[#allocation6 + $0x5d0] sm:$0xff] }
 0x2b3   :  { %4468 = vmatprep.subr.bf16.mxu1 %v14393_v45  ;;  %v985_v44 = vld [vmem:[#allocation6 + $0x5f0] sm:$0xff]  ;;  %v982_v45 = vld [vmem:[#allocation6 + $0x5d8] sm:$0xff] }
 0x2b4   :  { %4286 = vmatmul.mubr.bf16.vlgmr.msra.gmra.mrb[12].mxu0 %v17169_v40  ;;  %v14447_v50 = vcombine.high %v981_v0, %v985_v44  ;;  %v14449_v52 = vcombine.high %v982_v45, %v986_v46 }
 0x2b5   :  { %4458 = vmatmul.mubr.bf16.vlgmr.msra.gmra.mrb[12].mxu1 %v17169_v40  ;;  %4297 = vmatpush1.bf16.msra.mxu0 %v14390_v49  ;;  %v14408_v40 = vcombine.low %v942_v58, %v946_v59  ;;  %v14440_v49 = vcombine.low %v974_v39, %v978_v5  ;;  %v14448_v58 = vcombine.low %v982_v45, %v986_v46 }
 0x2b6   :  { %4328 = vmatprep.mubr.bf16.mxu0 %v17179_v3  ;;  %4469 = vmatpush1.bf16.msra.mxu1 %v14392_v53  ;;  %v989_v53 = vld [vmem:[#allocation6 + $0x610] sm:$0xff] }
 0x2b7   :  { %4500 = vmatprep.mubr.bf16.mxu1 %v17179_v3  ;;  %4298 = vmatprep.subr.bf16.mxu0 %v14399_v54  ;;  %v14414_v3 = vcombine.low %v949_v2, %v953_v4  ;;  %v993_v54 = vld [vmem:[#allocation6 + $0x630] sm:$0xff]  ;;  %v1002_v2 = vld [vmem:[#allocation6 + $0x678] sm:$0xff] }
 0x2b8   :  { %4470 = vmatprep.subr.bf16.mxu1 %v14401_v57  ;;  %v14446_v57 = vcombine.low %v981_v0, %v985_v44  ;;  %v14455_v59 = vcombine.high %v989_v53, %v993_v54  ;;  %v14454_v4 = vcombine.low %v989_v53, %v993_v54  ;;  %v1034_v0 = vld [vmem:[#allocation6 + $0x778] sm:$0xff] }
 0x2b9   :  { %4299 = vmatpush1.bf16.msra.mxu0 %v14398_v60  ;;  %v14457_v60 = vcombine.high %v990_v55, %v994_v56  ;;  %v1042_v53 = vld [vmem:[#allocation6 + $0x7b8] sm:$0xff] }
 0x2ba   :  { %4471 = vmatpush1.bf16.msra.mxu1 %v14400_v61  ;;  %4300 = vmatprep.subr.bf16.mxu0 %v14407_v63  ;;  %v997_v61 = vld [vmem:[#allocation6 + $0x650] sm:$0xff] }
 0x2bb   :  { %4472 = vmatprep.subr.bf16.mxu1 %v14409_v1  ;;  %v1001_v63 = vld [vmem:[#allocation6 + $0x670] sm:$0xff]  ;;  %v998_v1 = vld [vmem:[#allocation6 + $0x658] sm:$0xff] }
 0x2bc   :  { %v14463_v8 = vcombine.high %v997_v61, %v1001_v63  ;;  %v14462_v18 = vcombine.low %v997_v61, %v1001_v63  ;;  %v14464_v22 = vcombine.low %v998_v1, %v1002_v2  ;;  %v1050_v61 = vld [vmem:[#allocation6 + $0x7f8] sm:$0xff] }
 0x2bd   :  { %4301 = vmatpush1.bf16.msra.mxu0 %v14406_v10  ;;  %v14465_v10 = vcombine.high %v998_v1, %v1002_v2 }
 0x2be   :  { %4473 = vmatpush1.bf16.msra.mxu1 %v14408_v40  ;;  %4302 = vmatprep.subr.bf16.mxu0 %v14415_v11  ;;  %v1005_v40 = vld [vmem:[#allocation6 + $0x690] sm:$0xff] }
 0x2bf   :  { %4474 = vmatprep.subr.bf16.mxu1 %v14417_v12  ;;  %v1009_v11 = vld [vmem:[#allocation6 + $0x6b0] sm:$0xff]  ;;  %v1006_v12 = vld [vmem:[#allocation6 + $0x698] sm:$0xff] }
 0x2c0   :  { %v14471_v23 = vcombine.high %v1005_v40, %v1009_v11  ;;  %v14470_v29 = vcombine.low %v1005_v40, %v1009_v11  ;;  %v14472_v13 = vcombine.low %v1006_v12, %v1010_v17  ;;  %v1058_v40 = vld [vmem:[#allocation6 + $0x838] sm:$0xff] }
 0x2c1   :  { %4303 = vmatpush1.bf16.msra.mxu0 %v14414_v3  ;;  %v14473_v3 = vcombine.high %v1006_v12, %v1010_v17 }
 0x2c2   :  { %4475 = vmatpush1.bf16.msra.mxu1 %v14416_v25  ;;  %4304 = vmatprep.subr.bf16.mxu0 %v14423_v26  ;;  %v1013_v25 = vld [vmem:[#allocation6 + $0x6d0] sm:$0xff] }
 0x2c3   :  { %4476 = vmatprep.subr.bf16.mxu1 %v14425_v27  ;;  %v1017_v26 = vld [vmem:[#allocation6 + $0x6f0] sm:$0xff]  ;;  %v1014_v27 = vld [vmem:[#allocation6 + $0x6d8] sm:$0xff] }
 0x2c4   :  { %v14479_v30 = vcombine.high %v1013_v25, %v1017_v26  ;;  %v14478_v38 = vcombine.low %v1013_v25, %v1017_v26  ;;  %v14480_v39 = vcombine.low %v1014_v27, %v1018_v28  ;;  %v1062_v25 = vld [vmem:[#allocation6 + $0x858] sm:$0xff] }
 0x2c5   :  { %4305 = vmatpush1.bf16.msra.mxu0 %v14422_v31  ;;  %v14481_v31 = vcombine.high %v1014_v27, %v1018_v28  ;;  %v1066_v26 = vld [vmem:[#allocation6 + $0x878] sm:$0xff] }
 0x2c6   :  { %4477 = vmatpush1.bf16.msra.mxu1 %v14424_v33  ;;  %4306 = vmatprep.subr.bf16.mxu0 %v14431_v34  ;;  %v1021_v33 = vld [vmem:[#allocation6 + $0x710] sm:$0xff] }
 0x2c7   :  { %4478 = vmatprep.subr.bf16.mxu1 %v14433_v35  ;;  %v1025_v34 = vld [vmem:[#allocation6 + $0x730] sm:$0xff]  ;;  %v1022_v35 = vld [vmem:[#allocation6 + $0x718] sm:$0xff] }
 0x2c8   :  { %v14487_v5 = vcombine.high %v1021_v33, %v1025_v34  ;;  %v14486_v44 = vcombine.low %v1021_v33, %v1025_v34  ;;  %v14488_v45 = vcombine.low %v1022_v35, %v1026_v37  ;;  %v1074_v33 = vld [vmem:[#allocation6 + $0x8b8] sm:$0xff] }
 0x2c9   :  { %4307 = vmatpush1.bf16.msra.mxu0 %v14430_v41  ;;  %v14489_v41 = vcombine.high %v1022_v35, %v1026_v37  ;;  %v14528_v35 = vcombine.low %v1062_v25, %v1066_v26 }
 0x2ca   :  { %4479 = vmatpush1.bf16.msra.mxu1 %v14432_v43  ;;  %4308 = vmatprep.subr.bf16.mxu0 %v14439_v15  ;;  %v1029_v43 = vld [vmem:[#allocation6 + $0x750] sm:$0xff] }
 0x2cb   :  { %4480 = vmatprep.subr.bf16.mxu1 %v14441_v42  ;;  %v1033_v15 = vld [vmem:[#allocation6 + $0x770] sm:$0xff]  ;;  %v1030_v42 = vld [vmem:[#allocation6 + $0x758] sm:$0xff] }
 0x2cc   :  { %v14495_v46 = vcombine.high %v1029_v43, %v1033_v15  ;;  %v14494_v54 = vcombine.low %v1029_v43, %v1033_v15  ;;  %v14496_v55 = vcombine.low %v1030_v42, %v1034_v0  ;;  %v1082_v43 = vld [vmem:[#allocation6 + $0x8f8] sm:$0xff] }
 0x2cd   :  { %4309 = vmatpush1.bf16.msra.mxu0 %v14438_v48  ;;  %v14497_v48 = vcombine.high %v1030_v42, %v1034_v0 }
 0x2ce   :  { %4481 = vmatpush1.bf16.msra.mxu1 %v14440_v49  ;;  %4310 = vmatprep.subr.bf16.mxu0 %v14447_v50  ;;  %v1037_v49 = vld [vmem:[#allocation6 + $0x790] sm:$0xff] }
 0x2cf   :  { %4482 = vmatprep.subr.bf16.mxu1 %v14449_v52  ;;  %v1041_v50 = vld [vmem:[#allocation6 + $0x7b0] sm:$0xff]  ;;  %v1038_v52 = vld [vmem:[#allocation6 + $0x798] sm:$0xff] }
 0x2d0   :  { %v14503_v56 = vcombine.high %v1037_v49, %v1041_v50  ;;  %v14502_v63 = vcombine.low %v1037_v49, %v1041_v50  ;;  %v14504_v1 = vcombine.low %v1038_v52, %v1042_v53 }
 0x2d1   :  { %4311 = vmatpush1.bf16.msra.mxu0 %v14446_v57  ;;  %v14505_v57 = vcombine.high %v1038_v52, %v1042_v53  ;;  %v1093_v53 = vld [vmem:[#allocation6 + $0x950] sm:$0xff] }
 0x2d2   :  { %4483 = vmatpush1.bf16.msra.mxu1 %v14448_v58  ;;  %4312 = vmatprep.subr.bf16.mxu0 %v14455_v59  ;;  %v1045_v58 = vld [vmem:[#allocation6 + $0x7d0] sm:$0xff] }
 0x2d3   :  { %4484 = vmatprep.subr.bf16.mxu1 %v14457_v60  ;;  %v1049_v59 = vld [vmem:[#allocation6 + $0x7f0] sm:$0xff]  ;;  %v1046_v60 = vld [vmem:[#allocation6 + $0x7d8] sm:$0xff] }
 0x2d4   :  { %v14511_v2 = vcombine.high %v1045_v58, %v1049_v59  ;;  %v14510_v11 = vcombine.low %v1045_v58, %v1049_v59  ;;  %v14512_v12 = vcombine.low %v1046_v60, %v1050_v61 }
 0x2d5   :  { %4313 = vmatpush1.bf16.msra.mxu0 %v14454_v4  ;;  %v14513_v4 = vcombine.high %v1046_v60, %v1050_v61  ;;  %v1101_v61 = vld [vmem:[#allocation6 + $0x990] sm:$0xff] }
 0x2d6   :  { %4485 = vmatpush1.bf16.msra.mxu1 %v14456_v6  ;;  %4314 = vmatprep.subr.bf16.mxu0 %v14463_v8  ;;  %v1053_v6 = vld [vmem:[#allocation6 + $0x810] sm:$0xff] }
 0x2d7   :  { %4486 = vmatprep.subr.bf16.mxu1 %v14465_v10  ;;  %v1057_v8 = vld [vmem:[#allocation6 + $0x830] sm:$0xff]  ;;  %v1054_v10 = vld [vmem:[#allocation6 + $0x818] sm:$0xff] }
 0x2d8   :  { %v14519_v17 = vcombine.high %v1053_v6, %v1057_v8  ;;  %v14520_v27 = vcombine.low %v1054_v10, %v1058_v40 }
 0x2d9   :  { %4315 = vmatpush1.bf16.msra.mxu0 %v14462_v18  ;;  %v14521_v18 = vcombine.high %v1054_v10, %v1058_v40  ;;  %v1109_v40 = vld [vmem:[#allocation6 + $0x9d0] sm:$0xff] }
 0x2da   :  { %4487 = vmatpush1.bf16.msra.mxu1 %v14464_v22  ;;  %4316 = vmatprep.subr.bf16.mxu0 %v14471_v23  ;;  %v1061_v22 = vld [vmem:[#allocation6 + $0x850] sm:$0xff] }
 0x2db   :  { %4488 = vmatprep.subr.bf16.mxu1 %v14473_v3  ;;  %v1065_v23 = vld [vmem:[#allocation6 + $0x870] sm:$0xff]  ;;  %v14518_v3 = vcombine.low %v1053_v6, %v1057_v8 }
 0x2dc   :  { %v14527_v28 = vcombine.high %v1061_v22, %v1065_v23  ;;  %v14526_v34 = vcombine.low %v1061_v22, %v1065_v23 }
 0x2dd   :  { %4317 = vmatpush1.bf16.msra.mxu0 %v14470_v29  ;;  %v1069_v29 = vld [vmem:[#allocation6 + $0x890] sm:$0xff] }
 0x2de   :  { %4489 = vmatpush1.bf16.msra.mxu1 %v14472_v13  ;;  %4318 = vmatprep.subr.bf16.mxu0 %v14479_v30  ;;  %v1073_v13 = vld [vmem:[#allocation6 + $0x8b0] sm:$0xff]  ;;  %v14529_v30 = vcombine.high %v1062_v25, %v1066_v26 }
 0x2df   :  { %4490 = vmatprep.subr.bf16.mxu1 %v14481_v31  ;;  %v1070_v31 = vld [vmem:[#allocation6 + $0x898] sm:$0xff]  ;;  %v14535_v37 = vcombine.high %v1069_v29, %v1073_v13  ;;  %v14534_v15 = vcombine.low %v1069_v29, %v1073_v13  ;;  %v1117_v25 = vld [vmem:[#allocation6 + $0xa10] sm:$0xff] }
 0x2e0   :  { %v1121_v26 = vld [vmem:[#allocation6 + $0xa30] sm:$0xff] }
 0x2e1   :  { %4319 = vmatpush1.bf16.msra.mxu0 %v14478_v38  ;;  %v14537_v38 = vcombine.high %v1070_v31, %v1074_v33 }
 0x2e2   :  { %4491 = vmatpush1.bf16.msra.mxu1 %v14480_v39  ;;  %4320 = vmatprep.subr.bf16.mxu0 %v14487_v5  ;;  %v1077_v39 = vld [vmem:[#allocation6 + $0x8d0] sm:$0xff] }
 0x2e3   :  { %4492 = vmatprep.subr.bf16.mxu1 %v14489_v41  ;;  %v1081_v5 = vld [vmem:[#allocation6 + $0x8f0] sm:$0xff]  ;;  %v1078_v41 = vld [vmem:[#allocation6 + $0x8d8] sm:$0xff] }
 0x2e4   :  { %v14543_v42 = vcombine.high %v1077_v39, %v1081_v5  ;;  %v14545_v0 = vcombine.high %v1078_v41, %v1082_v43  ;;  %v14544_v49 = vcombine.low %v1078_v41, %v1082_v43  ;;  %v1133_v43 = vld [vmem:[#allocation6 + $0xa90] sm:$0xff] }
 0x2e5   :  { %4321 = vmatpush1.bf16.msra.mxu0 %v14486_v44  ;;  %v1085_v44 = vld [vmem:[#allocation6 + $0x910] sm:$0xff] }
 0x2e6   :  { %4493 = vmatpush1.bf16.msra.mxu1 %v14488_v45  ;;  %4322 = vmatprep.subr.bf16.mxu0 %v14495_v46  ;;  %v1089_v45 = vld [vmem:[#allocation6 + $0x930] sm:$0xff]  ;;  %v1086_v46 = vld [vmem:[#allocation6 + $0x918] sm:$0xff] }
 0x2e7   :  { %4494 = vmatprep.subr.bf16.mxu1 %v14497_v48  ;;  %v1090_v48 = vld [vmem:[#allocation6 + $0x938] sm:$0xff]  ;;  %v14551_v50 = vcombine.high %v1085_v44, %v1089_v45 }
 0x2e8   :  { %v14553_v52 = vcombine.high %v1086_v46, %v1090_v48  ;;  %v14552_v58 = vcombine.low %v1086_v46, %v1090_v48  ;;  %v1141_v48 = vld [vmem:[#allocation6 + $0xad0] sm:$0xff] }
 0x2e9   :  { %4323 = vmatpush1.bf16.msra.mxu0 %v14494_v54  ;;  %v1097_v54 = vld [vmem:[#allocation6 + $0x970] sm:$0xff] }
 0x2ea   :  { %4495 = vmatpush1.bf16.msra.mxu1 %v14496_v55  ;;  %4324 = vmatprep.subr.bf16.mxu0 %v14503_v56  ;;  %v1094_v55 = vld [vmem:[#allocation6 + $0x958] sm:$0xff]  ;;  %v14559_v59 = vcombine.high %v1093_v53, %v1097_v54 }
 0x2eb   :  { %4496 = vmatprep.subr.bf16.mxu1 %v14505_v57  ;;  %v1098_v56 = vld [vmem:[#allocation6 + $0x978] sm:$0xff]  ;;  %v14550_v57 = vcombine.low %v1085_v44, %v1089_v45 }
 0x2ec   :  { %v14561_v60 = vcombine.high %v1094_v55, %v1098_v56  ;;  %v14560_v6 = vcombine.low %v1094_v55, %v1098_v56  ;;  %v1149_v56 = vld [vmem:[#allocation6 + $0xb10] sm:$0xff] }
 0x2ed   :  { %4325 = vmatpush1.bf16.msra.mxu0 %v14502_v63  ;;  %v1105_v63 = vld [vmem:[#allocation6 + $0x9b0] sm:$0xff] }
 0x2ee   :  { %4497 = vmatpush1.bf16.msra.mxu1 %v14504_v1  ;;  %4326 = vmatprep.subr.bf16.mxu0 %v14511_v2  ;;  %v1102_v1 = vld [vmem:[#allocation6 + $0x998] sm:$0xff]  ;;  %v14567_v8 = vcombine.high %v1101_v61, %v1105_v63 }
 0x2ef   :  { %4498 = vmatprep.subr.bf16.mxu1 %v14513_v4  ;;  %v1106_v2 = vld [vmem:[#allocation6 + $0x9b8] sm:$0xff]  ;;  %v14558_v4 = vcombine.low %v1093_v53, %v1097_v54 }
 0x2f0   :  { %v14569_v10 = vcombine.high %v1102_v1, %v1106_v2  ;;  %v14568_v22 = vcombine.low %v1102_v1, %v1106_v2  ;;  %v1157_v2 = vld [vmem:[#allocation6 + $0xb50] sm:$0xff] }
 0x2f1   :  { %4327 = vmatpush1.bf16.msra.mxu0 %v14510_v11  ;;  %v1113_v11 = vld [vmem:[#allocation6 + $0x9f0] sm:$0xff] }
 0x2f2   :  { %4499 = vmatpush1.bf16.msra.mxu1 %v14512_v12  ;;  %4339 = vmatprep.subr.bf16.mxu0 %v14519_v17  ;;  %v1110_v12 = vld [vmem:[#allocation6 + $0x9d8] sm:$0xff]  ;;  %v14575_v23 = vcombine.high %v1109_v40, %v1113_v11  ;;  %v14574_v29 = vcombine.low %v1109_v40, %v1113_v11 }
 0x2f3   :  { %4511 = vmatprep.subr.bf16.mxu1 %v14521_v18  ;;  %v1114_v17 = vld [vmem:[#allocation6 + $0x9f8] sm:$0xff]  ;;  %v14566_v18 = vcombine.low %v1101_v61, %v1105_v63 }
 0x2f4   :  { %4329 = vmatmul.mubr.bf16.vlgmr.msra.gmra.mrb[12].mxu0 %v17177_v62  ;;  %v14576_v13 = vcombine.low %v1110_v12, %v1114_v17 }
 0x2f5   :  { %4501 = vmatmul.mubr.bf16.vlgmr.msra.gmra.mrb[12].mxu1 %v17177_v62  ;;  %4340 = vmatpush1.bf16.msra.mxu0 %v14518_v3  ;;  %v14536_v62 = vcombine.low %v1070_v31, %v1074_v33  ;;  %v14577_v3 = vcombine.high %v1110_v12, %v1114_v17  ;;  %v1125_v33 = vld [vmem:[#allocation6 + $0xa50] sm:$0xff] }
 0x2f6   :  { %4371 = vmatprep.mubr.bf16.mxu0 %v17195_v24  ;;  %4512 = vmatpush1.bf16.msra.mxu1 %v14520_v27  ;;  %v1118_v27 = vld [vmem:[#allocation6 + $0xa18] sm:$0xff]  ;;  %v1165_v17 = vld [vmem:[#allocation6 + $0xb90] sm:$0xff] }
 0x2f7   :  { %4543 = vmatprep.mubr.bf16.mxu1 %v17195_v24  ;;  %4341 = vmatprep.subr.bf16.mxu0 %v14527_v28  ;;  %v14542_v24 = vcombine.low %v1077_v39, %v1081_v5  ;;  %v1122_v28 = vld [vmem:[#allocation6 + $0xa38] sm:$0xff] }
 0x2f8   :  { %4513 = vmatprep.subr.bf16.mxu1 %v14529_v30  ;;  %v14583_v30 = vcombine.high %v1117_v25, %v1121_v26  ;;  %v14585_v31 = vcombine.high %v1118_v27, %v1122_v28  ;;  %v14584_v39 = vcombine.low %v1118_v27, %v1122_v28  ;;  %v1173_v28 = vld [vmem:[#allocation6 + $0xbd0] sm:$0xff] }
 0x2f9   :  { %4342 = vmatpush1.bf16.msra.mxu0 %v14526_v34  ;;  %v1129_v34 = vld [vmem:[#allocation6 + $0xa70] sm:$0xff] }
 0x2fa   :  { %4514 = vmatpush1.bf16.msra.mxu1 %v14528_v35  ;;  %4343 = vmatprep.subr.bf16.mxu0 %v14535_v37  ;;  %v1126_v35 = vld [vmem:[#allocation6 + $0xa58] sm:$0xff]  ;;  %v14591_v5 = vcombine.high %v1125_v33, %v1129_v34 }
 0x2fb   :  { %4515 = vmatprep.subr.bf16.mxu1 %v14537_v38  ;;  %v1130_v37 = vld [vmem:[#allocation6 + $0xa78] sm:$0xff]  ;;  %v14582_v38 = vcombine.low %v1117_v25, %v1121_v26 }
 0x2fc   :  { %v14593_v41 = vcombine.high %v1126_v35, %v1130_v37  ;;  %v14592_v44 = vcombine.low %v1126_v35, %v1130_v37  ;;  %v1181_v37 = vld [vmem:[#allocation6 + $0xc10] sm:$0xff] }
 0x2fd   :  { %4344 = vmatpush1.bf16.msra.mxu0 %v14534_v15  ;;  %v1137_v15 = vld [vmem:[#allocation6 + $0xab0] sm:$0xff] }
 0x2fe   :  { %4516 = vmatpush1.bf16.msra.mxu1 %v14536_v62  ;;  %4345 = vmatprep.subr.bf16.mxu0 %v14543_v42  ;;  %v1134_v62 = vld [vmem:[#allocation6 + $0xa98] sm:$0xff]  ;;  %v14599_v45 = vcombine.high %v1133_v43, %v1137_v15 }
 0x2ff   :  { %4517 = vmatprep.subr.bf16.mxu1 %v14545_v0  ;;  %v1138_v42 = vld [vmem:[#allocation6 + $0xab8] sm:$0xff]  ;;  %v14590_v0 = vcombine.low %v1125_v33, %v1129_v34 }
 0x300   :  { %v14601_v46 = vcombine.high %v1134_v62, %v1138_v42  ;;  %v14600_v53 = vcombine.low %v1134_v62, %v1138_v42  ;;  %v1189_v42 = vld [vmem:[#allocation6 + $0xc50] sm:$0xff] }
 0x301   :  { %4346 = vmatpush1.bf16.msra.mxu0 %v14542_v24  ;;  %v1145_v24 = vld [vmem:[#allocation6 + $0xaf0] sm:$0xff] }
 0x302   :  { %4518 = vmatpush1.bf16.msra.mxu1 %v14544_v49  ;;  %4347 = vmatprep.subr.bf16.mxu0 %v14551_v50  ;;  %v1142_v49 = vld [vmem:[#allocation6 + $0xad8] sm:$0xff]  ;;  %v14607_v54 = vcombine.high %v1141_v48, %v1145_v24 }
 0x303   :  { %4519 = vmatprep.subr.bf16.mxu1 %v14553_v52  ;;  %v1146_v50 = vld [vmem:[#allocation6 + $0xaf8] sm:$0xff]  ;;  %v14598_v52 = vcombine.low %v1133_v43, %v1137_v15 }
 0x304   :  { %v14609_v55 = vcombine.high %v1142_v49, %v1146_v50  ;;  %v14608_v61 = vcombine.low %v1142_v49, %v1146_v50  ;;  %v1197_v49 = vld [vmem:[#allocation6 + $0xc90] sm:$0xff] }
 0x305   :  { %4348 = vmatpush1.bf16.msra.mxu0 %v14550_v57  ;;  %v1153_v57 = vld [vmem:[#allocation6 + $0xb30] sm:$0xff] }
 0x306   :  { %4520 = vmatpush1.bf16.msra.mxu1 %v14552_v58  ;;  %4349 = vmatprep.subr.bf16.mxu0 %v14559_v59  ;;  %v1150_v58 = vld [vmem:[#allocation6 + $0xb18] sm:$0xff]  ;;  %v14615_v63 = vcombine.high %v1149_v56, %v1153_v57  ;;  %v1201_v50 = vld [vmem:[#allocation6 + $0xcb0] sm:$0xff] }
 0x307   :  { %4521 = vmatprep.subr.bf16.mxu1 %v14561_v60  ;;  %v1154_v59 = vld [vmem:[#allocation6 + $0xb38] sm:$0xff]  ;;  %v14606_v60 = vcombine.low %v1141_v48, %v1145_v24 }
 0x308   :  { %v14617_v1 = vcombine.high %v1150_v58, %v1154_v59  ;;  %v14616_v40 = vcombine.low %v1150_v58, %v1154_v59  ;;  %v1205_v59 = vld [vmem:[#allocation6 + $0xcd0] sm:$0xff] }
 0x309   :  { %4350 = vmatpush1.bf16.msra.mxu0 %v14558_v4  ;;  %v1161_v4 = vld [vmem:[#allocation6 + $0xb70] sm:$0xff] }
 0x30a   :  { %4522 = vmatpush1.bf16.msra.mxu1 %v14560_v6  ;;  %4351 = vmatprep.subr.bf16.mxu0 %v14567_v8  ;;  %v1158_v6 = vld [vmem:[#allocation6 + $0xb58] sm:$0xff]  ;;  %v14623_v11 = vcombine.high %v1157_v2, %v1161_v4 }
 0x30b   :  { %4523 = vmatprep.subr.bf16.mxu1 %v14569_v10  ;;  %v1162_v8 = vld [vmem:[#allocation6 + $0xb78] sm:$0xff]  ;;  %v14614_v10 = vcombine.low %v1149_v56, %v1153_v57  ;;  %v14663_v57 = vcombine.high %v1197_v49, %v1201_v50 }
 0x30c   :  { %v14625_v12 = vcombine.high %v1158_v6, %v1162_v8  ;;  %v14624_v25 = vcombine.low %v1158_v6, %v1162_v8  ;;  %v1213_v6 = vld [vmem:[#allocation6 + $0xd10] sm:$0xff] }
 0x30d   :  { %4352 = vmatpush1.bf16.msra.mxu0 %v14566_v18  ;;  %v1169_v18 = vld [vmem:[#allocation6 + $0xbb0] sm:$0xff] }
 0x30e   :  { %4524 = vmatpush1.bf16.msra.mxu1 %v14568_v22  ;;  %4353 = vmatprep.subr.bf16.mxu0 %v14575_v23  ;;  %v1166_v22 = vld [vmem:[#allocation6 + $0xb98] sm:$0xff]  ;;  %v14631_v26 = vcombine.high %v1165_v17, %v1169_v18  ;;  %v1217_v8 = vld [vmem:[#allocation6 + $0xd30] sm:$0xff] }
 0x30f   :  { %4525 = vmatprep.subr.bf16.mxu1 %v14577_v3  ;;  %v1170_v23 = vld [vmem:[#allocation6 + $0xbb8] sm:$0xff]  ;;  %v14622_v3 = vcombine.low %v1157_v2, %v1161_v4 }
 0x310   :  { %v14633_v27 = vcombine.high %v1166_v22, %v1170_v23  ;;  %v14632_v33 = vcombine.low %v1166_v22, %v1170_v23  ;;  %v1225_v22 = vld [vmem:[#allocation6 + $0xd70] sm:$0xff]  ;;  %v1222_v23 = vld [vmem:[#allocation6 + $0xd58] sm:$0xff] }
 0x311   :  { %4354 = vmatpush1.bf16.msra.mxu0 %v14574_v29  ;;  %v1177_v29 = vld [vmem:[#allocation6 + $0xbf0] sm:$0xff] }
 0x312   :  { %4526 = vmatpush1.bf16.msra.mxu1 %v14576_v13  ;;  %4355 = vmatprep.subr.bf16.mxu0 %v14583_v30  ;;  %v1174_v13 = vld [vmem:[#allocation6 + $0xbd8] sm:$0xff]  ;;  %v14639_v34 = vcombine.high %v1173_v28, %v1177_v29 }
 0x313   :  { %4527 = vmatprep.subr.bf16.mxu1 %v14585_v31  ;;  %v1178_v30 = vld [vmem:[#allocation6 + $0xbf8] sm:$0xff]  ;;  %v14630_v31 = vcombine.low %v1165_v17, %v1169_v18  ;;  %v1221_v18 = vld [vmem:[#allocation6 + $0xd50] sm:$0xff] }
 0x314   :  { %v14641_v35 = vcombine.high %v1174_v13, %v1178_v30  ;;  %v14640_v43 = vcombine.low %v1174_v13, %v1178_v30  ;;  %v1229_v13 = vld [vmem:[#allocation6 + $0xd90] sm:$0xff] }
 0x315   :  { %4356 = vmatpush1.bf16.msra.mxu0 %v14582_v38  ;;  %v1185_v38 = vld [vmem:[#allocation6 + $0xc30] sm:$0xff] }
 0x316   :  { %4528 = vmatpush1.bf16.msra.mxu1 %v14584_v39  ;;  %4357 = vmatprep.subr.bf16.mxu0 %v14591_v5  ;;  %v1182_v39 = vld [vmem:[#allocation6 + $0xc18] sm:$0xff]  ;;  %v14647_v15 = vcombine.high %v1181_v37, %v1185_v38  ;;  %v1233_v30 = vld [vmem:[#allocation6 + $0xdb0] sm:$0xff] }
 0x317   :  { %4529 = vmatprep.subr.bf16.mxu1 %v14593_v41  ;;  %v1186_v5 = vld [vmem:[#allocation6 + $0xc38] sm:$0xff]  ;;  %v14638_v41 = vcombine.low %v1173_v28, %v1177_v29  ;;  %v14687_v28 = vcombine.high %v1221_v18, %v1225_v22 }
 0x318   :  { %v14649_v62 = vcombine.high %v1182_v39, %v1186_v5  ;;  %v14648_v48 = vcombine.low %v1182_v39, %v1186_v5  ;;  %v14686_v39 = vcombine.low %v1221_v18, %v1225_v22 }
 0x319   :  { %4358 = vmatpush1.bf16.msra.mxu0 %v14590_v0  ;;  %v1193_v0 = vld [vmem:[#allocation6 + $0xc70] sm:$0xff] }
 0x31a   :  { %4530 = vmatpush1.bf16.msra.mxu1 %v14592_v44  ;;  %4359 = vmatprep.subr.bf16.mxu0 %v14599_v45  ;;  %v14646_v44 = vcombine.low %v1181_v37, %v1185_v38  ;;  %v1190_v45 = vld [vmem:[#allocation6 + $0xc58] sm:$0xff]  ;;  %v14655_v24 = vcombine.high %v1189_v42, %v1193_v0 }
 0x31b   :  { %4531 = vmatprep.subr.bf16.mxu1 %v14601_v46  ;;  %v1194_v46 = vld [vmem:[#allocation6 + $0xc78] sm:$0xff] }
 0x31c   :  { %v14656_v56 = vcombine.low %v1190_v45, %v1194_v46 }
 0x31d   :  { %4360 = vmatpush1.bf16.msra.mxu0 %v14598_v52  ;;  %v14657_v52 = vcombine.high %v1190_v45, %v1194_v46 }
 0x31e   :  { %4532 = vmatpush1.bf16.msra.mxu1 %v14600_v53  ;;  %4361 = vmatprep.subr.bf16.mxu0 %v14607_v54  ;;  %v1198_v53 = vld [vmem:[#allocation6 + $0xc98] sm:$0xff] }
 0x31f   :  { %4533 = vmatprep.subr.bf16.mxu1 %v14609_v55  ;;  %v1202_v54 = vld [vmem:[#allocation6 + $0xcb8] sm:$0xff]  ;;  %v14654_v55 = vcombine.low %v1189_v42, %v1193_v0 }
 0x320   :  { %v14665_v58 = vcombine.high %v1198_v53, %v1202_v54 }
 0x321   :  { %4362 = vmatpush1.bf16.msra.mxu0 %v14606_v60  ;;  %v1209_v60 = vld [vmem:[#allocation6 + $0xcf0] sm:$0xff] }
 0x322   :  { %4534 = vmatpush1.bf16.msra.mxu1 %v14608_v61  ;;  %4363 = vmatprep.subr.bf16.mxu0 %v14615_v63  ;;  %v1206_v61 = vld [vmem:[#allocation6 + $0xcd8] sm:$0xff]  ;;  %v14671_v2 = vcombine.high %v1205_v59, %v1209_v60 }
 0x323   :  { %4535 = vmatprep.subr.bf16.mxu1 %v14617_v1  ;;  %v1210_v63 = vld [vmem:[#allocation6 + $0xcf8] sm:$0xff]  ;;  %v14662_v1 = vcombine.low %v1197_v49, %v1201_v50 }
 0x324   :  { %v14673_v4 = vcombine.high %v1206_v61, %v1210_v63  ;;  %v1238_v49 = vld [vmem:[#allocation6 + $0xdd8] sm:$0xff] }
 0x325   :  { %4364 = vmatpush1.bf16.msra.mxu0 %v14614_v10  ;;  %v1214_v10 = vld [vmem:[#allocation6 + $0xd18] sm:$0xff] }
 0x326   :  { %4536 = vmatpush1.bf16.msra.mxu1 %v14616_v40  ;;  %4365 = vmatprep.subr.bf16.mxu0 %v14623_v11  ;;  %v1218_v40 = vld [vmem:[#allocation6 + $0xd38] sm:$0xff]  ;;  %v14672_v11 = vcombine.low %v1206_v61, %v1210_v63 }
 0x327   :  { %4537 = vmatprep.subr.bf16.mxu1 %v14625_v12  ;;  %v14679_v12 = vcombine.high %v1213_v6, %v1217_v8  ;;  %v14681_v17 = vcombine.high %v1214_v10, %v1218_v40  ;;  %v1242_v50 = vld [vmem:[#allocation6 + $0xdf8] sm:$0xff] }
 0x329   :  { %4366 = vmatpush1.bf16.msra.mxu0 %v14622_v3  ;;  %v1226_v3 = vld [vmem:[#allocation6 + $0xd78] sm:$0xff] }
 0x32a   :  { %4538 = vmatpush1.bf16.msra.mxu1 %v14624_v25  ;;  %4367 = vmatprep.subr.bf16.mxu0 %v14631_v26  ;;  %v14678_v25 = vcombine.low %v1213_v6, %v1217_v8  ;;  %v1307_v26 = vld [vmem:[#allocation7] sm:$0xff]  ;;  %v14689_v29 = vcombine.high %v1222_v23, %v1226_v3  ;;  %v14688_v5 = vcombine.low %v1222_v23, %v1226_v3  ;;  %v1245_v6 = vld [vmem:[#allocation6 + $0xe10] sm:$0xff] }
 0x32b   :  { %4539 = vmatprep.subr.bf16.mxu1 %v14633_v27  ;;  %v14680_v27 = vcombine.low %v1214_v10, %v1218_v40  ;;  %v1316_v37 = vrot.slane %v1307_v26, %v17153_v16  ;;  %v1324_v38 = vrot.slane %v1307_v26, %v17163_v21  ;;  %v1249_v8 = vld [vmem:[#allocation6 + $0xe30] sm:$0xff] }
 0x32d   :  { %4368 = vmatpush1.bf16.msra.mxu0 %v14630_v31  ;;  %v1312_v31 = vrot.slane %v1307_v26, %v17148_v14 }
 0x32e   :  { %4540 = vmatpush1.bf16.msra.mxu1 %v14632_v33  ;;  %4369 = vmatprep.subr.bf16.mxu0 %v14639_v34  ;;  %v1320_v33 = vrot.slane %v1307_v26, %v17160_v19  ;;  %v1230_v34 = vld [vmem:[#allocation6 + $0xd98] sm:$0xff] }
 0x32f   :  { %4541 = vmatprep.subr.bf16.mxu1 %v14641_v35  ;;  %v1234_v35 = vld [vmem:[#allocation6 + $0xdb8] sm:$0xff] }
 0x330   :  { %v14697_v0 = vcombine.high %v1230_v34, %v1234_v35 }
 0x331   :  { %4370 = vmatpush1.bf16.msra.mxu0 %v14638_v41  ;;  %v14695_v41 = vcombine.high %v1229_v13, %v1233_v30 }
 0x332   :  { %4542 = vmatpush1.bf16.msra.mxu1 %v14640_v43  ;;  %4382 = vmatprep.subr.bf16.mxu0 %v14647_v15  ;;  %v1237_v43 = vld [vmem:[#allocation6 + $0xdd0] sm:$0xff] }
 0x333   :  { %4554 = vmatprep.subr.bf16.mxu1 %v14649_v62  ;;  %v1241_v15 = vld [vmem:[#allocation6 + $0xdf0] sm:$0xff] }
 0x334   :  { %4372 = vmatmul.mubr.bf16.vlgmr.msra.gmra.mrb[12].mxu0 %v17193_v20  ;;  %v14703_v63 = vcombine.high %v1237_v43, %v1241_v15 }
 0x335   :  { %4544 = vmatmul.mubr.bf16.vlgmr.msra.gmra.mrb[12].mxu1 %v17193_v20  ;;  %4383 = vmatpush1.bf16.msra.mxu0 %v14646_v44  ;;  %v14664_v20 = vcombine.low %v1198_v53, %v1202_v54 }
 0x336   :  { %4414 = vmatprep.mubr.bf16.mxu0 %v17209_v51  ;;  %4555 = vmatpush1.bf16.msra.mxu1 %v14648_v48 }
 0x337   :  { %4586 = vmatprep.mubr.bf16.mxu1 %v17209_v51  ;;  %4384 = vmatprep.subr.bf16.mxu0 %v14655_v24  ;;  %v14670_v51 = vcombine.low %v1205_v59, %v1209_v60  ;;  %v14694_v24 = vcombine.low %v1229_v13, %v1233_v30  ;;  %v1253_v30 = vld [vmem:[#allocation6 + $0xe50] sm:$0xff] }
 0x338   :  { %4556 = vmatprep.subr.bf16.mxu1 %v14657_v52 }
 0x339   :  { %4385 = vmatpush1.bf16.msra.mxu0 %v14654_v55 }
 0x33a   :  { %4557 = vmatpush1.bf16.msra.mxu1 %v14656_v56  ;;  %4386 = vmatprep.subr.bf16.mxu0 %v14663_v57  ;;  %v14696_v56 = vcombine.low %v1230_v34, %v1234_v35  ;;  %v14702_v57 = vcombine.low %v1237_v43, %v1241_v15  ;;  %v1258_v34 = vld [vmem:[#allocation6 + $0xe78] sm:$0xff]  ;;  %v14710_v35 = vcombine.low %v1245_v6, %v1249_v8 }
 0x33b   :  { %4558 = vmatprep.subr.bf16.mxu1 %v14665_v58  ;;  %v1262_v43 = vld [vmem:[#allocation6 + $0xe98] sm:$0xff] }
 0x33c   :  { %v1266_v15 = vld [vmem:[#allocation6 + $0xeb8] sm:$0xff] }
 0x33d   :  { %4387 = vmatpush1.bf16.msra.mxu0 %v14662_v1 }
 0x33e   :  { %4559 = vmatpush1.bf16.msra.mxu1 %v14664_v20  ;;  %4388 = vmatprep.subr.bf16.mxu0 %v14671_v2  ;;  %v14704_v2 = vcombine.low %v1238_v49, %v1242_v50 }
 0x33f   :  { %4560 = vmatprep.subr.bf16.mxu1 %v14673_v4  ;;  %v14705_v4 = vcombine.high %v1238_v49, %v1242_v50  ;;  %v14728_v50 = vcombine.low %v1262_v43, %v1266_v15 }
 0x341   :  { %4389 = vmatpush1.bf16.msra.mxu0 %v14670_v51 }
 0x342   :  { %4561 = vmatpush1.bf16.msra.mxu1 %v14672_v11  ;;  %4390 = vmatprep.subr.bf16.mxu0 %v14679_v12  ;;  %v1246_v12 = vld [vmem:[#allocation6 + $0xe18] sm:$0xff] }
 0x343   :  { %4562 = vmatprep.subr.bf16.mxu1 %v14681_v17  ;;  %v1250_v17 = vld [vmem:[#allocation6 + $0xe38] sm:$0xff] }
 0x344   :  { %v14713_v13 = vcombine.high %v1246_v12, %v1250_v17 }
 0x345   :  { %4391 = vmatpush1.bf16.msra.mxu0 %v14678_v25 }
 0x346   :  { %4563 = vmatpush1.bf16.msra.mxu1 %v14680_v27  ;;  %4392 = vmatprep.subr.bf16.mxu0 %v14687_v28  ;;  %v14711_v27 = vcombine.high %v1245_v6, %v1249_v8 }
 0x347   :  { %v4072_v62 = vpop.f32.mrb[8].mxu0  ;;  %v4244_v42 = vpop.f32.mrb[8].mxu1  ;;  %4564 = vmatprep.subr.bf16.mxu1 %v14689_v29 }
 0x348   :  { %v16050_v44 = vadd.f32 %v4072_v62, %v1312_v31  ;;  %v16054_v45 = vadd.f32 %v4244_v42, %v1320_v33  ;;  %v4074_v46 = vpop.f32.mrb[9].mxu0  ;;  %v4246_v48 = vpop.f32.mrb[9].mxu1 }
 0x349   :  { %v16051_v52 = vadd.f32 %v4074_v46, %v1316_v37  ;;  %v16055_v53 = vadd.f32 %v4246_v48, %v1324_v38  ;;  %v4076_v54 = vpop.f32.mrb[10].mxu0  ;;  %v4248_v55 = vpop.f32.mrb[10].mxu1  ;;  %4393 = vmatpush1.bf16.msra.mxu0 %v14686_v39  ;;  %v1273_v46 = vld [vmem:[#allocation6 + $0xef0] sm:$0xff]  ;;  %v1270_v48 = vld [vmem:[#allocation6 + $0xed8] sm:$0xff] }
 0x34a   :  { %v16052_v58 = vadd.f32 %v4076_v54, %v1312_v31  ;;  %v16056_v59 = vadd.f32 %v4248_v55, %v1320_v33  ;;  %4565 = vmatpush1.bf16.msra.mxu1 %v14688_v5  ;;  %v4078_v60 = vpop.f32.mrb[11].mxu0  ;;  %v4250_v61 = vpop.f32.mrb[11].mxu1  ;;  %4394 = vmatprep.subr.bf16.mxu0 %v14695_v41  ;;  %v4597_v10 = vmax.f32 %v16050_v44, 0.0  ;;  %v4599_v40 = vmax.f32 %v16054_v45, 0.0  ;;  %v1257_v31 = vld [vmem:[#allocation6 + $0xe70] sm:$0xff]  ;;  %v1254_v33 = vld [vmem:[#allocation6 + $0xe58] sm:$0xff] }
 0x34b   :  { %v16053_v1 = vadd.f32 %v4078_v60, %v1316_v37  ;;  %v16057_v20 = vadd.f32 %v4250_v61, %v1324_v38  ;;  %4566 = vmatprep.subr.bf16.mxu1 %v14697_v0  ;;  %v4598_v18 = vmax.f32 %v16051_v52, 0.0  ;;  %v4600_v22 = vmax.f32 %v16055_v53, 0.0  ;;  %v1261_v5 = vld [vmem:[#allocation6 + $0xe90] sm:$0xff] }
 0x34c   :  { %v4605_v51 = vmax.f32 %v16052_v58, 0.0  ;;  %v4607_v11 = vmax.f32 %v16056_v59, 0.0  ;;  %v14712_v37 = vcombine.low %v1246_v12, %v1250_v17  ;;  %v14719_v38 = vcombine.high %v1253_v30, %v1257_v31  ;;  %v1265_v41 = vld [vmem:[#allocation6 + $0xeb0] sm:$0xff]  ;;  %v1298_v12 = vld [vmem:[#allocation6 + $0xfb8] sm:$0xff] }
 0x34d   :  { %v4606_v23 = vmax.f32 %v16053_v1, 0.0  ;;  %v4608_v3 = vmax.f32 %v16057_v20, 0.0  ;;  %4395 = vmatpush1.bf16.msra.mxu0 %v14694_v24  ;;  %v14721_v39 = vcombine.high %v1254_v33, %v1258_v34  ;;  %v14718_v62 = vcombine.low %v1253_v30, %v1257_v31  ;;  %v1269_v45 = vld [vmem:[#allocation6 + $0xed0] sm:$0xff]  ;;  %v1274_v24 = vld [vmem:[#allocation6 + $0xef8] sm:$0xff] }
 0x34e   :  { %v17239_v25 = vpack.c.bf16 %v4605_v51, %v4597_v10  ;;  %v17241_v26 = vpack.c.bf16 %v4607_v11, %v4599_v40  ;;  %4567 = vmatpush1.bf16.msra.mxu1 %v14696_v56  ;;  %4396 = vmatprep.subr.bf16.mxu0 %v14703_v63  ;;  %v14720_v42 = vcombine.low %v1254_v33, %v1258_v34  ;;  %v1277_v54 = vld [vmem:[#allocation6 + $0xf10] sm:$0xff]  ;;  %v1278_v56 = vld [vmem:[#allocation6 + $0xf18] sm:$0xff] }
 0x34f   :  { %v17243_v28 = vpack.c.bf16 %v4606_v23, %v4598_v18  ;;  %v17245_v29 = vpack.c.bf16 %v4608_v3, %v4600_v22  ;;  %4568 = vmatprep.subr.bf16.mxu1 %v14705_v4  ;;  %v14727_v0 = vcombine.high %v1261_v5, %v1265_v41  ;;  %v14729_v44 = vcombine.high %v1262_v43, %v1266_v15  ;;  %v1281_v55 = vld [vmem:[#allocation6 + $0xf30] sm:$0xff]  ;;  %v1286_v20 = vld [vmem:[#allocation6 + $0xf58] sm:$0xff] }
 0x350   :  { %v14726_v49 = vcombine.low %v1261_v5, %v1265_v41  ;;  %v14735_v52 = vcombine.high %v1269_v45, %v1273_v46  ;;  %v14737_v53 = vcombine.high %v1270_v48, %v1274_v24  ;;  %v14734_v58 = vcombine.low %v1269_v45, %v1273_v46  ;;  %v1285_v63 = vld [vmem:[#allocation6 + $0xf50] sm:$0xff]  ;;  %v1294_v11 = vld [vmem:[#allocation6 + $0xf98] sm:$0xff] }
 0x351   :  { %4397 = vmatpush1.bf16.msra.mxu0 %v14702_v57  ;;  %v1282_v57 = vld [vmem:[#allocation6 + $0xf38] sm:$0xff]  ;;  %v14736_v59 = vcombine.low %v1270_v48, %v1274_v24  ;;  %v14743_v60 = vcombine.high %v1277_v54, %v1281_v55  ;;  %v1289_v1 = vld [vmem:[#allocation6 + $0xf70] sm:$0xff]  ;;  %v14742_v4 = vcombine.low %v1277_v54, %v1281_v55  ;;  %v14761_v23 = vcombine.high %v1294_v11, %v1298_v12 }
 0x352   :  { %4569 = vmatpush1.bf16.msra.mxu1 %v14704_v2  ;;  %4398 = vmatprep.subr.bf16.mxu0 %v14711_v27  ;;  %v14745_v61 = vcombine.high %v1278_v56, %v1282_v57  ;;  %v1290_v2 = vld [vmem:[#allocation6 + $0xf78] sm:$0xff]  ;;  %v14744_v6 = vcombine.low %v1278_v56, %v1282_v57  ;;  %v14751_v8 = vcombine.high %v1285_v63, %v1289_v1  ;;  %v1293_v40 = vld [vmem:[#allocation6 + $0xf90] sm:$0xff] }
 0x353   :  { %4570 = vmatprep.subr.bf16.mxu1 %v14713_v13  ;;  %v14753_v10 = vcombine.high %v1286_v20, %v1290_v2  ;;  %v1297_v51 = vld [vmem:[#allocation6 + $0xfb0] sm:$0xff]  ;;  %v14750_v17 = vcombine.low %v1285_v63, %v1289_v1  ;;  %v14752_v18 = vcombine.low %v1286_v20, %v1290_v2  ;;  %v1302_v13 = vld [vmem:[#allocation6 + $0xfd8] sm:$0xff]  ;;  %v14760_v33 = vcombine.low %v1294_v11, %v1298_v12 }
 0x354   :  { %v14759_v22 = vcombine.high %v1293_v40, %v1297_v51  ;;  %v1301_v3 = vld [vmem:[#allocation6 + $0xfd0] sm:$0xff]  ;;  %v1306_v30 = vld [vmem:[#allocation6 + $0xff8] sm:$0xff]  ;;  %v14758_v31 = vcombine.low %v1293_v40, %v1297_v51 }
 0x355   :  { %4399 = vmatpush1.bf16.msra.mxu0 %v14710_v35  ;;  %v1305_v27 = vld [vmem:[#allocation6 + $0xff0] sm:$0xff]  ;;  %v14769_v35 = vcombine.high %v1302_v13, %v1306_v30  ;;  %v14768_v43 = vcombine.low %v1302_v13, %v1306_v30 }
 0x356   :  { %4571 = vmatpush1.bf16.msra.mxu1 %v14712_v37  ;;  %4400 = vmatprep.subr.bf16.mxu0 %v14719_v38  ;;  %v14767_v34 = vcombine.high %v1301_v3, %v1305_v27  ;;  %v4621_v37 = vld [vmem:[#allocation9] sm:$0xff]  ;;  %v4626_v5 = vld [vmem:[#allocation9 + $0x28] sm:$0xff]  ;;  %v14766_v41 = vcombine.low %v1301_v3, %v1305_v27 }
 0x357   :  { %4572 = vmatprep.subr.bf16.mxu1 %v14721_v39  ;;  %v4625_v38 = vld [vmem:[#allocation9 + $0x20] sm:$0xff]  ;;  %v4622_v39 = vld [vmem:[#allocation9 + $0x8] sm:$0xff] }
 0x358   :  { %v14771_v15 = vcombine.high %v4621_v37, %v4625_v38  ;;  %v4630_v45 = vld [vmem:[#allocation9 + $0x48] sm:$0xff]  ;;  %v14772_v48 = vcombine.low %v4622_v39, %v4626_v5 }
 0x359   :  { %4401 = vmatpush1.bf16.msra.mxu0 %v14718_v62  ;;  %v14773_v62 = vcombine.high %v4622_v39, %v4626_v5  ;;  %v4634_v46 = vld [vmem:[#allocation9 + $0x68] sm:$0xff] }
 0x35a   :  { %4573 = vmatpush1.bf16.msra.mxu1 %v14720_v42  ;;  %4402 = vmatprep.subr.bf16.mxu0 %v14727_v0  ;;  %v4629_v42 = vld [vmem:[#allocation9 + $0x40] sm:$0xff]  ;;  %v4642_v54 = vld [vmem:[#allocation9 + $0xa8] sm:$0xff]  ;;  %v14780_v56 = vcombine.low %v4630_v45, %v4634_v46 }
 0x35b   :  { %4574 = vmatprep.subr.bf16.mxu1 %v14729_v44  ;;  %v4633_v0 = vld [vmem:[#allocation9 + $0x60] sm:$0xff]  ;;  %v14770_v44 = vcombine.low %v4621_v37, %v4625_v38  ;;  %v4650_v63 = vld [vmem:[#allocation9 + $0xe8] sm:$0xff] }
 0x35c   :  { %v14779_v24 = vcombine.high %v4629_v42, %v4633_v0  ;;  %v14778_v55 = vcombine.low %v4629_v42, %v4633_v0 }
 0x35d   :  { %4403 = vmatpush1.bf16.msra.mxu0 %v14726_v49  ;;  %v4637_v49 = vld [vmem:[#allocation9 + $0x80] sm:$0xff] }
 0x35e   :  { %4575 = vmatpush1.bf16.msra.mxu1 %v14728_v50  ;;  %4404 = vmatprep.subr.bf16.mxu0 %v14735_v52  ;;  %v4641_v50 = vld [vmem:[#allocation9 + $0xa0] sm:$0xff]  ;;  %v14781_v52 = vcombine.high %v4630_v45, %v4634_v46 }
 0x35f   :  { %4576 = vmatprep.subr.bf16.mxu1 %v14737_v53  ;;  %v4638_v53 = vld [vmem:[#allocation9 + $0x88] sm:$0xff]  ;;  %v14787_v57 = vcombine.high %v4637_v49, %v4641_v50  ;;  %v14786_v1 = vcombine.low %v4637_v49, %v4641_v50  ;;  %v4685_v46 = vld [vmem:[#allocation9 + $0x200] sm:$0xff] }
 0x360   :  { %v4690_v49 = vld [vmem:[#allocation9 + $0x228] sm:$0xff] }
 0x361   :  { %4405 = vmatpush1.bf16.msra.mxu0 %v14734_v58  ;;  %v14789_v58 = vcombine.high %v4638_v53, %v4642_v54 }
 0x362   :  { %4577 = vmatpush1.bf16.msra.mxu1 %v14736_v59  ;;  %4406 = vmatprep.subr.bf16.mxu0 %v14743_v60  ;;  %v4645_v59 = vld [vmem:[#allocation9 + $0xc0] sm:$0xff] }
 0x363   :  { %4578 = vmatprep.subr.bf16.mxu1 %v14745_v61  ;;  %v4649_v60 = vld [vmem:[#allocation9 + $0xe0] sm:$0xff]  ;;  %v4646_v61 = vld [vmem:[#allocation9 + $0xc8] sm:$0xff] }
 0x364   :  { %v14795_v20 = vcombine.high %v4645_v59, %v4649_v60  ;;  %v14797_v2 = vcombine.high %v4646_v61, %v4650_v63  ;;  %v14794_v40 = vcombine.low %v4645_v59, %v4649_v60  ;;  %v14796_v51 = vcombine.low %v4646_v61, %v4650_v63 }
 0x365   :  { %4407 = vmatpush1.bf16.msra.mxu0 %v14742_v4  ;;  %v4653_v4 = vld [vmem:[#allocation9 + $0x100] sm:$0xff] }
 0x366   :  { %4579 = vmatpush1.bf16.msra.mxu1 %v14744_v6  ;;  %4408 = vmatprep.subr.bf16.mxu0 %v14751_v8  ;;  %v4657_v6 = vld [vmem:[#allocation9 + $0x120] sm:$0xff]  ;;  %v4654_v8 = vld [vmem:[#allocation9 + $0x108] sm:$0xff] }
 0x367   :  { %4580 = vmatprep.subr.bf16.mxu1 %v14753_v10  ;;  %v4658_v10 = vld [vmem:[#allocation9 + $0x128] sm:$0xff]  ;;  %v14803_v11 = vcombine.high %v4653_v4, %v4657_v6  ;;  %v14802_v3 = vcombine.low %v4653_v4, %v4657_v6 }
 0x368   :  { %v14805_v12 = vcombine.high %v4654_v8, %v4658_v10  ;;  %v14804_v27 = vcombine.low %v4654_v8, %v4658_v10 }
 0x369   :  { %4409 = vmatpush1.bf16.msra.mxu0 %v14750_v17  ;;  %v4661_v17 = vld [vmem:[#allocation9 + $0x140] sm:$0xff] }
 0x36a   :  { %4581 = vmatpush1.bf16.msra.mxu1 %v14752_v18  ;;  %4410 = vmatprep.subr.bf16.mxu0 %v14759_v22  ;;  %v4665_v18 = vld [vmem:[#allocation9 + $0x160] sm:$0xff]  ;;  %v4662_v22 = vld [vmem:[#allocation9 + $0x148] sm:$0xff] }
 0x36b   :  { %4582 = vmatprep.subr.bf16.mxu1 %v14761_v23  ;;  %v4666_v23 = vld [vmem:[#allocation9 + $0x168] sm:$0xff]  ;;  %v14811_v13 = vcombine.high %v4661_v17, %v4665_v18  ;;  %v14810_v37 = vcombine.low %v4661_v17, %v4665_v18 }
 0x36c   :  { %v14813_v30 = vcombine.high %v4662_v22, %v4666_v23  ;;  %v14812_v38 = vcombine.low %v4662_v22, %v4666_v23 }
 0x36d   :  { %4411 = vmatpush1.bf16.msra.mxu0 %v14758_v31  ;;  %v4669_v31 = vld [vmem:[#allocation9 + $0x180] sm:$0xff] }
 0x36e   :  { %4583 = vmatpush1.bf16.msra.mxu1 %v14760_v33  ;;  %4412 = vmatprep.subr.bf16.mxu0 %v14767_v34  ;;  %v4673_v33 = vld [vmem:[#allocation9 + $0x1a0] sm:$0xff]  ;;  %v4670_v34 = vld [vmem:[#allocation9 + $0x188] sm:$0xff] }
 0x36f   :  { %4584 = vmatprep.subr.bf16.mxu1 %v14769_v35  ;;  %v4674_v35 = vld [vmem:[#allocation9 + $0x1a8] sm:$0xff]  ;;  %v14819_v39 = vcombine.high %v4669_v31, %v4673_v33  ;;  %v14818_v42 = vcombine.low %v4669_v31, %v4673_v33 }
 0x370   :  { %v14821_v5 = vcombine.high %v4670_v34, %v4674_v35  ;;  %v14820_v0 = vcombine.low %v4670_v34, %v4674_v35 }
 0x371   :  { %4413 = vmatpush1.bf16.msra.mxu0 %v14766_v41  ;;  %v4677_v41 = vld [vmem:[#allocation9 + $0x1c0] sm:$0xff] }
 0x372   :  { %4585 = vmatpush1.bf16.msra.mxu1 %v14768_v43  ;;  %7735 = vmatprep.subr.bf16.mxu0 %v14771_v15  ;;  %v4681_v43 = vld [vmem:[#allocation9 + $0x1e0] sm:$0xff]  ;;  %v4678_v15 = vld [vmem:[#allocation9 + $0x1c8] sm:$0xff] }
 0x373   :  { %7907 = vmatprep.subr.bf16.mxu1 %v14773_v62  ;;  %v4682_v62 = vld [vmem:[#allocation9 + $0x1e8] sm:$0xff]  ;;  %v14826_v50 = vcombine.low %v4677_v41, %v4681_v43 }
 0x374   :  { %4415 = vmatmul.mubr.bf16.vlgmr.msra.gmra.mrb[12].mxu0 %v17207_v47  ;;  %v14829_v45 = vcombine.high %v4678_v15, %v4682_v62 }
 0x375   :  { %4587 = vmatmul.mubr.bf16.vlgmr.msra.gmra.mrb[12].mxu1 %v17207_v47  ;;  %7736 = vmatpush1.bf16.msra.mxu0 %v14770_v44  ;;  %v14788_v47 = vcombine.low %v4638_v53, %v4642_v54  ;;  %v14827_v44 = vcombine.high %v4677_v41, %v4681_v43 }
 0x376   :  { %7767 = vmatprep.mubr.bf16.mxu0 %v17243_v28  ;;  %7908 = vmatpush1.bf16.msra.mxu1 %v14772_v48  ;;  %v4689_v48 = vld [vmem:[#allocation9 + $0x220] sm:$0xff] }
 0x377   :  { %7939 = vmatprep.mubr.bf16.mxu1 %v17243_v28  ;;  %7737 = vmatprep.subr.bf16.mxu0 %v14779_v24  ;;  %v4686_v24 = vld [vmem:[#allocation9 + $0x208] sm:$0xff]  ;;  %v14835_v53 = vcombine.high %v4685_v46, %v4689_v48  ;;  %v14834_v59 = vcombine.low %v4685_v46, %v4689_v48 }
 0x378   :  { %7909 = vmatprep.subr.bf16.mxu1 %v14781_v52  ;;  %v14828_v52 = vcombine.low %v4678_v15, %v4682_v62  ;;  %v14837_v54 = vcombine.high %v4686_v24, %v4690_v49  ;;  %v14836_v60 = vcombine.low %v4686_v24, %v4690_v49 }
 0x379   :  { %7738 = vmatpush1.bf16.msra.mxu0 %v14778_v55  ;;  %v4693_v55 = vld [vmem:[#allocation9 + $0x240] sm:$0xff] }
 0x37a   :  { %7910 = vmatpush1.bf16.msra.mxu1 %v14780_v56  ;;  %7739 = vmatprep.subr.bf16.mxu0 %v14787_v57  ;;  %v4697_v56 = vld [vmem:[#allocation9 + $0x260] sm:$0xff]  ;;  %v4694_v57 = vld [vmem:[#allocation9 + $0x248] sm:$0xff] }
 0x37b   :  { %7911 = vmatprep.subr.bf16.mxu1 %v14789_v58  ;;  %v4698_v58 = vld [vmem:[#allocation9 + $0x268] sm:$0xff]  ;;  %v14843_v61 = vcombine.high %v4693_v55, %v4697_v56  ;;  %v14842_v4 = vcombine.low %v4693_v55, %v4697_v56 }
 0x37c   :  { %v14845_v63 = vcombine.high %v4694_v57, %v4698_v58  ;;  %v14844_v6 = vcombine.low %v4694_v57, %v4698_v58 }
 0x37d   :  { %7740 = vmatpush1.bf16.msra.mxu0 %v14786_v1  ;;  %v4701_v1 = vld [vmem:[#allocation9 + $0x280] sm:$0xff] }
 0x37e   :  { %7912 = vmatpush1.bf16.msra.mxu1 %v14788_v47  ;;  %7741 = vmatprep.subr.bf16.mxu0 %v14795_v20  ;;  %v4705_v47 = vld [vmem:[#allocation9 + $0x2a0] sm:$0xff]  ;;  %v4702_v20 = vld [vmem:[#allocation9 + $0x288] sm:$0xff] }
 0x37f   :  { %7913 = vmatprep.subr.bf16.mxu1 %v14797_v2  ;;  %v4706_v2 = vld [vmem:[#allocation9 + $0x2a8] sm:$0xff]  ;;  %v14851_v8 = vcombine.high %v4701_v1, %v4705_v47  ;;  %v14850_v17 = vcombine.low %v4701_v1, %v4705_v47 }
 0x380   :  { %v14853_v10 = vcombine.high %v4702_v20, %v4706_v2  ;;  %v14852_v18 = vcombine.low %v4702_v20, %v4706_v2 }
 0x381   :  { %7742 = vmatpush1.bf16.msra.mxu0 %v14794_v40  ;;  %v4709_v40 = vld [vmem:[#allocation9 + $0x2c0] sm:$0xff] }
 0x382   :  { %7914 = vmatpush1.bf16.msra.mxu1 %v14796_v51  ;;  %7743 = vmatprep.subr.bf16.mxu0 %v14803_v11  ;;  %v4713_v51 = vld [vmem:[#allocation9 + $0x2e0] sm:$0xff]  ;;  %v4710_v11 = vld [vmem:[#allocation9 + $0x2c8] sm:$0xff] }
 0x383   :  { %7915 = vmatprep.subr.bf16.mxu1 %v14805_v12  ;;  %v4714_v12 = vld [vmem:[#allocation9 + $0x2e8] sm:$0xff]  ;;  %v14859_v22 = vcombine.high %v4709_v40, %v4713_v51  ;;  %v14858_v31 = vcombine.low %v4709_v40, %v4713_v51 }
 0x384   :  { %v14861_v23 = vcombine.high %v4710_v11, %v4714_v12  ;;  %v14860_v33 = vcombine.low %v4710_v11, %v4714_v12  ;;  %v4762_v40 = vld [vmem:[#allocation9 + $0x468] sm:$0xff]  ;;  %v4765_v12 = vld [vmem:[#allocation9 + $0x480] sm:$0xff] }
 0x385   :  { %7744 = vmatpush1.bf16.msra.mxu0 %v14802_v3  ;;  %v4717_v3 = vld [vmem:[#allocation9 + $0x300] sm:$0xff] }
 0x386   :  { %7916 = vmatpush1.bf16.msra.mxu1 %v14804_v27  ;;  %7745 = vmatprep.subr.bf16.mxu0 %v14811_v13  ;;  %v4721_v27 = vld [vmem:[#allocation9 + $0x320] sm:$0xff]  ;;  %v4718_v13 = vld [vmem:[#allocation9 + $0x308] sm:$0xff] }
 0x387   :  { %7917 = vmatprep.subr.bf16.mxu1 %v14813_v30  ;;  %v4722_v30 = vld [vmem:[#allocation9 + $0x328] sm:$0xff]  ;;  %v14867_v34 = vcombine.high %v4717_v3, %v4721_v27  ;;  %v14866_v41 = vcombine.low %v4717_v3, %v4721_v27 }
 0x388   :  { %v14869_v35 = vcombine.high %v4718_v13, %v4722_v30  ;;  %v14868_v43 = vcombine.low %v4718_v13, %v4722_v30 }
 0x389   :  { %7746 = vmatpush1.bf16.msra.mxu0 %v14810_v37  ;;  %v4725_v37 = vld [vmem:[#allocation9 + $0x340] sm:$0xff] }
 0x38a   :  { %7918 = vmatpush1.bf16.msra.mxu1 %v14812_v38  ;;  %7747 = vmatprep.subr.bf16.mxu0 %v14819_v39  ;;  %v4729_v38 = vld [vmem:[#allocation9 + $0x360] sm:$0xff]  ;;  %v4726_v39 = vld [vmem:[#allocation9 + $0x348] sm:$0xff] }
 0x38b   :  { %7919 = vmatprep.subr.bf16.mxu1 %v14821_v5  ;;  %v4730_v5 = vld [vmem:[#allocation9 + $0x368] sm:$0xff]  ;;  %v14875_v15 = vcombine.high %v4725_v37, %v4729_v38  ;;  %v14874_v46 = vcombine.low %v4725_v37, %v4729_v38 }
 0x38c   :  { %v14877_v62 = vcombine.high %v4726_v39, %v4730_v5  ;;  %v14876_v48 = vcombine.low %v4726_v39, %v4730_v5 }
 0x38d   :  { %7748 = vmatpush1.bf16.msra.mxu0 %v14818_v42  ;;  %v4733_v42 = vld [vmem:[#allocation9 + $0x380] sm:$0xff] }
 0x38e   :  { %7920 = vmatpush1.bf16.msra.mxu1 %v14820_v0  ;;  %7749 = vmatprep.subr.bf16.mxu0 %v14827_v44  ;;  %v4737_v0 = vld [vmem:[#allocation9 + $0x3a0] sm:$0xff]  ;;  %v4734_v44 = vld [vmem:[#allocation9 + $0x388] sm:$0xff] }
 0x38f   :  { %7921 = vmatprep.subr.bf16.mxu1 %v14829_v45  ;;  %v4738_v45 = vld [vmem:[#allocation9 + $0x3a8] sm:$0xff]  ;;  %v14883_v24 = vcombine.high %v4733_v42, %v4737_v0  ;;  %v14882_v55 = vcombine.low %v4733_v42, %v4737_v0 }
 0x390   :  { %v14885_v49 = vcombine.high %v4734_v44, %v4738_v45  ;;  %v14884_v56 = vcombine.low %v4734_v44, %v4738_v45 }
 0x391   :  { %7750 = vmatpush1.bf16.msra.mxu0 %v14826_v50  ;;  %v4741_v50 = vld [vmem:[#allocation9 + $0x3c0] sm:$0xff] }
 0x392   :  { %7922 = vmatpush1.bf16.msra.mxu1 %v14828_v52  ;;  %7751 = vmatprep.subr.bf16.mxu0 %v14835_v53  ;;  %v4745_v52 = vld [vmem:[#allocation9 + $0x3e0] sm:$0xff]  ;;  %v4742_v53 = vld [vmem:[#allocation9 + $0x3c8] sm:$0xff] }
 0x393   :  { %7923 = vmatprep.subr.bf16.mxu1 %v14837_v54  ;;  %v4746_v54 = vld [vmem:[#allocation9 + $0x3e8] sm:$0xff]  ;;  %v14891_v57 = vcombine.high %v4741_v50, %v4745_v52  ;;  %v14890_v1 = vcombine.low %v4741_v50, %v4745_v52 }
 0x394   :  { %v14893_v58 = vcombine.high %v4742_v53, %v4746_v54  ;;  %v14892_v47 = vcombine.low %v4742_v53, %v4746_v54 }
 0x395   :  { %7752 = vmatpush1.bf16.msra.mxu0 %v14834_v59  ;;  %v4749_v59 = vld [vmem:[#allocation9 + $0x400] sm:$0xff] }
 0x396   :  { %7924 = vmatpush1.bf16.msra.mxu1 %v14836_v60  ;;  %7753 = vmatprep.subr.bf16.mxu0 %v14843_v61  ;;  %v4753_v60 = vld [vmem:[#allocation9 + $0x420] sm:$0xff]  ;;  %v4750_v61 = vld [vmem:[#allocation9 + $0x408] sm:$0xff] }
 0x397   :  { %7925 = vmatprep.subr.bf16.mxu1 %v14845_v63  ;;  %v4754_v63 = vld [vmem:[#allocation9 + $0x428] sm:$0xff]  ;;  %v14899_v20 = vcombine.high %v4749_v59, %v4753_v60 }
 0x398   :  { %v14901_v2 = vcombine.high %v4750_v61, %v4754_v63  ;;  %v14900_v51 = vcombine.low %v4750_v61, %v4754_v63 }
 0x399   :  { %7754 = vmatpush1.bf16.msra.mxu0 %v14842_v4  ;;  %v4757_v4 = vld [vmem:[#allocation9 + $0x440] sm:$0xff] }
 0x39a   :  { %7926 = vmatpush1.bf16.msra.mxu1 %v14844_v6  ;;  %7755 = vmatprep.subr.bf16.mxu0 %v14851_v8  ;;  %v4761_v6 = vld [vmem:[#allocation9 + $0x460] sm:$0xff]  ;;  %v14898_v8 = vcombine.low %v4749_v59, %v4753_v60 }
 0x39b   :  { %7927 = vmatprep.subr.bf16.mxu1 %v14853_v10  ;;  %v4758_v10 = vld [vmem:[#allocation9 + $0x448] sm:$0xff]  ;;  %v14907_v11 = vcombine.high %v4757_v4, %v4761_v6  ;;  %v14906_v3 = vcombine.low %v4757_v4, %v4761_v6 }
 0x39c   :  { %v14908_v27 = vcombine.low %v4758_v10, %v4762_v40 }
 0x39d   :  { %7756 = vmatpush1.bf16.msra.mxu0 %v14850_v17  ;;  %v4769_v17 = vld [vmem:[#allocation9 + $0x4a0] sm:$0xff] }
 0x39e   :  { %7928 = vmatpush1.bf16.msra.mxu1 %v14852_v18  ;;  %7757 = vmatprep.subr.bf16.mxu0 %v14859_v22  ;;  %v14909_v18 = vcombine.high %v4758_v10, %v4762_v40  ;;  %v4766_v22 = vld [vmem:[#allocation9 + $0x488] sm:$0xff]  ;;  %v14915_v13 = vcombine.high %v4765_v12, %v4769_v17  ;;  %v14914_v37 = vcombine.low %v4765_v12, %v4769_v17  ;;  %v4813_v40 = vld [vmem:[#allocation9 + $0x600] sm:$0xff] }
 0x39f   :  { %7929 = vmatprep.subr.bf16.mxu1 %v14861_v23  ;;  %v4770_v23 = vld [vmem:[#allocation9 + $0x4a8] sm:$0xff] }
 0x3a0   :  { %v14917_v30 = vcombine.high %v4766_v22, %v4770_v23  ;;  %v14916_v38 = vcombine.low %v4766_v22, %v4770_v23  ;;  %v4818_v12 = vld [vmem:[#allocation9 + $0x628] sm:$0xff] }
 0x3a1   :  { %7758 = vmatpush1.bf16.msra.mxu0 %v14858_v31  ;;  %v4773_v31 = vld [vmem:[#allocation9 + $0x4c0] sm:$0xff] }
 0x3a2   :  { %7930 = vmatpush1.bf16.msra.mxu1 %v14860_v33  ;;  %7759 = vmatprep.subr.bf16.mxu0 %v14867_v34  ;;  %v4777_v33 = vld [vmem:[#allocation9 + $0x4e0] sm:$0xff]  ;;  %v4774_v34 = vld [vmem:[#allocation9 + $0x4c8] sm:$0xff] }
 0x3a3   :  { %7931 = vmatprep.subr.bf16.mxu1 %v14869_v35  ;;  %v4778_v35 = vld [vmem:[#allocation9 + $0x4e8] sm:$0xff]  ;;  %v14923_v39 = vcombine.high %v4773_v31, %v4777_v33  ;;  %v14922_v42 = vcombine.low %v4773_v31, %v4777_v33 }
 0x3a4   :  { %v14925_v5 = vcombine.high %v4774_v34, %v4778_v35  ;;  %v14924_v0 = vcombine.low %v4774_v34, %v4778_v35 }
 0x3a5   :  { %7760 = vmatpush1.bf16.msra.mxu0 %v14866_v41  ;;  %v4781_v41 = vld [vmem:[#allocation9 + $0x500] sm:$0xff] }
 0x3a6   :  { %7932 = vmatpush1.bf16.msra.mxu1 %v14868_v43  ;;  %7761 = vmatprep.subr.bf16.mxu0 %v14875_v15  ;;  %v4785_v43 = vld [vmem:[#allocation9 + $0x520] sm:$0xff]  ;;  %v4782_v15 = vld [vmem:[#allocation9 + $0x508] sm:$0xff] }
 0x3a7   :  { %7933 = vmatprep.subr.bf16.mxu1 %v14877_v62  ;;  %v4786_v62 = vld [vmem:[#allocation9 + $0x528] sm:$0xff]  ;;  %v14931_v44 = vcombine.high %v4781_v41, %v4785_v43  ;;  %v14930_v50 = vcombine.low %v4781_v41, %v4785_v43 }
 0x3a8   :  { %v14933_v45 = vcombine.high %v4782_v15, %v4786_v62  ;;  %v14932_v52 = vcombine.low %v4782_v15, %v4786_v62 }
 0x3a9   :  { %7762 = vmatpush1.bf16.msra.mxu0 %v14874_v46  ;;  %v4789_v46 = vld [vmem:[#allocation9 + $0x540] sm:$0xff] }
 0x3aa   :  { %7934 = vmatpush1.bf16.msra.mxu1 %v14876_v48  ;;  %7763 = vmatprep.subr.bf16.mxu0 %v14883_v24  ;;  %v4793_v48 = vld [vmem:[#allocation9 + $0x560] sm:$0xff]  ;;  %v4790_v24 = vld [vmem:[#allocation9 + $0x548] sm:$0xff] }
 0x3ab   :  { %7935 = vmatprep.subr.bf16.mxu1 %v14885_v49  ;;  %v4794_v49 = vld [vmem:[#allocation9 + $0x568] sm:$0xff]  ;;  %v14939_v53 = vcombine.high %v4789_v46, %v4793_v48  ;;  %v14938_v59 = vcombine.low %v4789_v46, %v4793_v48 }
 0x3ac   :  { %v14941_v54 = vcombine.high %v4790_v24, %v4794_v49  ;;  %v14940_v60 = vcombine.low %v4790_v24, %v4794_v49 }
 0x3ad   :  { %7764 = vmatpush1.bf16.msra.mxu0 %v14882_v55  ;;  %v4797_v55 = vld [vmem:[#allocation9 + $0x580] sm:$0xff] }
 0x3ae   :  { %7936 = vmatpush1.bf16.msra.mxu1 %v14884_v56  ;;  %7765 = vmatprep.subr.bf16.mxu0 %v14891_v57  ;;  %v4801_v56 = vld [vmem:[#allocation9 + $0x5a0] sm:$0xff]  ;;  %v4798_v57 = vld [vmem:[#allocation9 + $0x588] sm:$0xff] }
 0x3af   :  { %7937 = vmatprep.subr.bf16.mxu1 %v14893_v58  ;;  %v4802_v58 = vld [vmem:[#allocation9 + $0x5a8] sm:$0xff]  ;;  %v14947_v61 = vcombine.high %v4797_v55, %v4801_v56  ;;  %v14946_v4 = vcombine.low %v4797_v55, %v4801_v56 }
 0x3b0   :  { %v14949_v63 = vcombine.high %v4798_v57, %v4802_v58  ;;  %v14948_v6 = vcombine.low %v4798_v57, %v4802_v58 }
 0x3b1   :  { %7766 = vmatpush1.bf16.msra.mxu0 %v14890_v1  ;;  %v4805_v1 = vld [vmem:[#allocation9 + $0x5c0] sm:$0xff] }
 0x3b2   :  { %7938 = vmatpush1.bf16.msra.mxu1 %v14892_v47  ;;  %7778 = vmatprep.subr.bf16.mxu0 %v14899_v20  ;;  %v4809_v47 = vld [vmem:[#allocation9 + $0x5e0] sm:$0xff]  ;;  %v4806_v20 = vld [vmem:[#allocation9 + $0x5c8] sm:$0xff] }
 0x3b3   :  { %7950 = vmatprep.subr.bf16.mxu1 %v14901_v2  ;;  %v4810_v2 = vld [vmem:[#allocation9 + $0x5e8] sm:$0xff]  ;;  %v14954_v17 = vcombine.low %v4805_v1, %v4809_v47 }
 0x3b4   :  { %7768 = vmatmul.mubr.bf16.vlgmr.msra.gmra.mrb[16].mxu0 %v17239_v25  ;;  %v14957_v10 = vcombine.high %v4806_v20, %v4810_v2 }
 0x3b5   :  { %7940 = vmatmul.mubr.bf16.vlgmr.msra.gmra.mrb[16].mxu1 %v17239_v25  ;;  %7779 = vmatpush1.bf16.msra.mxu0 %v14898_v8  ;;  %v14955_v8 = vcombine.high %v4805_v1, %v4809_v47 }
 0x3b6   :  { %7810 = vmatprep.mubr.bf16.mxu0 %v17245_v29  ;;  %7951 = vmatpush1.bf16.msra.mxu1 %v14900_v51  ;;  %v4817_v51 = vld [vmem:[#allocation9 + $0x620] sm:$0xff] }
 0x3b7   :  { %7982 = vmatprep.mubr.bf16.mxu1 %v17245_v29  ;;  %7780 = vmatprep.subr.bf16.mxu0 %v14907_v11  ;;  %v4814_v11 = vld [vmem:[#allocation9 + $0x608] sm:$0xff]  ;;  %v14963_v22 = vcombine.high %v4813_v40, %v4817_v51  ;;  %v14962_v31 = vcombine.low %v4813_v40, %v4817_v51 }
 0x3b8   :  { %7952 = vmatprep.subr.bf16.mxu1 %v14909_v18  ;;  %v14956_v18 = vcombine.low %v4806_v20, %v4810_v2  ;;  %v14965_v23 = vcombine.high %v4814_v11, %v4818_v12  ;;  %v14964_v33 = vcombine.low %v4814_v11, %v4818_v12 }
 0x3b9   :  { %7781 = vmatpush1.bf16.msra.mxu0 %v14906_v3  ;;  %v4821_v3 = vld [vmem:[#allocation9 + $0x640] sm:$0xff] }
 0x3ba   :  { %7953 = vmatpush1.bf16.msra.mxu1 %v14908_v27  ;;  %7782 = vmatprep.subr.bf16.mxu0 %v14915_v13  ;;  %v4825_v27 = vld [vmem:[#allocation9 + $0x660] sm:$0xff]  ;;  %v4822_v13 = vld [vmem:[#allocation9 + $0x648] sm:$0xff] }
 0x3bb   :  { %7954 = vmatprep.subr.bf16.mxu1 %v14917_v30  ;;  %v4826_v30 = vld [vmem:[#allocation9 + $0x668] sm:$0xff]  ;;  %v14971_v34 = vcombine.high %v4821_v3, %v4825_v27  ;;  %v14970_v41 = vcombine.low %v4821_v3, %v4825_v27 }
 0x3bc   :  { %v14973_v35 = vcombine.high %v4822_v13, %v4826_v30  ;;  %v14972_v43 = vcombine.low %v4822_v13, %v4826_v30 }
 0x3bd   :  { %7783 = vmatpush1.bf16.msra.mxu0 %v14914_v37  ;;  %v4829_v37 = vld [vmem:[#allocation9 + $0x680] sm:$0xff] }
 0x3be   :  { %7955 = vmatpush1.bf16.msra.mxu1 %v14916_v38  ;;  %7784 = vmatprep.subr.bf16.mxu0 %v14923_v39  ;;  %v4833_v38 = vld [vmem:[#allocation9 + $0x6a0] sm:$0xff]  ;;  %v4830_v39 = vld [vmem:[#allocation9 + $0x688] sm:$0xff] }
 0x3bf   :  { %7956 = vmatprep.subr.bf16.mxu1 %v14925_v5  ;;  %v4834_v5 = vld [vmem:[#allocation9 + $0x6a8] sm:$0xff]  ;;  %v14979_v15 = vcombine.high %v4829_v37, %v4833_v38  ;;  %v14978_v46 = vcombine.low %v4829_v37, %v4833_v38 }
 0x3c0   :  { %v14981_v62 = vcombine.high %v4830_v39, %v4834_v5  ;;  %v14980_v48 = vcombine.low %v4830_v39, %v4834_v5 }
 0x3c1   :  { %7785 = vmatpush1.bf16.msra.mxu0 %v14922_v42  ;;  %v4837_v42 = vld [vmem:[#allocation9 + $0x6c0] sm:$0xff] }
 0x3c2   :  { %7957 = vmatpush1.bf16.msra.mxu1 %v14924_v0  ;;  %7786 = vmatprep.subr.bf16.mxu0 %v14931_v44  ;;  %v4841_v0 = vld [vmem:[#allocation9 + $0x6e0] sm:$0xff]  ;;  %v4838_v44 = vld [vmem:[#allocation9 + $0x6c8] sm:$0xff] }
 0x3c3   :  { %7958 = vmatprep.subr.bf16.mxu1 %v14933_v45  ;;  %v4842_v45 = vld [vmem:[#allocation9 + $0x6e8] sm:$0xff]  ;;  %v14987_v24 = vcombine.high %v4837_v42, %v4841_v0  ;;  %v14986_v55 = vcombine.low %v4837_v42, %v4841_v0 }
 0x3c4   :  { %v14989_v49 = vcombine.high %v4838_v44, %v4842_v45  ;;  %v14988_v56 = vcombine.low %v4838_v44, %v4842_v45 }
 0x3c5   :  { %7787 = vmatpush1.bf16.msra.mxu0 %v14930_v50  ;;  %v4845_v50 = vld [vmem:[#allocation9 + $0x700] sm:$0xff] }
 0x3c6   :  { %7959 = vmatpush1.bf16.msra.mxu1 %v14932_v52  ;;  %7788 = vmatprep.subr.bf16.mxu0 %v14939_v53  ;;  %v4849_v52 = vld [vmem:[#allocation9 + $0x720] sm:$0xff]  ;;  %v4846_v53 = vld [vmem:[#allocation9 + $0x708] sm:$0xff] }
 0x3c7   :  { %7960 = vmatprep.subr.bf16.mxu1 %v14941_v54  ;;  %v4850_v54 = vld [vmem:[#allocation9 + $0x728] sm:$0xff]  ;;  %v14995_v57 = vcombine.high %v4845_v50, %v4849_v52  ;;  %v14994_v1 = vcombine.low %v4845_v50, %v4849_v52 }
 0x3c8   :  { %v14997_v58 = vcombine.high %v4846_v53, %v4850_v54  ;;  %v14996_v47 = vcombine.low %v4846_v53, %v4850_v54 }
 0x3c9   :  { %7789 = vmatpush1.bf16.msra.mxu0 %v14938_v59  ;;  %v4853_v59 = vld [vmem:[#allocation9 + $0x740] sm:$0xff] }
 0x3ca   :  { %7961 = vmatpush1.bf16.msra.mxu1 %v14940_v60  ;;  %7790 = vmatprep.subr.bf16.mxu0 %v14947_v61  ;;  %v4857_v60 = vld [vmem:[#allocation9 + $0x760] sm:$0xff]  ;;  %v4854_v61 = vld [vmem:[#allocation9 + $0x748] sm:$0xff] }
 0x3cb   :  { %7962 = vmatprep.subr.bf16.mxu1 %v14949_v63  ;;  %v4858_v63 = vld [vmem:[#allocation9 + $0x768] sm:$0xff]  ;;  %v15003_v20 = vcombine.high %v4853_v59, %v4857_v60  ;;  %v15002_v40 = vcombine.low %v4853_v59, %v4857_v60 }
 0x3cc   :  { %v15005_v2 = vcombine.high %v4854_v61, %v4858_v63  ;;  %v15004_v51 = vcombine.low %v4854_v61, %v4858_v63 }
 0x3cd   :  { %7791 = vmatpush1.bf16.msra.mxu0 %v14946_v4  ;;  %v4861_v4 = vld [vmem:[#allocation9 + $0x780] sm:$0xff] }
 0x3ce   :  { %7963 = vmatpush1.bf16.msra.mxu1 %v14948_v6  ;;  %7792 = vmatprep.subr.bf16.mxu0 %v14955_v8  ;;  %v4865_v6 = vld [vmem:[#allocation9 + $0x7a0] sm:$0xff]  ;;  %v4862_v8 = vld [vmem:[#allocation9 + $0x788] sm:$0xff] }
 0x3cf   :  { %7964 = vmatprep.subr.bf16.mxu1 %v14957_v10  ;;  %v4866_v10 = vld [vmem:[#allocation9 + $0x7a8] sm:$0xff]  ;;  %v15011_v11 = vcombine.high %v4861_v4, %v4865_v6  ;;  %v15010_v3 = vcombine.low %v4861_v4, %v4865_v6 }
 0x3d0   :  { %v15013_v12 = vcombine.high %v4862_v8, %v4866_v10  ;;  %v15012_v27 = vcombine.low %v4862_v8, %v4866_v10 }
 0x3d1   :  { %7793 = vmatpush1.bf16.msra.mxu0 %v14954_v17  ;;  %v4869_v17 = vld [vmem:[#allocation9 + $0x7c0] sm:$0xff] }
 0x3d2   :  { %7965 = vmatpush1.bf16.msra.mxu1 %v14956_v18  ;;  %7794 = vmatprep.subr.bf16.mxu0 %v14963_v22  ;;  %v4873_v18 = vld [vmem:[#allocation9 + $0x7e0] sm:$0xff]  ;;  %v4870_v22 = vld [vmem:[#allocation9 + $0x7c8] sm:$0xff] }
 0x3d3   :  { %7966 = vmatprep.subr.bf16.mxu1 %v14965_v23  ;;  %v4874_v23 = vld [vmem:[#allocation9 + $0x7e8] sm:$0xff]  ;;  %v15019_v13 = vcombine.high %v4869_v17, %v4873_v18  ;;  %v15018_v37 = vcombine.low %v4869_v17, %v4873_v18 }
 0x3d4   :  { %v15021_v30 = vcombine.high %v4870_v22, %v4874_v23  ;;  %v15020_v38 = vcombine.low %v4870_v22, %v4874_v23 }
 0x3d5   :  { %7795 = vmatpush1.bf16.msra.mxu0 %v14962_v31  ;;  %v4877_v31 = vld [vmem:[#allocation9 + $0x800] sm:$0xff] }
 0x3d6   :  { %7967 = vmatpush1.bf16.msra.mxu1 %v14964_v33  ;;  %7796 = vmatprep.subr.bf16.mxu0 %v14971_v34  ;;  %v4881_v33 = vld [vmem:[#allocation9 + $0x820] sm:$0xff]  ;;  %v4878_v34 = vld [vmem:[#allocation9 + $0x808] sm:$0xff] }
 0x3d7   :  { %7968 = vmatprep.subr.bf16.mxu1 %v14973_v35  ;;  %v4882_v35 = vld [vmem:[#allocation9 + $0x828] sm:$0xff]  ;;  %v15027_v39 = vcombine.high %v4877_v31, %v4881_v33  ;;  %v15026_v42 = vcombine.low %v4877_v31, %v4881_v33 }
 0x3d8   :  { %v15029_v5 = vcombine.high %v4878_v34, %v4882_v35  ;;  %v15028_v0 = vcombine.low %v4878_v34, %v4882_v35 }
 0x3d9   :  { %7797 = vmatpush1.bf16.msra.mxu0 %v14970_v41  ;;  %v4885_v41 = vld [vmem:[#allocation9 + $0x840] sm:$0xff] }
 0x3da   :  { %7969 = vmatpush1.bf16.msra.mxu1 %v14972_v43  ;;  %7798 = vmatprep.subr.bf16.mxu0 %v14979_v15  ;;  %v4889_v43 = vld [vmem:[#allocation9 + $0x860] sm:$0xff]  ;;  %v4886_v15 = vld [vmem:[#allocation9 + $0x848] sm:$0xff] }
 0x3db   :  { %7970 = vmatprep.subr.bf16.mxu1 %v14981_v62  ;;  %v4890_v62 = vld [vmem:[#allocation9 + $0x868] sm:$0xff]  ;;  %v15035_v44 = vcombine.high %v4885_v41, %v4889_v43  ;;  %v15034_v50 = vcombine.low %v4885_v41, %v4889_v43 }
 0x3dc   :  { %v15037_v45 = vcombine.high %v4886_v15, %v4890_v62  ;;  %v15036_v52 = vcombine.low %v4886_v15, %v4890_v62 }
 0x3dd   :  { %7799 = vmatpush1.bf16.msra.mxu0 %v14978_v46  ;;  %v4893_v46 = vld [vmem:[#allocation9 + $0x880] sm:$0xff] }
 0x3de   :  { %7971 = vmatpush1.bf16.msra.mxu1 %v14980_v48  ;;  %7800 = vmatprep.subr.bf16.mxu0 %v14987_v24  ;;  %v4897_v48 = vld [vmem:[#allocation9 + $0x8a0] sm:$0xff]  ;;  %v4894_v24 = vld [vmem:[#allocation9 + $0x888] sm:$0xff] }
 0x3df   :  { %7972 = vmatprep.subr.bf16.mxu1 %v14989_v49  ;;  %v4898_v49 = vld [vmem:[#allocation9 + $0x8a8] sm:$0xff]  ;;  %v15043_v53 = vcombine.high %v4893_v46, %v4897_v48  ;;  %v15042_v59 = vcombine.low %v4893_v46, %v4897_v48 }
 0x3e0   :  { %v15045_v54 = vcombine.high %v4894_v24, %v4898_v49  ;;  %v15044_v60 = vcombine.low %v4894_v24, %v4898_v49 }
 0x3e1   :  { %7801 = vmatpush1.bf16.msra.mxu0 %v14986_v55  ;;  %v4901_v55 = vld [vmem:[#allocation9 + $0x8c0] sm:$0xff] }
 0x3e2   :  { %7973 = vmatpush1.bf16.msra.mxu1 %v14988_v56  ;;  %7802 = vmatprep.subr.bf16.mxu0 %v14995_v57  ;;  %v4905_v56 = vld [vmem:[#allocation9 + $0x8e0] sm:$0xff]  ;;  %v4902_v57 = vld [vmem:[#allocation9 + $0x8c8] sm:$0xff] }
 0x3e3   :  { %7974 = vmatprep.subr.bf16.mxu1 %v14997_v58  ;;  %v4906_v58 = vld [vmem:[#allocation9 + $0x8e8] sm:$0xff]  ;;  %v15051_v61 = vcombine.high %v4901_v55, %v4905_v56  ;;  %v15050_v4 = vcombine.low %v4901_v55, %v4905_v56 }
 0x3e4   :  { %v15053_v63 = vcombine.high %v4902_v57, %v4906_v58  ;;  %v15052_v6 = vcombine.low %v4902_v57, %v4906_v58 }
 0x3e5   :  { %7803 = vmatpush1.bf16.msra.mxu0 %v14994_v1  ;;  %v4909_v1 = vld [vmem:[#allocation9 + $0x900] sm:$0xff] }
 0x3e6   :  { %7975 = vmatpush1.bf16.msra.mxu1 %v14996_v47  ;;  %7804 = vmatprep.subr.bf16.mxu0 %v15003_v20  ;;  %v4913_v47 = vld [vmem:[#allocation9 + $0x920] sm:$0xff]  ;;  %v4910_v20 = vld [vmem:[#allocation9 + $0x908] sm:$0xff] }
 0x3e7   :  { %7976 = vmatprep.subr.bf16.mxu1 %v15005_v2  ;;  %v4914_v2 = vld [vmem:[#allocation9 + $0x928] sm:$0xff]  ;;  %v15059_v8 = vcombine.high %v4909_v1, %v4913_v47  ;;  %v15058_v17 = vcombine.low %v4909_v1, %v4913_v47 }
 0x3e8   :  { %v15061_v10 = vcombine.high %v4910_v20, %v4914_v2  ;;  %v15060_v18 = vcombine.low %v4910_v20, %v4914_v2 }
 0x3e9   :  { %7805 = vmatpush1.bf16.msra.mxu0 %v15002_v40  ;;  %v4917_v40 = vld [vmem:[#allocation9 + $0x940] sm:$0xff] }
 0x3ea   :  { %7977 = vmatpush1.bf16.msra.mxu1 %v15004_v51  ;;  %7806 = vmatprep.subr.bf16.mxu0 %v15011_v11  ;;  %v4921_v51 = vld [vmem:[#allocation9 + $0x960] sm:$0xff]  ;;  %v4918_v11 = vld [vmem:[#allocation9 + $0x948] sm:$0xff] }
 0x3eb   :  { %7978 = vmatprep.subr.bf16.mxu1 %v15013_v12  ;;  %v4922_v12 = vld [vmem:[#allocation9 + $0x968] sm:$0xff]  ;;  %v15067_v22 = vcombine.high %v4917_v40, %v4921_v51  ;;  %v15066_v31 = vcombine.low %v4917_v40, %v4921_v51 }
 0x3ec   :  { %v15069_v23 = vcombine.high %v4918_v11, %v4922_v12  ;;  %v15068_v33 = vcombine.low %v4918_v11, %v4922_v12 }
 0x3ed   :  { %7807 = vmatpush1.bf16.msra.mxu0 %v15010_v3  ;;  %v4925_v3 = vld [vmem:[#allocation9 + $0x980] sm:$0xff] }
 0x3ee   :  { %7979 = vmatpush1.bf16.msra.mxu1 %v15012_v27  ;;  %7808 = vmatprep.subr.bf16.mxu0 %v15019_v13  ;;  %v4929_v27 = vld [vmem:[#allocation9 + $0x9a0] sm:$0xff]  ;;  %v4926_v13 = vld [vmem:[#allocation9 + $0x988] sm:$0xff] }
 0x3ef   :  { %7980 = vmatprep.subr.bf16.mxu1 %v15021_v30  ;;  %v4930_v30 = vld [vmem:[#allocation9 + $0x9a8] sm:$0xff]  ;;  %v15075_v34 = vcombine.high %v4925_v3, %v4929_v27  ;;  %v15074_v41 = vcombine.low %v4925_v3, %v4929_v27 }
 0x3f0   :  { %v15077_v35 = vcombine.high %v4926_v13, %v4930_v30  ;;  %v15076_v43 = vcombine.low %v4926_v13, %v4930_v30 }
 0x3f1   :  { %7809 = vmatpush1.bf16.msra.mxu0 %v15018_v37  ;;  %v4933_v37 = vld [vmem:[#allocation9 + $0x9c0] sm:$0xff] }
 0x3f2   :  { %7981 = vmatpush1.bf16.msra.mxu1 %v15020_v38  ;;  %7821 = vmatprep.subr.bf16.mxu0 %v15027_v39  ;;  %v4937_v38 = vld [vmem:[#allocation9 + $0x9e0] sm:$0xff]  ;;  %v4934_v39 = vld [vmem:[#allocation9 + $0x9c8] sm:$0xff] }
 0x3f3   :  { %7993 = vmatprep.subr.bf16.mxu1 %v15029_v5  ;;  %v4938_v5 = vld [vmem:[#allocation9 + $0x9e8] sm:$0xff]  ;;  %v15083_v15 = vcombine.high %v4933_v37, %v4937_v38  ;;  %v15082_v46 = vcombine.low %v4933_v37, %v4937_v38 }
 0x3f4   :  { %7811 = vmatmul.mubr.bf16.vlgmr.msra.gmra.mrb[16].mxu0 %v17241_v26  ;;  %v15085_v62 = vcombine.high %v4934_v39, %v4938_v5  ;;  %v15084_v48 = vcombine.low %v4934_v39, %v4938_v5 }
 0x3f5   :  { %7983 = vmatmul.mubr.bf16.vlgmr.msra.gmra.mrb[16].mxu1 %v17241_v26  ;;  %7822 = vmatpush1.bf16.msra.mxu0 %v15026_v42  ;;  %v4941_v42 = vld [vmem:[#allocation9 + $0xa00] sm:$0xff] }
 0x3f6   :  { %7994 = vmatpush1.bf16.msra.mxu1 %v15028_v0  ;;  %7823 = vmatprep.subr.bf16.mxu0 %v15035_v44  ;;  %v4945_v0 = vld [vmem:[#allocation9 + $0xa20] sm:$0xff]  ;;  %v4942_v44 = vld [vmem:[#allocation9 + $0xa08] sm:$0xff] }
 0x3f7   :  { %7995 = vmatprep.subr.bf16.mxu1 %v15037_v45  ;;  %v4946_v45 = vld [vmem:[#allocation9 + $0xa28] sm:$0xff]  ;;  %v15091_v24 = vcombine.high %v4941_v42, %v4945_v0  ;;  %v15090_v55 = vcombine.low %v4941_v42, %v4945_v0 }
 0x3f8   :  { %v15093_v49 = vcombine.high %v4942_v44, %v4946_v45  ;;  %v15092_v56 = vcombine.low %v4942_v44, %v4946_v45 }
 0x3f9   :  { %7824 = vmatpush1.bf16.msra.mxu0 %v15034_v50  ;;  %v4949_v50 = vld [vmem:[#allocation9 + $0xa40] sm:$0xff] }
 0x3fa   :  { %7996 = vmatpush1.bf16.msra.mxu1 %v15036_v52  ;;  %7825 = vmatprep.subr.bf16.mxu0 %v15043_v53  ;;  %v4953_v52 = vld [vmem:[#allocation9 + $0xa60] sm:$0xff]  ;;  %v4950_v53 = vld [vmem:[#allocation9 + $0xa48] sm:$0xff] }
 0x3fb   :  { %7997 = vmatprep.subr.bf16.mxu1 %v15045_v54  ;;  %v4954_v54 = vld [vmem:[#allocation9 + $0xa68] sm:$0xff]  ;;  %v15099_v57 = vcombine.high %v4949_v50, %v4953_v52  ;;  %v15098_v1 = vcombine.low %v4949_v50, %v4953_v52 }
 0x3fc   :  { %v15101_v58 = vcombine.high %v4950_v53, %v4954_v54  ;;  %v15100_v47 = vcombine.low %v4950_v53, %v4954_v54 }
 0x3fd   :  { %7826 = vmatpush1.bf16.msra.mxu0 %v15042_v59  ;;  %v4957_v59 = vld [vmem:[#allocation9 + $0xa80] sm:$0xff] }
 0x3fe   :  { %7998 = vmatpush1.bf16.msra.mxu1 %v15044_v60  ;;  %7827 = vmatprep.subr.bf16.mxu0 %v15051_v61  ;;  %v4961_v60 = vld [vmem:[#allocation9 + $0xaa0] sm:$0xff]  ;;  %v4958_v61 = vld [vmem:[#allocation9 + $0xa88] sm:$0xff] }
 0x3ff   :  { %7999 = vmatprep.subr.bf16.mxu1 %v15053_v63  ;;  %v4962_v63 = vld [vmem:[#allocation9 + $0xaa8] sm:$0xff]  ;;  %v15107_v20 = vcombine.high %v4957_v59, %v4961_v60  ;;  %v15106_v40 = vcombine.low %v4957_v59, %v4961_v60 }
 0x400   :  { %v15109_v2 = vcombine.high %v4958_v61, %v4962_v63  ;;  %v15108_v51 = vcombine.low %v4958_v61, %v4962_v63 }
 0x401   :  { %7828 = vmatpush1.bf16.msra.mxu0 %v15050_v4  ;;  %v4965_v4 = vld [vmem:[#allocation9 + $0xac0] sm:$0xff] }
 0x402   :  { %8000 = vmatpush1.bf16.msra.mxu1 %v15052_v6  ;;  %7829 = vmatprep.subr.bf16.mxu0 %v15059_v8  ;;  %v4969_v6 = vld [vmem:[#allocation9 + $0xae0] sm:$0xff]  ;;  %v4966_v8 = vld [vmem:[#allocation9 + $0xac8] sm:$0xff] }
 0x403   :  { %8001 = vmatprep.subr.bf16.mxu1 %v15061_v10  ;;  %v4970_v10 = vld [vmem:[#allocation9 + $0xae8] sm:$0xff]  ;;  %v15115_v11 = vcombine.high %v4965_v4, %v4969_v6  ;;  %v15114_v3 = vcombine.low %v4965_v4, %v4969_v6 }
 0x404   :  { %v15117_v12 = vcombine.high %v4966_v8, %v4970_v10  ;;  %v15116_v27 = vcombine.low %v4966_v8, %v4970_v10 }
 0x405   :  { %7830 = vmatpush1.bf16.msra.mxu0 %v15058_v17  ;;  %v4973_v17 = vld [vmem:[#allocation9 + $0xb00] sm:$0xff] }
 0x406   :  { %8002 = vmatpush1.bf16.msra.mxu1 %v15060_v18  ;;  %7831 = vmatprep.subr.bf16.mxu0 %v15067_v22  ;;  %v4977_v18 = vld [vmem:[#allocation9 + $0xb20] sm:$0xff]  ;;  %v4974_v22 = vld [vmem:[#allocation9 + $0xb08] sm:$0xff] }
 0x407   :  { %8003 = vmatprep.subr.bf16.mxu1 %v15069_v23  ;;  %v4978_v23 = vld [vmem:[#allocation9 + $0xb28] sm:$0xff]  ;;  %v15123_v13 = vcombine.high %v4973_v17, %v4977_v18  ;;  %v15122_v37 = vcombine.low %v4973_v17, %v4977_v18 }
 0x408   :  { %v15125_v30 = vcombine.high %v4974_v22, %v4978_v23  ;;  %v15124_v38 = vcombine.low %v4974_v22, %v4978_v23 }
 0x409   :  { %7832 = vmatpush1.bf16.msra.mxu0 %v15066_v31  ;;  %v4981_v31 = vld [vmem:[#allocation9 + $0xb40] sm:$0xff] }
 0x40a   :  { %8004 = vmatpush1.bf16.msra.mxu1 %v15068_v33  ;;  %7833 = vmatprep.subr.bf16.mxu0 %v15075_v34  ;;  %v4985_v33 = vld [vmem:[#allocation9 + $0xb60] sm:$0xff]  ;;  %v4982_v34 = vld [vmem:[#allocation9 + $0xb48] sm:$0xff] }
 0x40b   :  { %8005 = vmatprep.subr.bf16.mxu1 %v15077_v35  ;;  %v4986_v35 = vld [vmem:[#allocation9 + $0xb68] sm:$0xff]  ;;  %v15131_v39 = vcombine.high %v4981_v31, %v4985_v33  ;;  %v15130_v42 = vcombine.low %v4981_v31, %v4985_v33 }
 0x40c   :  { %v15133_v5 = vcombine.high %v4982_v34, %v4986_v35  ;;  %v15132_v0 = vcombine.low %v4982_v34, %v4986_v35 }
 0x40d   :  { %7834 = vmatpush1.bf16.msra.mxu0 %v15074_v41  ;;  %v4989_v41 = vld [vmem:[#allocation9 + $0xb80] sm:$0xff] }
 0x40e   :  { %8006 = vmatpush1.bf16.msra.mxu1 %v15076_v43  ;;  %7835 = vmatprep.subr.bf16.mxu0 %v15083_v15  ;;  %v4993_v43 = vld [vmem:[#allocation9 + $0xba0] sm:$0xff]  ;;  %v4990_v15 = vld [vmem:[#allocation9 + $0xb88] sm:$0xff] }
 0x40f   :  { %8007 = vmatprep.subr.bf16.mxu1 %v15085_v62  ;;  %v4994_v62 = vld [vmem:[#allocation9 + $0xba8] sm:$0xff]  ;;  %v15139_v44 = vcombine.high %v4989_v41, %v4993_v43  ;;  %v15138_v50 = vcombine.low %v4989_v41, %v4993_v43 }
 0x410   :  { %v15141_v45 = vcombine.high %v4990_v15, %v4994_v62  ;;  %v15140_v52 = vcombine.low %v4990_v15, %v4994_v62  ;;  %v5017_v62 = vld [vmem:[#allocation9 + $0xc60] sm:$0xff] }
 0x411   :  { %7836 = vmatpush1.bf16.msra.mxu0 %v15082_v46  ;;  %v4997_v46 = vld [vmem:[#allocation9 + $0xbc0] sm:$0xff] }
 0x412   :  { %8008 = vmatpush1.bf16.msra.mxu1 %v15084_v48  ;;  %7837 = vmatprep.subr.bf16.mxu0 %v15091_v24  ;;  %v5001_v48 = vld [vmem:[#allocation9 + $0xbe0] sm:$0xff]  ;;  %v4998_v24 = vld [vmem:[#allocation9 + $0xbc8] sm:$0xff] }
 0x413   :  { %8009 = vmatprep.subr.bf16.mxu1 %v15093_v49  ;;  %v5002_v49 = vld [vmem:[#allocation9 + $0xbe8] sm:$0xff]  ;;  %v15147_v53 = vcombine.high %v4997_v46, %v5001_v48  ;;  %v15146_v59 = vcombine.low %v4997_v46, %v5001_v48 }
 0x414   :  { %v15149_v54 = vcombine.high %v4998_v24, %v5002_v49  ;;  %v15148_v60 = vcombine.low %v4998_v24, %v5002_v49  ;;  %v5021_v49 = vld [vmem:[#allocation9 + $0xc80] sm:$0xff] }
 0x415   :  { %7838 = vmatpush1.bf16.msra.mxu0 %v15090_v55  ;;  %v17257_v55 = vld [vmem:[#allocation9 + $0xc00] sm:$0xff] }
 0x416   :  { %8010 = vmatpush1.bf16.msra.mxu1 %v15092_v56  ;;  %7839 = vmatprep.subr.bf16.mxu0 %v15099_v57  ;;  %v17259_v56 = vld [vmem:[#allocation9 + $0xc20] sm:$0xff]  ;;  %v17261_v57 = vld [vmem:[#allocation9 + $0xc08] sm:$0xff] }
 0x417   :  { %8011 = vmatprep.subr.bf16.mxu1 %v15101_v58  ;;  %v17263_v58 = vld [vmem:[#allocation9 + $0xc28] sm:$0xff]  ;;  %v15155_v61 = vcombine.high %v17257_v55, %v17259_v56  ;;  %v15154_v46 = vcombine.low %v17257_v55, %v17259_v56 }
 0x418   :  { %v15157_v63 = vcombine.high %v17261_v57, %v17263_v58  ;;  %v15156_v48 = vcombine.low %v17261_v57, %v17263_v58 }
 0x419   :  { %7840 = vmatpush1.bf16.msra.mxu0 %v15098_v1  ;;  %v16674_v1 = vld [vmem:[#allocation7] sm:$0xff] }
 0x41a   :  { %8012 = vmatpush1.bf16.msra.mxu1 %v15100_v47  ;;  %7841 = vmatprep.subr.bf16.mxu0 %v15107_v20  ;;  %v1328_v47 = vrot.slane %v16674_v1, %v17184_v32  ;;  %v1336_v20 = vrot.slane %v16674_v1, %v17198_v7  ;;  %v1340_v4 = vrot.slane %v16674_v1, %v17201_v9 }
 0x41b   :  { %8013 = vmatprep.subr.bf16.mxu1 %v15109_v2  ;;  %v1332_v2 = vrot.slane %v16674_v1, %v17187_v36  ;;  %v5034_v1 = vld [vmem:[#allocation9 + $0xce8] sm:$0xff] }
 0x41d   :  { %7842 = vmatpush1.bf16.msra.mxu0 %v15106_v40 }
 0x41e   :  { %8014 = vmatpush1.bf16.msra.mxu1 %v15108_v51  ;;  %7843 = vmatprep.subr.bf16.mxu0 %v15115_v11 }
 0x41f   :  { %8015 = vmatprep.subr.bf16.mxu1 %v15117_v12 }
 0x421   :  { %7844 = vmatpush1.bf16.msra.mxu0 %v15114_v3 }
 0x422   :  { %8016 = vmatpush1.bf16.msra.mxu1 %v15116_v27  ;;  %7845 = vmatprep.subr.bf16.mxu0 %v15123_v13 }
 0x423   :  { %8017 = vmatprep.subr.bf16.mxu1 %v15125_v30 }
 0x425   :  { %7846 = vmatpush1.bf16.msra.mxu0 %v15122_v37 }
 0x426   :  { %8018 = vmatpush1.bf16.msra.mxu1 %v15124_v38  ;;  %7847 = vmatprep.subr.bf16.mxu0 %v15131_v39 }
 0x427   :  { %8019 = vmatprep.subr.bf16.mxu1 %v15133_v5  ;;  %v5013_v5 = vld [vmem:[#allocation9 + $0xc40] sm:$0xff] }
 0x428   :  { %v15162_v55 = vcombine.low %v5013_v5, %v5017_v62 }
 0x429   :  { %7848 = vmatpush1.bf16.msra.mxu0 %v15130_v42  ;;  %v5014_v42 = vld [vmem:[#allocation9 + $0xc48] sm:$0xff] }
 0x42a   :  { %8020 = vmatpush1.bf16.msra.mxu1 %v15132_v0  ;;  %7849 = vmatprep.subr.bf16.mxu0 %v15139_v44  ;;  %v5018_v0 = vld [vmem:[#allocation9 + $0xc68] sm:$0xff] }
 0x42b   :  { %8021 = vmatprep.subr.bf16.mxu1 %v15141_v45  ;;  %v15164_v56 = vcombine.low %v5014_v42, %v5018_v0 }
 0x42d   :  { %7850 = vmatpush1.bf16.msra.mxu0 %v15138_v50  ;;  %v15163_v50 = vcombine.high %v5013_v5, %v5017_v62  ;;  %v5065_v62 = vld [vmem:[#allocation9 + $0xde0] sm:$0xff] }
 0x42e   :  { %8022 = vmatpush1.bf16.msra.mxu1 %v15140_v52  ;;  %7851 = vmatprep.subr.bf16.mxu0 %v15147_v53  ;;  %v15165_v52 = vcombine.high %v5014_v42, %v5018_v0  ;;  %v5025_v53 = vld [vmem:[#allocation9 + $0xca0] sm:$0xff]  ;;  %v5062_v42 = vld [vmem:[#allocation9 + $0xdc8] sm:$0xff] }
 0x42f   :  { %8023 = vmatprep.subr.bf16.mxu1 %v15149_v54  ;;  %v5022_v54 = vld [vmem:[#allocation9 + $0xc88] sm:$0xff]  ;;  %v15171_v57 = vcombine.high %v5021_v49, %v5025_v53 }
 0x430   :  { %v5066_v0 = vld [vmem:[#allocation9 + $0xde8] sm:$0xff] }
 0x431   :  { %7852 = vmatpush1.bf16.msra.mxu0 %v15146_v59  ;;  %v5026_v59 = vld [vmem:[#allocation9 + $0xca8] sm:$0xff] }
 0x432   :  { %8024 = vmatpush1.bf16.msra.mxu1 %v15148_v60  ;;  %7864 = vmatprep.subr.bf16.mxu0 %v15155_v61  ;;  %v15173_v58 = vcombine.high %v5022_v54, %v5026_v59  ;;  %v5029_v60 = vld [vmem:[#allocation9 + $0xcc0] sm:$0xff] }
 0x433   :  { %8036 = vmatprep.subr.bf16.mxu1 %v15157_v63  ;;  %v5033_v61 = vld [vmem:[#allocation9 + $0xce0] sm:$0xff]  ;;  %v5030_v63 = vld [vmem:[#allocation9 + $0xcc8] sm:$0xff] }
 0x447   :  { %v4416_v6 = vpop.f32.mrb[12].mxu0 }
 0x448   :  { %v16058_v8 = vadd.f32 %v4416_v6, %v1328_v47  ;;  %v4588_v10 = vpop.f32.mrb[12].mxu1  ;;  %v4418_v40 = vpop.f32.mrb[13].mxu0  ;;  %v5037_v6 = vld [vmem:[#allocation9 + $0xd00] sm:$0xff] }
 0x449   :  { %v16062_v51 = vadd.f32 %v4588_v10, %v1336_v20  ;;  %v16059_v11 = vadd.f32 %v4418_v40, %v1332_v2  ;;  %v4590_v12 = vpop.f32.mrb[13].mxu1  ;;  %v4420_v17 = vpop.f32.mrb[14].mxu0  ;;  %v5038_v10 = vld [vmem:[#allocation9 + $0xd08] sm:$0xff] }
 0x44a   :  { %v16063_v18 = vadd.f32 %v4590_v12, %v1340_v4  ;;  %v16060_v22 = vadd.f32 %v4420_v17, %v1328_v47  ;;  %v4592_v23 = vpop.f32.mrb[14].mxu1  ;;  %v4422_v3 = vpop.f32.mrb[15].mxu0  ;;  %v4601_v31 = vmax.f32 %v16058_v8, 0.0  ;;  %v15170_v47 = vcombine.low %v5021_v49, %v5025_v53  ;;  %v5041_v8 = vld [vmem:[#allocation9 + $0xd20] sm:$0xff]  ;;  %v5042_v40 = vld [vmem:[#allocation9 + $0xd28] sm:$0xff] }
 0x44b   :  { %v16064_v27 = vadd.f32 %v4592_v23, %v1336_v20  ;;  %v16061_v13 = vadd.f32 %v4422_v3, %v1332_v2  ;;  %v4594_v30 = vpop.f32.mrb[15].mxu1  ;;  %v4603_v35 = vmax.f32 %v16062_v51, 0.0  ;;  %v4602_v37 = vmax.f32 %v16059_v11, 0.0  ;;  %v5046_v23 = vld [vmem:[#allocation9 + $0xd48] sm:$0xff]  ;;  %v5073_v53 = vld [vmem:[#allocation9 + $0xe20] sm:$0xff] }
 0x44c   :  { %v4609_v33 = vmax.f32 %v16060_v22, 0.0  ;;  %v16065_v34 = vadd.f32 %v4594_v30, %v1340_v4  ;;  %v4604_v41 = vmax.f32 %v16063_v18, 0.0  ;;  %v15172_v20 = vcombine.low %v5022_v54, %v5026_v59  ;;  %v5045_v18 = vld [vmem:[#allocation9 + $0xd40] sm:$0xff]  ;;  %v5050_v3 = vld [vmem:[#allocation9 + $0xd68] sm:$0xff] }
 0x44d   :  { %v4611_v38 = vmax.f32 %v16064_v27, 0.0  ;;  %v4610_v39 = vmax.f32 %v16061_v13, 0.0  ;;  %v15179_v2 = vcombine.high %v5029_v60, %v5033_v61  ;;  %v15181_v4 = vcombine.high %v5030_v63, %v5034_v1  ;;  %v5049_v22 = vld [vmem:[#allocation9 + $0xd60] sm:$0xff]  ;;  %v5070_v54 = vld [vmem:[#allocation9 + $0xe08] sm:$0xff] }
 0x44e   :  { %v17273_v43 = vpack.c.bf16 %v4609_v33, %v4601_v31  ;;  %v4612_v15 = vmax.f32 %v16065_v34, 0.0  ;;  %v15178_v51 = vcombine.low %v5029_v60, %v5033_v61  ;;  %v15180_v11 = vcombine.low %v5030_v63, %v5034_v1  ;;  %v5053_v33 = vld [vmem:[#allocation9 + $0xd80] sm:$0xff]  ;;  %v5074_v59 = vld [vmem:[#allocation9 + $0xe28] sm:$0xff] }
 0x44f   :  { %v17275_v44 = vpack.c.bf16 %v4611_v38, %v4603_v35  ;;  %v17277_v45 = vpack.c.bf16 %v4610_v39, %v4602_v37  ;;  %v15187_v12 = vcombine.high %v5037_v6, %v5041_v8  ;;  %v15189_v17 = vcombine.high %v5038_v10, %v5042_v40  ;;  %v5057_v34 = vld [vmem:[#allocation9 + $0xda0] sm:$0xff]  ;;  %v5054_v35 = vld [vmem:[#allocation9 + $0xd88] sm:$0xff] }
 0x450   :  { %v17283_v24 = vpack.c.bf16 %v4612_v15, %v4604_v41  ;;  %v15186_v27 = vcombine.low %v5037_v6, %v5041_v8  ;;  %v15188_v13 = vcombine.low %v5038_v10, %v5042_v40  ;;  %v15195_v30 = vcombine.high %v5045_v18, %v5049_v22  ;;  %v5058_v37 = vld [vmem:[#allocation9 + $0xda8] sm:$0xff]  ;;  %v5061_v15 = vld [vmem:[#allocation9 + $0xdc0] sm:$0xff] }
 0x451   :  { %7853 = vmatprep.mubr.bf16.mxu0 %v17277_v45  ;;  %8025 = vmatprep.mubr.bf16.mxu1 %v17277_v45  ;;  %v15197_v31 = vcombine.high %v5046_v23, %v5050_v3  ;;  %v15194_v38 = vcombine.low %v5045_v18, %v5049_v22  ;;  %v15196_v39 = vcombine.low %v5046_v23, %v5050_v3  ;;  %v5077_v60 = vld [vmem:[#allocation9 + $0xe40] sm:$0xff]  ;;  %v5078_v63 = vld [vmem:[#allocation9 + $0xe48] sm:$0xff] }
 0x452   :  { %7854 = vmatmul.mubr.bf16.vlgmr.msra.gmra.mrb[16].mxu0 %v17273_v43  ;;  %8026 = vmatmul.mubr.bf16.vlgmr.msra.gmra.mrb[16].mxu1 %v17273_v43  ;;  %v15203_v5 = vcombine.high %v5053_v33, %v5057_v34  ;;  %v15205_v41 = vcombine.high %v5054_v35, %v5058_v37  ;;  %v15211_v49 = vcombine.high %v5061_v15, %v5065_v62  ;;  %v5081_v61 = vld [vmem:[#allocation9 + $0xe60] sm:$0xff]  ;;  %v5082_v1 = vld [vmem:[#allocation9 + $0xe68] sm:$0xff] }
 0x453   :  { %7865 = vmatpush1.bf16.msra.mxu0 %v15154_v46  ;;  %8037 = vmatpush1.bf16.msra.mxu1 %v15156_v48  ;;  %v15202_v46 = vcombine.low %v5053_v33, %v5057_v34  ;;  %v15204_v48 = vcombine.low %v5054_v35, %v5058_v37  ;;  %v5085_v6 = vld [vmem:[#allocation9 + $0xe80] sm:$0xff]  ;;  %v5086_v10 = vld [vmem:[#allocation9 + $0xe88] sm:$0xff] }
 0x454   :  { %7896 = vmatprep.mubr.bf16.mxu0 %v17283_v24  ;;  %8068 = vmatprep.mubr.bf16.mxu1 %v17283_v24  ;;  %v5089_v8 = vld [vmem:[#allocation9 + $0xea0] sm:$0xff]  ;;  %v5090_v40 = vld [vmem:[#allocation9 + $0xea8] sm:$0xff] }
 0x455   :  { %7866 = vmatprep.subr.bf16.mxu0 %v15163_v50  ;;  %8038 = vmatprep.subr.bf16.mxu1 %v15165_v52  ;;  %v15213_v50 = vcombine.high %v5062_v42, %v5066_v0  ;;  %v5069_v52 = vld [vmem:[#allocation9 + $0xe00] sm:$0xff]  ;;  %v5094_v23 = vld [vmem:[#allocation9 + $0xec8] sm:$0xff] }
 0x456   :  { %v5093_v18 = vld [vmem:[#allocation9 + $0xec0] sm:$0xff]  ;;  %v5098_v3 = vld [vmem:[#allocation9 + $0xee8] sm:$0xff] }
 0x457   :  { %7867 = vmatpush1.bf16.msra.mxu0 %v15162_v55  ;;  %8039 = vmatpush1.bf16.msra.mxu1 %v15164_v56  ;;  %v15210_v55 = vcombine.low %v5061_v15, %v5065_v62  ;;  %v15212_v56 = vcombine.low %v5062_v42, %v5066_v0  ;;  %v5097_v22 = vld [vmem:[#allocation9 + $0xee0] sm:$0xff]  ;;  %v5102_v35 = vld [vmem:[#allocation9 + $0xf08] sm:$0xff] }
 0x458   :  { %7868 = vmatprep.subr.bf16.mxu0 %v15171_v57  ;;  %8040 = vmatprep.subr.bf16.mxu1 %v15173_v58  ;;  %v15219_v57 = vcombine.high %v5069_v52, %v5073_v53  ;;  %v15221_v58 = vcombine.high %v5070_v54, %v5074_v59  ;;  %v5101_v33 = vld [vmem:[#allocation9 + $0xf00] sm:$0xff]  ;;  %v5106_v37 = vld [vmem:[#allocation9 + $0xf28] sm:$0xff] }
 0x459   :  { %v5105_v34 = vld [vmem:[#allocation9 + $0xf20] sm:$0xff]  ;;  %v5110_v42 = vld [vmem:[#allocation9 + $0xf48] sm:$0xff] }
 0x45a   :  { %v5109_v15 = vld [vmem:[#allocation9 + $0xf40] sm:$0xff]  ;;  %v5114_v0 = vld [vmem:[#allocation9 + $0xf68] sm:$0xff] }
 0x45b   :  { %7869 = vmatpush1.bf16.msra.mxu0 %v15170_v47  ;;  %8041 = vmatpush1.bf16.msra.mxu1 %v15172_v20  ;;  %v15218_v47 = vcombine.low %v5069_v52, %v5073_v53  ;;  %v15220_v20 = vcombine.low %v5070_v54, %v5074_v59  ;;  %v5113_v62 = vld [vmem:[#allocation9 + $0xf60] sm:$0xff]  ;;  %v5118_v54 = vld [vmem:[#allocation9 + $0xf88] sm:$0xff] }
 0x45c   :  { %7870 = vmatprep.subr.bf16.mxu0 %v15179_v2  ;;  %8042 = vmatprep.subr.bf16.mxu1 %v15181_v4  ;;  %v15227_v2 = vcombine.high %v5077_v60, %v5081_v61  ;;  %v15229_v4 = vcombine.high %v5078_v63, %v5082_v1  ;;  %v5117_v52 = vld [vmem:[#allocation9 + $0xf80] sm:$0xff]  ;;  %v5122_v59 = vld [vmem:[#allocation9 + $0xfa8] sm:$0xff] }
 0x45d   :  { %v5121_v53 = vld [vmem:[#allocation9 + $0xfa0] sm:$0xff] }
 0x45f   :  { %7871 = vmatpush1.bf16.msra.mxu0 %v15178_v51  ;;  %8043 = vmatpush1.bf16.msra.mxu1 %v15180_v11  ;;  %v15226_v51 = vcombine.low %v5077_v60, %v5081_v61  ;;  %v15228_v11 = vcombine.low %v5078_v63, %v5082_v1  ;;  %v5125_v60 = vld [vmem:[#allocation9 + $0xfc0] sm:$0xff]  ;;  %v5126_v63 = vld [vmem:[#allocation9 + $0xfc8] sm:$0xff] }
 0x460   :  { %7872 = vmatprep.subr.bf16.mxu0 %v15187_v12  ;;  %8044 = vmatprep.subr.bf16.mxu1 %v15189_v17  ;;  %v15235_v12 = vcombine.high %v5085_v6, %v5089_v8  ;;  %v15237_v17 = vcombine.high %v5086_v10, %v5090_v40  ;;  %v5129_v61 = vld [vmem:[#allocation9 + $0xfe0] sm:$0xff]  ;;  %v5130_v1 = vld [vmem:[#allocation9 + $0xfe8] sm:$0xff] }
 0x463   :  { %7873 = vmatpush1.bf16.msra.mxu0 %v15186_v27  ;;  %8045 = vmatpush1.bf16.msra.mxu1 %v15188_v13  ;;  %v15234_v27 = vcombine.low %v5085_v6, %v5089_v8  ;;  %v15236_v13 = vcombine.low %v5086_v10, %v5090_v40  ;;  %v4623_v6 = vld [vmem:[#allocation9 + $0x10] sm:$0xff]  ;;  %v4624_v10 = vld [vmem:[#allocation9 + $0x18] sm:$0xff] }
 0x464   :  { %7874 = vmatprep.subr.bf16.mxu0 %v15195_v30  ;;  %8046 = vmatprep.subr.bf16.mxu1 %v15197_v31  ;;  %v15243_v30 = vcombine.high %v5093_v18, %v5097_v22  ;;  %v15245_v31 = vcombine.high %v5094_v23, %v5098_v3  ;;  %v4627_v8 = vld [vmem:[#allocation9 + $0x30] sm:$0xff]  ;;  %v4628_v40 = vld [vmem:[#allocation9 + $0x38] sm:$0xff] }
 0x467   :  { %7875 = vmatpush1.bf16.msra.mxu0 %v15194_v38  ;;  %8047 = vmatpush1.bf16.msra.mxu1 %v15196_v39  ;;  %v15242_v38 = vcombine.low %v5093_v18, %v5097_v22  ;;  %v15244_v39 = vcombine.low %v5094_v23, %v5098_v3  ;;  %v4631_v18 = vld [vmem:[#allocation9 + $0x50] sm:$0xff]  ;;  %v4632_v23 = vld [vmem:[#allocation9 + $0x58] sm:$0xff] }
 0x468   :  { %7876 = vmatprep.subr.bf16.mxu0 %v15203_v5  ;;  %8048 = vmatprep.subr.bf16.mxu1 %v15205_v41  ;;  %v15251_v5 = vcombine.high %v5101_v33, %v5105_v34  ;;  %v15253_v41 = vcombine.high %v5102_v35, %v5106_v37  ;;  %v4635_v22 = vld [vmem:[#allocation9 + $0x70] sm:$0xff]  ;;  %v4636_v3 = vld [vmem:[#allocation9 + $0x78] sm:$0xff] }
 0x46b   :  { %7877 = vmatpush1.bf16.msra.mxu0 %v15202_v46  ;;  %8049 = vmatpush1.bf16.msra.mxu1 %v15204_v48  ;;  %v15250_v46 = vcombine.low %v5101_v33, %v5105_v34  ;;  %v15252_v48 = vcombine.low %v5102_v35, %v5106_v37  ;;  %v4639_v33 = vld [vmem:[#allocation9 + $0x90] sm:$0xff]  ;;  %v4640_v35 = vld [vmem:[#allocation9 + $0x98] sm:$0xff] }
 0x46c   :  { %7878 = vmatprep.subr.bf16.mxu0 %v15211_v49  ;;  %8050 = vmatprep.subr.bf16.mxu1 %v15213_v50  ;;  %v15259_v49 = vcombine.high %v5109_v15, %v5113_v62  ;;  %v15261_v50 = vcombine.high %v5110_v42, %v5114_v0  ;;  %v4643_v34 = vld [vmem:[#allocation9 + $0xb0] sm:$0xff]  ;;  %v4644_v37 = vld [vmem:[#allocation9 + $0xb8] sm:$0xff] }
 0x46f   :  { %7879 = vmatpush1.bf16.msra.mxu0 %v15210_v55  ;;  %8051 = vmatpush1.bf16.msra.mxu1 %v15212_v56  ;;  %v15258_v55 = vcombine.low %v5109_v15, %v5113_v62  ;;  %v15260_v56 = vcombine.low %v5110_v42, %v5114_v0  ;;  %v4647_v15 = vld [vmem:[#allocation9 + $0xd0] sm:$0xff]  ;;  %v4648_v42 = vld [vmem:[#allocation9 + $0xd8] sm:$0xff] }
 0x470   :  { %7880 = vmatprep.subr.bf16.mxu0 %v15219_v57  ;;  %8052 = vmatprep.subr.bf16.mxu1 %v15221_v58  ;;  %v15267_v57 = vcombine.high %v5117_v52, %v5121_v53  ;;  %v15269_v58 = vcombine.high %v5118_v54, %v5122_v59  ;;  %v4651_v62 = vld [vmem:[#allocation9 + $0xf0] sm:$0xff]  ;;  %v4652_v0 = vld [vmem:[#allocation9 + $0xf8] sm:$0xff] }
 0x473   :  { %7881 = vmatpush1.bf16.msra.mxu0 %v15218_v47  ;;  %8053 = vmatpush1.bf16.msra.mxu1 %v15220_v20  ;;  %v15266_v47 = vcombine.low %v5117_v52, %v5121_v53  ;;  %v15268_v20 = vcombine.low %v5118_v54, %v5122_v59  ;;  %v4655_v52 = vld [vmem:[#allocation9 + $0x110] sm:$0xff]  ;;  %v4660_v54 = vld [vmem:[#allocation9 + $0x138] sm:$0xff]  ;;  %v14798_v59 = vcombine.low %v4647_v15, %v4651_v62 }
 0x474   :  { %7882 = vmatprep.subr.bf16.mxu0 %v15227_v2  ;;  %8054 = vmatprep.subr.bf16.mxu1 %v15229_v4  ;;  %v15275_v2 = vcombine.high %v5125_v60, %v5129_v61  ;;  %v15277_v4 = vcombine.high %v5126_v63, %v5130_v1  ;;  %v4659_v53 = vld [vmem:[#allocation9 + $0x130] sm:$0xff] }
 0x477   :  { %7883 = vmatpush1.bf16.msra.mxu0 %v15226_v51  ;;  %8055 = vmatpush1.bf16.msra.mxu1 %v15228_v11  ;;  %v15274_v51 = vcombine.low %v5125_v60, %v5129_v61  ;;  %v15276_v11 = vcombine.low %v5126_v63, %v5130_v1  ;;  %v4667_v60 = vld [vmem:[#allocation9 + $0x170] sm:$0xff]  ;;  %v4664_v61 = vld [vmem:[#allocation9 + $0x158] sm:$0xff]  ;;  %v14806_v1 = vcombine.low %v4655_v52, %v4659_v53 }
 0x478   :  { %7884 = vmatprep.subr.bf16.mxu0 %v15235_v12  ;;  %8056 = vmatprep.subr.bf16.mxu1 %v15237_v17  ;;  %v14775_v12 = vcombine.high %v4623_v6, %v4627_v8  ;;  %v14777_v17 = vcombine.high %v4624_v10, %v4628_v40  ;;  %v4668_v63 = vld [vmem:[#allocation9 + $0x178] sm:$0xff] }
 0x47b   :  { %7885 = vmatpush1.bf16.msra.mxu0 %v15234_v27  ;;  %8057 = vmatpush1.bf16.msra.mxu1 %v15236_v13  ;;  %v14774_v27 = vcombine.low %v4623_v6, %v4627_v8  ;;  %v14776_v13 = vcombine.low %v4624_v10, %v4628_v40  ;;  %v4675_v6 = vld [vmem:[#allocation9 + $0x1b0] sm:$0xff]  ;;  %v4672_v8 = vld [vmem:[#allocation9 + $0x198] sm:$0xff] }
 0x47c   :  { %7886 = vmatprep.subr.bf16.mxu0 %v15243_v30  ;;  %8058 = vmatprep.subr.bf16.mxu1 %v15245_v31  ;;  %v14783_v30 = vcombine.high %v4631_v18, %v4635_v22  ;;  %v14785_v31 = vcombine.high %v4632_v23, %v4636_v3  ;;  %v4676_v10 = vld [vmem:[#allocation9 + $0x1b8] sm:$0xff] }
 0x47f   :  { %7887 = vmatpush1.bf16.msra.mxu0 %v15242_v38  ;;  %8059 = vmatpush1.bf16.msra.mxu1 %v15244_v39  ;;  %v14782_v38 = vcombine.low %v4631_v18, %v4635_v22  ;;  %v14784_v39 = vcombine.low %v4632_v23, %v4636_v3  ;;  %v4683_v18 = vld [vmem:[#allocation9 + $0x1f0] sm:$0xff]  ;;  %v4680_v22 = vld [vmem:[#allocation9 + $0x1d8] sm:$0xff] }
 0x480   :  { %7888 = vmatprep.subr.bf16.mxu0 %v15251_v5  ;;  %8060 = vmatprep.subr.bf16.mxu1 %v15253_v41  ;;  %v14791_v5 = vcombine.high %v4639_v33, %v4643_v34  ;;  %v14793_v41 = vcombine.high %v4640_v35, %v4644_v37  ;;  %v4684_v23 = vld [vmem:[#allocation9 + $0x1f8] sm:$0xff] }
 0x483   :  { %7889 = vmatpush1.bf16.msra.mxu0 %v15250_v46  ;;  %8061 = vmatpush1.bf16.msra.mxu1 %v15252_v48  ;;  %v14790_v46 = vcombine.low %v4639_v33, %v4643_v34  ;;  %v14792_v48 = vcombine.low %v4640_v35, %v4644_v37  ;;  %v4691_v33 = vld [vmem:[#allocation9 + $0x230] sm:$0xff]  ;;  %v4688_v34 = vld [vmem:[#allocation9 + $0x218] sm:$0xff] }
 0x484   :  { %7890 = vmatprep.subr.bf16.mxu0 %v15259_v49  ;;  %8062 = vmatprep.subr.bf16.mxu1 %v15261_v50  ;;  %v14799_v49 = vcombine.high %v4647_v15, %v4651_v62  ;;  %v14801_v50 = vcombine.high %v4648_v42, %v4652_v0  ;;  %v4692_v35 = vld [vmem:[#allocation9 + $0x238] sm:$0xff]  ;;  %v4699_v15 = vld [vmem:[#allocation9 + $0x270] sm:$0xff] }
 0x485   :  { %v4696_v62 = vld [vmem:[#allocation9 + $0x258] sm:$0xff] }
 0x487   :  { %7891 = vmatpush1.bf16.msra.mxu0 %v15258_v55  ;;  %8063 = vmatpush1.bf16.msra.mxu1 %v15260_v56  ;;  %v14800_v55 = vcombine.low %v4648_v42, %v4652_v0  ;;  %v14807_v56 = vcombine.high %v4655_v52, %v4659_v53  ;;  %v4700_v42 = vld [vmem:[#allocation9 + $0x278] sm:$0xff]  ;;  %v4707_v52 = vld [vmem:[#allocation9 + $0x2b0] sm:$0xff] }
 0x488   :  { %7892 = vmatprep.subr.bf16.mxu0 %v15267_v57  ;;  %8064 = vmatprep.subr.bf16.mxu1 %v15269_v58  ;;  %v4663_v58 = vld [vmem:[#allocation9 + $0x150] sm:$0xff]  ;;  %v4704_v53 = vld [vmem:[#allocation9 + $0x298] sm:$0xff] }
 0x489   :  { %v14814_v40 = vcombine.low %v4663_v58, %v4667_v60 }
 0x48b   :  { %7893 = vmatpush1.bf16.msra.mxu0 %v15266_v47  ;;  %8065 = vmatpush1.bf16.msra.mxu1 %v15268_v20  ;;  %v14815_v20 = vcombine.high %v4663_v58, %v4667_v60  ;;  %v4715_v58 = vld [vmem:[#allocation9 + $0x2f0] sm:$0xff]  ;;  %v4712_v60 = vld [vmem:[#allocation9 + $0x2d8] sm:$0xff] }
 0x48c   :  { %7894 = vmatprep.subr.bf16.mxu0 %v15275_v2  ;;  %8066 = vmatprep.subr.bf16.mxu1 %v15277_v4  ;;  %v14817_v2 = vcombine.high %v4664_v61, %v4668_v63  ;;  %v4671_v4 = vld [vmem:[#allocation9 + $0x190] sm:$0xff] }
 0x48d   :  { %v14822_v3 = vcombine.low %v4671_v4, %v4675_v6 }
 0x48f   :  { %7895 = vmatpush1.bf16.msra.mxu0 %v15274_v51  ;;  %8067 = vmatpush1.bf16.msra.mxu1 %v15276_v11  ;;  %v14816_v51 = vcombine.low %v4664_v61, %v4668_v63  ;;  %v14823_v11 = vcombine.high %v4671_v4, %v4675_v6  ;;  %v4716_v61 = vld [vmem:[#allocation9 + $0x2f8] sm:$0xff]  ;;  %v4723_v4 = vld [vmem:[#allocation9 + $0x330] sm:$0xff] }
 0x490   :  { %8079 = vmatprep.subr.bf16.mxu0 %v14775_v12  ;;  %8251 = vmatprep.subr.bf16.mxu1 %v14777_v17  ;;  %v14825_v12 = vcombine.high %v4672_v8, %v4676_v10  ;;  %v4679_v17 = vld [vmem:[#allocation9 + $0x1d0] sm:$0xff]  ;;  %v4720_v6 = vld [vmem:[#allocation9 + $0x318] sm:$0xff] }
 0x491   :  { %v14830_v37 = vcombine.low %v4679_v17, %v4683_v18 }
 0x492   :  { %7897 = vmatmul.mubr.bf16.vlgmr.msra.gmra.mrb[16].mxu0 %v17275_v44  ;;  %8069 = vmatmul.mubr.bf16.vlgmr.msra.gmra.mrb[16].mxu1 %v17275_v44 }
 0x493   :  { %8080 = vmatpush1.bf16.msra.mxu0 %v14774_v27  ;;  %8111 = vmatprep.mubr.bf16.mxu0 %v17243_v28  ;;  %v14824_v27 = vcombine.low %v4672_v8, %v4676_v10  ;;  %v4724_v8 = vld [vmem:[#allocation9 + $0x338] sm:$0xff] }
 0x494   :  { %8252 = vmatpush1.bf16.msra.mxu1 %v14776_v13  ;;  %8283 = vmatprep.mubr.bf16.mxu1 %v17243_v28  ;;  %v4656_v28 = vld [vmem:[#allocation9 + $0x118] sm:$0xff]  ;;  %v14831_v13 = vcombine.high %v4679_v17, %v4683_v18  ;;  %v4731_v17 = vld [vmem:[#allocation9 + $0x370] sm:$0xff] }
 0x495   :  { %8081 = vmatprep.subr.bf16.mxu0 %v14783_v30  ;;  %8253 = vmatprep.subr.bf16.mxu1 %v14785_v31  ;;  %v14809_v57 = vcombine.high %v4656_v28, %v4660_v54  ;;  %v14808_v47 = vcombine.low %v4656_v28, %v4660_v54  ;;  %v14833_v30 = vcombine.high %v4680_v22, %v4684_v23  ;;  %v4687_v31 = vld [vmem:[#allocation9 + $0x210] sm:$0xff]  ;;  %v4708_v28 = vld [vmem:[#allocation9 + $0x2b8] sm:$0xff] }
 0x496   :  { %v14838_v0 = vcombine.low %v4687_v31, %v4691_v33  ;;  %v4728_v18 = vld [vmem:[#allocation9 + $0x358] sm:$0xff] }
 0x497   :  { %8082 = vmatpush1.bf16.msra.mxu0 %v14782_v38  ;;  %v14832_v38 = vcombine.low %v4680_v22, %v4684_v23  ;;  %v4732_v22 = vld [vmem:[#allocation9 + $0x378] sm:$0xff] }
 0x498   :  { %8254 = vmatpush1.bf16.msra.mxu1 %v14784_v39  ;;  %8083 = vmatprep.subr.bf16.mxu0 %v14791_v5  ;;  %v14839_v39 = vcombine.high %v4687_v31, %v4691_v33  ;;  %v14841_v5 = vcombine.high %v4688_v34, %v4692_v35  ;;  %v4739_v31 = vld [vmem:[#allocation9 + $0x3b0] sm:$0xff]  ;;  %v4736_v33 = vld [vmem:[#allocation9 + $0x398] sm:$0xff] }
 0x499   :  { %8255 = vmatprep.subr.bf16.mxu1 %v14793_v41  ;;  %v4695_v41 = vld [vmem:[#allocation9 + $0x250] sm:$0xff] }
 0x49a   :  { %v14846_v54 = vcombine.low %v4695_v41, %v4699_v15 }
 0x49b   :  { %8084 = vmatpush1.bf16.msra.mxu0 %v14790_v46  ;;  %v14840_v46 = vcombine.low %v4688_v34, %v4692_v35  ;;  %v4740_v34 = vld [vmem:[#allocation9 + $0x3b8] sm:$0xff] }
 0x49c   :  { %8256 = vmatpush1.bf16.msra.mxu1 %v14792_v48  ;;  %8085 = vmatprep.subr.bf16.mxu0 %v14799_v49  ;;  %v14847_v48 = vcombine.high %v4695_v41, %v4699_v15  ;;  %v14849_v49 = vcombine.high %v4696_v62, %v4700_v42  ;;  %v4747_v41 = vld [vmem:[#allocation9 + $0x3f0] sm:$0xff]  ;;  %v4744_v15 = vld [vmem:[#allocation9 + $0x3d8] sm:$0xff] }
 0x49d   :  { %8257 = vmatprep.subr.bf16.mxu1 %v14801_v50  ;;  %v4703_v50 = vld [vmem:[#allocation9 + $0x290] sm:$0xff] }
 0x49e   :  { %v14854_v63 = vcombine.low %v4703_v50, %v4707_v52 }
 0x49f   :  { %8086 = vmatpush1.bf16.msra.mxu0 %v14798_v59  ;;  %v14848_v59 = vcombine.low %v4696_v62, %v4700_v42  ;;  %v4748_v62 = vld [vmem:[#allocation9 + $0x3f8] sm:$0xff] }
 0x4a0   :  { %8258 = vmatpush1.bf16.msra.mxu1 %v14800_v55  ;;  %8087 = vmatprep.subr.bf16.mxu0 %v14807_v56  ;;  %v14855_v55 = vcombine.high %v4703_v50, %v4707_v52  ;;  %v14857_v56 = vcombine.high %v4704_v53, %v4708_v28  ;;  %v4755_v50 = vld [vmem:[#allocation9 + $0x430] sm:$0xff]  ;;  %v4752_v52 = vld [vmem:[#allocation9 + $0x418] sm:$0xff] }
 0x4a1   :  { %8259 = vmatprep.subr.bf16.mxu1 %v14809_v57  ;;  %v4711_v57 = vld [vmem:[#allocation9 + $0x2d0] sm:$0xff] }
 0x4a2   :  { %v14862_v10 = vcombine.low %v4711_v57, %v4715_v58 }
 0x4a3   :  { %8088 = vmatpush1.bf16.msra.mxu0 %v14806_v1  ;;  %v14856_v1 = vcombine.low %v4704_v53, %v4708_v28  ;;  %v4756_v53 = vld [vmem:[#allocation9 + $0x438] sm:$0xff] }
 0x4a4   :  { %8260 = vmatpush1.bf16.msra.mxu1 %v14808_v47  ;;  %8089 = vmatprep.subr.bf16.mxu0 %v14815_v20  ;;  %v14863_v47 = vcombine.high %v4711_v57, %v4715_v58  ;;  %v14865_v20 = vcombine.high %v4712_v60, %v4716_v61  ;;  %v4763_v57 = vld [vmem:[#allocation9 + $0x470] sm:$0xff] }
 0x4a5   :  { %8261 = vmatprep.subr.bf16.mxu1 %v14817_v2  ;;  %v4719_v2 = vld [vmem:[#allocation9 + $0x310] sm:$0xff] }
 0x4a6   :  { %v14870_v23 = vcombine.low %v4719_v2, %v4723_v4 }
 0x4a7   :  { %8090 = vmatpush1.bf16.msra.mxu0 %v14814_v40  ;;  %v14864_v40 = vcombine.low %v4712_v60, %v4716_v61  ;;  %v4760_v60 = vld [vmem:[#allocation9 + $0x458] sm:$0xff] }
 0x4a8   :  { %8262 = vmatpush1.bf16.msra.mxu1 %v14816_v51  ;;  %8091 = vmatprep.subr.bf16.mxu0 %v14823_v11  ;;  %v14871_v51 = vcombine.high %v4719_v2, %v4723_v4  ;;  %v14873_v11 = vcombine.high %v4720_v6, %v4724_v8  ;;  %v4764_v61 = vld [vmem:[#allocation9 + $0x478] sm:$0xff] }
 0x4a9   :  { %8263 = vmatprep.subr.bf16.mxu1 %v14825_v12  ;;  %v4727_v12 = vld [vmem:[#allocation9 + $0x350] sm:$0xff]  ;;  %v14913_v2 = vcombine.high %v4760_v60, %v4764_v61  ;;  %v4768_v4 = vld [vmem:[#allocation9 + $0x498] sm:$0xff] }
 0x4aa   :  { %v14878_v35 = vcombine.low %v4727_v12, %v4731_v17 }
 0x4ab   :  { %8092 = vmatpush1.bf16.msra.mxu0 %v14822_v3  ;;  %v14872_v3 = vcombine.low %v4720_v6, %v4724_v8  ;;  %v4772_v6 = vld [vmem:[#allocation9 + $0x4b8] sm:$0xff] }
 0x4ac   :  { %8264 = vmatpush1.bf16.msra.mxu1 %v14824_v27  ;;  %8093 = vmatprep.subr.bf16.mxu0 %v14831_v13  ;;  %v14879_v27 = vcombine.high %v4727_v12, %v4731_v17  ;;  %v14881_v13 = vcombine.high %v4728_v18, %v4732_v22  ;;  %v4779_v12 = vld [vmem:[#allocation9 + $0x4f0] sm:$0xff]  ;;  %v4776_v17 = vld [vmem:[#allocation9 + $0x4d8] sm:$0xff] }
 0x4ad   :  { %8265 = vmatprep.subr.bf16.mxu1 %v14833_v30  ;;  %v4735_v30 = vld [vmem:[#allocation9 + $0x390] sm:$0xff] }
 0x4ae   :  { %v14886_v42 = vcombine.low %v4735_v30, %v4739_v31 }
 0x4af   :  { %8094 = vmatpush1.bf16.msra.mxu0 %v14830_v37  ;;  %v14880_v37 = vcombine.low %v4728_v18, %v4732_v22  ;;  %v4780_v18 = vld [vmem:[#allocation9 + $0x4f8] sm:$0xff] }
 0x4b0   :  { %8266 = vmatpush1.bf16.msra.mxu1 %v14832_v38  ;;  %8095 = vmatprep.subr.bf16.mxu0 %v14839_v39  ;;  %v14887_v38 = vcombine.high %v4735_v30, %v4739_v31  ;;  %v14889_v39 = vcombine.high %v4736_v33, %v4740_v34  ;;  %v4784_v30 = vld [vmem:[#allocation9 + $0x518] sm:$0xff] }
 0x4b1   :  { %8267 = vmatprep.subr.bf16.mxu1 %v14841_v5  ;;  %v4743_v5 = vld [vmem:[#allocation9 + $0x3d0] sm:$0xff]  ;;  %v4788_v31 = vld [vmem:[#allocation9 + $0x538] sm:$0xff] }
 0x4b2   :  { %v14894_v28 = vcombine.low %v4743_v5, %v4747_v41 }
 0x4b3   :  { %8096 = vmatpush1.bf16.msra.mxu0 %v14838_v0  ;;  %v14888_v0 = vcombine.low %v4736_v33, %v4740_v34  ;;  %v14928_v33 = vcombine.low %v4776_v17, %v4780_v18 }
 0x4b4   :  { %8268 = vmatpush1.bf16.msra.mxu1 %v14840_v46  ;;  %8097 = vmatprep.subr.bf16.mxu0 %v14847_v48  ;;  %v14895_v46 = vcombine.high %v4743_v5, %v4747_v41  ;;  %v14897_v48 = vcombine.high %v4744_v15, %v4748_v62  ;;  %v4796_v5 = vld [vmem:[#allocation9 + $0x578] sm:$0xff] }
 0x4b5   :  { %8269 = vmatprep.subr.bf16.mxu1 %v14849_v49  ;;  %v4751_v49 = vld [vmem:[#allocation9 + $0x410] sm:$0xff] }
 0x4b6   :  { %v14902_v58 = vcombine.low %v4751_v49, %v4755_v50 }
 0x4b7   :  { %8098 = vmatpush1.bf16.msra.mxu0 %v14846_v54  ;;  %v14896_v54 = vcombine.low %v4744_v15, %v4748_v62  ;;  %v14936_v15 = vcombine.low %v4784_v30, %v4788_v31 }
 0x4b8   :  { %8270 = vmatpush1.bf16.msra.mxu1 %v14848_v59  ;;  %8099 = vmatprep.subr.bf16.mxu0 %v14855_v55  ;;  %v14903_v59 = vcombine.high %v4751_v49, %v4755_v50  ;;  %v14905_v55 = vcombine.high %v4752_v52, %v4756_v53  ;;  %v4804_v49 = vld [vmem:[#allocation9 + $0x5b8] sm:$0xff] }
 0x4b9   :  { %8271 = vmatprep.subr.bf16.mxu1 %v14857_v56  ;;  %v4759_v56 = vld [vmem:[#allocation9 + $0x450] sm:$0xff] }
 0x4ba   :  { %v14910_v8 = vcombine.low %v4759_v56, %v4763_v57 }
 0x4bb   :  { %8100 = vmatpush1.bf16.msra.mxu0 %v14854_v63  ;;  %v14904_v63 = vcombine.low %v4752_v52, %v4756_v53 }
 0x4bc   :  { %8272 = vmatpush1.bf16.msra.mxu1 %v14856_v1  ;;  %8101 = vmatprep.subr.bf16.mxu0 %v14863_v47  ;;  %v14911_v1 = vcombine.high %v4759_v56, %v4763_v57  ;;  %v4767_v47 = vld [vmem:[#allocation9 + $0x490] sm:$0xff]  ;;  %v4812_v56 = vld [vmem:[#allocation9 + $0x5f8] sm:$0xff] }
 0x4bd   :  { %8273 = vmatprep.subr.bf16.mxu1 %v14865_v20  ;;  %v4771_v20 = vld [vmem:[#allocation9 + $0x4b0] sm:$0xff] }
 0x4be   :  { %v14918_v22 = vcombine.low %v4767_v47, %v4771_v20 }
 0x4bf   :  { %8102 = vmatpush1.bf16.msra.mxu0 %v14862_v10  ;;  %v14912_v10 = vcombine.low %v4760_v60, %v4764_v61 }
 0x4c0   :  { %8274 = vmatpush1.bf16.msra.mxu1 %v14864_v40  ;;  %8103 = vmatprep.subr.bf16.mxu0 %v14871_v51  ;;  %v14919_v40 = vcombine.high %v4767_v47, %v4771_v20  ;;  %v14921_v51 = vcombine.high %v4768_v4, %v4772_v6  ;;  %v4816_v47 = vld [vmem:[#allocation9 + $0x618] sm:$0xff] }
 0x4c1   :  { %8275 = vmatprep.subr.bf16.mxu1 %v14873_v11  ;;  %v4775_v11 = vld [vmem:[#allocation9 + $0x4d0] sm:$0xff]  ;;  %v4820_v20 = vld [vmem:[#allocation9 + $0x638] sm:$0xff] }
 0x4c3   :  { %8104 = vmatpush1.bf16.msra.mxu0 %v14870_v23  ;;  %v14927_v23 = vcombine.high %v4775_v11, %v4779_v12 }
 0x4c4   :  { %8276 = vmatpush1.bf16.msra.mxu1 %v14872_v3  ;;  %8105 = vmatprep.subr.bf16.mxu0 %v14879_v27  ;;  %v14929_v3 = vcombine.high %v4776_v17, %v4780_v18  ;;  %v4783_v27 = vld [vmem:[#allocation9 + $0x510] sm:$0xff]  ;;  %v14968_v17 = vcombine.low %v4816_v47, %v4820_v20 }
 0x4c5   :  { %8277 = vmatprep.subr.bf16.mxu1 %v14881_v13  ;;  %v4787_v13 = vld [vmem:[#allocation9 + $0x530] sm:$0xff] }
 0x4c6   :  { %v14935_v34 = vcombine.high %v4783_v27, %v4787_v13  ;;  %v14934_v41 = vcombine.low %v4783_v27, %v4787_v13  ;;  %v4836_v27 = vld [vmem:[#allocation9 + $0x6b8] sm:$0xff] }
 0x4c7   :  { %8106 = vmatpush1.bf16.msra.mxu0 %v14878_v35  ;;  %v14937_v35 = vcombine.high %v4784_v30, %v4788_v31 }
 0x4c8   :  { %8278 = vmatpush1.bf16.msra.mxu1 %v14880_v37  ;;  %8107 = vmatprep.subr.bf16.mxu0 %v14887_v38  ;;  %v4791_v37 = vld [vmem:[#allocation9 + $0x550] sm:$0xff] }
 0x4c9   :  { %8279 = vmatprep.subr.bf16.mxu1 %v14889_v39  ;;  %v4795_v38 = vld [vmem:[#allocation9 + $0x570] sm:$0xff]  ;;  %v4792_v39 = vld [vmem:[#allocation9 + $0x558] sm:$0xff] }
 0x4ca   :  { %v14943_v62 = vcombine.high %v4791_v37, %v4795_v38  ;;  %v14942_v50 = vcombine.low %v4791_v37, %v4795_v38  ;;  %v14944_v52 = vcombine.low %v4792_v39, %v4796_v5  ;;  %v4844_v37 = vld [vmem:[#allocation9 + $0x6f8] sm:$0xff] }
 0x4cb   :  { %8108 = vmatpush1.bf16.msra.mxu0 %v14886_v42  ;;  %v14945_v42 = vcombine.high %v4792_v39, %v4796_v5 }
 0x4cc   :  { %8280 = vmatpush1.bf16.msra.mxu1 %v14888_v0  ;;  %8109 = vmatprep.subr.bf16.mxu0 %v14895_v46  ;;  %v4799_v0 = vld [vmem:[#allocation9 + $0x590] sm:$0xff] }
 0x4cd   :  { %8281 = vmatprep.subr.bf16.mxu1 %v14897_v48  ;;  %v4803_v46 = vld [vmem:[#allocation9 + $0x5b0] sm:$0xff]  ;;  %v4800_v48 = vld [vmem:[#allocation9 + $0x598] sm:$0xff] }
 0x4ce   :  { %v14951_v53 = vcombine.high %v4799_v0, %v4803_v46  ;;  %v14950_v57 = vcombine.low %v4799_v0, %v4803_v46  ;;  %v4852_v0 = vld [vmem:[#allocation9 + $0x738] sm:$0xff] }
 0x4cf   :  { %8110 = vmatpush1.bf16.msra.mxu0 %v14894_v28  ;;  %v14953_v28 = vcombine.high %v4800_v48, %v4804_v49 }
 0x4d0   :  { %8282 = vmatpush1.bf16.msra.mxu1 %v14896_v54  ;;  %8122 = vmatprep.subr.bf16.mxu0 %v14903_v59  ;;  %v4807_v54 = vld [vmem:[#allocation9 + $0x5d0] sm:$0xff] }
 0x4d1   :  { %8294 = vmatprep.subr.bf16.mxu1 %v14905_v55  ;;  %v4811_v59 = vld [vmem:[#allocation9 + $0x5f0] sm:$0xff]  ;;  %v4808_v55 = vld [vmem:[#allocation9 + $0x5d8] sm:$0xff] }
 0x4d2   :  { %8112 = vmatmul.mubr.bf16.vlgmr.msra.gmra.mrb[20].mxu0 %v17239_v25  ;;  %v14959_v60 = vcombine.high %v4807_v54, %v4811_v59  ;;  %v14961_v61 = vcombine.high %v4808_v55, %v4812_v56 }
 0x4d3   :  { %8284 = vmatmul.mubr.bf16.vlgmr.msra.gmra.mrb[20].mxu1 %v17239_v25  ;;  %8123 = vmatpush1.bf16.msra.mxu0 %v14902_v58  ;;  %v14920_v25 = vcombine.low %v4768_v4, %v4772_v6  ;;  %v14952_v58 = vcombine.low %v4800_v48, %v4804_v49  ;;  %v14960_v4 = vcombine.low %v4808_v55, %v4812_v56 }
 0x4d4   :  { %8154 = vmatprep.mubr.bf16.mxu0 %v17245_v29  ;;  %8295 = vmatpush1.bf16.msra.mxu1 %v14904_v63  ;;  %v4815_v63 = vld [vmem:[#allocation9 + $0x610] sm:$0xff] }
 0x4d5   :  { %8326 = vmatprep.mubr.bf16.mxu1 %v17245_v29  ;;  %8124 = vmatprep.subr.bf16.mxu0 %v14911_v1  ;;  %v14926_v29 = vcombine.low %v4775_v11, %v4779_v12  ;;  %v4819_v1 = vld [vmem:[#allocation9 + $0x630] sm:$0xff]  ;;  %v4828_v11 = vld [vmem:[#allocation9 + $0x678] sm:$0xff] }
 0x4d6   :  { %8296 = vmatprep.subr.bf16.mxu1 %v14913_v2  ;;  %v14958_v2 = vcombine.low %v4807_v54, %v4811_v59  ;;  %v14967_v6 = vcombine.high %v4815_v63, %v4819_v1  ;;  %v14966_v12 = vcombine.low %v4815_v63, %v4819_v1  ;;  %v4860_v54 = vld [vmem:[#allocation9 + $0x778] sm:$0xff] }
 0x4d7   :  { %8125 = vmatpush1.bf16.msra.mxu0 %v14910_v8  ;;  %v14969_v8 = vcombine.high %v4816_v47, %v4820_v20  ;;  %v4868_v63 = vld [vmem:[#allocation9 + $0x7b8] sm:$0xff] }
 0x4d8   :  { %8297 = vmatpush1.bf16.msra.mxu1 %v14912_v10  ;;  %8126 = vmatprep.subr.bf16.mxu0 %v14919_v40  ;;  %v4823_v10 = vld [vmem:[#allocation9 + $0x650] sm:$0xff] }
 0x4d9   :  { %8298 = vmatprep.subr.bf16.mxu1 %v14921_v51  ;;  %v4827_v40 = vld [vmem:[#allocation9 + $0x670] sm:$0xff]  ;;  %v4824_v51 = vld [vmem:[#allocation9 + $0x658] sm:$0xff] }
 0x4da   :  { %v14975_v18 = vcombine.high %v4823_v10, %v4827_v40  ;;  %v14974_v13 = vcombine.low %v4823_v10, %v4827_v40  ;;  %v14976_v30 = vcombine.low %v4824_v51, %v4828_v11  ;;  %v4876_v10 = vld [vmem:[#allocation9 + $0x7f8] sm:$0xff] }
 0x4db   :  { %8127 = vmatpush1.bf16.msra.mxu0 %v14918_v22  ;;  %v14977_v22 = vcombine.high %v4824_v51, %v4828_v11 }
 0x4dc   :  { %8299 = vmatpush1.bf16.msra.mxu1 %v14920_v25  ;;  %8128 = vmatprep.subr.bf16.mxu0 %v14927_v23  ;;  %v4831_v25 = vld [vmem:[#allocation9 + $0x690] sm:$0xff] }
 0x4dd   :  { %8300 = vmatprep.subr.bf16.mxu1 %v14929_v3  ;;  %v4835_v23 = vld [vmem:[#allocation9 + $0x6b0] sm:$0xff]  ;;  %v4832_v3 = vld [vmem:[#allocation9 + $0x698] sm:$0xff] }
 0x4de   :  { %v14983_v31 = vcombine.high %v4831_v25, %v4835_v23  ;;  %v14982_v38 = vcombine.low %v4831_v25, %v4835_v23  ;;  %v14984_v39 = vcombine.low %v4832_v3, %v4836_v27  ;;  %v4884_v25 = vld [vmem:[#allocation9 + $0x838] sm:$0xff] }
 0x4df   :  { %8129 = vmatpush1.bf16.msra.mxu0 %v14926_v29  ;;  %v14985_v29 = vcombine.high %v4832_v3, %v4836_v27 }
 0x4e0   :  { %8301 = vmatpush1.bf16.msra.mxu1 %v14928_v33  ;;  %8130 = vmatprep.subr.bf16.mxu0 %v14935_v34  ;;  %v4839_v33 = vld [vmem:[#allocation9 + $0x6d0] sm:$0xff] }
 0x4e1   :  { %8302 = vmatprep.subr.bf16.mxu1 %v14937_v35  ;;  %v4843_v34 = vld [vmem:[#allocation9 + $0x6f0] sm:$0xff]  ;;  %v4840_v35 = vld [vmem:[#allocation9 + $0x6d8] sm:$0xff] }
 0x4e2   :  { %v14991_v5 = vcombine.high %v4839_v33, %v4843_v34  ;;  %v14990_v46 = vcombine.low %v4839_v33, %v4843_v34  ;;  %v14992_v48 = vcombine.low %v4840_v35, %v4844_v37  ;;  %v4888_v33 = vld [vmem:[#allocation9 + $0x858] sm:$0xff] }
 0x4e3   :  { %8131 = vmatpush1.bf16.msra.mxu0 %v14934_v41  ;;  %v14993_v41 = vcombine.high %v4840_v35, %v4844_v37  ;;  %v4892_v34 = vld [vmem:[#allocation9 + $0x878] sm:$0xff] }
 0x4e4   :  { %8303 = vmatpush1.bf16.msra.mxu1 %v14936_v15  ;;  %8132 = vmatprep.subr.bf16.mxu0 %v14943_v62  ;;  %v4847_v15 = vld [vmem:[#allocation9 + $0x710] sm:$0xff] }
 0x4e5   :  { %8304 = vmatprep.subr.bf16.mxu1 %v14945_v42  ;;  %v4851_v62 = vld [vmem:[#allocation9 + $0x730] sm:$0xff]  ;;  %v4848_v42 = vld [vmem:[#allocation9 + $0x718] sm:$0xff] }
 0x4e6   :  { %v14999_v49 = vcombine.high %v4847_v15, %v4851_v62  ;;  %v14998_v59 = vcombine.low %v4847_v15, %v4851_v62  ;;  %v15000_v55 = vcombine.low %v4848_v42, %v4852_v0  ;;  %v4900_v15 = vld [vmem:[#allocation9 + $0x8b8] sm:$0xff] }
 0x4e7   :  { %8133 = vmatpush1.bf16.msra.mxu0 %v14942_v50  ;;  %v15001_v50 = vcombine.high %v4848_v42, %v4852_v0  ;;  %v15040_v42 = vcombine.low %v4888_v33, %v4892_v34 }
 0x4e8   :  { %8305 = vmatpush1.bf16.msra.mxu1 %v14944_v52  ;;  %8134 = vmatprep.subr.bf16.mxu0 %v14951_v53  ;;  %v4855_v52 = vld [vmem:[#allocation9 + $0x750] sm:$0xff] }
 0x4e9   :  { %8306 = vmatprep.subr.bf16.mxu1 %v14953_v28  ;;  %v4859_v53 = vld [vmem:[#allocation9 + $0x770] sm:$0xff]  ;;  %v4856_v28 = vld [vmem:[#allocation9 + $0x758] sm:$0xff] }
 0x4ea   :  { %v15007_v56 = vcombine.high %v4855_v52, %v4859_v53  ;;  %v15006_v1 = vcombine.low %v4855_v52, %v4859_v53  ;;  %v15008_v47 = vcombine.low %v4856_v28, %v4860_v54  ;;  %v4908_v52 = vld [vmem:[#allocation9 + $0x8f8] sm:$0xff] }
 0x4eb   :  { %8135 = vmatpush1.bf16.msra.mxu0 %v14950_v57  ;;  %v15009_v57 = vcombine.high %v4856_v28, %v4860_v54 }
 0x4ec   :  { %8307 = vmatpush1.bf16.msra.mxu1 %v14952_v58  ;;  %8136 = vmatprep.subr.bf16.mxu0 %v14959_v60  ;;  %v4863_v58 = vld [vmem:[#allocation9 + $0x790] sm:$0xff] }
 0x4ed   :  { %8308 = vmatprep.subr.bf16.mxu1 %v14961_v61  ;;  %v4867_v60 = vld [vmem:[#allocation9 + $0x7b0] sm:$0xff]  ;;  %v4864_v61 = vld [vmem:[#allocation9 + $0x798] sm:$0xff] }
 0x4ee   :  { %v15015_v20 = vcombine.high %v4863_v58, %v4867_v60  ;;  %v15014_v40 = vcombine.low %v4863_v58, %v4867_v60  ;;  %v15016_v51 = vcombine.low %v4864_v61, %v4868_v63 }
 0x4ef   :  { %8137 = vmatpush1.bf16.msra.mxu0 %v14958_v2  ;;  %v15017_v2 = vcombine.high %v4864_v61, %v4868_v63  ;;  %v4919_v63 = vld [vmem:[#allocation9 + $0x950] sm:$0xff] }
 0x4f0   :  { %8309 = vmatpush1.bf16.msra.mxu1 %v14960_v4  ;;  %8138 = vmatprep.subr.bf16.mxu0 %v14967_v6  ;;  %v4871_v4 = vld [vmem:[#allocation9 + $0x7d0] sm:$0xff] }
 0x4f1   :  { %8310 = vmatprep.subr.bf16.mxu1 %v14969_v8  ;;  %v4875_v6 = vld [vmem:[#allocation9 + $0x7f0] sm:$0xff]  ;;  %v4872_v8 = vld [vmem:[#allocation9 + $0x7d8] sm:$0xff] }
 0x4f2   :  { %v15023_v11 = vcombine.high %v4871_v4, %v4875_v6  ;;  %v15022_v23 = vcombine.low %v4871_v4, %v4875_v6  ;;  %v15024_v3 = vcombine.low %v4872_v8, %v4876_v10 }
 0x4f3   :  { %8139 = vmatpush1.bf16.msra.mxu0 %v14966_v12  ;;  %v15025_v12 = vcombine.high %v4872_v8, %v4876_v10  ;;  %v4927_v10 = vld [vmem:[#allocation9 + $0x990] sm:$0xff] }
 0x4f4   :  { %8311 = vmatpush1.bf16.msra.mxu1 %v14968_v17  ;;  %8140 = vmatprep.subr.bf16.mxu0 %v14975_v18  ;;  %v4879_v17 = vld [vmem:[#allocation9 + $0x810] sm:$0xff] }
 0x4f5   :  { %8312 = vmatprep.subr.bf16.mxu1 %v14977_v22  ;;  %v4883_v18 = vld [vmem:[#allocation9 + $0x830] sm:$0xff]  ;;  %v4880_v22 = vld [vmem:[#allocation9 + $0x818] sm:$0xff] }
 0x4f6   :  { %v15031_v27 = vcombine.high %v4879_v17, %v4883_v18  ;;  %v15032_v35 = vcombine.low %v4880_v22, %v4884_v25 }
 0x4f7   :  { %8141 = vmatpush1.bf16.msra.mxu0 %v14974_v13  ;;  %v15033_v13 = vcombine.high %v4880_v22, %v4884_v25  ;;  %v4935_v25 = vld [vmem:[#allocation9 + $0x9d0] sm:$0xff] }
 0x4f8   :  { %8313 = vmatpush1.bf16.msra.mxu1 %v14976_v30  ;;  %8142 = vmatprep.subr.bf16.mxu0 %v14983_v31  ;;  %v4887_v30 = vld [vmem:[#allocation9 + $0x850] sm:$0xff] }
 0x4f9   :  { %8314 = vmatprep.subr.bf16.mxu1 %v14985_v29  ;;  %v4891_v31 = vld [vmem:[#allocation9 + $0x870] sm:$0xff]  ;;  %v15030_v29 = vcombine.low %v4879_v17, %v4883_v18 }
 0x4fa   :  { %v15039_v37 = vcombine.high %v4887_v30, %v4891_v31  ;;  %v15038_v62 = vcombine.low %v4887_v30, %v4891_v31 }
 0x4fb   :  { %8143 = vmatpush1.bf16.msra.mxu0 %v14982_v38  ;;  %v4895_v38 = vld [vmem:[#allocation9 + $0x890] sm:$0xff] }
 0x4fc   :  { %8315 = vmatpush1.bf16.msra.mxu1 %v14984_v39  ;;  %8144 = vmatprep.subr.bf16.mxu0 %v14991_v5  ;;  %v4899_v39 = vld [vmem:[#allocation9 + $0x8b0] sm:$0xff]  ;;  %v15041_v5 = vcombine.high %v4888_v33, %v4892_v34 }
 0x4fd   :  { %8316 = vmatprep.subr.bf16.mxu1 %v14993_v41  ;;  %v4896_v41 = vld [vmem:[#allocation9 + $0x898] sm:$0xff]  ;;  %v15047_v0 = vcombine.high %v4895_v38, %v4899_v39  ;;  %v15046_v53 = vcombine.low %v4895_v38, %v4899_v39  ;;  %v4943_v33 = vld [vmem:[#allocation9 + $0xa10] sm:$0xff] }
 0x4fe   :  { %v4947_v34 = vld [vmem:[#allocation9 + $0xa30] sm:$0xff] }
 0x4ff   :  { %8145 = vmatpush1.bf16.msra.mxu0 %v14990_v46  ;;  %v15049_v46 = vcombine.high %v4896_v41, %v4900_v15 }
 0x500   :  { %8317 = vmatpush1.bf16.msra.mxu1 %v14992_v48  ;;  %8146 = vmatprep.subr.bf16.mxu0 %v14999_v49  ;;  %v4903_v48 = vld [vmem:[#allocation9 + $0x8d0] sm:$0xff] }
 0x501   :  { %8318 = vmatprep.subr.bf16.mxu1 %v15001_v50  ;;  %v4907_v49 = vld [vmem:[#allocation9 + $0x8f0] sm:$0xff]  ;;  %v4904_v50 = vld [vmem:[#allocation9 + $0x8d8] sm:$0xff] }
 0x502   :  { %v15055_v28 = vcombine.high %v4903_v48, %v4907_v49  ;;  %v15057_v54 = vcombine.high %v4904_v50, %v4908_v52  ;;  %v15056_v58 = vcombine.low %v4904_v50, %v4908_v52  ;;  %v4959_v52 = vld [vmem:[#allocation9 + $0xa90] sm:$0xff] }
 0x503   :  { %8147 = vmatpush1.bf16.msra.mxu0 %v14998_v59  ;;  %v4911_v59 = vld [vmem:[#allocation9 + $0x910] sm:$0xff] }
 0x504   :  { %8319 = vmatpush1.bf16.msra.mxu1 %v15000_v55  ;;  %8148 = vmatprep.subr.bf16.mxu0 %v15007_v56  ;;  %v4915_v55 = vld [vmem:[#allocation9 + $0x930] sm:$0xff]  ;;  %v4912_v56 = vld [vmem:[#allocation9 + $0x918] sm:$0xff] }
 0x505   :  { %8320 = vmatprep.subr.bf16.mxu1 %v15009_v57  ;;  %v4916_v57 = vld [vmem:[#allocation9 + $0x938] sm:$0xff]  ;;  %v15063_v60 = vcombine.high %v4911_v59, %v4915_v55 }
 0x506   :  { %v15065_v61 = vcombine.high %v4912_v56, %v4916_v57  ;;  %v15064_v4 = vcombine.low %v4912_v56, %v4916_v57  ;;  %v4967_v57 = vld [vmem:[#allocation9 + $0xad0] sm:$0xff] }
 0x507   :  { %8149 = vmatpush1.bf16.msra.mxu0 %v15006_v1  ;;  %v4923_v1 = vld [vmem:[#allocation9 + $0x970] sm:$0xff] }
 0x508   :  { %8321 = vmatpush1.bf16.msra.mxu1 %v15008_v47  ;;  %8150 = vmatprep.subr.bf16.mxu0 %v15015_v20  ;;  %v4920_v47 = vld [vmem:[#allocation9 + $0x958] sm:$0xff]  ;;  %v15071_v6 = vcombine.high %v4919_v63, %v4923_v1 }
 0x509   :  { %8322 = vmatprep.subr.bf16.mxu1 %v15017_v2  ;;  %v4924_v20 = vld [vmem:[#allocation9 + $0x978] sm:$0xff]  ;;  %v15062_v2 = vcombine.low %v4911_v59, %v4915_v55 }
 0x50a   :  { %v15073_v8 = vcombine.high %v4920_v47, %v4924_v20  ;;  %v15072_v17 = vcombine.low %v4920_v47, %v4924_v20  ;;  %v4975_v20 = vld [vmem:[#allocation9 + $0xb10] sm:$0xff] }
 0x50b   :  { %8151 = vmatpush1.bf16.msra.mxu0 %v15014_v40  ;;  %v4931_v40 = vld [vmem:[#allocation9 + $0x9b0] sm:$0xff] }
 0x50c   :  { %8323 = vmatpush1.bf16.msra.mxu1 %v15016_v51  ;;  %8152 = vmatprep.subr.bf16.mxu0 %v15023_v11  ;;  %v4928_v51 = vld [vmem:[#allocation9 + $0x998] sm:$0xff]  ;;  %v15079_v18 = vcombine.high %v4927_v10, %v4931_v40 }
 0x50d   :  { %8324 = vmatprep.subr.bf16.mxu1 %v15025_v12  ;;  %v4932_v11 = vld [vmem:[#allocation9 + $0x9b8] sm:$0xff]  ;;  %v15070_v12 = vcombine.low %v4919_v63, %v4923_v1 }
 0x50e   :  { %v15081_v22 = vcombine.high %v4928_v51, %v4932_v11  ;;  %v15080_v30 = vcombine.low %v4928_v51, %v4932_v11  ;;  %v4983_v11 = vld [vmem:[#allocation9 + $0xb50] sm:$0xff] }
 0x50f   :  { %8153 = vmatpush1.bf16.msra.mxu0 %v15022_v23  ;;  %v4939_v23 = vld [vmem:[#allocation9 + $0x9f0] sm:$0xff] }
 0x510   :  { %8325 = vmatpush1.bf16.msra.mxu1 %v15024_v3  ;;  %8165 = vmatprep.subr.bf16.mxu0 %v15031_v27  ;;  %v4936_v3 = vld [vmem:[#allocation9 + $0x9d8] sm:$0xff]  ;;  %v15087_v31 = vcombine.high %v4935_v25, %v4939_v23  ;;  %v15086_v38 = vcombine.low %v4935_v25, %v4939_v23 }
 0x511   :  { %8337 = vmatprep.subr.bf16.mxu1 %v15033_v13  ;;  %v4940_v27 = vld [vmem:[#allocation9 + $0x9f8] sm:$0xff]  ;;  %v15078_v13 = vcombine.low %v4927_v10, %v4931_v40 }
 0x512   :  { %8155 = vmatmul.mubr.bf16.vlgmr.msra.gmra.mrb[20].mxu0 %v17241_v26  ;;  %v15088_v39 = vcombine.low %v4936_v3, %v4940_v27 }
 0x513   :  { %8327 = vmatmul.mubr.bf16.vlgmr.msra.gmra.mrb[20].mxu1 %v17241_v26  ;;  %8166 = vmatpush1.bf16.msra.mxu0 %v15030_v29  ;;  %v15048_v26 = vcombine.low %v4896_v41, %v4900_v15  ;;  %v15089_v29 = vcombine.high %v4936_v3, %v4940_v27  ;;  %v4951_v15 = vld [vmem:[#allocation9 + $0xa50] sm:$0xff] }
 0x514   :  { %8197 = vmatprep.mubr.bf16.mxu0 %v17277_v45  ;;  %8338 = vmatpush1.bf16.msra.mxu1 %v15032_v35  ;;  %v4944_v35 = vld [vmem:[#allocation9 + $0xa18] sm:$0xff]  ;;  %v4991_v27 = vld [vmem:[#allocation9 + $0xb90] sm:$0xff] }
 0x515   :  { %8369 = vmatprep.mubr.bf16.mxu1 %v17277_v45  ;;  %8167 = vmatprep.subr.bf16.mxu0 %v15039_v37  ;;  %v15054_v45 = vcombine.low %v4903_v48, %v4907_v49  ;;  %v4948_v37 = vld [vmem:[#allocation9 + $0xa38] sm:$0xff] }
 0x516   :  { %8339 = vmatprep.subr.bf16.mxu1 %v15041_v5  ;;  %v15095_v5 = vcombine.high %v4943_v33, %v4947_v34  ;;  %v15097_v41 = vcombine.high %v4944_v35, %v4948_v37  ;;  %v15096_v48 = vcombine.low %v4944_v35, %v4948_v37  ;;  %v4999_v37 = vld [vmem:[#allocation9 + $0xbd0] sm:$0xff] }
 0x517   :  { %8168 = vmatpush1.bf16.msra.mxu0 %v15038_v62  ;;  %v4955_v62 = vld [vmem:[#allocation9 + $0xa70] sm:$0xff] }
 0x518   :  { %8340 = vmatpush1.bf16.msra.mxu1 %v15040_v42  ;;  %8169 = vmatprep.subr.bf16.mxu0 %v15047_v0  ;;  %v4952_v42 = vld [vmem:[#allocation9 + $0xa58] sm:$0xff]  ;;  %v15103_v49 = vcombine.high %v4951_v15, %v4955_v62 }
 0x519   :  { %8341 = vmatprep.subr.bf16.mxu1 %v15049_v46  ;;  %v4956_v0 = vld [vmem:[#allocation9 + $0xa78] sm:$0xff]  ;;  %v15094_v46 = vcombine.low %v4943_v33, %v4947_v34 }
 0x51a   :  { %v15105_v50 = vcombine.high %v4952_v42, %v4956_v0  ;;  %v15104_v59 = vcombine.low %v4952_v42, %v4956_v0  ;;  %v5007_v0 = vld [vmem:[#allocation9 + $0xc10] sm:$0xff] }
 0x51b   :  { %8170 = vmatpush1.bf16.msra.mxu0 %v15046_v53  ;;  %v4963_v53 = vld [vmem:[#allocation9 + $0xab0] sm:$0xff] }
 0x51c   :  { %8342 = vmatpush1.bf16.msra.mxu1 %v15048_v26  ;;  %8171 = vmatprep.subr.bf16.mxu0 %v15055_v28  ;;  %v4960_v26 = vld [vmem:[#allocation9 + $0xa98] sm:$0xff]  ;;  %v15111_v55 = vcombine.high %v4959_v52, %v4963_v53 }
 0x51d   :  { %8343 = vmatprep.subr.bf16.mxu1 %v15057_v54  ;;  %v4964_v28 = vld [vmem:[#allocation9 + $0xab8] sm:$0xff]  ;;  %v15102_v54 = vcombine.low %v4951_v15, %v4955_v62 }
 0x51e   :  { %v15113_v56 = vcombine.high %v4960_v26, %v4964_v28  ;;  %v15112_v63 = vcombine.low %v4960_v26, %v4964_v28  ;;  %v5015_v28 = vld [vmem:[#allocation9 + $0xc50] sm:$0xff] }
 0x51f   :  { %8172 = vmatpush1.bf16.msra.mxu0 %v15054_v45  ;;  %v4971_v45 = vld [vmem:[#allocation9 + $0xaf0] sm:$0xff] }
 0x520   :  { %8344 = vmatpush1.bf16.msra.mxu1 %v15056_v58  ;;  %8173 = vmatprep.subr.bf16.mxu0 %v15063_v60  ;;  %v4968_v58 = vld [vmem:[#allocation9 + $0xad8] sm:$0xff]  ;;  %v15119_v1 = vcombine.high %v4967_v57, %v4971_v45 }
 0x521   :  { %8345 = vmatprep.subr.bf16.mxu1 %v15065_v61  ;;  %v4972_v60 = vld [vmem:[#allocation9 + $0xaf8] sm:$0xff]  ;;  %v15110_v61 = vcombine.low %v4959_v52, %v4963_v53 }
 0x522   :  { %v15121_v47 = vcombine.high %v4968_v58, %v4972_v60  ;;  %v15120_v10 = vcombine.low %v4968_v58, %v4972_v60  ;;  %v5023_v58 = vld [vmem:[#allocation9 + $0xc90] sm:$0xff] }
 0x523   :  { %8174 = vmatpush1.bf16.msra.mxu0 %v15062_v2  ;;  %v4979_v2 = vld [vmem:[#allocation9 + $0xb30] sm:$0xff] }
 0x524   :  { %8346 = vmatpush1.bf16.msra.mxu1 %v15064_v4  ;;  %8175 = vmatprep.subr.bf16.mxu0 %v15071_v6  ;;  %v4976_v4 = vld [vmem:[#allocation9 + $0xb18] sm:$0xff]  ;;  %v15127_v40 = vcombine.high %v4975_v20, %v4979_v2  ;;  %v5027_v60 = vld [vmem:[#allocation9 + $0xcb0] sm:$0xff] }
 0x525   :  { %8347 = vmatprep.subr.bf16.mxu1 %v15073_v8  ;;  %v4980_v6 = vld [vmem:[#allocation9 + $0xb38] sm:$0xff]  ;;  %v15118_v8 = vcombine.low %v4967_v57, %v4971_v45 }
 0x526   :  { %v15129_v51 = vcombine.high %v4976_v4, %v4980_v6  ;;  %v15128_v25 = vcombine.low %v4976_v4, %v4980_v6  ;;  %v5031_v6 = vld [vmem:[#allocation9 + $0xcd0] sm:$0xff] }
 0x527   :  { %8176 = vmatpush1.bf16.msra.mxu0 %v15070_v12  ;;  %v4987_v12 = vld [vmem:[#allocation9 + $0xb70] sm:$0xff] }
 0x528   :  { %8348 = vmatpush1.bf16.msra.mxu1 %v15072_v17  ;;  %8177 = vmatprep.subr.bf16.mxu0 %v15079_v18  ;;  %v4984_v17 = vld [vmem:[#allocation9 + $0xb58] sm:$0xff]  ;;  %v15135_v23 = vcombine.high %v4983_v11, %v4987_v12 }
 0x529   :  { %8349 = vmatprep.subr.bf16.mxu1 %v15081_v22  ;;  %v4988_v18 = vld [vmem:[#allocation9 + $0xb78] sm:$0xff]  ;;  %v15126_v22 = vcombine.low %v4975_v20, %v4979_v2  ;;  %v15175_v2 = vcombine.high %v5023_v58, %v5027_v60 }
 0x52a   :  { %v15137_v3 = vcombine.high %v4984_v17, %v4988_v18  ;;  %v15136_v33 = vcombine.low %v4984_v17, %v4988_v18  ;;  %v5039_v17 = vld [vmem:[#allocation9 + $0xd10] sm:$0xff] }
 0x52b   :  { %8178 = vmatpush1.bf16.msra.mxu0 %v15078_v13  ;;  %v4995_v13 = vld [vmem:[#allocation9 + $0xbb0] sm:$0xff] }
 0x52c   :  { %8350 = vmatpush1.bf16.msra.mxu1 %v15080_v30  ;;  %8179 = vmatprep.subr.bf16.mxu0 %v15087_v31  ;;  %v4992_v30 = vld [vmem:[#allocation9 + $0xb98] sm:$0xff]  ;;  %v15143_v34 = vcombine.high %v4991_v27, %v4995_v13  ;;  %v5043_v18 = vld [vmem:[#allocation9 + $0xd30] sm:$0xff] }
 0x52d   :  { %8351 = vmatprep.subr.bf16.mxu1 %v15089_v29  ;;  %v4996_v31 = vld [vmem:[#allocation9 + $0xbb8] sm:$0xff]  ;;  %v15134_v29 = vcombine.low %v4983_v11, %v4987_v12 }
 0x52e   :  { %v15145_v35 = vcombine.high %v4992_v30, %v4996_v31  ;;  %v15144_v15 = vcombine.low %v4992_v30, %v4996_v31  ;;  %v5051_v30 = vld [vmem:[#allocation9 + $0xd70] sm:$0xff]  ;;  %v5048_v31 = vld [vmem:[#allocation9 + $0xd58] sm:$0xff] }
 0x52f   :  { %8180 = vmatpush1.bf16.msra.mxu0 %v15086_v38  ;;  %v5003_v38 = vld [vmem:[#allocation9 + $0xbf0] sm:$0xff] }
 0x530   :  { %8352 = vmatpush1.bf16.msra.mxu1 %v15088_v39  ;;  %8181 = vmatprep.subr.bf16.mxu0 %v15095_v5  ;;  %v5000_v39 = vld [vmem:[#allocation9 + $0xbd8] sm:$0xff]  ;;  %v15151_v62 = vcombine.high %v4999_v37, %v5003_v38 }
 0x531   :  { %8353 = vmatprep.subr.bf16.mxu1 %v15097_v41  ;;  %v5004_v5 = vld [vmem:[#allocation9 + $0xbf8] sm:$0xff]  ;;  %v15142_v41 = vcombine.low %v4991_v27, %v4995_v13  ;;  %v5047_v13 = vld [vmem:[#allocation9 + $0xd50] sm:$0xff] }
 0x532   :  { %v15153_v42 = vcombine.high %v5000_v39, %v5004_v5  ;;  %v15152_v52 = vcombine.low %v5000_v39, %v5004_v5  ;;  %v5055_v39 = vld [vmem:[#allocation9 + $0xd90] sm:$0xff] }
 0x533   :  { %8182 = vmatpush1.bf16.msra.mxu0 %v15094_v46  ;;  %v5011_v46 = vld [vmem:[#allocation9 + $0xc30] sm:$0xff] }
 0x534   :  { %8354 = vmatpush1.bf16.msra.mxu1 %v15096_v48  ;;  %8183 = vmatprep.subr.bf16.mxu0 %v15103_v49  ;;  %v5008_v48 = vld [vmem:[#allocation9 + $0xc18] sm:$0xff]  ;;  %v15159_v53 = vcombine.high %v5007_v0, %v5011_v46  ;;  %v5059_v5 = vld [vmem:[#allocation9 + $0xdb0] sm:$0xff] }
 0x535   :  { %8355 = vmatprep.subr.bf16.mxu1 %v15105_v50  ;;  %v5012_v49 = vld [vmem:[#allocation9 + $0xc38] sm:$0xff]  ;;  %v15150_v50 = vcombine.low %v4999_v37, %v5003_v38  ;;  %v15199_v37 = vcombine.high %v5047_v13, %v5051_v30 }
 0x536   :  { %v15161_v26 = vcombine.high %v5008_v48, %v5012_v49  ;;  %v15160_v57 = vcombine.low %v5008_v48, %v5012_v49  ;;  %v15198_v48 = vcombine.low %v5047_v13, %v5051_v30 }
 0x537   :  { %8184 = vmatpush1.bf16.msra.mxu0 %v15102_v54  ;;  %v5019_v54 = vld [vmem:[#allocation9 + $0xc70] sm:$0xff] }
 0x538   :  { %8356 = vmatpush1.bf16.msra.mxu1 %v15104_v59  ;;  %8185 = vmatprep.subr.bf16.mxu0 %v15111_v55  ;;  %v15158_v59 = vcombine.low %v5007_v0, %v5011_v46  ;;  %v5016_v55 = vld [vmem:[#allocation9 + $0xc58] sm:$0xff]  ;;  %v15167_v45 = vcombine.high %v5015_v28, %v5019_v54 }
 0x539   :  { %8357 = vmatprep.subr.bf16.mxu1 %v15113_v56  ;;  %v5020_v56 = vld [vmem:[#allocation9 + $0xc78] sm:$0xff] }
 0x53a   :  { %v15168_v20 = vcombine.low %v5016_v55, %v5020_v56 }
 0x53b   :  { %8186 = vmatpush1.bf16.msra.mxu0 %v15110_v61  ;;  %v15169_v61 = vcombine.high %v5016_v55, %v5020_v56 }
 0x53c   :  { %8358 = vmatpush1.bf16.msra.mxu1 %v15112_v63  ;;  %8187 = vmatprep.subr.bf16.mxu0 %v15119_v1  ;;  %v5024_v63 = vld [vmem:[#allocation9 + $0xc98] sm:$0xff] }
 0x53d   :  { %8359 = vmatprep.subr.bf16.mxu1 %v15121_v47  ;;  %v5028_v1 = vld [vmem:[#allocation9 + $0xcb8] sm:$0xff]  ;;  %v15166_v47 = vcombine.low %v5015_v28, %v5019_v54 }
 0x53e   :  { %v15177_v4 = vcombine.high %v5024_v63, %v5028_v1 }
 0x53f   :  { %8188 = vmatpush1.bf16.msra.mxu0 %v15118_v8  ;;  %v5035_v8 = vld [vmem:[#allocation9 + $0xcf0] sm:$0xff] }
 0x540   :  { %8360 = vmatpush1.bf16.msra.mxu1 %v15120_v10  ;;  %8189 = vmatprep.subr.bf16.mxu0 %v15127_v40  ;;  %v5032_v10 = vld [vmem:[#allocation9 + $0xcd8] sm:$0xff]  ;;  %v15183_v11 = vcombine.high %v5031_v6, %v5035_v8 }
 0x541   :  { %8361 = vmatprep.subr.bf16.mxu1 %v15129_v51  ;;  %v5036_v40 = vld [vmem:[#allocation9 + $0xcf8] sm:$0xff]  ;;  %v15174_v51 = vcombine.low %v5023_v58, %v5027_v60 }
 0x542   :  { %v15185_v12 = vcombine.high %v5032_v10, %v5036_v40  ;;  %v5064_v58 = vld [vmem:[#allocation9 + $0xdd8] sm:$0xff] }
 0x543   :  { %8190 = vmatpush1.bf16.msra.mxu0 %v15126_v22  ;;  %v5040_v22 = vld [vmem:[#allocation9 + $0xd18] sm:$0xff] }
 0x544   :  { %8362 = vmatpush1.bf16.msra.mxu1 %v15128_v25  ;;  %8191 = vmatprep.subr.bf16.mxu0 %v15135_v23  ;;  %v5044_v25 = vld [vmem:[#allocation9 + $0xd38] sm:$0xff]  ;;  %v15184_v23 = vcombine.low %v5032_v10, %v5036_v40 }
 0x545   :  { %8363 = vmatprep.subr.bf16.mxu1 %v15137_v3  ;;  %v15191_v3 = vcombine.high %v5039_v17, %v5043_v18  ;;  %v15193_v27 = vcombine.high %v5040_v22, %v5044_v25  ;;  %v5068_v60 = vld [vmem:[#allocation9 + $0xdf8] sm:$0xff] }
 0x547   :  { %8192 = vmatpush1.bf16.msra.mxu0 %v15134_v29  ;;  %v5052_v29 = vld [vmem:[#allocation9 + $0xd78] sm:$0xff] }
 0x548   :  { %8364 = vmatpush1.bf16.msra.mxu1 %v15136_v33  ;;  %8193 = vmatprep.subr.bf16.mxu0 %v15143_v34  ;;  %v15190_v33 = vcombine.low %v5039_v17, %v5043_v18  ;;  %v5133_v34 = vld [vmem:[#allocation10] sm:$0xff]  ;;  %v15201_v38 = vcombine.high %v5048_v31, %v5052_v29  ;;  %v15200_v49 = vcombine.low %v5048_v31, %v5052_v29  ;;  %v5071_v17 = vld [vmem:[#allocation9 + $0xe10] sm:$0xff] }
 0x549   :  { %8365 = vmatprep.subr.bf16.mxu1 %v15145_v35  ;;  %v15192_v35 = vcombine.low %v5040_v22, %v5044_v25  ;;  %v5142_v0 = vrot.slane %v5133_v34, %v17153_v16  ;;  %v5150_v46 = vrot.slane %v5133_v34, %v17163_v21  ;;  %v5075_v18 = vld [vmem:[#allocation9 + $0xe30] sm:$0xff] }
 0x54b   :  { %8194 = vmatpush1.bf16.msra.mxu0 %v15142_v41  ;;  %v5138_v41 = vrot.slane %v5133_v34, %v17148_v14 }
 0x54c   :  { %8366 = vmatpush1.bf16.msra.mxu1 %v15144_v15  ;;  %8195 = vmatprep.subr.bf16.mxu0 %v15151_v62  ;;  %v5146_v15 = vrot.slane %v5133_v34, %v17160_v19  ;;  %v5056_v62 = vld [vmem:[#allocation9 + $0xd98] sm:$0xff] }
 0x54d   :  { %8367 = vmatprep.subr.bf16.mxu1 %v15153_v42  ;;  %v5060_v42 = vld [vmem:[#allocation9 + $0xdb8] sm:$0xff] }
 0x54e   :  { %v15209_v54 = vcombine.high %v5056_v62, %v5060_v42 }
 0x54f   :  { %8196 = vmatpush1.bf16.msra.mxu0 %v15150_v50  ;;  %v15207_v50 = vcombine.high %v5055_v39, %v5059_v5 }
 0x550   :  { %8368 = vmatpush1.bf16.msra.mxu1 %v15152_v52  ;;  %8208 = vmatprep.subr.bf16.mxu0 %v15159_v53  ;;  %v5063_v52 = vld [vmem:[#allocation9 + $0xdd0] sm:$0xff] }
 0x551   :  { %8380 = vmatprep.subr.bf16.mxu1 %v15161_v26  ;;  %v5067_v53 = vld [vmem:[#allocation9 + $0xdf0] sm:$0xff] }
 0x552   :  { %8198 = vmatmul.mubr.bf16.vlgmr.msra.gmra.mrb[20].mxu0 %v17273_v43  ;;  %v15215_v40 = vcombine.high %v5063_v52, %v5067_v53 }
 0x553   :  { %8370 = vmatmul.mubr.bf16.vlgmr.msra.gmra.mrb[20].mxu1 %v17273_v43  ;;  %8209 = vmatpush1.bf16.msra.mxu0 %v15158_v59  ;;  %v15176_v43 = vcombine.low %v5024_v63, %v5028_v1 }
 0x554   :  { %8240 = vmatprep.mubr.bf16.mxu0 %v17283_v24  ;;  %8381 = vmatpush1.bf16.msra.mxu1 %v15160_v57 }
 0x555   :  { %8412 = vmatprep.mubr.bf16.mxu1 %v17283_v24  ;;  %8210 = vmatprep.subr.bf16.mxu0 %v15167_v45  ;;  %v15182_v24 = vcombine.low %v5031_v6, %v5035_v8  ;;  %v15206_v45 = vcombine.low %v5055_v39, %v5059_v5  ;;  %v5079_v5 = vld [vmem:[#allocation9 + $0xe50] sm:$0xff] }
 0x556   :  { %8382 = vmatprep.subr.bf16.mxu1 %v15169_v61 }
 0x557   :  { %8211 = vmatpush1.bf16.msra.mxu0 %v15166_v47 }
 0x558   :  { %8383 = vmatpush1.bf16.msra.mxu1 %v15168_v20  ;;  %8212 = vmatprep.subr.bf16.mxu0 %v15175_v2  ;;  %v15208_v20 = vcombine.low %v5056_v62, %v5060_v42  ;;  %v15214_v2 = vcombine.low %v5063_v52, %v5067_v53  ;;  %v5084_v62 = vld [vmem:[#allocation9 + $0xe78] sm:$0xff]  ;;  %v15222_v42 = vcombine.low %v5071_v17, %v5075_v18 }
 0x559   :  { %8384 = vmatprep.subr.bf16.mxu1 %v15177_v4  ;;  %v5088_v52 = vld [vmem:[#allocation9 + $0xe98] sm:$0xff] }
 0x55a   :  { %v5092_v53 = vld [vmem:[#allocation9 + $0xeb8] sm:$0xff] }
 0x55b   :  { %8213 = vmatpush1.bf16.msra.mxu0 %v15174_v51 }
 0x55c   :  { %8385 = vmatpush1.bf16.msra.mxu1 %v15176_v43  ;;  %8214 = vmatprep.subr.bf16.mxu0 %v15183_v11  ;;  %v15216_v11 = vcombine.low %v5064_v58, %v5068_v60 }
 0x55d   :  { %8386 = vmatprep.subr.bf16.mxu1 %v15185_v12  ;;  %v15217_v12 = vcombine.high %v5064_v58, %v5068_v60  ;;  %v15240_v60 = vcombine.low %v5088_v52, %v5092_v53 }
 0x55f   :  { %8215 = vmatpush1.bf16.msra.mxu0 %v15182_v24 }
 0x560   :  { %8387 = vmatpush1.bf16.msra.mxu1 %v15184_v23  ;;  %8216 = vmatprep.subr.bf16.mxu0 %v15191_v3  ;;  %v5072_v3 = vld [vmem:[#allocation9 + $0xe18] sm:$0xff] }
 0x561   :  { %8388 = vmatprep.subr.bf16.mxu1 %v15193_v27  ;;  %v5076_v27 = vld [vmem:[#allocation9 + $0xe38] sm:$0xff] }
 0x562   :  { %v15225_v39 = vcombine.high %v5072_v3, %v5076_v27 }
 0x563   :  { %8217 = vmatpush1.bf16.msra.mxu0 %v15190_v33 }
 0x564   :  { %8389 = vmatpush1.bf16.msra.mxu1 %v15192_v35  ;;  %8218 = vmatprep.subr.bf16.mxu0 %v15199_v37  ;;  %v15223_v35 = vcombine.high %v5071_v17, %v5075_v18 }
 0x565   :  { %v7898_v26 = vpop.f32.mrb[16].mxu0  ;;  %v8070_v28 = vpop.f32.mrb[16].mxu1  ;;  %8390 = vmatprep.subr.bf16.mxu1 %v15201_v38 }
 0x566   :  { %v16066_v59 = vadd.f32 %v7898_v26, %v5138_v41  ;;  %v16070_v55 = vadd.f32 %v8070_v28, %v5146_v15  ;;  %v7900_v56 = vpop.f32.mrb[17].mxu0  ;;  %v8072_v57 = vpop.f32.mrb[17].mxu1 }
 0x567   :  { %v16067_v61 = vadd.f32 %v7900_v56, %v5142_v0  ;;  %v16071_v63 = vadd.f32 %v8072_v57, %v5150_v46  ;;  %v7902_v1 = vpop.f32.mrb[18].mxu0  ;;  %v8074_v47 = vpop.f32.mrb[18].mxu1  ;;  %8219 = vmatpush1.bf16.msra.mxu0 %v15198_v48  ;;  %v5099_v56 = vld [vmem:[#allocation9 + $0xef0] sm:$0xff]  ;;  %v5096_v57 = vld [vmem:[#allocation9 + $0xed8] sm:$0xff] }
 0x568   :  { %v16068_v4 = vadd.f32 %v7902_v1, %v5138_v41  ;;  %v16072_v6 = vadd.f32 %v8074_v47, %v5146_v15  ;;  %8391 = vmatpush1.bf16.msra.mxu1 %v15200_v49  ;;  %v7904_v8 = vpop.f32.mrb[19].mxu0  ;;  %v8076_v10 = vpop.f32.mrb[19].mxu1  ;;  %8220 = vmatprep.subr.bf16.mxu0 %v15207_v50  ;;  %v8423_v22 = vmax.f32 %v16066_v59, 0.0  ;;  %v8425_v25 = vmax.f32 %v16070_v55, 0.0  ;;  %v5083_v41 = vld [vmem:[#allocation9 + $0xe70] sm:$0xff]  ;;  %v5080_v15 = vld [vmem:[#allocation9 + $0xe58] sm:$0xff] }
 0x569   :  { %v16069_v51 = vadd.f32 %v7904_v8, %v5142_v0  ;;  %v16073_v43 = vadd.f32 %v8076_v10, %v5150_v46  ;;  %8392 = vmatprep.subr.bf16.mxu1 %v15209_v54  ;;  %v8424_v13 = vmax.f32 %v16067_v61, 0.0  ;;  %v8426_v30 = vmax.f32 %v16071_v63, 0.0  ;;  %v5087_v49 = vld [vmem:[#allocation9 + $0xe90] sm:$0xff] }
 0x56a   :  { %v8431_v24 = vmax.f32 %v16068_v4, 0.0  ;;  %v8433_v23 = vmax.f32 %v16072_v6, 0.0  ;;  %v15224_v0 = vcombine.low %v5072_v3, %v5076_v27  ;;  %v15231_v46 = vcombine.high %v5079_v5, %v5083_v41  ;;  %v5091_v50 = vld [vmem:[#allocation9 + $0xeb0] sm:$0xff]  ;;  %v5124_v3 = vld [vmem:[#allocation9 + $0xfb8] sm:$0xff] }
 0x56b   :  { %v8432_v31 = vmax.f32 %v16069_v51, 0.0  ;;  %v8434_v29 = vmax.f32 %v16073_v43, 0.0  ;;  %8221 = vmatpush1.bf16.msra.mxu0 %v15206_v45  ;;  %v15233_v48 = vcombine.high %v5080_v15, %v5084_v62  ;;  %v15230_v26 = vcombine.low %v5079_v5, %v5083_v41  ;;  %v5095_v55 = vld [vmem:[#allocation9 + $0xed0] sm:$0xff]  ;;  %v5100_v45 = vld [vmem:[#allocation9 + $0xef8] sm:$0xff] }
 0x56c   :  { %v17311_v33 = vpack.c.bf16 %v8431_v24, %v8423_v22  ;;  %v17313_v34 = vpack.c.bf16 %v8433_v23, %v8425_v25  ;;  %8393 = vmatpush1.bf16.msra.mxu1 %v15208_v20  ;;  %8222 = vmatprep.subr.bf16.mxu0 %v15215_v40  ;;  %v15232_v28 = vcombine.low %v5080_v15, %v5084_v62  ;;  %v5103_v1 = vld [vmem:[#allocation9 + $0xf10] sm:$0xff]  ;;  %v5104_v20 = vld [vmem:[#allocation9 + $0xf18] sm:$0xff] }
 0x56d   :  { %v17315_v37 = vpack.c.bf16 %v8432_v31, %v8424_v13  ;;  %v17317_v38 = vpack.c.bf16 %v8434_v29, %v8426_v30  ;;  %8394 = vmatprep.subr.bf16.mxu1 %v15217_v12  ;;  %v15239_v54 = vcombine.high %v5087_v49, %v5091_v50  ;;  %v15241_v59 = vcombine.high %v5088_v52, %v5092_v53  ;;  %v5107_v47 = vld [vmem:[#allocation9 + $0xf30] sm:$0xff]  ;;  %v5112_v43 = vld [vmem:[#allocation9 + $0xf58] sm:$0xff] }
 0x56e   :  { %v15238_v58 = vcombine.low %v5087_v49, %v5091_v50  ;;  %v15247_v61 = vcombine.high %v5095_v55, %v5099_v56  ;;  %v15249_v63 = vcombine.high %v5096_v57, %v5100_v45  ;;  %v15246_v4 = vcombine.low %v5095_v55, %v5099_v56  ;;  %v5111_v40 = vld [vmem:[#allocation9 + $0xf50] sm:$0xff]  ;;  %v5120_v23 = vld [vmem:[#allocation9 + $0xf98] sm:$0xff] }
 0x56f   :  { %8223 = vmatpush1.bf16.msra.mxu0 %v15214_v2  ;;  %v5108_v2 = vld [vmem:[#allocation9 + $0xf38] sm:$0xff]  ;;  %v15248_v6 = vcombine.low %v5096_v57, %v5100_v45  ;;  %v15255_v8 = vcombine.high %v5103_v1, %v5107_v47  ;;  %v5115_v51 = vld [vmem:[#allocation9 + $0xf70] sm:$0xff]  ;;  %v15254_v12 = vcombine.low %v5103_v1, %v5107_v47  ;;  %v15273_v31 = vcombine.high %v5120_v23, %v5124_v3 }
 0x570   :  { %8395 = vmatpush1.bf16.msra.mxu1 %v15216_v11  ;;  %8224 = vmatprep.subr.bf16.mxu0 %v15223_v35  ;;  %v15257_v10 = vcombine.high %v5104_v20, %v5108_v2  ;;  %v5116_v11 = vld [vmem:[#allocation9 + $0xf78] sm:$0xff]  ;;  %v15256_v17 = vcombine.low %v5104_v20, %v5108_v2  ;;  %v15263_v18 = vcombine.high %v5111_v40, %v5115_v51  ;;  %v5119_v25 = vld [vmem:[#allocation9 + $0xf90] sm:$0xff] }
 0x571   :  { %8396 = vmatprep.subr.bf16.mxu1 %v15225_v39  ;;  %v15265_v22 = vcombine.high %v5112_v43, %v5116_v11  ;;  %v5123_v24 = vld [vmem:[#allocation9 + $0xfb0] sm:$0xff]  ;;  %v15262_v27 = vcombine.low %v5111_v40, %v5115_v51  ;;  %v15264_v13 = vcombine.low %v5112_v43, %v5116_v11  ;;  %v5128_v39 = vld [vmem:[#allocation9 + $0xfd8] sm:$0xff]  ;;  %v15272_v15 = vcombine.low %v5120_v23, %v5124_v3 }
 0x572   :  { %v15271_v30 = vcombine.high %v5119_v25, %v5123_v24  ;;  %v5127_v29 = vld [vmem:[#allocation9 + $0xfd0] sm:$0xff]  ;;  %v5132_v5 = vld [vmem:[#allocation9 + $0xff8] sm:$0xff]  ;;  %v15270_v41 = vcombine.low %v5119_v25, %v5123_v24 }
 0x573   :  { %8225 = vmatpush1.bf16.msra.mxu0 %v15222_v42  ;;  %v5131_v35 = vld [vmem:[#allocation9 + $0xff0] sm:$0xff]  ;;  %v15281_v42 = vcombine.high %v5128_v39, %v5132_v5  ;;  %v15280_v52 = vcombine.low %v5128_v39, %v5132_v5 }
 0x574   :  { %8397 = vmatpush1.bf16.msra.mxu1 %v15224_v0  ;;  %8226 = vmatprep.subr.bf16.mxu0 %v15231_v46  ;;  %v15279_v62 = vcombine.high %v5127_v29, %v5131_v35  ;;  %v8447_v0 = vld [vmem:[#allocation12] sm:$0xff]  ;;  %v8452_v49 = vld [vmem:[#allocation12 + $0x28] sm:$0xff]  ;;  %v15278_v50 = vcombine.low %v5127_v29, %v5131_v35 }
 0x575   :  { %8398 = vmatprep.subr.bf16.mxu1 %v15233_v48  ;;  %v8451_v46 = vld [vmem:[#allocation12 + $0x20] sm:$0xff]  ;;  %v8448_v48 = vld [vmem:[#allocation12 + $0x8] sm:$0xff] }
 0x576   :  { %v15283_v53 = vcombine.high %v8447_v0, %v8451_v46  ;;  %v8456_v55 = vld [vmem:[#allocation12 + $0x48] sm:$0xff]  ;;  %v15284_v57 = vcombine.low %v8448_v48, %v8452_v49 }
 0x577   :  { %8227 = vmatpush1.bf16.msra.mxu0 %v15230_v26  ;;  %v15285_v26 = vcombine.high %v8448_v48, %v8452_v49  ;;  %v8460_v56 = vld [vmem:[#allocation12 + $0x68] sm:$0xff] }
 0x578   :  { %8399 = vmatpush1.bf16.msra.mxu1 %v15232_v28  ;;  %8228 = vmatprep.subr.bf16.mxu0 %v15239_v54  ;;  %v8455_v28 = vld [vmem:[#allocation12 + $0x40] sm:$0xff]  ;;  %v8468_v1 = vld [vmem:[#allocation12 + $0xa8] sm:$0xff]  ;;  %v15292_v20 = vcombine.low %v8456_v55, %v8460_v56 }
 0x579   :  { %8400 = vmatprep.subr.bf16.mxu1 %v15241_v59  ;;  %v8459_v54 = vld [vmem:[#allocation12 + $0x60] sm:$0xff]  ;;  %v15282_v59 = vcombine.low %v8447_v0, %v8451_v46  ;;  %v8476_v40 = vld [vmem:[#allocation12 + $0xe8] sm:$0xff] }
 0x57a   :  { %v15291_v45 = vcombine.high %v8455_v28, %v8459_v54  ;;  %v15290_v47 = vcombine.low %v8455_v28, %v8459_v54 }
 0x57b   :  { %8229 = vmatpush1.bf16.msra.mxu0 %v15238_v58  ;;  %v8463_v58 = vld [vmem:[#allocation12 + $0x80] sm:$0xff] }
 0x57c   :  { %8401 = vmatpush1.bf16.msra.mxu1 %v15240_v60  ;;  %8230 = vmatprep.subr.bf16.mxu0 %v15247_v61  ;;  %v8467_v60 = vld [vmem:[#allocation12 + $0xa0] sm:$0xff]  ;;  %v15293_v61 = vcombine.high %v8456_v55, %v8460_v56 }
 0x57d   :  { %8402 = vmatprep.subr.bf16.mxu1 %v15249_v63  ;;  %v8464_v63 = vld [vmem:[#allocation12 + $0x88] sm:$0xff]  ;;  %v15299_v2 = vcombine.high %v8463_v58, %v8467_v60  ;;  %v15298_v51 = vcombine.low %v8463_v58, %v8467_v60  ;;  %v8511_v56 = vld [vmem:[#allocation12 + $0x200] sm:$0xff] }
 0x57e   :  { %v8516_v58 = vld [vmem:[#allocation12 + $0x228] sm:$0xff] }
 0x57f   :  { %8231 = vmatpush1.bf16.msra.mxu0 %v15246_v4  ;;  %v15301_v4 = vcombine.high %v8464_v63, %v8468_v1 }
 0x580   :  { %8403 = vmatpush1.bf16.msra.mxu1 %v15248_v6  ;;  %8232 = vmatprep.subr.bf16.mxu0 %v15255_v8  ;;  %v8471_v6 = vld [vmem:[#allocation12 + $0xc0] sm:$0xff] }
 0x581   :  { %8404 = vmatprep.subr.bf16.mxu1 %v15257_v10  ;;  %v8475_v8 = vld [vmem:[#allocation12 + $0xe0] sm:$0xff]  ;;  %v8472_v10 = vld [vmem:[#allocation12 + $0xc8] sm:$0xff] }
 0x582   :  { %v15307_v43 = vcombine.high %v8471_v6, %v8475_v8  ;;  %v15309_v11 = vcombine.high %v8472_v10, %v8476_v40  ;;  %v15306_v25 = vcombine.low %v8471_v6, %v8475_v8  ;;  %v15308_v24 = vcombine.low %v8472_v10, %v8476_v40 }
 0x583   :  { %8233 = vmatpush1.bf16.msra.mxu0 %v15254_v12  ;;  %v8479_v12 = vld [vmem:[#allocation12 + $0x100] sm:$0xff] }
 0x584   :  { %8405 = vmatpush1.bf16.msra.mxu1 %v15256_v17  ;;  %8234 = vmatprep.subr.bf16.mxu0 %v15263_v18  ;;  %v8483_v17 = vld [vmem:[#allocation12 + $0x120] sm:$0xff]  ;;  %v8480_v18 = vld [vmem:[#allocation12 + $0x108] sm:$0xff] }
 0x585   :  { %8406 = vmatprep.subr.bf16.mxu1 %v15265_v22  ;;  %v8484_v22 = vld [vmem:[#allocation12 + $0x128] sm:$0xff]  ;;  %v15315_v23 = vcombine.high %v8479_v12, %v8483_v17  ;;  %v15314_v29 = vcombine.low %v8479_v12, %v8483_v17 }
 0x586   :  { %v15317_v3 = vcombine.high %v8480_v18, %v8484_v22  ;;  %v15316_v35 = vcombine.low %v8480_v18, %v8484_v22 }
 0x587   :  { %8235 = vmatpush1.bf16.msra.mxu0 %v15262_v27  ;;  %v8487_v27 = vld [vmem:[#allocation12 + $0x140] sm:$0xff] }
 0x588   :  { %8407 = vmatpush1.bf16.msra.mxu1 %v15264_v13  ;;  %8236 = vmatprep.subr.bf16.mxu0 %v15271_v30  ;;  %v8491_v13 = vld [vmem:[#allocation12 + $0x160] sm:$0xff]  ;;  %v8488_v30 = vld [vmem:[#allocation12 + $0x148] sm:$0xff] }
 0x589   :  { %8408 = vmatprep.subr.bf16.mxu1 %v15273_v31  ;;  %v8492_v31 = vld [vmem:[#allocation12 + $0x168] sm:$0xff]  ;;  %v15323_v39 = vcombine.high %v8487_v27, %v8491_v13  ;;  %v15322_v0 = vcombine.low %v8487_v27, %v8491_v13 }
 0x58a   :  { %v15325_v5 = vcombine.high %v8488_v30, %v8492_v31  ;;  %v15324_v46 = vcombine.low %v8488_v30, %v8492_v31 }
 0x58b   :  { %8237 = vmatpush1.bf16.msra.mxu0 %v15270_v41  ;;  %v8495_v41 = vld [vmem:[#allocation12 + $0x180] sm:$0xff] }
 0x58c   :  { %8409 = vmatpush1.bf16.msra.mxu1 %v15272_v15  ;;  %8238 = vmatprep.subr.bf16.mxu0 %v15279_v62  ;;  %v8499_v15 = vld [vmem:[#allocation12 + $0x1a0] sm:$0xff]  ;;  %v8496_v62 = vld [vmem:[#allocation12 + $0x188] sm:$0xff] }
 0x58d   :  { %8410 = vmatprep.subr.bf16.mxu1 %v15281_v42  ;;  %v8500_v42 = vld [vmem:[#allocation12 + $0x1a8] sm:$0xff]  ;;  %v15331_v48 = vcombine.high %v8495_v41, %v8499_v15  ;;  %v15330_v28 = vcombine.low %v8495_v41, %v8499_v15 }
 0x58e   :  { %v15333_v49 = vcombine.high %v8496_v62, %v8500_v42  ;;  %v15332_v54 = vcombine.low %v8496_v62, %v8500_v42 }
 0x58f   :  { %8239 = vmatpush1.bf16.msra.mxu0 %v15278_v50  ;;  %v8503_v50 = vld [vmem:[#allocation12 + $0x1c0] sm:$0xff] }
 0x590   :  { %8411 = vmatpush1.bf16.msra.mxu1 %v15280_v52  ;;  %11561 = vmatprep.subr.bf16.mxu0 %v15283_v53  ;;  %v8507_v52 = vld [vmem:[#allocation12 + $0x1e0] sm:$0xff]  ;;  %v8504_v53 = vld [vmem:[#allocation12 + $0x1c8] sm:$0xff] }
 0x591   :  { %11733 = vmatprep.subr.bf16.mxu1 %v15285_v26  ;;  %v8508_v26 = vld [vmem:[#allocation12 + $0x1e8] sm:$0xff]  ;;  %v15338_v60 = vcombine.low %v8503_v50, %v8507_v52 }
 0x592   :  { %8241 = vmatmul.mubr.bf16.vlgmr.msra.gmra.mrb[20].mxu0 %v17275_v44  ;;  %v15341_v55 = vcombine.high %v8504_v53, %v8508_v26 }
 0x593   :  { %8413 = vmatmul.mubr.bf16.vlgmr.msra.gmra.mrb[20].mxu1 %v17275_v44  ;;  %11562 = vmatpush1.bf16.msra.mxu0 %v15282_v59  ;;  %v15300_v44 = vcombine.low %v8464_v63, %v8468_v1  ;;  %v15339_v59 = vcombine.high %v8503_v50, %v8507_v52 }
 0x594   :  { %11593 = vmatprep.mubr.bf16.mxu0 %v17315_v37  ;;  %11734 = vmatpush1.bf16.msra.mxu1 %v15284_v57  ;;  %v8515_v57 = vld [vmem:[#allocation12 + $0x220] sm:$0xff] }
 0x595   :  { %11765 = vmatprep.mubr.bf16.mxu1 %v17315_v37  ;;  %11563 = vmatprep.subr.bf16.mxu0 %v15291_v45  ;;  %v8512_v45 = vld [vmem:[#allocation12 + $0x208] sm:$0xff]  ;;  %v15347_v63 = vcombine.high %v8511_v56, %v8515_v57  ;;  %v15346_v6 = vcombine.low %v8511_v56, %v8515_v57 }
 0x596   :  { %11735 = vmatprep.subr.bf16.mxu1 %v15293_v61  ;;  %v15340_v61 = vcombine.low %v8504_v53, %v8508_v26  ;;  %v15349_v1 = vcombine.high %v8512_v45, %v8516_v58  ;;  %v15348_v8 = vcombine.low %v8512_v45, %v8516_v58 }
 0x597   :  { %11564 = vmatpush1.bf16.msra.mxu0 %v15290_v47  ;;  %v8519_v47 = vld [vmem:[#allocation12 + $0x240] sm:$0xff] }
 0x598   :  { %11736 = vmatpush1.bf16.msra.mxu1 %v15292_v20  ;;  %11565 = vmatprep.subr.bf16.mxu0 %v15299_v2  ;;  %v8523_v20 = vld [vmem:[#allocation12 + $0x260] sm:$0xff]  ;;  %v8520_v2 = vld [vmem:[#allocation12 + $0x248] sm:$0xff] }
 0x599   :  { %11737 = vmatprep.subr.bf16.mxu1 %v15301_v4  ;;  %v8524_v4 = vld [vmem:[#allocation12 + $0x268] sm:$0xff]  ;;  %v15355_v10 = vcombine.high %v8519_v47, %v8523_v20  ;;  %v15354_v12 = vcombine.low %v8519_v47, %v8523_v20 }
 0x59a   :  { %v15357_v40 = vcombine.high %v8520_v2, %v8524_v4  ;;  %v15356_v17 = vcombine.low %v8520_v2, %v8524_v4 }
 0x59b   :  { %11566 = vmatpush1.bf16.msra.mxu0 %v15298_v51  ;;  %v8527_v51 = vld [vmem:[#allocation12 + $0x280] sm:$0xff] }
 0x59c   :  { %11738 = vmatpush1.bf16.msra.mxu1 %v15300_v44  ;;  %11567 = vmatprep.subr.bf16.mxu0 %v15307_v43  ;;  %v8531_v44 = vld [vmem:[#allocation12 + $0x2a0] sm:$0xff]  ;;  %v8528_v43 = vld [vmem:[#allocation12 + $0x288] sm:$0xff] }
 0x59d   :  { %11739 = vmatprep.subr.bf16.mxu1 %v15309_v11  ;;  %v8532_v11 = vld [vmem:[#allocation12 + $0x2a8] sm:$0xff]  ;;  %v15363_v18 = vcombine.high %v8527_v51, %v8531_v44  ;;  %v15362_v27 = vcombine.low %v8527_v51, %v8531_v44 }
 0x59e   :  { %v15365_v22 = vcombine.high %v8528_v43, %v8532_v11  ;;  %v15364_v13 = vcombine.low %v8528_v43, %v8532_v11 }
 0x59f   :  { %11568 = vmatpush1.bf16.msra.mxu0 %v15306_v25  ;;  %v8535_v25 = vld [vmem:[#allocation12 + $0x2c0] sm:$0xff] }
 0x5a0   :  { %11740 = vmatpush1.bf16.msra.mxu1 %v15308_v24  ;;  %11569 = vmatprep.subr.bf16.mxu0 %v15315_v23  ;;  %v8539_v24 = vld [vmem:[#allocation12 + $0x2e0] sm:$0xff]  ;;  %v8536_v23 = vld [vmem:[#allocation12 + $0x2c8] sm:$0xff] }
 0x5a1   :  { %11741 = vmatprep.subr.bf16.mxu1 %v15317_v3  ;;  %v8540_v3 = vld [vmem:[#allocation12 + $0x2e8] sm:$0xff]  ;;  %v15371_v30 = vcombine.high %v8535_v25, %v8539_v24  ;;  %v15370_v41 = vcombine.low %v8535_v25, %v8539_v24 }
 0x5a2   :  { %v15373_v31 = vcombine.high %v8536_v23, %v8540_v3  ;;  %v15372_v15 = vcombine.low %v8536_v23, %v8540_v3  ;;  %v8588_v25 = vld [vmem:[#allocation12 + $0x468] sm:$0xff]  ;;  %v8591_v3 = vld [vmem:[#allocation12 + $0x480] sm:$0xff] }
 0x5a3   :  { %11570 = vmatpush1.bf16.msra.mxu0 %v15314_v29  ;;  %v8543_v29 = vld [vmem:[#allocation12 + $0x300] sm:$0xff] }
 0x5a4   :  { %11742 = vmatpush1.bf16.msra.mxu1 %v15316_v35  ;;  %11571 = vmatprep.subr.bf16.mxu0 %v15323_v39  ;;  %v8547_v35 = vld [vmem:[#allocation12 + $0x320] sm:$0xff]  ;;  %v8544_v39 = vld [vmem:[#allocation12 + $0x308] sm:$0xff] }
 0x5a5   :  { %11743 = vmatprep.subr.bf16.mxu1 %v15325_v5  ;;  %v8548_v5 = vld [vmem:[#allocation12 + $0x328] sm:$0xff]  ;;  %v15379_v62 = vcombine.high %v8543_v29, %v8547_v35  ;;  %v15378_v50 = vcombine.low %v8543_v29, %v8547_v35 }
 0x5a6   :  { %v15381_v42 = vcombine.high %v8544_v39, %v8548_v5  ;;  %v15380_v52 = vcombine.low %v8544_v39, %v8548_v5 }
 0x5a7   :  { %11572 = vmatpush1.bf16.msra.mxu0 %v15322_v0  ;;  %v8551_v0 = vld [vmem:[#allocation12 + $0x340] sm:$0xff] }
 0x5a8   :  { %11744 = vmatpush1.bf16.msra.mxu1 %v15324_v46  ;;  %11573 = vmatprep.subr.bf16.mxu0 %v15331_v48  ;;  %v8555_v46 = vld [vmem:[#allocation12 + $0x360] sm:$0xff]  ;;  %v8552_v48 = vld [vmem:[#allocation12 + $0x348] sm:$0xff] }
 0x5a9   :  { %11745 = vmatprep.subr.bf16.mxu1 %v15333_v49  ;;  %v8556_v49 = vld [vmem:[#allocation12 + $0x368] sm:$0xff]  ;;  %v15387_v53 = vcombine.high %v8551_v0, %v8555_v46  ;;  %v15386_v56 = vcombine.low %v8551_v0, %v8555_v46 }
 0x5aa   :  { %v15389_v26 = vcombine.high %v8552_v48, %v8556_v49  ;;  %v15388_v57 = vcombine.low %v8552_v48, %v8556_v49 }
 0x5ab   :  { %11574 = vmatpush1.bf16.msra.mxu0 %v15330_v28  ;;  %v8559_v28 = vld [vmem:[#allocation12 + $0x380] sm:$0xff] }
 0x5ac   :  { %11746 = vmatpush1.bf16.msra.mxu1 %v15332_v54  ;;  %11575 = vmatprep.subr.bf16.mxu0 %v15339_v59  ;;  %v8563_v54 = vld [vmem:[#allocation12 + $0x3a0] sm:$0xff]  ;;  %v8560_v59 = vld [vmem:[#allocation12 + $0x388] sm:$0xff] }
 0x5ad   :  { %11747 = vmatprep.subr.bf16.mxu1 %v15341_v55  ;;  %v8564_v55 = vld [vmem:[#allocation12 + $0x3a8] sm:$0xff]  ;;  %v15395_v45 = vcombine.high %v8559_v28, %v8563_v54  ;;  %v15394_v47 = vcombine.low %v8559_v28, %v8563_v54 }
 0x5ae   :  { %v15397_v58 = vcombine.high %v8560_v59, %v8564_v55  ;;  %v15396_v20 = vcombine.low %v8560_v59, %v8564_v55 }
 0x5af   :  { %11576 = vmatpush1.bf16.msra.mxu0 %v15338_v60  ;;  %v8567_v60 = vld [vmem:[#allocation12 + $0x3c0] sm:$0xff] }
 0x5b0   :  { %11748 = vmatpush1.bf16.msra.mxu1 %v15340_v61  ;;  %11577 = vmatprep.subr.bf16.mxu0 %v15347_v63  ;;  %v8571_v61 = vld [vmem:[#allocation12 + $0x3e0] sm:$0xff]  ;;  %v8568_v63 = vld [vmem:[#allocation12 + $0x3c8] sm:$0xff] }
 0x5b1   :  { %11749 = vmatprep.subr.bf16.mxu1 %v15349_v1  ;;  %v8572_v1 = vld [vmem:[#allocation12 + $0x3e8] sm:$0xff]  ;;  %v15403_v2 = vcombine.high %v8567_v60, %v8571_v61  ;;  %v15402_v51 = vcombine.low %v8567_v60, %v8571_v61 }
 0x5b2   :  { %v15405_v4 = vcombine.high %v8568_v63, %v8572_v1  ;;  %v15404_v44 = vcombine.low %v8568_v63, %v8572_v1 }
 0x5b3   :  { %11578 = vmatpush1.bf16.msra.mxu0 %v15346_v6  ;;  %v8575_v6 = vld [vmem:[#allocation12 + $0x400] sm:$0xff] }
 0x5b4   :  { %11750 = vmatpush1.bf16.msra.mxu1 %v15348_v8  ;;  %11579 = vmatprep.subr.bf16.mxu0 %v15355_v10  ;;  %v8579_v8 = vld [vmem:[#allocation12 + $0x420] sm:$0xff]  ;;  %v8576_v10 = vld [vmem:[#allocation12 + $0x408] sm:$0xff] }
 0x5b5   :  { %11751 = vmatprep.subr.bf16.mxu1 %v15357_v40  ;;  %v8580_v40 = vld [vmem:[#allocation12 + $0x428] sm:$0xff]  ;;  %v15411_v43 = vcombine.high %v8575_v6, %v8579_v8 }
 0x5b6   :  { %v15413_v11 = vcombine.high %v8576_v10, %v8580_v40  ;;  %v15412_v24 = vcombine.low %v8576_v10, %v8580_v40 }
 0x5b7   :  { %11580 = vmatpush1.bf16.msra.mxu0 %v15354_v12  ;;  %v8583_v12 = vld [vmem:[#allocation12 + $0x440] sm:$0xff] }
 0x5b8   :  { %11752 = vmatpush1.bf16.msra.mxu1 %v15356_v17  ;;  %11581 = vmatprep.subr.bf16.mxu0 %v15363_v18  ;;  %v8587_v17 = vld [vmem:[#allocation12 + $0x460] sm:$0xff]  ;;  %v15410_v18 = vcombine.low %v8575_v6, %v8579_v8 }
 0x5b9   :  { %11753 = vmatprep.subr.bf16.mxu1 %v15365_v22  ;;  %v8584_v22 = vld [vmem:[#allocation12 + $0x448] sm:$0xff]  ;;  %v15419_v23 = vcombine.high %v8583_v12, %v8587_v17  ;;  %v15418_v29 = vcombine.low %v8583_v12, %v8587_v17 }
 0x5ba   :  { %v15420_v35 = vcombine.low %v8584_v22, %v8588_v25 }
 0x5bb   :  { %11582 = vmatpush1.bf16.msra.mxu0 %v15362_v27  ;;  %v8595_v27 = vld [vmem:[#allocation12 + $0x4a0] sm:$0xff] }
 0x5bc   :  { %11754 = vmatpush1.bf16.msra.mxu1 %v15364_v13  ;;  %11583 = vmatprep.subr.bf16.mxu0 %v15371_v30  ;;  %v15421_v13 = vcombine.high %v8584_v22, %v8588_v25  ;;  %v8592_v30 = vld [vmem:[#allocation12 + $0x488] sm:$0xff]  ;;  %v15427_v39 = vcombine.high %v8591_v3, %v8595_v27  ;;  %v15426_v0 = vcombine.low %v8591_v3, %v8595_v27  ;;  %v8639_v25 = vld [vmem:[#allocation12 + $0x600] sm:$0xff] }
 0x5bd   :  { %11755 = vmatprep.subr.bf16.mxu1 %v15373_v31  ;;  %v8596_v31 = vld [vmem:[#allocation12 + $0x4a8] sm:$0xff] }
 0x5be   :  { %v15429_v5 = vcombine.high %v8592_v30, %v8596_v31  ;;  %v15428_v46 = vcombine.low %v8592_v30, %v8596_v31  ;;  %v8644_v3 = vld [vmem:[#allocation12 + $0x628] sm:$0xff] }
 0x5bf   :  { %11584 = vmatpush1.bf16.msra.mxu0 %v15370_v41  ;;  %v8599_v41 = vld [vmem:[#allocation12 + $0x4c0] sm:$0xff] }
 0x5c0   :  { %11756 = vmatpush1.bf16.msra.mxu1 %v15372_v15  ;;  %11585 = vmatprep.subr.bf16.mxu0 %v15379_v62  ;;  %v8603_v15 = vld [vmem:[#allocation12 + $0x4e0] sm:$0xff]  ;;  %v8600_v62 = vld [vmem:[#allocation12 + $0x4c8] sm:$0xff] }
 0x5c1   :  { %11757 = vmatprep.subr.bf16.mxu1 %v15381_v42  ;;  %v8604_v42 = vld [vmem:[#allocation12 + $0x4e8] sm:$0xff]  ;;  %v15435_v48 = vcombine.high %v8599_v41, %v8603_v15  ;;  %v15434_v28 = vcombine.low %v8599_v41, %v8603_v15 }
 0x5c2   :  { %v15437_v49 = vcombine.high %v8600_v62, %v8604_v42  ;;  %v15436_v54 = vcombine.low %v8600_v62, %v8604_v42 }
 0x5c3   :  { %11586 = vmatpush1.bf16.msra.mxu0 %v15378_v50  ;;  %v8607_v50 = vld [vmem:[#allocation12 + $0x500] sm:$0xff] }
 0x5c4   :  { %11758 = vmatpush1.bf16.msra.mxu1 %v15380_v52  ;;  %11587 = vmatprep.subr.bf16.mxu0 %v15387_v53  ;;  %v8611_v52 = vld [vmem:[#allocation12 + $0x520] sm:$0xff]  ;;  %v8608_v53 = vld [vmem:[#allocation12 + $0x508] sm:$0xff] }
 0x5c5   :  { %11759 = vmatprep.subr.bf16.mxu1 %v15389_v26  ;;  %v8612_v26 = vld [vmem:[#allocation12 + $0x528] sm:$0xff]  ;;  %v15443_v59 = vcombine.high %v8607_v50, %v8611_v52  ;;  %v15442_v60 = vcombine.low %v8607_v50, %v8611_v52 }
 0x5c6   :  { %v15445_v55 = vcombine.high %v8608_v53, %v8612_v26  ;;  %v15444_v61 = vcombine.low %v8608_v53, %v8612_v26 }
 0x5c7   :  { %11588 = vmatpush1.bf16.msra.mxu0 %v15386_v56  ;;  %v8615_v56 = vld [vmem:[#allocation12 + $0x540] sm:$0xff] }
 0x5c8   :  { %11760 = vmatpush1.bf16.msra.mxu1 %v15388_v57  ;;  %11589 = vmatprep.subr.bf16.mxu0 %v15395_v45  ;;  %v8619_v57 = vld [vmem:[#allocation12 + $0x560] sm:$0xff]  ;;  %v8616_v45 = vld [vmem:[#allocation12 + $0x548] sm:$0xff] }
 0x5c9   :  { %11761 = vmatprep.subr.bf16.mxu1 %v15397_v58  ;;  %v8620_v58 = vld [vmem:[#allocation12 + $0x568] sm:$0xff]  ;;  %v15451_v63 = vcombine.high %v8615_v56, %v8619_v57  ;;  %v15450_v6 = vcombine.low %v8615_v56, %v8619_v57 }
 0x5ca   :  { %v15453_v1 = vcombine.high %v8616_v45, %v8620_v58  ;;  %v15452_v8 = vcombine.low %v8616_v45, %v8620_v58 }
 0x5cb   :  { %11590 = vmatpush1.bf16.msra.mxu0 %v15394_v47  ;;  %v8623_v47 = vld [vmem:[#allocation12 + $0x580] sm:$0xff] }
 0x5cc   :  { %11762 = vmatpush1.bf16.msra.mxu1 %v15396_v20  ;;  %11591 = vmatprep.subr.bf16.mxu0 %v15403_v2  ;;  %v8627_v20 = vld [vmem:[#allocation12 + $0x5a0] sm:$0xff]  ;;  %v8624_v2 = vld [vmem:[#allocation12 + $0x588] sm:$0xff] }
 0x5cd   :  { %11763 = vmatprep.subr.bf16.mxu1 %v15405_v4  ;;  %v8628_v4 = vld [vmem:[#allocation12 + $0x5a8] sm:$0xff]  ;;  %v15459_v10 = vcombine.high %v8623_v47, %v8627_v20  ;;  %v15458_v12 = vcombine.low %v8623_v47, %v8627_v20 }
 0x5ce   :  { %v15461_v40 = vcombine.high %v8624_v2, %v8628_v4  ;;  %v15460_v17 = vcombine.low %v8624_v2, %v8628_v4 }
 0x5cf   :  { %11592 = vmatpush1.bf16.msra.mxu0 %v15402_v51  ;;  %v8631_v51 = vld [vmem:[#allocation12 + $0x5c0] sm:$0xff] }
 0x5d0   :  { %11764 = vmatpush1.bf16.msra.mxu1 %v15404_v44  ;;  %11604 = vmatprep.subr.bf16.mxu0 %v15411_v43  ;;  %v8635_v44 = vld [vmem:[#allocation12 + $0x5e0] sm:$0xff]  ;;  %v8632_v43 = vld [vmem:[#allocation12 + $0x5c8] sm:$0xff] }
 0x5d1   :  { %11776 = vmatprep.subr.bf16.mxu1 %v15413_v11  ;;  %v8636_v11 = vld [vmem:[#allocation12 + $0x5e8] sm:$0xff]  ;;  %v15466_v27 = vcombine.low %v8631_v51, %v8635_v44 }
 0x5d2   :  { %11594 = vmatmul.mubr.bf16.vlgmr.msra.gmra.mrb[24].mxu0 %v17311_v33  ;;  %v15469_v22 = vcombine.high %v8632_v43, %v8636_v11 }
 0x5d3   :  { %11766 = vmatmul.mubr.bf16.vlgmr.msra.gmra.mrb[24].mxu1 %v17311_v33  ;;  %11605 = vmatpush1.bf16.msra.mxu0 %v15410_v18  ;;  %v15467_v18 = vcombine.high %v8631_v51, %v8635_v44 }
 0x5d4   :  { %11636 = vmatprep.mubr.bf16.mxu0 %v17317_v38  ;;  %11777 = vmatpush1.bf16.msra.mxu1 %v15412_v24  ;;  %v8643_v24 = vld [vmem:[#allocation12 + $0x620] sm:$0xff] }
 0x5d5   :  { %11808 = vmatprep.mubr.bf16.mxu1 %v17317_v38  ;;  %11606 = vmatprep.subr.bf16.mxu0 %v15419_v23  ;;  %v8640_v23 = vld [vmem:[#allocation12 + $0x608] sm:$0xff]  ;;  %v15475_v30 = vcombine.high %v8639_v25, %v8643_v24  ;;  %v15474_v41 = vcombine.low %v8639_v25, %v8643_v24 }
 0x5d6   :  { %11778 = vmatprep.subr.bf16.mxu1 %v15421_v13  ;;  %v15468_v13 = vcombine.low %v8632_v43, %v8636_v11  ;;  %v15477_v31 = vcombine.high %v8640_v23, %v8644_v3  ;;  %v15476_v15 = vcombine.low %v8640_v23, %v8644_v3 }
 0x5d7   :  { %11607 = vmatpush1.bf16.msra.mxu0 %v15418_v29  ;;  %v8647_v29 = vld [vmem:[#allocation12 + $0x640] sm:$0xff] }
 0x5d8   :  { %11779 = vmatpush1.bf16.msra.mxu1 %v15420_v35  ;;  %11608 = vmatprep.subr.bf16.mxu0 %v15427_v39  ;;  %v8651_v35 = vld [vmem:[#allocation12 + $0x660] sm:$0xff]  ;;  %v8648_v39 = vld [vmem:[#allocation12 + $0x648] sm:$0xff] }
 0x5d9   :  { %11780 = vmatprep.subr.bf16.mxu1 %v15429_v5  ;;  %v8652_v5 = vld [vmem:[#allocation12 + $0x668] sm:$0xff]  ;;  %v15483_v62 = vcombine.high %v8647_v29, %v8651_v35  ;;  %v15482_v50 = vcombine.low %v8647_v29, %v8651_v35 }
 0x5da   :  { %v15485_v42 = vcombine.high %v8648_v39, %v8652_v5  ;;  %v15484_v52 = vcombine.low %v8648_v39, %v8652_v5 }
 0x5db   :  { %11609 = vmatpush1.bf16.msra.mxu0 %v15426_v0  ;;  %v8655_v0 = vld [vmem:[#allocation12 + $0x680] sm:$0xff] }
 0x5dc   :  { %11781 = vmatpush1.bf16.msra.mxu1 %v15428_v46  ;;  %11610 = vmatprep.subr.bf16.mxu0 %v15435_v48  ;;  %v8659_v46 = vld [vmem:[#allocation12 + $0x6a0] sm:$0xff]  ;;  %v8656_v48 = vld [vmem:[#allocation12 + $0x688] sm:$0xff] }
 0x5dd   :  { %11782 = vmatprep.subr.bf16.mxu1 %v15437_v49  ;;  %v8660_v49 = vld [vmem:[#allocation12 + $0x6a8] sm:$0xff]  ;;  %v15491_v53 = vcombine.high %v8655_v0, %v8659_v46  ;;  %v15490_v56 = vcombine.low %v8655_v0, %v8659_v46 }
 0x5de   :  { %v15493_v26 = vcombine.high %v8656_v48, %v8660_v49  ;;  %v15492_v57 = vcombine.low %v8656_v48, %v8660_v49 }
 0x5df   :  { %11611 = vmatpush1.bf16.msra.mxu0 %v15434_v28  ;;  %v8663_v28 = vld [vmem:[#allocation12 + $0x6c0] sm:$0xff] }
 0x5e0   :  { %11783 = vmatpush1.bf16.msra.mxu1 %v15436_v54  ;;  %11612 = vmatprep.subr.bf16.mxu0 %v15443_v59  ;;  %v8667_v54 = vld [vmem:[#allocation12 + $0x6e0] sm:$0xff]  ;;  %v8664_v59 = vld [vmem:[#allocation12 + $0x6c8] sm:$0xff] }
 0x5e1   :  { %11784 = vmatprep.subr.bf16.mxu1 %v15445_v55  ;;  %v8668_v55 = vld [vmem:[#allocation12 + $0x6e8] sm:$0xff]  ;;  %v15499_v45 = vcombine.high %v8663_v28, %v8667_v54  ;;  %v15498_v47 = vcombine.low %v8663_v28, %v8667_v54 }
 0x5e2   :  { %v15501_v58 = vcombine.high %v8664_v59, %v8668_v55  ;;  %v15500_v20 = vcombine.low %v8664_v59, %v8668_v55 }
 0x5e3   :  { %11613 = vmatpush1.bf16.msra.mxu0 %v15442_v60  ;;  %v8671_v60 = vld [vmem:[#allocation12 + $0x700] sm:$0xff] }
 0x5e4   :  { %11785 = vmatpush1.bf16.msra.mxu1 %v15444_v61  ;;  %11614 = vmatprep.subr.bf16.mxu0 %v15451_v63  ;;  %v8675_v61 = vld [vmem:[#allocation12 + $0x720] sm:$0xff]  ;;  %v8672_v63 = vld [vmem:[#allocation12 + $0x708] sm:$0xff] }
 0x5e5   :  { %11786 = vmatprep.subr.bf16.mxu1 %v15453_v1  ;;  %v8676_v1 = vld [vmem:[#allocation12 + $0x728] sm:$0xff]  ;;  %v15507_v2 = vcombine.high %v8671_v60, %v8675_v61  ;;  %v15506_v51 = vcombine.low %v8671_v60, %v8675_v61 }
 0x5e6   :  { %v15509_v4 = vcombine.high %v8672_v63, %v8676_v1  ;;  %v15508_v44 = vcombine.low %v8672_v63, %v8676_v1 }
 0x5e7   :  { %11615 = vmatpush1.bf16.msra.mxu0 %v15450_v6  ;;  %v8679_v6 = vld [vmem:[#allocation12 + $0x740] sm:$0xff] }
 0x5e8   :  { %11787 = vmatpush1.bf16.msra.mxu1 %v15452_v8  ;;  %11616 = vmatprep.subr.bf16.mxu0 %v15459_v10  ;;  %v8683_v8 = vld [vmem:[#allocation12 + $0x760] sm:$0xff]  ;;  %v8680_v10 = vld [vmem:[#allocation12 + $0x748] sm:$0xff] }
 0x5e9   :  { %11788 = vmatprep.subr.bf16.mxu1 %v15461_v40  ;;  %v8684_v40 = vld [vmem:[#allocation12 + $0x768] sm:$0xff]  ;;  %v15515_v43 = vcombine.high %v8679_v6, %v8683_v8  ;;  %v15514_v25 = vcombine.low %v8679_v6, %v8683_v8 }
 0x5ea   :  { %v15517_v11 = vcombine.high %v8680_v10, %v8684_v40  ;;  %v15516_v24 = vcombine.low %v8680_v10, %v8684_v40 }
 0x5eb   :  { %11617 = vmatpush1.bf16.msra.mxu0 %v15458_v12  ;;  %v8687_v12 = vld [vmem:[#allocation12 + $0x780] sm:$0xff] }
 0x5ec   :  { %11789 = vmatpush1.bf16.msra.mxu1 %v15460_v17  ;;  %11618 = vmatprep.subr.bf16.mxu0 %v15467_v18  ;;  %v8691_v17 = vld [vmem:[#allocation12 + $0x7a0] sm:$0xff]  ;;  %v8688_v18 = vld [vmem:[#allocation12 + $0x788] sm:$0xff] }
 0x5ed   :  { %11790 = vmatprep.subr.bf16.mxu1 %v15469_v22  ;;  %v8692_v22 = vld [vmem:[#allocation12 + $0x7a8] sm:$0xff]  ;;  %v15523_v23 = vcombine.high %v8687_v12, %v8691_v17  ;;  %v15522_v29 = vcombine.low %v8687_v12, %v8691_v17 }
 0x5ee   :  { %v15525_v3 = vcombine.high %v8688_v18, %v8692_v22  ;;  %v15524_v35 = vcombine.low %v8688_v18, %v8692_v22 }
 0x5ef   :  { %11619 = vmatpush1.bf16.msra.mxu0 %v15466_v27  ;;  %v8695_v27 = vld [vmem:[#allocation12 + $0x7c0] sm:$0xff] }
 0x5f0   :  { %11791 = vmatpush1.bf16.msra.mxu1 %v15468_v13  ;;  %11620 = vmatprep.subr.bf16.mxu0 %v15475_v30  ;;  %v8699_v13 = vld [vmem:[#allocation12 + $0x7e0] sm:$0xff]  ;;  %v8696_v30 = vld [vmem:[#allocation12 + $0x7c8] sm:$0xff] }
 0x5f1   :  { %11792 = vmatprep.subr.bf16.mxu1 %v15477_v31  ;;  %v8700_v31 = vld [vmem:[#allocation12 + $0x7e8] sm:$0xff]  ;;  %v15531_v39 = vcombine.high %v8695_v27, %v8699_v13  ;;  %v15530_v0 = vcombine.low %v8695_v27, %v8699_v13 }
 0x5f2   :  { %v15533_v5 = vcombine.high %v8696_v30, %v8700_v31  ;;  %v15532_v46 = vcombine.low %v8696_v30, %v8700_v31 }
 0x5f3   :  { %11621 = vmatpush1.bf16.msra.mxu0 %v15474_v41  ;;  %v8703_v41 = vld [vmem:[#allocation12 + $0x800] sm:$0xff] }
 0x5f4   :  { %11793 = vmatpush1.bf16.msra.mxu1 %v15476_v15  ;;  %11622 = vmatprep.subr.bf16.mxu0 %v15483_v62  ;;  %v8707_v15 = vld [vmem:[#allocation12 + $0x820] sm:$0xff]  ;;  %v8704_v62 = vld [vmem:[#allocation12 + $0x808] sm:$0xff] }
 0x5f5   :  { %11794 = vmatprep.subr.bf16.mxu1 %v15485_v42  ;;  %v8708_v42 = vld [vmem:[#allocation12 + $0x828] sm:$0xff]  ;;  %v15539_v48 = vcombine.high %v8703_v41, %v8707_v15  ;;  %v15538_v28 = vcombine.low %v8703_v41, %v8707_v15 }
 0x5f6   :  { %v15541_v49 = vcombine.high %v8704_v62, %v8708_v42  ;;  %v15540_v54 = vcombine.low %v8704_v62, %v8708_v42 }
 0x5f7   :  { %11623 = vmatpush1.bf16.msra.mxu0 %v15482_v50  ;;  %v8711_v50 = vld [vmem:[#allocation12 + $0x840] sm:$0xff] }
 0x5f8   :  { %11795 = vmatpush1.bf16.msra.mxu1 %v15484_v52  ;;  %11624 = vmatprep.subr.bf16.mxu0 %v15491_v53  ;;  %v8715_v52 = vld [vmem:[#allocation12 + $0x860] sm:$0xff]  ;;  %v8712_v53 = vld [vmem:[#allocation12 + $0x848] sm:$0xff] }
 0x5f9   :  { %11796 = vmatprep.subr.bf16.mxu1 %v15493_v26  ;;  %v8716_v26 = vld [vmem:[#allocation12 + $0x868] sm:$0xff]  ;;  %v15547_v59 = vcombine.high %v8711_v50, %v8715_v52  ;;  %v15546_v60 = vcombine.low %v8711_v50, %v8715_v52 }
 0x5fa   :  { %v15549_v55 = vcombine.high %v8712_v53, %v8716_v26  ;;  %v15548_v61 = vcombine.low %v8712_v53, %v8716_v26 }
 0x5fb   :  { %11625 = vmatpush1.bf16.msra.mxu0 %v15490_v56  ;;  %v8719_v56 = vld [vmem:[#allocation12 + $0x880] sm:$0xff] }
 0x5fc   :  { %11797 = vmatpush1.bf16.msra.mxu1 %v15492_v57  ;;  %11626 = vmatprep.subr.bf16.mxu0 %v15499_v45  ;;  %v8723_v57 = vld [vmem:[#allocation12 + $0x8a0] sm:$0xff]  ;;  %v8720_v45 = vld [vmem:[#allocation12 + $0x888] sm:$0xff] }
 0x5fd   :  { %11798 = vmatprep.subr.bf16.mxu1 %v15501_v58  ;;  %v8724_v58 = vld [vmem:[#allocation12 + $0x8a8] sm:$0xff]  ;;  %v15555_v63 = vcombine.high %v8719_v56, %v8723_v57  ;;  %v15554_v6 = vcombine.low %v8719_v56, %v8723_v57 }
 0x5fe   :  { %v15557_v1 = vcombine.high %v8720_v45, %v8724_v58  ;;  %v15556_v8 = vcombine.low %v8720_v45, %v8724_v58 }
 0x5ff   :  { %11627 = vmatpush1.bf16.msra.mxu0 %v15498_v47  ;;  %v8727_v47 = vld [vmem:[#allocation12 + $0x8c0] sm:$0xff] }
 0x600   :  { %11799 = vmatpush1.bf16.msra.mxu1 %v15500_v20  ;;  %11628 = vmatprep.subr.bf16.mxu0 %v15507_v2  ;;  %v8731_v20 = vld [vmem:[#allocation12 + $0x8e0] sm:$0xff]  ;;  %v8728_v2 = vld [vmem:[#allocation12 + $0x8c8] sm:$0xff] }
 0x601   :  { %11800 = vmatprep.subr.bf16.mxu1 %v15509_v4  ;;  %v8732_v4 = vld [vmem:[#allocation12 + $0x8e8] sm:$0xff]  ;;  %v15563_v10 = vcombine.high %v8727_v47, %v8731_v20  ;;  %v15562_v12 = vcombine.low %v8727_v47, %v8731_v20 }
 0x602   :  { %v15565_v40 = vcombine.high %v8728_v2, %v8732_v4  ;;  %v15564_v17 = vcombine.low %v8728_v2, %v8732_v4 }
 0x603   :  { %11629 = vmatpush1.bf16.msra.mxu0 %v15506_v51  ;;  %v8735_v51 = vld [vmem:[#allocation12 + $0x900] sm:$0xff] }
 0x604   :  { %11801 = vmatpush1.bf16.msra.mxu1 %v15508_v44  ;;  %11630 = vmatprep.subr.bf16.mxu0 %v15515_v43  ;;  %v8739_v44 = vld [vmem:[#allocation12 + $0x920] sm:$0xff]  ;;  %v8736_v43 = vld [vmem:[#allocation12 + $0x908] sm:$0xff] }
 0x605   :  { %11802 = vmatprep.subr.bf16.mxu1 %v15517_v11  ;;  %v8740_v11 = vld [vmem:[#allocation12 + $0x928] sm:$0xff]  ;;  %v15571_v18 = vcombine.high %v8735_v51, %v8739_v44  ;;  %v15570_v27 = vcombine.low %v8735_v51, %v8739_v44 }
 0x606   :  { %v15573_v22 = vcombine.high %v8736_v43, %v8740_v11  ;;  %v15572_v13 = vcombine.low %v8736_v43, %v8740_v11 }
 0x607   :  { %11631 = vmatpush1.bf16.msra.mxu0 %v15514_v25  ;;  %v8743_v25 = vld [vmem:[#allocation12 + $0x940] sm:$0xff] }
 0x608   :  { %11803 = vmatpush1.bf16.msra.mxu1 %v15516_v24  ;;  %11632 = vmatprep.subr.bf16.mxu0 %v15523_v23  ;;  %v8747_v24 = vld [vmem:[#allocation12 + $0x960] sm:$0xff]  ;;  %v8744_v23 = vld [vmem:[#allocation12 + $0x948] sm:$0xff] }
 0x609   :  { %11804 = vmatprep.subr.bf16.mxu1 %v15525_v3  ;;  %v8748_v3 = vld [vmem:[#allocation12 + $0x968] sm:$0xff]  ;;  %v15579_v30 = vcombine.high %v8743_v25, %v8747_v24  ;;  %v15578_v41 = vcombine.low %v8743_v25, %v8747_v24 }
 0x60a   :  { %v15581_v31 = vcombine.high %v8744_v23, %v8748_v3  ;;  %v15580_v15 = vcombine.low %v8744_v23, %v8748_v3 }
 0x60b   :  { %11633 = vmatpush1.bf16.msra.mxu0 %v15522_v29  ;;  %v8751_v29 = vld [vmem:[#allocation12 + $0x980] sm:$0xff] }
 0x60c   :  { %11805 = vmatpush1.bf16.msra.mxu1 %v15524_v35  ;;  %11634 = vmatprep.subr.bf16.mxu0 %v15531_v39  ;;  %v8755_v35 = vld [vmem:[#allocation12 + $0x9a0] sm:$0xff]  ;;  %v8752_v39 = vld [vmem:[#allocation12 + $0x988] sm:$0xff] }
 0x60d   :  { %11806 = vmatprep.subr.bf16.mxu1 %v15533_v5  ;;  %v8756_v5 = vld [vmem:[#allocation12 + $0x9a8] sm:$0xff]  ;;  %v15587_v62 = vcombine.high %v8751_v29, %v8755_v35  ;;  %v15586_v50 = vcombine.low %v8751_v29, %v8755_v35 }
 0x60e   :  { %v15589_v42 = vcombine.high %v8752_v39, %v8756_v5  ;;  %v15588_v52 = vcombine.low %v8752_v39, %v8756_v5 }
 0x60f   :  { %11635 = vmatpush1.bf16.msra.mxu0 %v15530_v0  ;;  %v8759_v0 = vld [vmem:[#allocation12 + $0x9c0] sm:$0xff] }
 0x610   :  { %11807 = vmatpush1.bf16.msra.mxu1 %v15532_v46  ;;  %11647 = vmatprep.subr.bf16.mxu0 %v15539_v48  ;;  %v8763_v46 = vld [vmem:[#allocation12 + $0x9e0] sm:$0xff]  ;;  %v8760_v48 = vld [vmem:[#allocation12 + $0x9c8] sm:$0xff] }
 0x611   :  { %11819 = vmatprep.subr.bf16.mxu1 %v15541_v49  ;;  %v8764_v49 = vld [vmem:[#allocation12 + $0x9e8] sm:$0xff]  ;;  %v15595_v53 = vcombine.high %v8759_v0, %v8763_v46  ;;  %v15594_v56 = vcombine.low %v8759_v0, %v8763_v46 }
 0x612   :  { %11637 = vmatmul.mubr.bf16.vlgmr.msra.gmra.mrb[24].mxu0 %v17313_v34  ;;  %v15597_v26 = vcombine.high %v8760_v48, %v8764_v49  ;;  %v15596_v57 = vcombine.low %v8760_v48, %v8764_v49 }
 0x613   :  { %11809 = vmatmul.mubr.bf16.vlgmr.msra.gmra.mrb[24].mxu1 %v17313_v34  ;;  %11648 = vmatpush1.bf16.msra.mxu0 %v15538_v28  ;;  %v8767_v28 = vld [vmem:[#allocation12 + $0xa00] sm:$0xff] }
 0x614   :  { %11820 = vmatpush1.bf16.msra.mxu1 %v15540_v54  ;;  %11649 = vmatprep.subr.bf16.mxu0 %v15547_v59  ;;  %v8771_v54 = vld [vmem:[#allocation12 + $0xa20] sm:$0xff]  ;;  %v8768_v59 = vld [vmem:[#allocation12 + $0xa08] sm:$0xff] }
 0x615   :  { %11821 = vmatprep.subr.bf16.mxu1 %v15549_v55  ;;  %v8772_v55 = vld [vmem:[#allocation12 + $0xa28] sm:$0xff]  ;;  %v15603_v45 = vcombine.high %v8767_v28, %v8771_v54  ;;  %v15602_v47 = vcombine.low %v8767_v28, %v8771_v54 }
 0x616   :  { %v15605_v58 = vcombine.high %v8768_v59, %v8772_v55  ;;  %v15604_v20 = vcombine.low %v8768_v59, %v8772_v55 }
 0x617   :  { %11650 = vmatpush1.bf16.msra.mxu0 %v15546_v60  ;;  %v8775_v60 = vld [vmem:[#allocation12 + $0xa40] sm:$0xff] }
 0x618   :  { %11822 = vmatpush1.bf16.msra.mxu1 %v15548_v61  ;;  %11651 = vmatprep.subr.bf16.mxu0 %v15555_v63  ;;  %v8779_v61 = vld [vmem:[#allocation12 + $0xa60] sm:$0xff]  ;;  %v8776_v63 = vld [vmem:[#allocation12 + $0xa48] sm:$0xff] }
 0x619   :  { %11823 = vmatprep.subr.bf16.mxu1 %v15557_v1  ;;  %v8780_v1 = vld [vmem:[#allocation12 + $0xa68] sm:$0xff]  ;;  %v15611_v2 = vcombine.high %v8775_v60, %v8779_v61  ;;  %v15610_v51 = vcombine.low %v8775_v60, %v8779_v61 }
 0x61a   :  { %v15613_v4 = vcombine.high %v8776_v63, %v8780_v1  ;;  %v15612_v44 = vcombine.low %v8776_v63, %v8780_v1 }
 0x61b   :  { %11652 = vmatpush1.bf16.msra.mxu0 %v15554_v6  ;;  %v8783_v6 = vld [vmem:[#allocation12 + $0xa80] sm:$0xff] }
 0x61c   :  { %11824 = vmatpush1.bf16.msra.mxu1 %v15556_v8  ;;  %11653 = vmatprep.subr.bf16.mxu0 %v15563_v10  ;;  %v8787_v8 = vld [vmem:[#allocation12 + $0xaa0] sm:$0xff]  ;;  %v8784_v10 = vld [vmem:[#allocation12 + $0xa88] sm:$0xff] }
 0x61d   :  { %11825 = vmatprep.subr.bf16.mxu1 %v15565_v40  ;;  %v8788_v40 = vld [vmem:[#allocation12 + $0xaa8] sm:$0xff]  ;;  %v15619_v43 = vcombine.high %v8783_v6, %v8787_v8  ;;  %v15618_v25 = vcombine.low %v8783_v6, %v8787_v8 }
 0x61e   :  { %v15621_v11 = vcombine.high %v8784_v10, %v8788_v40  ;;  %v15620_v24 = vcombine.low %v8784_v10, %v8788_v40 }
 0x61f   :  { %11654 = vmatpush1.bf16.msra.mxu0 %v15562_v12  ;;  %v8791_v12 = vld [vmem:[#allocation12 + $0xac0] sm:$0xff] }
 0x620   :  { %11826 = vmatpush1.bf16.msra.mxu1 %v15564_v17  ;;  %11655 = vmatprep.subr.bf16.mxu0 %v15571_v18  ;;  %v8795_v17 = vld [vmem:[#allocation12 + $0xae0] sm:$0xff]  ;;  %v8792_v18 = vld [vmem:[#allocation12 + $0xac8] sm:$0xff] }
 0x621   :  { %11827 = vmatprep.subr.bf16.mxu1 %v15573_v22  ;;  %v8796_v22 = vld [vmem:[#allocation12 + $0xae8] sm:$0xff]  ;;  %v15627_v23 = vcombine.high %v8791_v12, %v8795_v17  ;;  %v15626_v29 = vcombine.low %v8791_v12, %v8795_v17 }
 0x622   :  { %v15629_v3 = vcombine.high %v8792_v18, %v8796_v22  ;;  %v15628_v35 = vcombine.low %v8792_v18, %v8796_v22 }
 0x623   :  { %11656 = vmatpush1.bf16.msra.mxu0 %v15570_v27  ;;  %v8799_v27 = vld [vmem:[#allocation12 + $0xb00] sm:$0xff] }
 0x624   :  { %11828 = vmatpush1.bf16.msra.mxu1 %v15572_v13  ;;  %11657 = vmatprep.subr.bf16.mxu0 %v15579_v30  ;;  %v8803_v13 = vld [vmem:[#allocation12 + $0xb20] sm:$0xff]  ;;  %v8800_v30 = vld [vmem:[#allocation12 + $0xb08] sm:$0xff] }
 0x625   :  { %11829 = vmatprep.subr.bf16.mxu1 %v15581_v31  ;;  %v8804_v31 = vld [vmem:[#allocation12 + $0xb28] sm:$0xff]  ;;  %v15635_v39 = vcombine.high %v8799_v27, %v8803_v13  ;;  %v15634_v0 = vcombine.low %v8799_v27, %v8803_v13 }
 0x626   :  { %v15637_v5 = vcombine.high %v8800_v30, %v8804_v31  ;;  %v15636_v46 = vcombine.low %v8800_v30, %v8804_v31 }
 0x627   :  { %11658 = vmatpush1.bf16.msra.mxu0 %v15578_v41  ;;  %v8807_v41 = vld [vmem:[#allocation12 + $0xb40] sm:$0xff] }
 0x628   :  { %11830 = vmatpush1.bf16.msra.mxu1 %v15580_v15  ;;  %11659 = vmatprep.subr.bf16.mxu0 %v15587_v62  ;;  %v8811_v15 = vld [vmem:[#allocation12 + $0xb60] sm:$0xff]  ;;  %v8808_v62 = vld [vmem:[#allocation12 + $0xb48] sm:$0xff] }
 0x629   :  { %11831 = vmatprep.subr.bf16.mxu1 %v15589_v42  ;;  %v8812_v42 = vld [vmem:[#allocation12 + $0xb68] sm:$0xff]  ;;  %v15643_v48 = vcombine.high %v8807_v41, %v8811_v15  ;;  %v15642_v28 = vcombine.low %v8807_v41, %v8811_v15 }
 0x62a   :  { %v15645_v49 = vcombine.high %v8808_v62, %v8812_v42  ;;  %v15644_v54 = vcombine.low %v8808_v62, %v8812_v42 }
 0x62b   :  { %11660 = vmatpush1.bf16.msra.mxu0 %v15586_v50  ;;  %v8815_v50 = vld [vmem:[#allocation12 + $0xb80] sm:$0xff] }
 0x62c   :  { %11832 = vmatpush1.bf16.msra.mxu1 %v15588_v52  ;;  %11661 = vmatprep.subr.bf16.mxu0 %v15595_v53  ;;  %v8819_v52 = vld [vmem:[#allocation12 + $0xba0] sm:$0xff]  ;;  %v8816_v53 = vld [vmem:[#allocation12 + $0xb88] sm:$0xff] }
 0x62d   :  { %11833 = vmatprep.subr.bf16.mxu1 %v15597_v26  ;;  %v8820_v26 = vld [vmem:[#allocation12 + $0xba8] sm:$0xff]  ;;  %v15651_v59 = vcombine.high %v8815_v50, %v8819_v52  ;;  %v15650_v60 = vcombine.low %v8815_v50, %v8819_v52 }
 0x62e   :  { %v15653_v55 = vcombine.high %v8816_v53, %v8820_v26  ;;  %v15652_v61 = vcombine.low %v8816_v53, %v8820_v26  ;;  %v8843_v26 = vld [vmem:[#allocation12 + $0xc60] sm:$0xff] }
 0x62f   :  { %11662 = vmatpush1.bf16.msra.mxu0 %v15594_v56  ;;  %v8823_v56 = vld [vmem:[#allocation12 + $0xbc0] sm:$0xff] }
 0x630   :  { %11834 = vmatpush1.bf16.msra.mxu1 %v15596_v57  ;;  %11663 = vmatprep.subr.bf16.mxu0 %v15603_v45  ;;  %v8827_v57 = vld [vmem:[#allocation12 + $0xbe0] sm:$0xff]  ;;  %v8824_v45 = vld [vmem:[#allocation12 + $0xbc8] sm:$0xff] }
 0x631   :  { %11835 = vmatprep.subr.bf16.mxu1 %v15605_v58  ;;  %v8828_v58 = vld [vmem:[#allocation12 + $0xbe8] sm:$0xff]  ;;  %v15659_v63 = vcombine.high %v8823_v56, %v8827_v57  ;;  %v15658_v6 = vcombine.low %v8823_v56, %v8827_v57 }
 0x632   :  { %v15661_v1 = vcombine.high %v8824_v45, %v8828_v58  ;;  %v15660_v8 = vcombine.low %v8824_v45, %v8828_v58  ;;  %v8847_v58 = vld [vmem:[#allocation12 + $0xc80] sm:$0xff] }
 0x633   :  { %11664 = vmatpush1.bf16.msra.mxu0 %v15602_v47  ;;  %v17329_v47 = vld [vmem:[#allocation12 + $0xc00] sm:$0xff] }
 0x634   :  { %11836 = vmatpush1.bf16.msra.mxu1 %v15604_v20  ;;  %11665 = vmatprep.subr.bf16.mxu0 %v15611_v2  ;;  %v17331_v20 = vld [vmem:[#allocation12 + $0xc20] sm:$0xff]  ;;  %v17333_v2 = vld [vmem:[#allocation12 + $0xc08] sm:$0xff] }
 0x635   :  { %11837 = vmatprep.subr.bf16.mxu1 %v15613_v4  ;;  %v17335_v4 = vld [vmem:[#allocation12 + $0xc28] sm:$0xff]  ;;  %v15667_v10 = vcombine.high %v17329_v47, %v17331_v20  ;;  %v15666_v56 = vcombine.low %v17329_v47, %v17331_v20 }
 0x636   :  { %v15669_v40 = vcombine.high %v17333_v2, %v17335_v4  ;;  %v15668_v57 = vcombine.low %v17333_v2, %v17335_v4 }
 0x637   :  { %11666 = vmatpush1.bf16.msra.mxu0 %v15610_v51  ;;  %v16675_v51 = vld [vmem:[#allocation10] sm:$0xff] }
 0x638   :  { %11838 = vmatpush1.bf16.msra.mxu1 %v15612_v44  ;;  %11667 = vmatprep.subr.bf16.mxu0 %v15619_v43  ;;  %v5154_v44 = vrot.slane %v16675_v51, %v17184_v32  ;;  %v5162_v43 = vrot.slane %v16675_v51, %v17198_v7  ;;  %v5166_v12 = vrot.slane %v16675_v51, %v17201_v9 }
 0x639   :  { %11839 = vmatprep.subr.bf16.mxu1 %v15621_v11  ;;  %v5158_v11 = vrot.slane %v16675_v51, %v17187_v36  ;;  %v8860_v51 = vld [vmem:[#allocation12 + $0xce8] sm:$0xff] }
 0x63b   :  { %11668 = vmatpush1.bf16.msra.mxu0 %v15618_v25 }
 0x63c   :  { %11840 = vmatpush1.bf16.msra.mxu1 %v15620_v24  ;;  %11669 = vmatprep.subr.bf16.mxu0 %v15627_v23 }
 0x63d   :  { %11841 = vmatprep.subr.bf16.mxu1 %v15629_v3 }
 0x63f   :  { %11670 = vmatpush1.bf16.msra.mxu0 %v15626_v29 }
 0x640   :  { %11842 = vmatpush1.bf16.msra.mxu1 %v15628_v35  ;;  %11671 = vmatprep.subr.bf16.mxu0 %v15635_v39 }
 0x641   :  { %11843 = vmatprep.subr.bf16.mxu1 %v15637_v5 }
 0x643   :  { %11672 = vmatpush1.bf16.msra.mxu0 %v15634_v0 }
 0x644   :  { %11844 = vmatpush1.bf16.msra.mxu1 %v15636_v46  ;;  %11673 = vmatprep.subr.bf16.mxu0 %v15643_v48 }
 0x645   :  { %11845 = vmatprep.subr.bf16.mxu1 %v15645_v49  ;;  %v8839_v49 = vld [vmem:[#allocation12 + $0xc40] sm:$0xff] }
 0x646   :  { %v15674_v47 = vcombine.low %v8839_v49, %v8843_v26 }
 0x647   :  { %11674 = vmatpush1.bf16.msra.mxu0 %v15642_v28  ;;  %v8840_v28 = vld [vmem:[#allocation12 + $0xc48] sm:$0xff] }
 0x648   :  { %11846 = vmatpush1.bf16.msra.mxu1 %v15644_v54  ;;  %11675 = vmatprep.subr.bf16.mxu0 %v15651_v59  ;;  %v8844_v54 = vld [vmem:[#allocation12 + $0xc68] sm:$0xff] }
 0x649   :  { %11847 = vmatprep.subr.bf16.mxu1 %v15653_v55  ;;  %v15676_v20 = vcombine.low %v8840_v28, %v8844_v54 }
 0x64b   :  { %11676 = vmatpush1.bf16.msra.mxu0 %v15650_v60  ;;  %v15675_v60 = vcombine.high %v8839_v49, %v8843_v26  ;;  %v8891_v26 = vld [vmem:[#allocation12 + $0xde0] sm:$0xff] }
 0x64c   :  { %11848 = vmatpush1.bf16.msra.mxu1 %v15652_v61  ;;  %11677 = vmatprep.subr.bf16.mxu0 %v15659_v63  ;;  %v15677_v61 = vcombine.high %v8840_v28, %v8844_v54  ;;  %v8851_v63 = vld [vmem:[#allocation12 + $0xca0] sm:$0xff]  ;;  %v8888_v28 = vld [vmem:[#allocation12 + $0xdc8] sm:$0xff] }
 0x64d   :  { %11849 = vmatprep.subr.bf16.mxu1 %v15661_v1  ;;  %v8848_v1 = vld [vmem:[#allocation12 + $0xc88] sm:$0xff]  ;;  %v15683_v2 = vcombine.high %v8847_v58, %v8851_v63 }
 0x64e   :  { %v8892_v54 = vld [vmem:[#allocation12 + $0xde8] sm:$0xff] }
 0x64f   :  { %11678 = vmatpush1.bf16.msra.mxu0 %v15658_v6  ;;  %v8852_v6 = vld [vmem:[#allocation12 + $0xca8] sm:$0xff] }
 0x650   :  { %11850 = vmatpush1.bf16.msra.mxu1 %v15660_v8  ;;  %11690 = vmatprep.subr.bf16.mxu0 %v15667_v10  ;;  %v15685_v4 = vcombine.high %v8848_v1, %v8852_v6  ;;  %v8855_v8 = vld [vmem:[#allocation12 + $0xcc0] sm:$0xff] }
 0x651   :  { %11862 = vmatprep.subr.bf16.mxu1 %v15669_v40  ;;  %v8859_v10 = vld [vmem:[#allocation12 + $0xce0] sm:$0xff]  ;;  %v8856_v40 = vld [vmem:[#allocation12 + $0xcc8] sm:$0xff] }
 0x665   :  { %v8242_v17 = vpop.f32.mrb[20].mxu0 }
 0x666   :  { %v16074_v18 = vadd.f32 %v8242_v17, %v5154_v44  ;;  %v8414_v22 = vpop.f32.mrb[20].mxu1  ;;  %v8244_v25 = vpop.f32.mrb[21].mxu0  ;;  %v8863_v17 = vld [vmem:[#allocation12 + $0xd00] sm:$0xff] }
 0x667   :  { %v16078_v24 = vadd.f32 %v8414_v22, %v5162_v43  ;;  %v16075_v23 = vadd.f32 %v8244_v25, %v5158_v11  ;;  %v8416_v3 = vpop.f32.mrb[21].mxu1  ;;  %v8246_v27 = vpop.f32.mrb[22].mxu0  ;;  %v8864_v22 = vld [vmem:[#allocation12 + $0xd08] sm:$0xff] }
 0x668   :  { %v16079_v13 = vadd.f32 %v8416_v3, %v5166_v12  ;;  %v16076_v30 = vadd.f32 %v8246_v27, %v5154_v44  ;;  %v8418_v31 = vpop.f32.mrb[22].mxu1  ;;  %v8248_v29 = vpop.f32.mrb[23].mxu0  ;;  %v8427_v41 = vmax.f32 %v16074_v18, 0.0  ;;  %v15682_v44 = vcombine.low %v8847_v58, %v8851_v63  ;;  %v8867_v18 = vld [vmem:[#allocation12 + $0xd20] sm:$0xff]  ;;  %v8868_v25 = vld [vmem:[#allocation12 + $0xd28] sm:$0xff] }
 0x669   :  { %v16080_v35 = vadd.f32 %v8418_v31, %v5162_v43  ;;  %v16077_v39 = vadd.f32 %v8248_v29, %v5158_v11  ;;  %v8420_v5 = vpop.f32.mrb[23].mxu1  ;;  %v8429_v42 = vmax.f32 %v16078_v24, 0.0  ;;  %v8428_v0 = vmax.f32 %v16075_v23, 0.0  ;;  %v8872_v31 = vld [vmem:[#allocation12 + $0xd48] sm:$0xff]  ;;  %v8899_v63 = vld [vmem:[#allocation12 + $0xe20] sm:$0xff] }
 0x66a   :  { %v8435_v15 = vmax.f32 %v16076_v30, 0.0  ;;  %v16081_v62 = vadd.f32 %v8420_v5, %v5166_v12  ;;  %v8430_v50 = vmax.f32 %v16079_v13, 0.0  ;;  %v15684_v43 = vcombine.low %v8848_v1, %v8852_v6  ;;  %v8871_v13 = vld [vmem:[#allocation12 + $0xd40] sm:$0xff]  ;;  %v8876_v29 = vld [vmem:[#allocation12 + $0xd68] sm:$0xff] }
 0x66b   :  { %v8437_v46 = vmax.f32 %v16080_v35, 0.0  ;;  %v8436_v48 = vmax.f32 %v16077_v39, 0.0  ;;  %v15691_v11 = vcombine.high %v8855_v8, %v8859_v10  ;;  %v15693_v12 = vcombine.high %v8856_v40, %v8860_v51  ;;  %v8875_v30 = vld [vmem:[#allocation12 + $0xd60] sm:$0xff]  ;;  %v8896_v1 = vld [vmem:[#allocation12 + $0xe08] sm:$0xff] }
 0x66c   :  { %v17345_v52 = vpack.c.bf16 %v8435_v15, %v8427_v41  ;;  %v8438_v53 = vmax.f32 %v16081_v62, 0.0  ;;  %v15690_v24 = vcombine.low %v8855_v8, %v8859_v10  ;;  %v15692_v23 = vcombine.low %v8856_v40, %v8860_v51  ;;  %v8879_v15 = vld [vmem:[#allocation12 + $0xd80] sm:$0xff]  ;;  %v8900_v6 = vld [vmem:[#allocation12 + $0xe28] sm:$0xff] }
 0x66d   :  { %v17347_v59 = vpack.c.bf16 %v8437_v46, %v8429_v42  ;;  %v17349_v55 = vpack.c.bf16 %v8436_v48, %v8428_v0  ;;  %v15699_v3 = vcombine.high %v8863_v17, %v8867_v18  ;;  %v15701_v27 = vcombine.high %v8864_v22, %v8868_v25  ;;  %v8883_v62 = vld [vmem:[#allocation12 + $0xda0] sm:$0xff]  ;;  %v8880_v42 = vld [vmem:[#allocation12 + $0xd88] sm:$0xff] }
 0x66e   :  { %v17355_v45 = vpack.c.bf16 %v8438_v53, %v8430_v50  ;;  %v15698_v35 = vcombine.low %v8863_v17, %v8867_v18  ;;  %v15700_v39 = vcombine.low %v8864_v22, %v8868_v25  ;;  %v15707_v5 = vcombine.high %v8871_v13, %v8875_v30  ;;  %v8884_v0 = vld [vmem:[#allocation12 + $0xda8] sm:$0xff]  ;;  %v8887_v53 = vld [vmem:[#allocation12 + $0xdc0] sm:$0xff] }
 0x66f   :  { %11679 = vmatprep.mubr.bf16.mxu0 %v17349_v55  ;;  %11851 = vmatprep.mubr.bf16.mxu1 %v17349_v55  ;;  %v15709_v41 = vcombine.high %v8872_v31, %v8876_v29  ;;  %v15706_v46 = vcombine.low %v8871_v13, %v8875_v30  ;;  %v15708_v48 = vcombine.low %v8872_v31, %v8876_v29  ;;  %v8903_v8 = vld [vmem:[#allocation12 + $0xe40] sm:$0xff]  ;;  %v8904_v40 = vld [vmem:[#allocation12 + $0xe48] sm:$0xff] }
 0x670   :  { %11680 = vmatmul.mubr.bf16.vlgmr.msra.gmra.mrb[24].mxu0 %v17345_v52  ;;  %11852 = vmatmul.mubr.bf16.vlgmr.msra.gmra.mrb[24].mxu1 %v17345_v52  ;;  %v15715_v49 = vcombine.high %v8879_v15, %v8883_v62  ;;  %v15717_v50 = vcombine.high %v8880_v42, %v8884_v0  ;;  %v15723_v58 = vcombine.high %v8887_v53, %v8891_v26  ;;  %v8907_v10 = vld [vmem:[#allocation12 + $0xe60] sm:$0xff]  ;;  %v8908_v51 = vld [vmem:[#allocation12 + $0xe68] sm:$0xff] }
 0x671   :  { %11691 = vmatpush1.bf16.msra.mxu0 %v15666_v56  ;;  %11863 = vmatpush1.bf16.msra.mxu1 %v15668_v57  ;;  %v15714_v56 = vcombine.low %v8879_v15, %v8883_v62  ;;  %v15716_v57 = vcombine.low %v8880_v42, %v8884_v0  ;;  %v8911_v17 = vld [vmem:[#allocation12 + $0xe80] sm:$0xff]  ;;  %v8912_v22 = vld [vmem:[#allocation12 + $0xe88] sm:$0xff] }
 0x672   :  { %11722 = vmatprep.mubr.bf16.mxu0 %v17355_v45  ;;  %11894 = vmatprep.mubr.bf16.mxu1 %v17355_v45  ;;  %v8915_v18 = vld [vmem:[#allocation12 + $0xea0] sm:$0xff]  ;;  %v8916_v25 = vld [vmem:[#allocation12 + $0xea8] sm:$0xff] }
 0x673   :  { %11692 = vmatprep.subr.bf16.mxu0 %v15675_v60  ;;  %11864 = vmatprep.subr.bf16.mxu1 %v15677_v61  ;;  %v15725_v60 = vcombine.high %v8888_v28, %v8892_v54  ;;  %v8895_v61 = vld [vmem:[#allocation12 + $0xe00] sm:$0xff]  ;;  %v8920_v31 = vld [vmem:[#allocation12 + $0xec8] sm:$0xff] }
 0x674   :  { %v8919_v13 = vld [vmem:[#allocation12 + $0xec0] sm:$0xff]  ;;  %v8924_v29 = vld [vmem:[#allocation12 + $0xee8] sm:$0xff] }
 0x675   :  { %11693 = vmatpush1.bf16.msra.mxu0 %v15674_v47  ;;  %11865 = vmatpush1.bf16.msra.mxu1 %v15676_v20  ;;  %v15722_v47 = vcombine.low %v8887_v53, %v8891_v26  ;;  %v15724_v20 = vcombine.low %v8888_v28, %v8892_v54  ;;  %v8923_v30 = vld [vmem:[#allocation12 + $0xee0] sm:$0xff]  ;;  %v8928_v42 = vld [vmem:[#allocation12 + $0xf08] sm:$0xff] }
 0x676   :  { %11694 = vmatprep.subr.bf16.mxu0 %v15683_v2  ;;  %11866 = vmatprep.subr.bf16.mxu1 %v15685_v4  ;;  %v15731_v2 = vcombine.high %v8895_v61, %v8899_v63  ;;  %v15733_v4 = vcombine.high %v8896_v1, %v8900_v6  ;;  %v8927_v15 = vld [vmem:[#allocation12 + $0xf00] sm:$0xff]  ;;  %v8932_v0 = vld [vmem:[#allocation12 + $0xf28] sm:$0xff] }
 0x677   :  { %v8931_v62 = vld [vmem:[#allocation12 + $0xf20] sm:$0xff]  ;;  %v8936_v28 = vld [vmem:[#allocation12 + $0xf48] sm:$0xff] }
 0x678   :  { %v8935_v53 = vld [vmem:[#allocation12 + $0xf40] sm:$0xff]  ;;  %v8940_v54 = vld [vmem:[#allocation12 + $0xf68] sm:$0xff] }
 0x679   :  { %11695 = vmatpush1.bf16.msra.mxu0 %v15682_v44  ;;  %11867 = vmatpush1.bf16.msra.mxu1 %v15684_v43  ;;  %v15730_v44 = vcombine.low %v8895_v61, %v8899_v63  ;;  %v15732_v43 = vcombine.low %v8896_v1, %v8900_v6  ;;  %v8939_v26 = vld [vmem:[#allocation12 + $0xf60] sm:$0xff]  ;;  %v8944_v1 = vld [vmem:[#allocation12 + $0xf88] sm:$0xff] }
 0x67a   :  { %11696 = vmatprep.subr.bf16.mxu0 %v15691_v11  ;;  %11868 = vmatprep.subr.bf16.mxu1 %v15693_v12  ;;  %v15739_v11 = vcombine.high %v8903_v8, %v8907_v10  ;;  %v15741_v12 = vcombine.high %v8904_v40, %v8908_v51  ;;  %v8943_v61 = vld [vmem:[#allocation12 + $0xf80] sm:$0xff]  ;;  %v8948_v6 = vld [vmem:[#allocation12 + $0xfa8] sm:$0xff] }
 0x67b   :  { %v8947_v63 = vld [vmem:[#allocation12 + $0xfa0] sm:$0xff] }
 0x67d   :  { %11697 = vmatpush1.bf16.msra.mxu0 %v15690_v24  ;;  %11869 = vmatpush1.bf16.msra.mxu1 %v15692_v23  ;;  %v15738_v24 = vcombine.low %v8903_v8, %v8907_v10  ;;  %v15740_v23 = vcombine.low %v8904_v40, %v8908_v51  ;;  %v8951_v8 = vld [vmem:[#allocation12 + $0xfc0] sm:$0xff]  ;;  %v8952_v40 = vld [vmem:[#allocation12 + $0xfc8] sm:$0xff] }
 0x67e   :  { %11698 = vmatprep.subr.bf16.mxu0 %v15699_v3  ;;  %11870 = vmatprep.subr.bf16.mxu1 %v15701_v27  ;;  %v15747_v3 = vcombine.high %v8911_v17, %v8915_v18  ;;  %v15749_v27 = vcombine.high %v8912_v22, %v8916_v25  ;;  %v8955_v10 = vld [vmem:[#allocation12 + $0xfe0] sm:$0xff]  ;;  %v8956_v51 = vld [vmem:[#allocation12 + $0xfe8] sm:$0xff] }
 0x681   :  { %11699 = vmatpush1.bf16.msra.mxu0 %v15698_v35  ;;  %11871 = vmatpush1.bf16.msra.mxu1 %v15700_v39  ;;  %v15746_v35 = vcombine.low %v8911_v17, %v8915_v18  ;;  %v15748_v39 = vcombine.low %v8912_v22, %v8916_v25  ;;  %v8449_v17 = vld [vmem:[#allocation12 + $0x10] sm:$0xff]  ;;  %v8450_v22 = vld [vmem:[#allocation12 + $0x18] sm:$0xff] }
 0x682   :  { %11700 = vmatprep.subr.bf16.mxu0 %v15707_v5  ;;  %11872 = vmatprep.subr.bf16.mxu1 %v15709_v41  ;;  %v15755_v5 = vcombine.high %v8919_v13, %v8923_v30  ;;  %v15757_v41 = vcombine.high %v8920_v31, %v8924_v29  ;;  %v8453_v18 = vld [vmem:[#allocation12 + $0x30] sm:$0xff]  ;;  %v8454_v25 = vld [vmem:[#allocation12 + $0x38] sm:$0xff] }
 0x685   :  { %11701 = vmatpush1.bf16.msra.mxu0 %v15706_v46  ;;  %11873 = vmatpush1.bf16.msra.mxu1 %v15708_v48  ;;  %v15754_v46 = vcombine.low %v8919_v13, %v8923_v30  ;;  %v15756_v48 = vcombine.low %v8920_v31, %v8924_v29  ;;  %v8457_v13 = vld [vmem:[#allocation12 + $0x50] sm:$0xff]  ;;  %v8458_v31 = vld [vmem:[#allocation12 + $0x58] sm:$0xff] }
 0x686   :  { %11702 = vmatprep.subr.bf16.mxu0 %v15715_v49  ;;  %11874 = vmatprep.subr.bf16.mxu1 %v15717_v50  ;;  %v15763_v49 = vcombine.high %v8927_v15, %v8931_v62  ;;  %v15765_v50 = vcombine.high %v8928_v42, %v8932_v0  ;;  %v8461_v30 = vld [vmem:[#allocation12 + $0x70] sm:$0xff]  ;;  %v8462_v29 = vld [vmem:[#allocation12 + $0x78] sm:$0xff] }
 0x689   :  { %11703 = vmatpush1.bf16.msra.mxu0 %v15714_v56  ;;  %11875 = vmatpush1.bf16.msra.mxu1 %v15716_v57  ;;  %v15762_v56 = vcombine.low %v8927_v15, %v8931_v62  ;;  %v15764_v57 = vcombine.low %v8928_v42, %v8932_v0  ;;  %v8465_v15 = vld [vmem:[#allocation12 + $0x90] sm:$0xff]  ;;  %v8466_v42 = vld [vmem:[#allocation12 + $0x98] sm:$0xff] }
 0x68a   :  { %11704 = vmatprep.subr.bf16.mxu0 %v15723_v58  ;;  %11876 = vmatprep.subr.bf16.mxu1 %v15725_v60  ;;  %v15771_v58 = vcombine.high %v8935_v53, %v8939_v26  ;;  %v15773_v60 = vcombine.high %v8936_v28, %v8940_v54  ;;  %v8469_v62 = vld [vmem:[#allocation12 + $0xb0] sm:$0xff]  ;;  %v8470_v0 = vld [vmem:[#allocation12 + $0xb8] sm:$0xff] }
 0x68d   :  { %11705 = vmatpush1.bf16.msra.mxu0 %v15722_v47  ;;  %11877 = vmatpush1.bf16.msra.mxu1 %v15724_v20  ;;  %v15770_v47 = vcombine.low %v8935_v53, %v8939_v26  ;;  %v15772_v20 = vcombine.low %v8936_v28, %v8940_v54  ;;  %v8473_v53 = vld [vmem:[#allocation12 + $0xd0] sm:$0xff]  ;;  %v8474_v28 = vld [vmem:[#allocation12 + $0xd8] sm:$0xff] }
 0x68e   :  { %11706 = vmatprep.subr.bf16.mxu0 %v15731_v2  ;;  %11878 = vmatprep.subr.bf16.mxu1 %v15733_v4  ;;  %v15779_v2 = vcombine.high %v8943_v61, %v8947_v63  ;;  %v15781_v4 = vcombine.high %v8944_v1, %v8948_v6  ;;  %v8477_v26 = vld [vmem:[#allocation12 + $0xf0] sm:$0xff]  ;;  %v8478_v54 = vld [vmem:[#allocation12 + $0xf8] sm:$0xff] }
 0x691   :  { %11707 = vmatpush1.bf16.msra.mxu0 %v15730_v44  ;;  %11879 = vmatpush1.bf16.msra.mxu1 %v15732_v43  ;;  %v15778_v44 = vcombine.low %v8943_v61, %v8947_v63  ;;  %v15780_v43 = vcombine.low %v8944_v1, %v8948_v6  ;;  %v8481_v61 = vld [vmem:[#allocation12 + $0x110] sm:$0xff]  ;;  %v8486_v1 = vld [vmem:[#allocation12 + $0x138] sm:$0xff]  ;;  %v15310_v6 = vcombine.low %v8473_v53, %v8477_v26 }
 0x692   :  { %11708 = vmatprep.subr.bf16.mxu0 %v15739_v11  ;;  %11880 = vmatprep.subr.bf16.mxu1 %v15741_v12  ;;  %v15787_v11 = vcombine.high %v8951_v8, %v8955_v10  ;;  %v15789_v12 = vcombine.high %v8952_v40, %v8956_v51  ;;  %v8485_v63 = vld [vmem:[#allocation12 + $0x130] sm:$0xff] }
 0x695   :  { %11709 = vmatpush1.bf16.msra.mxu0 %v15738_v24  ;;  %11881 = vmatpush1.bf16.msra.mxu1 %v15740_v23  ;;  %v15786_v24 = vcombine.low %v8951_v8, %v8955_v10  ;;  %v15788_v23 = vcombine.low %v8952_v40, %v8956_v51  ;;  %v8493_v8 = vld [vmem:[#allocation12 + $0x170] sm:$0xff]  ;;  %v8490_v10 = vld [vmem:[#allocation12 + $0x158] sm:$0xff]  ;;  %v15318_v51 = vcombine.low %v8481_v61, %v8485_v63 }
 0x696   :  { %11710 = vmatprep.subr.bf16.mxu0 %v15747_v3  ;;  %11882 = vmatprep.subr.bf16.mxu1 %v15749_v27  ;;  %v15287_v3 = vcombine.high %v8449_v17, %v8453_v18  ;;  %v15289_v27 = vcombine.high %v8450_v22, %v8454_v25  ;;  %v8494_v40 = vld [vmem:[#allocation12 + $0x178] sm:$0xff] }
 0x699   :  { %11711 = vmatpush1.bf16.msra.mxu0 %v15746_v35  ;;  %11883 = vmatpush1.bf16.msra.mxu1 %v15748_v39  ;;  %v15286_v35 = vcombine.low %v8449_v17, %v8453_v18  ;;  %v15288_v39 = vcombine.low %v8450_v22, %v8454_v25  ;;  %v8501_v17 = vld [vmem:[#allocation12 + $0x1b0] sm:$0xff]  ;;  %v8498_v18 = vld [vmem:[#allocation12 + $0x198] sm:$0xff] }
 0x69a   :  { %11712 = vmatprep.subr.bf16.mxu0 %v15755_v5  ;;  %11884 = vmatprep.subr.bf16.mxu1 %v15757_v41  ;;  %v15295_v5 = vcombine.high %v8457_v13, %v8461_v30  ;;  %v15297_v41 = vcombine.high %v8458_v31, %v8462_v29  ;;  %v8502_v22 = vld [vmem:[#allocation12 + $0x1b8] sm:$0xff] }
 0x69d   :  { %11713 = vmatpush1.bf16.msra.mxu0 %v15754_v46  ;;  %11885 = vmatpush1.bf16.msra.mxu1 %v15756_v48  ;;  %v15294_v46 = vcombine.low %v8457_v13, %v8461_v30  ;;  %v15296_v48 = vcombine.low %v8458_v31, %v8462_v29  ;;  %v8509_v13 = vld [vmem:[#allocation12 + $0x1f0] sm:$0xff]  ;;  %v8506_v30 = vld [vmem:[#allocation12 + $0x1d8] sm:$0xff] }
 0x69e   :  { %11714 = vmatprep.subr.bf16.mxu0 %v15763_v49  ;;  %11886 = vmatprep.subr.bf16.mxu1 %v15765_v50  ;;  %v15303_v49 = vcombine.high %v8465_v15, %v8469_v62  ;;  %v15305_v50 = vcombine.high %v8466_v42, %v8470_v0  ;;  %v8510_v31 = vld [vmem:[#allocation12 + $0x1f8] sm:$0xff] }
 0x6a1   :  { %11715 = vmatpush1.bf16.msra.mxu0 %v15762_v56  ;;  %11887 = vmatpush1.bf16.msra.mxu1 %v15764_v57  ;;  %v15302_v56 = vcombine.low %v8465_v15, %v8469_v62  ;;  %v15304_v57 = vcombine.low %v8466_v42, %v8470_v0  ;;  %v8517_v15 = vld [vmem:[#allocation12 + $0x230] sm:$0xff]  ;;  %v8514_v62 = vld [vmem:[#allocation12 + $0x218] sm:$0xff] }
 0x6a2   :  { %11716 = vmatprep.subr.bf16.mxu0 %v15771_v58  ;;  %11888 = vmatprep.subr.bf16.mxu1 %v15773_v60  ;;  %v15311_v58 = vcombine.high %v8473_v53, %v8477_v26  ;;  %v15313_v60 = vcombine.high %v8474_v28, %v8478_v54  ;;  %v8518_v42 = vld [vmem:[#allocation12 + $0x238] sm:$0xff]  ;;  %v8525_v53 = vld [vmem:[#allocation12 + $0x270] sm:$0xff] }
 0x6a3   :  { %v8522_v26 = vld [vmem:[#allocation12 + $0x258] sm:$0xff] }
 0x6a5   :  { %11717 = vmatpush1.bf16.msra.mxu0 %v15770_v47  ;;  %11889 = vmatpush1.bf16.msra.mxu1 %v15772_v20  ;;  %v15312_v47 = vcombine.low %v8474_v28, %v8478_v54  ;;  %v15319_v20 = vcombine.high %v8481_v61, %v8485_v63  ;;  %v8526_v28 = vld [vmem:[#allocation12 + $0x278] sm:$0xff]  ;;  %v8533_v61 = vld [vmem:[#allocation12 + $0x2b0] sm:$0xff] }
 0x6a6   :  { %11718 = vmatprep.subr.bf16.mxu0 %v15779_v2  ;;  %11890 = vmatprep.subr.bf16.mxu1 %v15781_v4  ;;  %v8489_v4 = vld [vmem:[#allocation12 + $0x150] sm:$0xff]  ;;  %v8530_v63 = vld [vmem:[#allocation12 + $0x298] sm:$0xff] }
 0x6a7   :  { %v15326_v25 = vcombine.low %v8489_v4, %v8493_v8 }
 0x6a9   :  { %11719 = vmatpush1.bf16.msra.mxu0 %v15778_v44  ;;  %11891 = vmatpush1.bf16.msra.mxu1 %v15780_v43  ;;  %v15327_v43 = vcombine.high %v8489_v4, %v8493_v8  ;;  %v8541_v4 = vld [vmem:[#allocation12 + $0x2f0] sm:$0xff]  ;;  %v8538_v8 = vld [vmem:[#allocation12 + $0x2d8] sm:$0xff] }
 0x6aa   :  { %11720 = vmatprep.subr.bf16.mxu0 %v15787_v11  ;;  %11892 = vmatprep.subr.bf16.mxu1 %v15789_v12  ;;  %v15329_v11 = vcombine.high %v8490_v10, %v8494_v40  ;;  %v8497_v12 = vld [vmem:[#allocation12 + $0x190] sm:$0xff] }
 0x6ab   :  { %v15334_v29 = vcombine.low %v8497_v12, %v8501_v17 }
 0x6ad   :  { %11721 = vmatpush1.bf16.msra.mxu0 %v15786_v24  ;;  %11893 = vmatpush1.bf16.msra.mxu1 %v15788_v23  ;;  %v15328_v24 = vcombine.low %v8490_v10, %v8494_v40  ;;  %v15335_v23 = vcombine.high %v8497_v12, %v8501_v17  ;;  %v8542_v10 = vld [vmem:[#allocation12 + $0x2f8] sm:$0xff]  ;;  %v8549_v12 = vld [vmem:[#allocation12 + $0x330] sm:$0xff] }
 0x6ae   :  { %11905 = vmatprep.subr.bf16.mxu0 %v15287_v3  ;;  %12077 = vmatprep.subr.bf16.mxu1 %v15289_v27  ;;  %v15337_v3 = vcombine.high %v8498_v18, %v8502_v22  ;;  %v8505_v27 = vld [vmem:[#allocation12 + $0x1d0] sm:$0xff]  ;;  %v8546_v17 = vld [vmem:[#allocation12 + $0x318] sm:$0xff] }
 0x6af   :  { %v15342_v0 = vcombine.low %v8505_v27, %v8509_v13 }
 0x6b0   :  { %11723 = vmatmul.mubr.bf16.vlgmr.msra.gmra.mrb[24].mxu0 %v17347_v59  ;;  %11895 = vmatmul.mubr.bf16.vlgmr.msra.gmra.mrb[24].mxu1 %v17347_v59 }
 0x6b1   :  { %11906 = vmatpush1.bf16.msra.mxu0 %v15286_v35  ;;  %11937 = vmatprep.mubr.bf16.mxu0 %v17315_v37  ;;  %v15336_v35 = vcombine.low %v8498_v18, %v8502_v22  ;;  %v8550_v18 = vld [vmem:[#allocation12 + $0x338] sm:$0xff] }
 0x6b2   :  { %12078 = vmatpush1.bf16.msra.mxu1 %v15288_v39  ;;  %12109 = vmatprep.mubr.bf16.mxu1 %v17315_v37  ;;  %v8482_v37 = vld [vmem:[#allocation12 + $0x118] sm:$0xff]  ;;  %v15343_v39 = vcombine.high %v8505_v27, %v8509_v13  ;;  %v8557_v27 = vld [vmem:[#allocation12 + $0x370] sm:$0xff] }
 0x6b3   :  { %11907 = vmatprep.subr.bf16.mxu0 %v15295_v5  ;;  %12079 = vmatprep.subr.bf16.mxu1 %v15297_v41  ;;  %v15321_v2 = vcombine.high %v8482_v37, %v8486_v1  ;;  %v15320_v44 = vcombine.low %v8482_v37, %v8486_v1  ;;  %v15345_v5 = vcombine.high %v8506_v30, %v8510_v31  ;;  %v8513_v41 = vld [vmem:[#allocation12 + $0x210] sm:$0xff]  ;;  %v8534_v37 = vld [vmem:[#allocation12 + $0x2b8] sm:$0xff] }
 0x6b4   :  { %v15350_v54 = vcombine.low %v8513_v41, %v8517_v15  ;;  %v8554_v13 = vld [vmem:[#allocation12 + $0x358] sm:$0xff] }
 0x6b5   :  { %11908 = vmatpush1.bf16.msra.mxu0 %v15294_v46  ;;  %v15344_v46 = vcombine.low %v8506_v30, %v8510_v31  ;;  %v8558_v30 = vld [vmem:[#allocation12 + $0x378] sm:$0xff] }
 0x6b6   :  { %12080 = vmatpush1.bf16.msra.mxu1 %v15296_v48  ;;  %11909 = vmatprep.subr.bf16.mxu0 %v15303_v49  ;;  %v15351_v48 = vcombine.high %v8513_v41, %v8517_v15  ;;  %v15353_v49 = vcombine.high %v8514_v62, %v8518_v42  ;;  %v8565_v41 = vld [vmem:[#allocation12 + $0x3b0] sm:$0xff]  ;;  %v8562_v15 = vld [vmem:[#allocation12 + $0x398] sm:$0xff] }
 0x6b7   :  { %12081 = vmatprep.subr.bf16.mxu1 %v15305_v50  ;;  %v8521_v50 = vld [vmem:[#allocation12 + $0x250] sm:$0xff] }
 0x6b8   :  { %v15358_v1 = vcombine.low %v8521_v50, %v8525_v53 }
 0x6b9   :  { %11910 = vmatpush1.bf16.msra.mxu0 %v15302_v56  ;;  %v15352_v56 = vcombine.low %v8514_v62, %v8518_v42  ;;  %v8566_v62 = vld [vmem:[#allocation12 + $0x3b8] sm:$0xff] }
 0x6ba   :  { %12082 = vmatpush1.bf16.msra.mxu1 %v15304_v57  ;;  %11911 = vmatprep.subr.bf16.mxu0 %v15311_v58  ;;  %v15359_v57 = vcombine.high %v8521_v50, %v8525_v53  ;;  %v15361_v58 = vcombine.high %v8522_v26, %v8526_v28  ;;  %v8573_v50 = vld [vmem:[#allocation12 + $0x3f0] sm:$0xff]  ;;  %v8570_v53 = vld [vmem:[#allocation12 + $0x3d8] sm:$0xff] }
 0x6bb   :  { %12083 = vmatprep.subr.bf16.mxu1 %v15313_v60  ;;  %v8529_v60 = vld [vmem:[#allocation12 + $0x290] sm:$0xff] }
 0x6bc   :  { %v15366_v40 = vcombine.low %v8529_v60, %v8533_v61 }
 0x6bd   :  { %11912 = vmatpush1.bf16.msra.mxu0 %v15310_v6  ;;  %v15360_v6 = vcombine.low %v8522_v26, %v8526_v28  ;;  %v8574_v26 = vld [vmem:[#allocation12 + $0x3f8] sm:$0xff] }
 0x6be   :  { %12084 = vmatpush1.bf16.msra.mxu1 %v15312_v47  ;;  %11913 = vmatprep.subr.bf16.mxu0 %v15319_v20  ;;  %v15367_v47 = vcombine.high %v8529_v60, %v8533_v61  ;;  %v15369_v20 = vcombine.high %v8530_v63, %v8534_v37  ;;  %v8581_v60 = vld [vmem:[#allocation12 + $0x430] sm:$0xff]  ;;  %v8578_v61 = vld [vmem:[#allocation12 + $0x418] sm:$0xff] }
 0x6bf   :  { %12085 = vmatprep.subr.bf16.mxu1 %v15321_v2  ;;  %v8537_v2 = vld [vmem:[#allocation12 + $0x2d0] sm:$0xff] }
 0x6c0   :  { %v15374_v22 = vcombine.low %v8537_v2, %v8541_v4 }
 0x6c1   :  { %11914 = vmatpush1.bf16.msra.mxu0 %v15318_v51  ;;  %v15368_v51 = vcombine.low %v8530_v63, %v8534_v37  ;;  %v8582_v63 = vld [vmem:[#allocation12 + $0x438] sm:$0xff] }
 0x6c2   :  { %12086 = vmatpush1.bf16.msra.mxu1 %v15320_v44  ;;  %11915 = vmatprep.subr.bf16.mxu0 %v15327_v43  ;;  %v15375_v44 = vcombine.high %v8537_v2, %v8541_v4  ;;  %v15377_v43 = vcombine.high %v8538_v8, %v8542_v10  ;;  %v8589_v2 = vld [vmem:[#allocation12 + $0x470] sm:$0xff] }
 0x6c3   :  { %12087 = vmatprep.subr.bf16.mxu1 %v15329_v11  ;;  %v8545_v11 = vld [vmem:[#allocation12 + $0x310] sm:$0xff] }
 0x6c4   :  { %v15382_v31 = vcombine.low %v8545_v11, %v8549_v12 }
 0x6c5   :  { %11916 = vmatpush1.bf16.msra.mxu0 %v15326_v25  ;;  %v15376_v25 = vcombine.low %v8538_v8, %v8542_v10  ;;  %v8586_v8 = vld [vmem:[#allocation12 + $0x458] sm:$0xff] }
 0x6c6   :  { %12088 = vmatpush1.bf16.msra.mxu1 %v15328_v24  ;;  %11917 = vmatprep.subr.bf16.mxu0 %v15335_v23  ;;  %v15383_v24 = vcombine.high %v8545_v11, %v8549_v12  ;;  %v15385_v23 = vcombine.high %v8546_v17, %v8550_v18  ;;  %v8590_v10 = vld [vmem:[#allocation12 + $0x478] sm:$0xff] }
 0x6c7   :  { %12089 = vmatprep.subr.bf16.mxu1 %v15337_v3  ;;  %v8553_v3 = vld [vmem:[#allocation12 + $0x350] sm:$0xff]  ;;  %v15425_v11 = vcombine.high %v8586_v8, %v8590_v10  ;;  %v8594_v12 = vld [vmem:[#allocation12 + $0x498] sm:$0xff] }
 0x6c8   :  { %v15390_v42 = vcombine.low %v8553_v3, %v8557_v27 }
 0x6c9   :  { %11918 = vmatpush1.bf16.msra.mxu0 %v15334_v29  ;;  %v15384_v29 = vcombine.low %v8546_v17, %v8550_v18  ;;  %v8598_v17 = vld [vmem:[#allocation12 + $0x4b8] sm:$0xff] }
 0x6ca   :  { %12090 = vmatpush1.bf16.msra.mxu1 %v15336_v35  ;;  %11919 = vmatprep.subr.bf16.mxu0 %v15343_v39  ;;  %v15391_v35 = vcombine.high %v8553_v3, %v8557_v27  ;;  %v15393_v39 = vcombine.high %v8554_v13, %v8558_v30  ;;  %v8605_v3 = vld [vmem:[#allocation12 + $0x4f0] sm:$0xff]  ;;  %v8602_v27 = vld [vmem:[#allocation12 + $0x4d8] sm:$0xff] }
 0x6cb   :  { %12091 = vmatprep.subr.bf16.mxu1 %v15345_v5  ;;  %v8561_v5 = vld [vmem:[#allocation12 + $0x390] sm:$0xff] }
 0x6cc   :  { %v15398_v28 = vcombine.low %v8561_v5, %v8565_v41 }
 0x6cd   :  { %11920 = vmatpush1.bf16.msra.mxu0 %v15342_v0  ;;  %v15392_v0 = vcombine.low %v8554_v13, %v8558_v30  ;;  %v8606_v13 = vld [vmem:[#allocation12 + $0x4f8] sm:$0xff] }
 0x6ce   :  { %12092 = vmatpush1.bf16.msra.mxu1 %v15344_v46  ;;  %11921 = vmatprep.subr.bf16.mxu0 %v15351_v48  ;;  %v15399_v46 = vcombine.high %v8561_v5, %v8565_v41  ;;  %v15401_v48 = vcombine.high %v8562_v15, %v8566_v62  ;;  %v8610_v5 = vld [vmem:[#allocation12 + $0x518] sm:$0xff] }
 0x6cf   :  { %12093 = vmatprep.subr.bf16.mxu1 %v15353_v49  ;;  %v8569_v49 = vld [vmem:[#allocation12 + $0x3d0] sm:$0xff]  ;;  %v8614_v41 = vld [vmem:[#allocation12 + $0x538] sm:$0xff] }
 0x6d0   :  { %v15406_v37 = vcombine.low %v8569_v49, %v8573_v50 }
 0x6d1   :  { %11922 = vmatpush1.bf16.msra.mxu0 %v15350_v54  ;;  %v15400_v54 = vcombine.low %v8562_v15, %v8566_v62  ;;  %v15440_v15 = vcombine.low %v8602_v27, %v8606_v13 }
 0x6d2   :  { %12094 = vmatpush1.bf16.msra.mxu1 %v15352_v56  ;;  %11923 = vmatprep.subr.bf16.mxu0 %v15359_v57  ;;  %v15407_v56 = vcombine.high %v8569_v49, %v8573_v50  ;;  %v15409_v57 = vcombine.high %v8570_v53, %v8574_v26  ;;  %v8622_v49 = vld [vmem:[#allocation12 + $0x578] sm:$0xff] }
 0x6d3   :  { %12095 = vmatprep.subr.bf16.mxu1 %v15361_v58  ;;  %v8577_v58 = vld [vmem:[#allocation12 + $0x410] sm:$0xff] }
 0x6d4   :  { %v15414_v4 = vcombine.low %v8577_v58, %v8581_v60 }
 0x6d5   :  { %11924 = vmatpush1.bf16.msra.mxu0 %v15358_v1  ;;  %v15408_v1 = vcombine.low %v8570_v53, %v8574_v26  ;;  %v15448_v53 = vcombine.low %v8610_v5, %v8614_v41 }
 0x6d6   :  { %12096 = vmatpush1.bf16.msra.mxu1 %v15360_v6  ;;  %11925 = vmatprep.subr.bf16.mxu0 %v15367_v47  ;;  %v15415_v6 = vcombine.high %v8577_v58, %v8581_v60  ;;  %v15417_v47 = vcombine.high %v8578_v61, %v8582_v63  ;;  %v8630_v58 = vld [vmem:[#allocation12 + $0x5b8] sm:$0xff] }
 0x6d7   :  { %12097 = vmatprep.subr.bf16.mxu1 %v15369_v20  ;;  %v8585_v20 = vld [vmem:[#allocation12 + $0x450] sm:$0xff] }
 0x6d8   :  { %v15422_v18 = vcombine.low %v8585_v20, %v8589_v2 }
 0x6d9   :  { %11926 = vmatpush1.bf16.msra.mxu0 %v15366_v40  ;;  %v15416_v40 = vcombine.low %v8578_v61, %v8582_v63 }
 0x6da   :  { %12098 = vmatpush1.bf16.msra.mxu1 %v15368_v51  ;;  %11927 = vmatprep.subr.bf16.mxu0 %v15375_v44  ;;  %v15423_v51 = vcombine.high %v8585_v20, %v8589_v2  ;;  %v8593_v44 = vld [vmem:[#allocation12 + $0x490] sm:$0xff]  ;;  %v8638_v20 = vld [vmem:[#allocation12 + $0x5f8] sm:$0xff] }
 0x6db   :  { %12099 = vmatprep.subr.bf16.mxu1 %v15377_v43  ;;  %v8597_v43 = vld [vmem:[#allocation12 + $0x4b0] sm:$0xff] }
 0x6dc   :  { %v15430_v30 = vcombine.low %v8593_v44, %v8597_v43 }
 0x6dd   :  { %11928 = vmatpush1.bf16.msra.mxu0 %v15374_v22  ;;  %v15424_v22 = vcombine.low %v8586_v8, %v8590_v10 }
 0x6de   :  { %12100 = vmatpush1.bf16.msra.mxu1 %v15376_v25  ;;  %11929 = vmatprep.subr.bf16.mxu0 %v15383_v24  ;;  %v15431_v25 = vcombine.high %v8593_v44, %v8597_v43  ;;  %v15433_v24 = vcombine.high %v8594_v12, %v8598_v17  ;;  %v8642_v44 = vld [vmem:[#allocation12 + $0x618] sm:$0xff] }
 0x6df   :  { %12101 = vmatprep.subr.bf16.mxu1 %v15385_v23  ;;  %v8601_v23 = vld [vmem:[#allocation12 + $0x4d0] sm:$0xff]  ;;  %v8646_v43 = vld [vmem:[#allocation12 + $0x638] sm:$0xff] }
 0x6e1   :  { %11930 = vmatpush1.bf16.msra.mxu0 %v15382_v31  ;;  %v15439_v31 = vcombine.high %v8601_v23, %v8605_v3 }
 0x6e2   :  { %12102 = vmatpush1.bf16.msra.mxu1 %v15384_v29  ;;  %11931 = vmatprep.subr.bf16.mxu0 %v15391_v35  ;;  %v15441_v29 = vcombine.high %v8602_v27, %v8606_v13  ;;  %v8609_v35 = vld [vmem:[#allocation12 + $0x510] sm:$0xff]  ;;  %v15480_v27 = vcombine.low %v8642_v44, %v8646_v43 }
 0x6e3   :  { %12103 = vmatprep.subr.bf16.mxu1 %v15393_v39  ;;  %v8613_v39 = vld [vmem:[#allocation12 + $0x530] sm:$0xff] }
 0x6e4   :  { %v15447_v62 = vcombine.high %v8609_v35, %v8613_v39  ;;  %v15446_v50 = vcombine.low %v8609_v35, %v8613_v39  ;;  %v8662_v35 = vld [vmem:[#allocation12 + $0x6b8] sm:$0xff] }
 0x6e5   :  { %11932 = vmatpush1.bf16.msra.mxu0 %v15390_v42  ;;  %v15449_v42 = vcombine.high %v8610_v5, %v8614_v41 }
 0x6e6   :  { %12104 = vmatpush1.bf16.msra.mxu1 %v15392_v0  ;;  %11933 = vmatprep.subr.bf16.mxu0 %v15399_v46  ;;  %v8617_v0 = vld [vmem:[#allocation12 + $0x550] sm:$0xff] }
 0x6e7   :  { %12105 = vmatprep.subr.bf16.mxu1 %v15401_v48  ;;  %v8621_v46 = vld [vmem:[#allocation12 + $0x570] sm:$0xff]  ;;  %v8618_v48 = vld [vmem:[#allocation12 + $0x558] sm:$0xff] }
 0x6e8   :  { %v15455_v26 = vcombine.high %v8617_v0, %v8621_v46  ;;  %v15454_v60 = vcombine.low %v8617_v0, %v8621_v46  ;;  %v15456_v61 = vcombine.low %v8618_v48, %v8622_v49  ;;  %v8670_v0 = vld [vmem:[#allocation12 + $0x6f8] sm:$0xff] }
 0x6e9   :  { %11934 = vmatpush1.bf16.msra.mxu0 %v15398_v28  ;;  %v15457_v28 = vcombine.high %v8618_v48, %v8622_v49 }
 0x6ea   :  { %12106 = vmatpush1.bf16.msra.mxu1 %v15400_v54  ;;  %11935 = vmatprep.subr.bf16.mxu0 %v15407_v56  ;;  %v8625_v54 = vld [vmem:[#allocation12 + $0x590] sm:$0xff] }
 0x6eb   :  { %12107 = vmatprep.subr.bf16.mxu1 %v15409_v57  ;;  %v8629_v56 = vld [vmem:[#allocation12 + $0x5b0] sm:$0xff]  ;;  %v8626_v57 = vld [vmem:[#allocation12 + $0x598] sm:$0xff] }
 0x6ec   :  { %v15463_v63 = vcombine.high %v8625_v54, %v8629_v56  ;;  %v15462_v2 = vcombine.low %v8625_v54, %v8629_v56  ;;  %v8678_v54 = vld [vmem:[#allocation12 + $0x738] sm:$0xff] }
 0x6ed   :  { %11936 = vmatpush1.bf16.msra.mxu0 %v15406_v37  ;;  %v15465_v37 = vcombine.high %v8626_v57, %v8630_v58 }
 0x6ee   :  { %12108 = vmatpush1.bf16.msra.mxu1 %v15408_v1  ;;  %11948 = vmatprep.subr.bf16.mxu0 %v15415_v6  ;;  %v8633_v1 = vld [vmem:[#allocation12 + $0x5d0] sm:$0xff] }
 0x6ef   :  { %12120 = vmatprep.subr.bf16.mxu1 %v15417_v47  ;;  %v8637_v6 = vld [vmem:[#allocation12 + $0x5f0] sm:$0xff]  ;;  %v8634_v47 = vld [vmem:[#allocation12 + $0x5d8] sm:$0xff] }
 0x6f0   :  { %11938 = vmatmul.mubr.bf16.vlgmr.msra.gmra.mrb[28].mxu0 %v17311_v33  ;;  %v15471_v8 = vcombine.high %v8633_v1, %v8637_v6  ;;  %v15473_v10 = vcombine.high %v8634_v47, %v8638_v20 }
 0x6f1   :  { %12110 = vmatmul.mubr.bf16.vlgmr.msra.gmra.mrb[28].mxu1 %v17311_v33  ;;  %11949 = vmatpush1.bf16.msra.mxu0 %v15414_v4  ;;  %v15432_v33 = vcombine.low %v8594_v12, %v8598_v17  ;;  %v15464_v4 = vcombine.low %v8626_v57, %v8630_v58  ;;  %v15472_v12 = vcombine.low %v8634_v47, %v8638_v20 }
 0x6f2   :  { %11980 = vmatprep.mubr.bf16.mxu0 %v17317_v38  ;;  %12121 = vmatpush1.bf16.msra.mxu1 %v15416_v40  ;;  %v8641_v40 = vld [vmem:[#allocation12 + $0x610] sm:$0xff] }
 0x6f3   :  { %12152 = vmatprep.mubr.bf16.mxu1 %v17317_v38  ;;  %11950 = vmatprep.subr.bf16.mxu0 %v15423_v51  ;;  %v15438_v38 = vcombine.low %v8601_v23, %v8605_v3  ;;  %v8645_v51 = vld [vmem:[#allocation12 + $0x630] sm:$0xff]  ;;  %v8654_v23 = vld [vmem:[#allocation12 + $0x678] sm:$0xff] }
 0x6f4   :  { %12122 = vmatprep.subr.bf16.mxu1 %v15425_v11  ;;  %v15470_v11 = vcombine.low %v8633_v1, %v8637_v6  ;;  %v15479_v17 = vcombine.high %v8641_v40, %v8645_v51  ;;  %v15478_v3 = vcombine.low %v8641_v40, %v8645_v51  ;;  %v8686_v1 = vld [vmem:[#allocation12 + $0x778] sm:$0xff] }
 0x6f5   :  { %11951 = vmatpush1.bf16.msra.mxu0 %v15422_v18  ;;  %v15481_v18 = vcombine.high %v8642_v44, %v8646_v43  ;;  %v8694_v40 = vld [vmem:[#allocation12 + $0x7b8] sm:$0xff] }
 0x6f6   :  { %12123 = vmatpush1.bf16.msra.mxu1 %v15424_v22  ;;  %11952 = vmatprep.subr.bf16.mxu0 %v15431_v25  ;;  %v8649_v22 = vld [vmem:[#allocation12 + $0x650] sm:$0xff] }
 0x6f7   :  { %12124 = vmatprep.subr.bf16.mxu1 %v15433_v24  ;;  %v8653_v25 = vld [vmem:[#allocation12 + $0x670] sm:$0xff]  ;;  %v8650_v24 = vld [vmem:[#allocation12 + $0x658] sm:$0xff] }
 0x6f8   :  { %v15487_v13 = vcombine.high %v8649_v22, %v8653_v25  ;;  %v15486_v39 = vcombine.low %v8649_v22, %v8653_v25  ;;  %v15488_v5 = vcombine.low %v8650_v24, %v8654_v23  ;;  %v8702_v22 = vld [vmem:[#allocation12 + $0x7f8] sm:$0xff] }
 0x6f9   :  { %11953 = vmatpush1.bf16.msra.mxu0 %v15430_v30  ;;  %v15489_v30 = vcombine.high %v8650_v24, %v8654_v23 }
 0x6fa   :  { %12125 = vmatpush1.bf16.msra.mxu1 %v15432_v33  ;;  %11954 = vmatprep.subr.bf16.mxu0 %v15439_v31  ;;  %v8657_v33 = vld [vmem:[#allocation12 + $0x690] sm:$0xff] }
 0x6fb   :  { %12126 = vmatprep.subr.bf16.mxu1 %v15441_v29  ;;  %v8661_v31 = vld [vmem:[#allocation12 + $0x6b0] sm:$0xff]  ;;  %v8658_v29 = vld [vmem:[#allocation12 + $0x698] sm:$0xff] }
 0x6fc   :  { %v15495_v41 = vcombine.high %v8657_v33, %v8661_v31  ;;  %v15494_v46 = vcombine.low %v8657_v33, %v8661_v31  ;;  %v15496_v48 = vcombine.low %v8658_v29, %v8662_v35  ;;  %v8710_v33 = vld [vmem:[#allocation12 + $0x838] sm:$0xff] }
 0x6fd   :  { %11955 = vmatpush1.bf16.msra.mxu0 %v15438_v38  ;;  %v15497_v38 = vcombine.high %v8658_v29, %v8662_v35 }
 0x6fe   :  { %12127 = vmatpush1.bf16.msra.mxu1 %v15440_v15  ;;  %11956 = vmatprep.subr.bf16.mxu0 %v15447_v62  ;;  %v8665_v15 = vld [vmem:[#allocation12 + $0x6d0] sm:$0xff] }
 0x6ff   :  { %12128 = vmatprep.subr.bf16.mxu1 %v15449_v42  ;;  %v8669_v62 = vld [vmem:[#allocation12 + $0x6f0] sm:$0xff]  ;;  %v8666_v42 = vld [vmem:[#allocation12 + $0x6d8] sm:$0xff] }
 0x700   :  { %v15503_v49 = vcombine.high %v8665_v15, %v8669_v62  ;;  %v15502_v56 = vcombine.low %v8665_v15, %v8669_v62  ;;  %v15504_v57 = vcombine.low %v8666_v42, %v8670_v0  ;;  %v8714_v15 = vld [vmem:[#allocation12 + $0x858] sm:$0xff] }
 0x701   :  { %11957 = vmatpush1.bf16.msra.mxu0 %v15446_v50  ;;  %v15505_v50 = vcombine.high %v8666_v42, %v8670_v0  ;;  %v8718_v62 = vld [vmem:[#allocation12 + $0x878] sm:$0xff] }
 0x702   :  { %12129 = vmatpush1.bf16.msra.mxu1 %v15448_v53  ;;  %11958 = vmatprep.subr.bf16.mxu0 %v15455_v26  ;;  %v8673_v53 = vld [vmem:[#allocation12 + $0x710] sm:$0xff] }
 0x703   :  { %12130 = vmatprep.subr.bf16.mxu1 %v15457_v28  ;;  %v8677_v26 = vld [vmem:[#allocation12 + $0x730] sm:$0xff]  ;;  %v8674_v28 = vld [vmem:[#allocation12 + $0x718] sm:$0xff] }
 0x704   :  { %v15511_v58 = vcombine.high %v8673_v53, %v8677_v26  ;;  %v15510_v6 = vcombine.low %v8673_v53, %v8677_v26  ;;  %v15512_v47 = vcombine.low %v8674_v28, %v8678_v54  ;;  %v8726_v53 = vld [vmem:[#allocation12 + $0x8b8] sm:$0xff] }
 0x705   :  { %11959 = vmatpush1.bf16.msra.mxu0 %v15454_v60  ;;  %v15513_v60 = vcombine.high %v8674_v28, %v8678_v54  ;;  %v15552_v28 = vcombine.low %v8714_v15, %v8718_v62 }
 0x706   :  { %12131 = vmatpush1.bf16.msra.mxu1 %v15456_v61  ;;  %11960 = vmatprep.subr.bf16.mxu0 %v15463_v63  ;;  %v8681_v61 = vld [vmem:[#allocation12 + $0x750] sm:$0xff] }
 0x707   :  { %12132 = vmatprep.subr.bf16.mxu1 %v15465_v37  ;;  %v8685_v63 = vld [vmem:[#allocation12 + $0x770] sm:$0xff]  ;;  %v8682_v37 = vld [vmem:[#allocation12 + $0x758] sm:$0xff] }
 0x708   :  { %v15519_v20 = vcombine.high %v8681_v61, %v8685_v63  ;;  %v15518_v51 = vcombine.low %v8681_v61, %v8685_v63  ;;  %v15520_v44 = vcombine.low %v8682_v37, %v8686_v1  ;;  %v8734_v61 = vld [vmem:[#allocation12 + $0x8f8] sm:$0xff] }
 0x709   :  { %11961 = vmatpush1.bf16.msra.mxu0 %v15462_v2  ;;  %v15521_v2 = vcombine.high %v8682_v37, %v8686_v1 }
 0x70a   :  { %12133 = vmatpush1.bf16.msra.mxu1 %v15464_v4  ;;  %11962 = vmatprep.subr.bf16.mxu0 %v15471_v8  ;;  %v8689_v4 = vld [vmem:[#allocation12 + $0x790] sm:$0xff] }
 0x70b   :  { %12134 = vmatprep.subr.bf16.mxu1 %v15473_v10  ;;  %v8693_v8 = vld [vmem:[#allocation12 + $0x7b0] sm:$0xff]  ;;  %v8690_v10 = vld [vmem:[#allocation12 + $0x798] sm:$0xff] }
 0x70c   :  { %v15527_v43 = vcombine.high %v8689_v4, %v8693_v8  ;;  %v15526_v25 = vcombine.low %v8689_v4, %v8693_v8  ;;  %v15528_v24 = vcombine.low %v8690_v10, %v8694_v40 }
 0x70d   :  { %11963 = vmatpush1.bf16.msra.mxu0 %v15470_v11  ;;  %v15529_v11 = vcombine.high %v8690_v10, %v8694_v40  ;;  %v8745_v40 = vld [vmem:[#allocation12 + $0x950] sm:$0xff] }
 0x70e   :  { %12135 = vmatpush1.bf16.msra.mxu1 %v15472_v12  ;;  %11964 = vmatprep.subr.bf16.mxu0 %v15479_v17  ;;  %v8697_v12 = vld [vmem:[#allocation12 + $0x7d0] sm:$0xff] }
 0x70f   :  { %12136 = vmatprep.subr.bf16.mxu1 %v15481_v18  ;;  %v8701_v17 = vld [vmem:[#allocation12 + $0x7f0] sm:$0xff]  ;;  %v8698_v18 = vld [vmem:[#allocation12 + $0x7d8] sm:$0xff] }
 0x710   :  { %v15535_v23 = vcombine.high %v8697_v12, %v8701_v17  ;;  %v15534_v31 = vcombine.low %v8697_v12, %v8701_v17  ;;  %v15536_v29 = vcombine.low %v8698_v18, %v8702_v22 }
 0x711   :  { %11965 = vmatpush1.bf16.msra.mxu0 %v15478_v3  ;;  %v15537_v3 = vcombine.high %v8698_v18, %v8702_v22  ;;  %v8753_v22 = vld [vmem:[#allocation12 + $0x990] sm:$0xff] }
 0x712   :  { %12137 = vmatpush1.bf16.msra.mxu1 %v15480_v27  ;;  %11966 = vmatprep.subr.bf16.mxu0 %v15487_v13  ;;  %v8705_v27 = vld [vmem:[#allocation12 + $0x810] sm:$0xff] }
 0x713   :  { %12138 = vmatprep.subr.bf16.mxu1 %v15489_v30  ;;  %v8709_v13 = vld [vmem:[#allocation12 + $0x830] sm:$0xff]  ;;  %v8706_v30 = vld [vmem:[#allocation12 + $0x818] sm:$0xff] }
 0x714   :  { %v15543_v35 = vcombine.high %v8705_v27, %v8709_v13  ;;  %v15544_v42 = vcombine.low %v8706_v30, %v8710_v33 }
 0x715   :  { %11967 = vmatpush1.bf16.msra.mxu0 %v15486_v39  ;;  %v15545_v39 = vcombine.high %v8706_v30, %v8710_v33  ;;  %v8761_v33 = vld [vmem:[#allocation12 + $0x9d0] sm:$0xff] }
 0x716   :  { %12139 = vmatpush1.bf16.msra.mxu1 %v15488_v5  ;;  %11968 = vmatprep.subr.bf16.mxu0 %v15495_v41  ;;  %v8713_v5 = vld [vmem:[#allocation12 + $0x850] sm:$0xff] }
 0x717   :  { %12140 = vmatprep.subr.bf16.mxu1 %v15497_v38  ;;  %v8717_v41 = vld [vmem:[#allocation12 + $0x870] sm:$0xff]  ;;  %v15542_v38 = vcombine.low %v8705_v27, %v8709_v13 }
 0x718   :  { %v15551_v0 = vcombine.high %v8713_v5, %v8717_v41  ;;  %v15550_v26 = vcombine.low %v8713_v5, %v8717_v41 }
 0x719   :  { %11969 = vmatpush1.bf16.msra.mxu0 %v15494_v46  ;;  %v8721_v46 = vld [vmem:[#allocation12 + $0x890] sm:$0xff] }
 0x71a   :  { %12141 = vmatpush1.bf16.msra.mxu1 %v15496_v48  ;;  %11970 = vmatprep.subr.bf16.mxu0 %v15503_v49  ;;  %v8725_v48 = vld [vmem:[#allocation12 + $0x8b0] sm:$0xff]  ;;  %v15553_v49 = vcombine.high %v8714_v15, %v8718_v62 }
 0x71b   :  { %12142 = vmatprep.subr.bf16.mxu1 %v15505_v50  ;;  %v8722_v50 = vld [vmem:[#allocation12 + $0x898] sm:$0xff]  ;;  %v15559_v54 = vcombine.high %v8721_v46, %v8725_v48  ;;  %v15558_v63 = vcombine.low %v8721_v46, %v8725_v48  ;;  %v8769_v15 = vld [vmem:[#allocation12 + $0xa10] sm:$0xff] }
 0x71c   :  { %v8773_v62 = vld [vmem:[#allocation12 + $0xa30] sm:$0xff] }
 0x71d   :  { %11971 = vmatpush1.bf16.msra.mxu0 %v15502_v56  ;;  %v15561_v56 = vcombine.high %v8722_v50, %v8726_v53 }
 0x71e   :  { %12143 = vmatpush1.bf16.msra.mxu1 %v15504_v57  ;;  %11972 = vmatprep.subr.bf16.mxu0 %v15511_v58  ;;  %v8729_v57 = vld [vmem:[#allocation12 + $0x8d0] sm:$0xff] }
 0x71f   :  { %12144 = vmatprep.subr.bf16.mxu1 %v15513_v60  ;;  %v8733_v58 = vld [vmem:[#allocation12 + $0x8f0] sm:$0xff]  ;;  %v8730_v60 = vld [vmem:[#allocation12 + $0x8d8] sm:$0xff] }
 0x720   :  { %v15567_v37 = vcombine.high %v8729_v57, %v8733_v58  ;;  %v15569_v1 = vcombine.high %v8730_v60, %v8734_v61  ;;  %v15568_v4 = vcombine.low %v8730_v60, %v8734_v61  ;;  %v8785_v61 = vld [vmem:[#allocation12 + $0xa90] sm:$0xff] }
 0x721   :  { %11973 = vmatpush1.bf16.msra.mxu0 %v15510_v6  ;;  %v8737_v6 = vld [vmem:[#allocation12 + $0x910] sm:$0xff] }
 0x722   :  { %12145 = vmatpush1.bf16.msra.mxu1 %v15512_v47  ;;  %11974 = vmatprep.subr.bf16.mxu0 %v15519_v20  ;;  %v8741_v47 = vld [vmem:[#allocation12 + $0x930] sm:$0xff]  ;;  %v8738_v20 = vld [vmem:[#allocation12 + $0x918] sm:$0xff] }
 0x723   :  { %12146 = vmatprep.subr.bf16.mxu1 %v15521_v2  ;;  %v8742_v2 = vld [vmem:[#allocation12 + $0x938] sm:$0xff]  ;;  %v15575_v8 = vcombine.high %v8737_v6, %v8741_v47 }
 0x724   :  { %v15577_v10 = vcombine.high %v8738_v20, %v8742_v2  ;;  %v15576_v12 = vcombine.low %v8738_v20, %v8742_v2  ;;  %v8793_v2 = vld [vmem:[#allocation12 + $0xad0] sm:$0xff] }
 0x725   :  { %11975 = vmatpush1.bf16.msra.mxu0 %v15518_v51  ;;  %v8749_v51 = vld [vmem:[#allocation12 + $0x970] sm:$0xff] }
 0x726   :  { %12147 = vmatpush1.bf16.msra.mxu1 %v15520_v44  ;;  %11976 = vmatprep.subr.bf16.mxu0 %v15527_v43  ;;  %v8746_v44 = vld [vmem:[#allocation12 + $0x958] sm:$0xff]  ;;  %v15583_v17 = vcombine.high %v8745_v40, %v8749_v51 }
 0x727   :  { %12148 = vmatprep.subr.bf16.mxu1 %v15529_v11  ;;  %v8750_v43 = vld [vmem:[#allocation12 + $0x978] sm:$0xff]  ;;  %v15574_v11 = vcombine.low %v8737_v6, %v8741_v47 }
 0x728   :  { %v15585_v18 = vcombine.high %v8746_v44, %v8750_v43  ;;  %v15584_v27 = vcombine.low %v8746_v44, %v8750_v43  ;;  %v8801_v43 = vld [vmem:[#allocation12 + $0xb10] sm:$0xff] }
 0x729   :  { %11977 = vmatpush1.bf16.msra.mxu0 %v15526_v25  ;;  %v8757_v25 = vld [vmem:[#allocation12 + $0x9b0] sm:$0xff] }
 0x72a   :  { %12149 = vmatpush1.bf16.msra.mxu1 %v15528_v24  ;;  %11978 = vmatprep.subr.bf16.mxu0 %v15535_v23  ;;  %v8754_v24 = vld [vmem:[#allocation12 + $0x998] sm:$0xff]  ;;  %v15591_v13 = vcombine.high %v8753_v22, %v8757_v25 }
 0x72b   :  { %12150 = vmatprep.subr.bf16.mxu1 %v15537_v3  ;;  %v8758_v23 = vld [vmem:[#allocation12 + $0x9b8] sm:$0xff]  ;;  %v15582_v3 = vcombine.low %v8745_v40, %v8749_v51 }
 0x72c   :  { %v15593_v30 = vcombine.high %v8754_v24, %v8758_v23  ;;  %v15592_v5 = vcombine.low %v8754_v24, %v8758_v23  ;;  %v8809_v23 = vld [vmem:[#allocation12 + $0xb50] sm:$0xff] }
 0x72d   :  { %11979 = vmatpush1.bf16.msra.mxu0 %v15534_v31  ;;  %v8765_v31 = vld [vmem:[#allocation12 + $0x9f0] sm:$0xff] }
 0x72e   :  { %12151 = vmatpush1.bf16.msra.mxu1 %v15536_v29  ;;  %11991 = vmatprep.subr.bf16.mxu0 %v15543_v35  ;;  %v8762_v29 = vld [vmem:[#allocation12 + $0x9d8] sm:$0xff]  ;;  %v15599_v41 = vcombine.high %v8761_v33, %v8765_v31  ;;  %v15598_v46 = vcombine.low %v8761_v33, %v8765_v31 }
 0x72f   :  { %12163 = vmatprep.subr.bf16.mxu1 %v15545_v39  ;;  %v8766_v35 = vld [vmem:[#allocation12 + $0x9f8] sm:$0xff]  ;;  %v15590_v39 = vcombine.low %v8753_v22, %v8757_v25 }
 0x730   :  { %11981 = vmatmul.mubr.bf16.vlgmr.msra.gmra.mrb[28].mxu0 %v17313_v34  ;;  %v15600_v48 = vcombine.low %v8762_v29, %v8766_v35 }
 0x731   :  { %12153 = vmatmul.mubr.bf16.vlgmr.msra.gmra.mrb[28].mxu1 %v17313_v34  ;;  %11992 = vmatpush1.bf16.msra.mxu0 %v15542_v38  ;;  %v15560_v34 = vcombine.low %v8722_v50, %v8726_v53  ;;  %v15601_v38 = vcombine.high %v8762_v29, %v8766_v35  ;;  %v8777_v53 = vld [vmem:[#allocation12 + $0xa50] sm:$0xff] }
 0x732   :  { %12023 = vmatprep.mubr.bf16.mxu0 %v17349_v55  ;;  %12164 = vmatpush1.bf16.msra.mxu1 %v15544_v42  ;;  %v8770_v42 = vld [vmem:[#allocation12 + $0xa18] sm:$0xff]  ;;  %v8817_v35 = vld [vmem:[#allocation12 + $0xb90] sm:$0xff] }
 0x733   :  { %12195 = vmatprep.mubr.bf16.mxu1 %v17349_v55  ;;  %11993 = vmatprep.subr.bf16.mxu0 %v15551_v0  ;;  %v15566_v55 = vcombine.low %v8729_v57, %v8733_v58  ;;  %v8774_v0 = vld [vmem:[#allocation12 + $0xa38] sm:$0xff] }
 0x734   :  { %12165 = vmatprep.subr.bf16.mxu1 %v15553_v49  ;;  %v15607_v49 = vcombine.high %v8769_v15, %v8773_v62  ;;  %v15609_v50 = vcombine.high %v8770_v42, %v8774_v0  ;;  %v15608_v57 = vcombine.low %v8770_v42, %v8774_v0  ;;  %v8825_v0 = vld [vmem:[#allocation12 + $0xbd0] sm:$0xff] }
 0x735   :  { %11994 = vmatpush1.bf16.msra.mxu0 %v15550_v26  ;;  %v8781_v26 = vld [vmem:[#allocation12 + $0xa70] sm:$0xff] }
 0x736   :  { %12166 = vmatpush1.bf16.msra.mxu1 %v15552_v28  ;;  %11995 = vmatprep.subr.bf16.mxu0 %v15559_v54  ;;  %v8778_v28 = vld [vmem:[#allocation12 + $0xa58] sm:$0xff]  ;;  %v15615_v58 = vcombine.high %v8777_v53, %v8781_v26 }
 0x737   :  { %12167 = vmatprep.subr.bf16.mxu1 %v15561_v56  ;;  %v8782_v54 = vld [vmem:[#allocation12 + $0xa78] sm:$0xff]  ;;  %v15606_v56 = vcombine.low %v8769_v15, %v8773_v62 }
 0x738   :  { %v15617_v60 = vcombine.high %v8778_v28, %v8782_v54  ;;  %v15616_v6 = vcombine.low %v8778_v28, %v8782_v54  ;;  %v8833_v54 = vld [vmem:[#allocation12 + $0xc10] sm:$0xff] }
 0x739   :  { %11996 = vmatpush1.bf16.msra.mxu0 %v15558_v63  ;;  %v8789_v63 = vld [vmem:[#allocation12 + $0xab0] sm:$0xff] }
 0x73a   :  { %12168 = vmatpush1.bf16.msra.mxu1 %v15560_v34  ;;  %11997 = vmatprep.subr.bf16.mxu0 %v15567_v37  ;;  %v8786_v34 = vld [vmem:[#allocation12 + $0xa98] sm:$0xff]  ;;  %v15623_v47 = vcombine.high %v8785_v61, %v8789_v63 }
 0x73b   :  { %12169 = vmatprep.subr.bf16.mxu1 %v15569_v1  ;;  %v8790_v37 = vld [vmem:[#allocation12 + $0xab8] sm:$0xff]  ;;  %v15614_v1 = vcombine.low %v8777_v53, %v8781_v26 }
 0x73c   :  { %v15625_v20 = vcombine.high %v8786_v34, %v8790_v37  ;;  %v15624_v40 = vcombine.low %v8786_v34, %v8790_v37  ;;  %v8841_v37 = vld [vmem:[#allocation12 + $0xc50] sm:$0xff] }
 0x73d   :  { %11998 = vmatpush1.bf16.msra.mxu0 %v15566_v55  ;;  %v8797_v55 = vld [vmem:[#allocation12 + $0xaf0] sm:$0xff] }
 0x73e   :  { %12170 = vmatpush1.bf16.msra.mxu1 %v15568_v4  ;;  %11999 = vmatprep.subr.bf16.mxu0 %v15575_v8  ;;  %v8794_v4 = vld [vmem:[#allocation12 + $0xad8] sm:$0xff]  ;;  %v15631_v51 = vcombine.high %v8793_v2, %v8797_v55 }
 0x73f   :  { %12171 = vmatprep.subr.bf16.mxu1 %v15577_v10  ;;  %v8798_v8 = vld [vmem:[#allocation12 + $0xaf8] sm:$0xff]  ;;  %v15622_v10 = vcombine.low %v8785_v61, %v8789_v63 }
 0x740   :  { %v15633_v44 = vcombine.high %v8794_v4, %v8798_v8  ;;  %v15632_v22 = vcombine.low %v8794_v4, %v8798_v8  ;;  %v8849_v4 = vld [vmem:[#allocation12 + $0xc90] sm:$0xff] }
 0x741   :  { %12000 = vmatpush1.bf16.msra.mxu0 %v15574_v11  ;;  %v8805_v11 = vld [vmem:[#allocation12 + $0xb30] sm:$0xff] }
 0x742   :  { %12172 = vmatpush1.bf16.msra.mxu1 %v15576_v12  ;;  %12001 = vmatprep.subr.bf16.mxu0 %v15583_v17  ;;  %v8802_v12 = vld [vmem:[#allocation12 + $0xb18] sm:$0xff]  ;;  %v15639_v25 = vcombine.high %v8801_v43, %v8805_v11  ;;  %v8853_v8 = vld [vmem:[#allocation12 + $0xcb0] sm:$0xff] }
 0x743   :  { %12173 = vmatprep.subr.bf16.mxu1 %v15585_v18  ;;  %v8806_v17 = vld [vmem:[#allocation12 + $0xb38] sm:$0xff]  ;;  %v15630_v18 = vcombine.low %v8793_v2, %v8797_v55 }
 0x744   :  { %v15641_v24 = vcombine.high %v8802_v12, %v8806_v17  ;;  %v15640_v33 = vcombine.low %v8802_v12, %v8806_v17  ;;  %v8857_v17 = vld [vmem:[#allocation12 + $0xcd0] sm:$0xff] }
 0x745   :  { %12002 = vmatpush1.bf16.msra.mxu0 %v15582_v3  ;;  %v8813_v3 = vld [vmem:[#allocation12 + $0xb70] sm:$0xff] }
 0x746   :  { %12174 = vmatpush1.bf16.msra.mxu1 %v15584_v27  ;;  %12003 = vmatprep.subr.bf16.mxu0 %v15591_v13  ;;  %v8810_v27 = vld [vmem:[#allocation12 + $0xb58] sm:$0xff]  ;;  %v15647_v31 = vcombine.high %v8809_v23, %v8813_v3 }
 0x747   :  { %12175 = vmatprep.subr.bf16.mxu1 %v15593_v30  ;;  %v8814_v13 = vld [vmem:[#allocation12 + $0xb78] sm:$0xff]  ;;  %v15638_v30 = vcombine.low %v8801_v43, %v8805_v11  ;;  %v15687_v11 = vcombine.high %v8849_v4, %v8853_v8 }
 0x748   :  { %v15649_v29 = vcombine.high %v8810_v27, %v8814_v13  ;;  %v15648_v15 = vcombine.low %v8810_v27, %v8814_v13  ;;  %v8865_v27 = vld [vmem:[#allocation12 + $0xd10] sm:$0xff] }
 0x749   :  { %12004 = vmatpush1.bf16.msra.mxu0 %v15590_v39  ;;  %v8821_v39 = vld [vmem:[#allocation12 + $0xbb0] sm:$0xff] }
 0x74a   :  { %12176 = vmatpush1.bf16.msra.mxu1 %v15592_v5  ;;  %12005 = vmatprep.subr.bf16.mxu0 %v15599_v41  ;;  %v8818_v5 = vld [vmem:[#allocation12 + $0xb98] sm:$0xff]  ;;  %v15655_v62 = vcombine.high %v8817_v35, %v8821_v39  ;;  %v8869_v13 = vld [vmem:[#allocation12 + $0xd30] sm:$0xff] }
 0x74b   :  { %12177 = vmatprep.subr.bf16.mxu1 %v15601_v38  ;;  %v8822_v41 = vld [vmem:[#allocation12 + $0xbb8] sm:$0xff]  ;;  %v15646_v38 = vcombine.low %v8809_v23, %v8813_v3 }
 0x74c   :  { %v15657_v42 = vcombine.high %v8818_v5, %v8822_v41  ;;  %v15656_v53 = vcombine.low %v8818_v5, %v8822_v41  ;;  %v8877_v5 = vld [vmem:[#allocation12 + $0xd70] sm:$0xff]  ;;  %v8874_v41 = vld [vmem:[#allocation12 + $0xd58] sm:$0xff] }
 0x74d   :  { %12006 = vmatpush1.bf16.msra.mxu0 %v15598_v46  ;;  %v8829_v46 = vld [vmem:[#allocation12 + $0xbf0] sm:$0xff] }
 0x74e   :  { %12178 = vmatpush1.bf16.msra.mxu1 %v15600_v48  ;;  %12007 = vmatprep.subr.bf16.mxu0 %v15607_v49  ;;  %v8826_v48 = vld [vmem:[#allocation12 + $0xbd8] sm:$0xff]  ;;  %v15663_v26 = vcombine.high %v8825_v0, %v8829_v46 }
 0x74f   :  { %12179 = vmatprep.subr.bf16.mxu1 %v15609_v50  ;;  %v8830_v49 = vld [vmem:[#allocation12 + $0xbf8] sm:$0xff]  ;;  %v15654_v50 = vcombine.low %v8817_v35, %v8821_v39  ;;  %v8873_v39 = vld [vmem:[#allocation12 + $0xd50] sm:$0xff] }
 0x750   :  { %v15665_v28 = vcombine.high %v8826_v48, %v8830_v49  ;;  %v15664_v61 = vcombine.low %v8826_v48, %v8830_v49  ;;  %v8881_v48 = vld [vmem:[#allocation12 + $0xd90] sm:$0xff] }
 0x751   :  { %12008 = vmatpush1.bf16.msra.mxu0 %v15606_v56  ;;  %v8837_v56 = vld [vmem:[#allocation12 + $0xc30] sm:$0xff] }
 0x752   :  { %12180 = vmatpush1.bf16.msra.mxu1 %v15608_v57  ;;  %12009 = vmatprep.subr.bf16.mxu0 %v15615_v58  ;;  %v8834_v57 = vld [vmem:[#allocation12 + $0xc18] sm:$0xff]  ;;  %v15671_v63 = vcombine.high %v8833_v54, %v8837_v56  ;;  %v8885_v49 = vld [vmem:[#allocation12 + $0xdb0] sm:$0xff] }
 0x753   :  { %12181 = vmatprep.subr.bf16.mxu1 %v15617_v60  ;;  %v8838_v58 = vld [vmem:[#allocation12 + $0xc38] sm:$0xff]  ;;  %v15662_v60 = vcombine.low %v8825_v0, %v8829_v46  ;;  %v15711_v0 = vcombine.high %v8873_v39, %v8877_v5 }
 0x754   :  { %v15673_v34 = vcombine.high %v8834_v57, %v8838_v58  ;;  %v15672_v2 = vcombine.low %v8834_v57, %v8838_v58  ;;  %v15710_v57 = vcombine.low %v8873_v39, %v8877_v5 }
 0x755   :  { %12010 = vmatpush1.bf16.msra.mxu0 %v15614_v1  ;;  %v8845_v1 = vld [vmem:[#allocation12 + $0xc70] sm:$0xff] }
 0x756   :  { %12182 = vmatpush1.bf16.msra.mxu1 %v15616_v6  ;;  %12011 = vmatprep.subr.bf16.mxu0 %v15623_v47  ;;  %v15670_v6 = vcombine.low %v8833_v54, %v8837_v56  ;;  %v8842_v47 = vld [vmem:[#allocation12 + $0xc58] sm:$0xff]  ;;  %v15679_v55 = vcombine.high %v8841_v37, %v8845_v1 }
 0x757   :  { %12183 = vmatprep.subr.bf16.mxu1 %v15625_v20  ;;  %v8846_v20 = vld [vmem:[#allocation12 + $0xc78] sm:$0xff] }
 0x758   :  { %v15680_v43 = vcombine.low %v8842_v47, %v8846_v20 }
 0x759   :  { %12012 = vmatpush1.bf16.msra.mxu0 %v15622_v10  ;;  %v15681_v10 = vcombine.high %v8842_v47, %v8846_v20 }
 0x75a   :  { %12184 = vmatpush1.bf16.msra.mxu1 %v15624_v40  ;;  %12013 = vmatprep.subr.bf16.mxu0 %v15631_v51  ;;  %v8850_v40 = vld [vmem:[#allocation12 + $0xc98] sm:$0xff] }
 0x75b   :  { %12185 = vmatprep.subr.bf16.mxu1 %v15633_v44  ;;  %v8854_v51 = vld [vmem:[#allocation12 + $0xcb8] sm:$0xff]  ;;  %v15678_v44 = vcombine.low %v8841_v37, %v8845_v1 }
 0x75c   :  { %v15689_v12 = vcombine.high %v8850_v40, %v8854_v51 }
 0x75d   :  { %12014 = vmatpush1.bf16.msra.mxu0 %v15630_v18  ;;  %v8861_v18 = vld [vmem:[#allocation12 + $0xcf0] sm:$0xff] }
 0x75e   :  { %12186 = vmatpush1.bf16.msra.mxu1 %v15632_v22  ;;  %12015 = vmatprep.subr.bf16.mxu0 %v15639_v25  ;;  %v8858_v22 = vld [vmem:[#allocation12 + $0xcd8] sm:$0xff]  ;;  %v15695_v23 = vcombine.high %v8857_v17, %v8861_v18 }
 0x75f   :  { %12187 = vmatprep.subr.bf16.mxu1 %v15641_v24  ;;  %v8862_v25 = vld [vmem:[#allocation12 + $0xcf8] sm:$0xff]  ;;  %v15686_v24 = vcombine.low %v8849_v4, %v8853_v8 }
 0x760   :  { %v15697_v3 = vcombine.high %v8858_v22, %v8862_v25  ;;  %v8890_v4 = vld [vmem:[#allocation12 + $0xdd8] sm:$0xff] }
 0x761   :  { %12016 = vmatpush1.bf16.msra.mxu0 %v15638_v30  ;;  %v8866_v30 = vld [vmem:[#allocation12 + $0xd18] sm:$0xff] }
 0x762   :  { %12188 = vmatpush1.bf16.msra.mxu1 %v15640_v33  ;;  %12017 = vmatprep.subr.bf16.mxu0 %v15647_v31  ;;  %v8870_v33 = vld [vmem:[#allocation12 + $0xd38] sm:$0xff]  ;;  %v15696_v31 = vcombine.low %v8858_v22, %v8862_v25 }
 0x763   :  { %12189 = vmatprep.subr.bf16.mxu1 %v15649_v29  ;;  %v15703_v29 = vcombine.high %v8865_v27, %v8869_v13  ;;  %v15705_v35 = vcombine.high %v8866_v30, %v8870_v33  ;;  %v8894_v8 = vld [vmem:[#allocation12 + $0xdf8] sm:$0xff] }
 0x765   :  { %12018 = vmatpush1.bf16.msra.mxu0 %v15646_v38  ;;  %v8878_v38 = vld [vmem:[#allocation12 + $0xd78] sm:$0xff] }
 0x766   :  { %12190 = vmatpush1.bf16.msra.mxu1 %v15648_v15  ;;  %12019 = vmatprep.subr.bf16.mxu0 %v15655_v62  ;;  %v15702_v15 = vcombine.low %v8865_v27, %v8869_v13  ;;  %v8959_v62 = vld [vmem:[#allocation13] sm:$0xff]  ;;  %v15713_v46 = vcombine.high %v8874_v41, %v8878_v38  ;;  %v15712_v58 = vcombine.low %v8874_v41, %v8878_v38  ;;  %v8897_v27 = vld [vmem:[#allocation12 + $0xe10] sm:$0xff] }
 0x767   :  { %12191 = vmatprep.subr.bf16.mxu1 %v15657_v42  ;;  %v15704_v42 = vcombine.low %v8866_v30, %v8870_v33  ;;  %v8968_v54 = vrot.slane %v8959_v62, %v17153_v16  ;;  %v8976_v56 = vrot.slane %v8959_v62, %v17163_v21  ;;  %v8901_v13 = vld [vmem:[#allocation12 + $0xe30] sm:$0xff] }
 0x769   :  { %12020 = vmatpush1.bf16.msra.mxu0 %v15654_v50  ;;  %v8964_v50 = vrot.slane %v8959_v62, %v17148_v14 }
 0x76a   :  { %12192 = vmatpush1.bf16.msra.mxu1 %v15656_v53  ;;  %12021 = vmatprep.subr.bf16.mxu0 %v15663_v26  ;;  %v8972_v53 = vrot.slane %v8959_v62, %v17160_v19  ;;  %v8882_v26 = vld [vmem:[#allocation12 + $0xd98] sm:$0xff] }
 0x76b   :  { %12193 = vmatprep.subr.bf16.mxu1 %v15665_v28  ;;  %v8886_v28 = vld [vmem:[#allocation12 + $0xdb8] sm:$0xff] }
 0x76c   :  { %v15721_v1 = vcombine.high %v8882_v26, %v8886_v28 }
 0x76d   :  { %12022 = vmatpush1.bf16.msra.mxu0 %v15662_v60  ;;  %v15719_v60 = vcombine.high %v8881_v48, %v8885_v49 }
 0x76e   :  { %12194 = vmatpush1.bf16.msra.mxu1 %v15664_v61  ;;  %12034 = vmatprep.subr.bf16.mxu0 %v15671_v63  ;;  %v8889_v61 = vld [vmem:[#allocation12 + $0xdd0] sm:$0xff] }
 0x76f   :  { %12206 = vmatprep.subr.bf16.mxu1 %v15673_v34  ;;  %v8893_v63 = vld [vmem:[#allocation12 + $0xdf0] sm:$0xff] }
 0x770   :  { %12024 = vmatmul.mubr.bf16.vlgmr.msra.gmra.mrb[28].mxu0 %v17345_v52  ;;  %v15727_v25 = vcombine.high %v8889_v61, %v8893_v63 }
 0x771   :  { %12196 = vmatmul.mubr.bf16.vlgmr.msra.gmra.mrb[28].mxu1 %v17345_v52  ;;  %12035 = vmatpush1.bf16.msra.mxu0 %v15670_v6  ;;  %v15688_v52 = vcombine.low %v8850_v40, %v8854_v51 }
 0x772   :  { %12066 = vmatprep.mubr.bf16.mxu0 %v17355_v45  ;;  %12207 = vmatpush1.bf16.msra.mxu1 %v15672_v2 }
 0x773   :  { %12238 = vmatprep.mubr.bf16.mxu1 %v17355_v45  ;;  %12036 = vmatprep.subr.bf16.mxu0 %v15679_v55  ;;  %v15694_v45 = vcombine.low %v8857_v17, %v8861_v18  ;;  %v15718_v55 = vcombine.low %v8881_v48, %v8885_v49  ;;  %v8905_v49 = vld [vmem:[#allocation12 + $0xe50] sm:$0xff] }
 0x774   :  { %12208 = vmatprep.subr.bf16.mxu1 %v15681_v10 }
 0x775   :  { %12037 = vmatpush1.bf16.msra.mxu0 %v15678_v44 }
 0x776   :  { %12209 = vmatpush1.bf16.msra.mxu1 %v15680_v43  ;;  %12038 = vmatprep.subr.bf16.mxu0 %v15687_v11  ;;  %v15720_v43 = vcombine.low %v8882_v26, %v8886_v28  ;;  %v15726_v11 = vcombine.low %v8889_v61, %v8893_v63  ;;  %v8910_v26 = vld [vmem:[#allocation12 + $0xe78] sm:$0xff]  ;;  %v15734_v28 = vcombine.low %v8897_v27, %v8901_v13 }
 0x777   :  { %12210 = vmatprep.subr.bf16.mxu1 %v15689_v12  ;;  %v8914_v61 = vld [vmem:[#allocation12 + $0xe98] sm:$0xff] }
 0x778   :  { %v8918_v63 = vld [vmem:[#allocation12 + $0xeb8] sm:$0xff] }
 0x779   :  { %12039 = vmatpush1.bf16.msra.mxu0 %v15686_v24 }
 0x77a   :  { %12211 = vmatpush1.bf16.msra.mxu1 %v15688_v52  ;;  %12040 = vmatprep.subr.bf16.mxu0 %v15695_v23  ;;  %v15728_v23 = vcombine.low %v8890_v4, %v8894_v8 }
 0x77b   :  { %12212 = vmatprep.subr.bf16.mxu1 %v15697_v3  ;;  %v15729_v3 = vcombine.high %v8890_v4, %v8894_v8  ;;  %v15752_v8 = vcombine.low %v8914_v61, %v8918_v63 }
 0x77d   :  { %12041 = vmatpush1.bf16.msra.mxu0 %v15694_v45 }
 0x77e   :  { %12213 = vmatpush1.bf16.msra.mxu1 %v15696_v31  ;;  %12042 = vmatprep.subr.bf16.mxu0 %v15703_v29  ;;  %v8898_v29 = vld [vmem:[#allocation12 + $0xe18] sm:$0xff] }
 0x77f   :  { %12214 = vmatprep.subr.bf16.mxu1 %v15705_v35  ;;  %v8902_v35 = vld [vmem:[#allocation12 + $0xe38] sm:$0xff] }
 0x780   :  { %v15737_v48 = vcombine.high %v8898_v29, %v8902_v35 }
 0x781   :  { %12043 = vmatpush1.bf16.msra.mxu0 %v15702_v15 }
 0x782   :  { %12215 = vmatpush1.bf16.msra.mxu1 %v15704_v42  ;;  %12044 = vmatprep.subr.bf16.mxu0 %v15711_v0  ;;  %v15735_v42 = vcombine.high %v8897_v27, %v8901_v13 }
 0x783   :  { %v11724_v34 = vpop.f32.mrb[24].mxu0  ;;  %v11896_v37 = vpop.f32.mrb[24].mxu1  ;;  %12216 = vmatprep.subr.bf16.mxu1 %v15713_v46 }
 0x784   :  { %v16082_v6 = vadd.f32 %v11724_v34, %v8964_v50  ;;  %v16086_v47 = vadd.f32 %v11896_v37, %v8972_v53  ;;  %v11726_v20 = vpop.f32.mrb[25].mxu0  ;;  %v11898_v2 = vpop.f32.mrb[25].mxu1 }
 0x785   :  { %v16083_v10 = vadd.f32 %v11726_v20, %v8968_v54  ;;  %v16087_v40 = vadd.f32 %v11898_v2, %v8976_v56  ;;  %v11728_v51 = vpop.f32.mrb[26].mxu0  ;;  %v11900_v44 = vpop.f32.mrb[26].mxu1  ;;  %12045 = vmatpush1.bf16.msra.mxu0 %v15710_v57  ;;  %v8925_v20 = vld [vmem:[#allocation12 + $0xef0] sm:$0xff]  ;;  %v8922_v2 = vld [vmem:[#allocation12 + $0xed8] sm:$0xff] }
 0x786   :  { %v16084_v12 = vadd.f32 %v11728_v51, %v8964_v50  ;;  %v16088_v17 = vadd.f32 %v11900_v44, %v8972_v53  ;;  %12217 = vmatpush1.bf16.msra.mxu1 %v15712_v58  ;;  %v11730_v18 = vpop.f32.mrb[27].mxu0  ;;  %v11902_v22 = vpop.f32.mrb[27].mxu1  ;;  %12046 = vmatprep.subr.bf16.mxu0 %v15719_v60  ;;  %v12249_v30 = vmax.f32 %v16082_v6, 0.0  ;;  %v12251_v33 = vmax.f32 %v16086_v47, 0.0  ;;  %v8909_v50 = vld [vmem:[#allocation12 + $0xe70] sm:$0xff]  ;;  %v8906_v53 = vld [vmem:[#allocation12 + $0xe58] sm:$0xff] }
 0x787   :  { %v16085_v24 = vadd.f32 %v11730_v18, %v8968_v54  ;;  %v16089_v52 = vadd.f32 %v11902_v22, %v8976_v56  ;;  %12218 = vmatprep.subr.bf16.mxu1 %v15721_v1  ;;  %v12250_v39 = vmax.f32 %v16083_v10, 0.0  ;;  %v12252_v5 = vmax.f32 %v16087_v40, 0.0  ;;  %v8913_v58 = vld [vmem:[#allocation12 + $0xe90] sm:$0xff] }
 0x788   :  { %v12257_v45 = vmax.f32 %v16084_v12, 0.0  ;;  %v12259_v31 = vmax.f32 %v16088_v17, 0.0  ;;  %v15736_v54 = vcombine.low %v8898_v29, %v8902_v35  ;;  %v15743_v56 = vcombine.high %v8905_v49, %v8909_v50  ;;  %v8917_v60 = vld [vmem:[#allocation12 + $0xeb0] sm:$0xff]  ;;  %v8950_v29 = vld [vmem:[#allocation12 + $0xfb8] sm:$0xff] }
 0x789   :  { %v12258_v41 = vmax.f32 %v16085_v24, 0.0  ;;  %v12260_v38 = vmax.f32 %v16089_v52, 0.0  ;;  %12047 = vmatpush1.bf16.msra.mxu0 %v15718_v55  ;;  %v15745_v57 = vcombine.high %v8906_v53, %v8910_v26  ;;  %v15742_v34 = vcombine.low %v8905_v49, %v8909_v50  ;;  %v8921_v47 = vld [vmem:[#allocation12 + $0xed0] sm:$0xff]  ;;  %v8926_v55 = vld [vmem:[#allocation12 + $0xef8] sm:$0xff] }
 0x78a   :  { %v17383_v15 = vpack.c.bf16 %v12257_v45, %v12249_v30  ;;  %v17385_v62 = vpack.c.bf16 %v12259_v31, %v12251_v33  ;;  %12219 = vmatpush1.bf16.msra.mxu1 %v15720_v43  ;;  %12048 = vmatprep.subr.bf16.mxu0 %v15727_v25  ;;  %v15744_v37 = vcombine.low %v8906_v53, %v8910_v26  ;;  %v8929_v51 = vld [vmem:[#allocation12 + $0xf10] sm:$0xff]  ;;  %v8930_v43 = vld [vmem:[#allocation12 + $0xf18] sm:$0xff] }
 0x78b   :  { %v17387_v0 = vpack.c.bf16 %v12258_v41, %v12250_v39  ;;  %v17389_v46 = vpack.c.bf16 %v12260_v38, %v12252_v5  ;;  %12220 = vmatprep.subr.bf16.mxu1 %v15729_v3  ;;  %v15751_v1 = vcombine.high %v8913_v58, %v8917_v60  ;;  %v15753_v6 = vcombine.high %v8914_v61, %v8918_v63  ;;  %v8933_v44 = vld [vmem:[#allocation12 + $0xf30] sm:$0xff]  ;;  %v8938_v52 = vld [vmem:[#allocation12 + $0xf58] sm:$0xff] }
 0x78c   :  { %v15750_v4 = vcombine.low %v8913_v58, %v8917_v60  ;;  %v15759_v10 = vcombine.high %v8921_v47, %v8925_v20  ;;  %v15761_v40 = vcombine.high %v8922_v2, %v8926_v55  ;;  %v15758_v12 = vcombine.low %v8921_v47, %v8925_v20  ;;  %v8937_v25 = vld [vmem:[#allocation12 + $0xf50] sm:$0xff]  ;;  %v8946_v31 = vld [vmem:[#allocation12 + $0xf98] sm:$0xff] }
 0x78d   :  { %12049 = vmatpush1.bf16.msra.mxu0 %v15726_v11  ;;  %v8934_v11 = vld [vmem:[#allocation12 + $0xf38] sm:$0xff]  ;;  %v15760_v17 = vcombine.low %v8922_v2, %v8926_v55  ;;  %v15767_v18 = vcombine.high %v8929_v51, %v8933_v44  ;;  %v8941_v24 = vld [vmem:[#allocation12 + $0xf70] sm:$0xff]  ;;  %v15766_v3 = vcombine.low %v8929_v51, %v8933_v44  ;;  %v15785_v41 = vcombine.high %v8946_v31, %v8950_v29 }
 0x78e   :  { %12221 = vmatpush1.bf16.msra.mxu1 %v15728_v23  ;;  %12050 = vmatprep.subr.bf16.mxu0 %v15735_v42  ;;  %v15769_v22 = vcombine.high %v8930_v43, %v8934_v11  ;;  %v8942_v23 = vld [vmem:[#allocation12 + $0xf78] sm:$0xff]  ;;  %v15768_v27 = vcombine.low %v8930_v43, %v8934_v11  ;;  %v15775_v13 = vcombine.high %v8937_v25, %v8941_v24  ;;  %v8945_v33 = vld [vmem:[#allocation12 + $0xf90] sm:$0xff] }
 0x78f   :  { %12222 = vmatprep.subr.bf16.mxu1 %v15737_v48  ;;  %v15777_v30 = vcombine.high %v8938_v52, %v8942_v23  ;;  %v8949_v45 = vld [vmem:[#allocation12 + $0xfb0] sm:$0xff]  ;;  %v15774_v35 = vcombine.low %v8937_v25, %v8941_v24  ;;  %v15776_v39 = vcombine.low %v8938_v52, %v8942_v23  ;;  %v8954_v48 = vld [vmem:[#allocation12 + $0xfd8] sm:$0xff]  ;;  %v15784_v53 = vcombine.low %v8946_v31, %v8950_v29 }
 0x790   :  { %v15783_v5 = vcombine.high %v8945_v33, %v8949_v45  ;;  %v8953_v38 = vld [vmem:[#allocation12 + $0xfd0] sm:$0xff]  ;;  %v8958_v49 = vld [vmem:[#allocation12 + $0xff8] sm:$0xff]  ;;  %v15782_v50 = vcombine.low %v8945_v33, %v8949_v45 }
 0x791   :  { %12051 = vmatpush1.bf16.msra.mxu0 %v15734_v28  ;;  %v8957_v42 = vld [vmem:[#allocation12 + $0xff0] sm:$0xff]  ;;  %v15793_v28 = vcombine.high %v8954_v48, %v8958_v49  ;;  %v16290_v60 = vld [vmem:[#allocation15] ss:$16 sps:$4 sm:$0xff]   ;;  %v16298_v63 = vld [vmem:[#allocation15 + $0x24] ss:$16 sps:$4 sm:$0xff]  }
 0x792   :  { %12223 = vmatpush1.bf16.msra.mxu1 %v15736_v54  ;;  %12052 = vmatprep.subr.bf16.mxu0 %v15743_v56  ;;  %v15791_v26 = vcombine.high %v8953_v38, %v8957_v42  ;;  %v15790_v54 = vcombine.low %v8953_v38, %v8957_v42  ;;  %v15792_v56 = vcombine.low %v8954_v48, %v8958_v49  ;;  %v16295_v58 = vld [vmem:[#allocation15 + $0xc] ss:$16 sps:$4 sm:$0xff]   ;;  %v16293_v61 = vld [vmem:[#allocation15 + $0x8] ss:$16 sps:$4 sm:$0xff]   ;;  %v16302_v20 = vld [vmem:[#allocation15 + $0x40] ss:$16 sps:$4 sm:$0xff]  }
 0x793   :  { %12224 = vmatprep.subr.bf16.mxu1 %v15745_v57  ;;  %v16292_v57 = vld [vmem:[#allocation15 + $0x4] ss:$16 sps:$4 sm:$0xff]   ;;  %v16307_v47 = vld [vmem:[#allocation15 + $0x4c] ss:$16 sps:$4 sm:$0xff]   ;;  %v16305_v2 = vld [vmem:[#allocation15 + $0x48] ss:$16 sps:$4 sm:$0xff]  }
 0x794   :  { %v16310_v55 = vld [vmem:[#allocation15 + $0x64] ss:$16 sps:$4 sm:$0xff]   ;;  %v16317_v51 = vld [vmem:[#allocation15 + $0x88] ss:$16 sps:$4 sm:$0xff]   ;;  %v16325_v43 = vld [vmem:[#allocation15 + $0xac] ss:$16 sps:$4 sm:$0xff]  }
 0x795   :  { %12053 = vmatpush1.bf16.msra.mxu0 %v15742_v34  ;;  %v16301_v34 = vld [vmem:[#allocation15 + $0x2c] ss:$16 sps:$4 sm:$0xff]   ;;  %v16322_v44 = vld [vmem:[#allocation15 + $0xa4] ss:$16 sps:$4 sm:$0xff]   ;;  %v16320_v11 = vld [vmem:[#allocation15 + $0xa0] ss:$16 sps:$4 sm:$0xff]  }
 0x796   :  { %12225 = vmatpush1.bf16.msra.mxu1 %v15744_v37  ;;  %12054 = vmatprep.subr.bf16.mxu0 %v15751_v1  ;;  %v16296_v37 = vld [vmem:[#allocation15 + $0x20] ss:$16 sps:$4 sm:$0xff]   ;;  %v16299_v1 = vld [vmem:[#allocation15 + $0x28] ss:$16 sps:$4 sm:$0xff]   ;;  %v16334_v24 = vld [vmem:[#allocation15 + $0xe4] ss:$16 sps:$4 sm:$0xff]  }
 0x797   :  { %12226 = vmatprep.subr.bf16.mxu1 %v15753_v6  ;;  %v16304_v6 = vld [vmem:[#allocation15 + $0x44] ss:$16 sps:$4 sm:$0xff]   ;;  %v16329_v25 = vld [vmem:[#allocation15 + $0xc8] ss:$16 sps:$4 sm:$0xff]   ;;  %v16337_v52 = vld [vmem:[#allocation15 + $0xec] ss:$16 sps:$4 sm:$0xff]  }
 0x798   :  { %v16332_v23 = vld [vmem:[#allocation15 + $0xe0] ss:$16 sps:$4 sm:$0xff]   ;;  %v16341_v33 = vld [vmem:[#allocation15 + $0x108] ss:$16 sps:$4 sm:$0xff]   ;;  %v16346_v45 = vld [vmem:[#allocation15 + $0x124] ss:$16 sps:$4 sm:$0xff]  }
 0x799   :  { %12055 = vmatpush1.bf16.msra.mxu0 %v15750_v4  ;;  %v16308_v4 = vld [vmem:[#allocation15 + $0x60] ss:$16 sps:$4 sm:$0xff]   ;;  %v16349_v31 = vld [vmem:[#allocation15 + $0x12c] ss:$16 sps:$4 sm:$0xff]   ;;  %v16353_v38 = vld [vmem:[#allocation15 + $0x148] ss:$16 sps:$4 sm:$0xff]  }
 0x79a   :  { %12227 = vmatpush1.bf16.msra.mxu1 %v15752_v8  ;;  %12056 = vmatprep.subr.bf16.mxu0 %v15759_v10  ;;  %v16311_v8 = vld [vmem:[#allocation15 + $0x68] ss:$16 sps:$4 sm:$0xff]   ;;  %v16316_v10 = vld [vmem:[#allocation15 + $0x84] ss:$16 sps:$4 sm:$0xff]   ;;  %v16344_v29 = vld [vmem:[#allocation15 + $0x120] ss:$16 sps:$4 sm:$0xff]  }
 0x79b   :  { %12228 = vmatprep.subr.bf16.mxu1 %v15761_v40  ;;  %v16319_v40 = vld [vmem:[#allocation15 + $0x8c] ss:$16 sps:$4 sm:$0xff]   ;;  %v16358_v42 = vld [vmem:[#allocation15 + $0x164] ss:$16 sps:$4 sm:$0xff]   ;;  %v16356_v49 = vld [vmem:[#allocation15 + $0x160] ss:$16 sps:$4 sm:$0xff]  }
 0x79c   :  { %v16361_v48 = vld [vmem:[#allocation15 + $0x16c] ss:$16 sps:$4 sm:$0xff]  }
 0x79d   :  { %12057 = vmatpush1.bf16.msra.mxu0 %v15758_v12  ;;  %v16323_v12 = vld [vmem:[#allocation15 + $0xa8] ss:$16 sps:$4 sm:$0xff]  }
 0x79e   :  { %12229 = vmatpush1.bf16.msra.mxu1 %v15760_v17  ;;  %12058 = vmatprep.subr.bf16.mxu0 %v15767_v18  ;;  %v16328_v17 = vld [vmem:[#allocation15 + $0xc4] ss:$16 sps:$4 sm:$0xff]   ;;  %v16331_v18 = vld [vmem:[#allocation15 + $0xcc] ss:$16 sps:$4 sm:$0xff]  }
 0x79f   :  { %12230 = vmatprep.subr.bf16.mxu1 %v15769_v22  ;;  %v16326_v22 = vld [vmem:[#allocation15 + $0xc0] ss:$16 sps:$4 sm:$0xff]  }
 0x7a1   :  { %12059 = vmatpush1.bf16.msra.mxu0 %v15766_v3  ;;  %v16335_v3 = vld [vmem:[#allocation15 + $0xe8] ss:$16 sps:$4 sm:$0xff]  }
 0x7a2   :  { %12231 = vmatpush1.bf16.msra.mxu1 %v15768_v27  ;;  %12060 = vmatprep.subr.bf16.mxu0 %v15775_v13  ;;  %v16340_v27 = vld [vmem:[#allocation15 + $0x104] ss:$16 sps:$4 sm:$0xff]   ;;  %v16343_v13 = vld [vmem:[#allocation15 + $0x10c] ss:$16 sps:$4 sm:$0xff]  }
 0x7a3   :  { %12232 = vmatprep.subr.bf16.mxu1 %v15777_v30  ;;  %v16338_v30 = vld [vmem:[#allocation15 + $0x100] ss:$16 sps:$4 sm:$0xff]  }
 0x7a5   :  { %12061 = vmatpush1.bf16.msra.mxu0 %v15774_v35  ;;  %v16347_v35 = vld [vmem:[#allocation15 + $0x128] ss:$16 sps:$4 sm:$0xff]  }
 0x7a6   :  { %12233 = vmatpush1.bf16.msra.mxu1 %v15776_v39  ;;  %12062 = vmatprep.subr.bf16.mxu0 %v15783_v5  ;;  %v16352_v39 = vld [vmem:[#allocation15 + $0x144] ss:$16 sps:$4 sm:$0xff]   ;;  %v16355_v5 = vld [vmem:[#allocation15 + $0x14c] ss:$16 sps:$4 sm:$0xff]  }
 0x7a7   :  { %12234 = vmatprep.subr.bf16.mxu1 %v15785_v41  ;;  %v16350_v41 = vld [vmem:[#allocation15 + $0x140] ss:$16 sps:$4 sm:$0xff]  }
 0x7a9   :  { %12063 = vmatpush1.bf16.msra.mxu0 %v15782_v50  ;;  %v16359_v50 = vld [vmem:[#allocation15 + $0x168] ss:$16 sps:$4 sm:$0xff]  }
 0x7aa   :  { %12235 = vmatpush1.bf16.msra.mxu1 %v15784_v53  ;;  %12064 = vmatprep.subr.bf16.mxu0 %v15791_v26  ;;  %v16364_v53 = vld [vmem:[#allocation15 + $0x184] ss:$16 sps:$4 sm:$0xff]   ;;  %v16367_v26 = vld [vmem:[#allocation15 + $0x18c] ss:$16 sps:$4 sm:$0xff]  }
 0x7ab   :  { %12236 = vmatprep.subr.bf16.mxu1 %v15793_v28  ;;  %v16362_v28 = vld [vmem:[#allocation15 + $0x180] ss:$16 sps:$4 sm:$0xff]  }
 0x7ad   :  { %12065 = vmatpush1.bf16.msra.mxu0 %v15790_v54  ;;  %v16365_v54 = vld [vmem:[#allocation15 + $0x188] ss:$16 sps:$4 sm:$0xff]  }
 0x7ae   :  { %12237 = vmatpush1.bf16.msra.mxu1 %v15792_v56  ;;  %13831 = vmatprep.subr.bf16.mxu0 %v16292_v57  ;;  %v16370_v56 = vld [vmem:[#allocation15 + $0x1a4] ss:$16 sps:$4 sm:$0xff]   ;;  %v16373_v57 = vld [vmem:[#allocation15 + $0x1ac] ss:$16 sps:$4 sm:$0xff]  }
 0x7af   :  { %14003 = vmatprep.subr.bf16.mxu1 %v16295_v58  ;;  %v16368_v58 = vld [vmem:[#allocation15 + $0x1a0] ss:$16 sps:$4 sm:$0xff]  }
 0x7b0   :  { %12067 = vmatmul.mubr.bf16.vlgmr.msra.gmra.mrb[28].mxu0 %v17347_v59 }
 0x7b1   :  { %12239 = vmatmul.mubr.bf16.vlgmr.msra.gmra.mrb[28].mxu1 %v17347_v59  ;;  %13832 = vmatpush1.bf16.msra.mxu0 %v16290_v60  ;;  %v16313_v59 = vld [vmem:[#allocation15 + $0x6c] ss:$16 sps:$4 sm:$0xff]   ;;  %v16371_v60 = vld [vmem:[#allocation15 + $0x1a8] ss:$16 sps:$4 sm:$0xff]  }
 0x7b2   :  { %13863 = vmatprep.mubr.bf16.mxu0 %v17387_v0  ;;  %14004 = vmatpush1.bf16.msra.mxu1 %v16293_v61  ;;  %v16376_v61 = vld [vmem:[#allocation15 + $0x1c4] ss:$16 sps:$4 sm:$0xff]  }
 0x7b3   :  { %14035 = vmatprep.mubr.bf16.mxu1 %v17387_v0  ;;  %13833 = vmatprep.subr.bf16.mxu0 %v16298_v63  ;;  %v16314_v0 = vld [vmem:[#allocation15 + $0x80] ss:$16 sps:$4 sm:$0xff]   ;;  %v16379_v63 = vld [vmem:[#allocation15 + $0x1cc] ss:$16 sps:$4 sm:$0xff]  }
 0x7b4   :  { %14005 = vmatprep.subr.bf16.mxu1 %v16301_v34  ;;  %v16374_v34 = vld [vmem:[#allocation15 + $0x1c0] ss:$16 sps:$4 sm:$0xff]  }
 0x7b5   :  { %13834 = vmatpush1.bf16.msra.mxu0 %v16296_v37  ;;  %v16377_v37 = vld [vmem:[#allocation15 + $0x1c8] ss:$16 sps:$4 sm:$0xff]  }
 0x7b6   :  { %14006 = vmatpush1.bf16.msra.mxu1 %v16299_v1  ;;  %13835 = vmatprep.subr.bf16.mxu0 %v16304_v6  ;;  %v16382_v1 = vld [vmem:[#allocation15 + $0x1e4] ss:$16 sps:$4 sm:$0xff]   ;;  %v16385_v6 = vld [vmem:[#allocation15 + $0x1ec] ss:$16 sps:$4 sm:$0xff]  }
 0x7b7   :  { %14007 = vmatprep.subr.bf16.mxu1 %v16307_v47  ;;  %v16380_v47 = vld [vmem:[#allocation15 + $0x1e0] ss:$16 sps:$4 sm:$0xff]  }
 0x7b9   :  { %13836 = vmatpush1.bf16.msra.mxu0 %v16302_v20  ;;  %v16383_v20 = vld [vmem:[#allocation15 + $0x1e8] ss:$16 sps:$4 sm:$0xff]  }
 0x7ba   :  { %14008 = vmatpush1.bf16.msra.mxu1 %v16305_v2  ;;  %13837 = vmatprep.subr.bf16.mxu0 %v16310_v55  ;;  %v16388_v2 = vld [vmem:[#allocation15 + $0x204] ss:$16 sps:$4 sm:$0xff]   ;;  %v16391_v55 = vld [vmem:[#allocation15 + $0x20c] ss:$16 sps:$4 sm:$0xff]  }
 0x7bb   :  { %14009 = vmatprep.subr.bf16.mxu1 %v16313_v59  ;;  %v16386_v59 = vld [vmem:[#allocation15 + $0x200] ss:$16 sps:$4 sm:$0xff]  }
 0x7bd   :  { %13838 = vmatpush1.bf16.msra.mxu0 %v16308_v4  ;;  %v16389_v4 = vld [vmem:[#allocation15 + $0x208] ss:$16 sps:$4 sm:$0xff]  }
 0x7be   :  { %14010 = vmatpush1.bf16.msra.mxu1 %v16311_v8  ;;  %13839 = vmatprep.subr.bf16.mxu0 %v16316_v10  ;;  %v16394_v8 = vld [vmem:[#allocation15 + $0x224] ss:$16 sps:$4 sm:$0xff]   ;;  %v16397_v10 = vld [vmem:[#allocation15 + $0x22c] ss:$16 sps:$4 sm:$0xff]  }
 0x7bf   :  { %14011 = vmatprep.subr.bf16.mxu1 %v16319_v40  ;;  %v16392_v40 = vld [vmem:[#allocation15 + $0x220] ss:$16 sps:$4 sm:$0xff]  }
 0x7c1   :  { %13840 = vmatpush1.bf16.msra.mxu0 %v16314_v0  ;;  %v16395_v0 = vld [vmem:[#allocation15 + $0x228] ss:$16 sps:$4 sm:$0xff]  }
 0x7c2   :  { %14012 = vmatpush1.bf16.msra.mxu1 %v16317_v51  ;;  %13841 = vmatprep.subr.bf16.mxu0 %v16322_v44  ;;  %v16400_v51 = vld [vmem:[#allocation15 + $0x244] ss:$16 sps:$4 sm:$0xff]   ;;  %v16403_v44 = vld [vmem:[#allocation15 + $0x24c] ss:$16 sps:$4 sm:$0xff]  }
 0x7c3   :  { %14013 = vmatprep.subr.bf16.mxu1 %v16325_v43  ;;  %v16398_v43 = vld [vmem:[#allocation15 + $0x240] ss:$16 sps:$4 sm:$0xff]  }
 0x7c5   :  { %13842 = vmatpush1.bf16.msra.mxu0 %v16320_v11  ;;  %v16401_v11 = vld [vmem:[#allocation15 + $0x248] ss:$16 sps:$4 sm:$0xff]  }
 0x7c6   :  { %14014 = vmatpush1.bf16.msra.mxu1 %v16323_v12  ;;  %13843 = vmatprep.subr.bf16.mxu0 %v16328_v17  ;;  %v16406_v12 = vld [vmem:[#allocation15 + $0x264] ss:$16 sps:$4 sm:$0xff]   ;;  %v16404_v17 = vld [vmem:[#allocation15 + $0x260] ss:$16 sps:$4 sm:$0xff]  }
 0x7c7   :  { %14015 = vmatprep.subr.bf16.mxu1 %v16331_v18  ;;  %v16407_v18 = vld [vmem:[#allocation15 + $0x268] ss:$16 sps:$4 sm:$0xff]  }
 0x7c9   :  { %13844 = vmatpush1.bf16.msra.mxu0 %v16326_v22  ;;  %v16412_v22 = vld [vmem:[#allocation15 + $0x284] ss:$16 sps:$4 sm:$0xff]  }
 0x7ca   :  { %14016 = vmatpush1.bf16.msra.mxu1 %v16329_v25  ;;  %13845 = vmatprep.subr.bf16.mxu0 %v16334_v24  ;;  %v16415_v25 = vld [vmem:[#allocation15 + $0x28c] ss:$16 sps:$4 sm:$0xff]   ;;  %v16413_v24 = vld [vmem:[#allocation15 + $0x288] ss:$16 sps:$4 sm:$0xff]  }
 0x7cb   :  { %14017 = vmatprep.subr.bf16.mxu1 %v16337_v52  ;;  %v16418_v52 = vld [vmem:[#allocation15 + $0x2a4] ss:$16 sps:$4 sm:$0xff]  }
 0x7cd   :  { %13846 = vmatpush1.bf16.msra.mxu0 %v16332_v23  ;;  %v16421_v23 = vld [vmem:[#allocation15 + $0x2ac] ss:$16 sps:$4 sm:$0xff]  }
 0x7ce   :  { %14018 = vmatpush1.bf16.msra.mxu1 %v16335_v3  ;;  %13847 = vmatprep.subr.bf16.mxu0 %v16340_v27  ;;  %v16416_v3 = vld [vmem:[#allocation15 + $0x2a0] ss:$16 sps:$4 sm:$0xff]   ;;  %v16419_v27 = vld [vmem:[#allocation15 + $0x2a8] ss:$16 sps:$4 sm:$0xff]  }
 0x7cf   :  { %14019 = vmatprep.subr.bf16.mxu1 %v16343_v13  ;;  %v16424_v13 = vld [vmem:[#allocation15 + $0x2c4] ss:$16 sps:$4 sm:$0xff]  }
 0x7d1   :  { %13848 = vmatpush1.bf16.msra.mxu0 %v16338_v30  ;;  %v16427_v30 = vld [vmem:[#allocation15 + $0x2cc] ss:$16 sps:$4 sm:$0xff]  }
 0x7d2   :  { %14020 = vmatpush1.bf16.msra.mxu1 %v16341_v33  ;;  %13849 = vmatprep.subr.bf16.mxu0 %v16346_v45  ;;  %v16422_v33 = vld [vmem:[#allocation15 + $0x2c0] ss:$16 sps:$4 sm:$0xff]   ;;  %v16425_v45 = vld [vmem:[#allocation15 + $0x2c8] ss:$16 sps:$4 sm:$0xff]  }
 0x7d3   :  { %14021 = vmatprep.subr.bf16.mxu1 %v16349_v31  ;;  %v16430_v31 = vld [vmem:[#allocation15 + $0x2e4] ss:$16 sps:$4 sm:$0xff]  }
 0x7d5   :  { %13850 = vmatpush1.bf16.msra.mxu0 %v16344_v29  ;;  %v16433_v29 = vld [vmem:[#allocation15 + $0x2ec] ss:$16 sps:$4 sm:$0xff]  }
 0x7d6   :  { %14022 = vmatpush1.bf16.msra.mxu1 %v16347_v35  ;;  %13851 = vmatprep.subr.bf16.mxu0 %v16352_v39  ;;  %v16428_v35 = vld [vmem:[#allocation15 + $0x2e0] ss:$16 sps:$4 sm:$0xff]   ;;  %v16431_v39 = vld [vmem:[#allocation15 + $0x2e8] ss:$16 sps:$4 sm:$0xff]  }
 0x7d7   :  { %14023 = vmatprep.subr.bf16.mxu1 %v16355_v5  ;;  %v16436_v5 = vld [vmem:[#allocation15 + $0x304] ss:$16 sps:$4 sm:$0xff]  }
 0x7d9   :  { %13852 = vmatpush1.bf16.msra.mxu0 %v16350_v41  ;;  %v16439_v41 = vld [vmem:[#allocation15 + $0x30c] ss:$16 sps:$4 sm:$0xff]  }
 0x7da   :  { %14024 = vmatpush1.bf16.msra.mxu1 %v16353_v38  ;;  %13853 = vmatprep.subr.bf16.mxu0 %v16358_v42  ;;  %v16434_v38 = vld [vmem:[#allocation15 + $0x300] ss:$16 sps:$4 sm:$0xff]   ;;  %v16437_v42 = vld [vmem:[#allocation15 + $0x308] ss:$16 sps:$4 sm:$0xff]  }
 0x7db   :  { %14025 = vmatprep.subr.bf16.mxu1 %v16361_v48  ;;  %v16442_v48 = vld [vmem:[#allocation15 + $0x324] ss:$16 sps:$4 sm:$0xff]  }
 0x7dd   :  { %13854 = vmatpush1.bf16.msra.mxu0 %v16356_v49  ;;  %v16445_v49 = vld [vmem:[#allocation15 + $0x32c] ss:$16 sps:$4 sm:$0xff]  }
 0x7de   :  { %14026 = vmatpush1.bf16.msra.mxu1 %v16359_v50  ;;  %13855 = vmatprep.subr.bf16.mxu0 %v16364_v53  ;;  %v16440_v50 = vld [vmem:[#allocation15 + $0x320] ss:$16 sps:$4 sm:$0xff]   ;;  %v16443_v53 = vld [vmem:[#allocation15 + $0x328] ss:$16 sps:$4 sm:$0xff]  }
 0x7df   :  { %14027 = vmatprep.subr.bf16.mxu1 %v16367_v26  ;;  %v16448_v26 = vld [vmem:[#allocation15 + $0x344] ss:$16 sps:$4 sm:$0xff]  }
 0x7e1   :  { %13856 = vmatpush1.bf16.msra.mxu0 %v16362_v28  ;;  %v16451_v28 = vld [vmem:[#allocation15 + $0x34c] ss:$16 sps:$4 sm:$0xff]  }
 0x7e2   :  { %14028 = vmatpush1.bf16.msra.mxu1 %v16365_v54  ;;  %13857 = vmatprep.subr.bf16.mxu0 %v16370_v56  ;;  %v16446_v54 = vld [vmem:[#allocation15 + $0x340] ss:$16 sps:$4 sm:$0xff]   ;;  %v16449_v56 = vld [vmem:[#allocation15 + $0x348] ss:$16 sps:$4 sm:$0xff]  }
 0x7e3   :  { %14029 = vmatprep.subr.bf16.mxu1 %v16373_v57  ;;  %v16454_v57 = vld [vmem:[#allocation15 + $0x364] ss:$16 sps:$4 sm:$0xff]  }
 0x7e5   :  { %13858 = vmatpush1.bf16.msra.mxu0 %v16368_v58  ;;  %v16457_v58 = vld [vmem:[#allocation15 + $0x36c] ss:$16 sps:$4 sm:$0xff]  }
 0x7e6   :  { %14030 = vmatpush1.bf16.msra.mxu1 %v16371_v60  ;;  %13859 = vmatprep.subr.bf16.mxu0 %v16376_v61  ;;  %v16452_v60 = vld [vmem:[#allocation15 + $0x360] ss:$16 sps:$4 sm:$0xff]   ;;  %v16455_v61 = vld [vmem:[#allocation15 + $0x368] ss:$16 sps:$4 sm:$0xff]  }
 0x7e7   :  { %14031 = vmatprep.subr.bf16.mxu1 %v16379_v63  ;;  %v16460_v63 = vld [vmem:[#allocation15 + $0x384] ss:$16 sps:$4 sm:$0xff]  }
 0x7e9   :  { %13860 = vmatpush1.bf16.msra.mxu0 %v16374_v34  ;;  %v16463_v34 = vld [vmem:[#allocation15 + $0x38c] ss:$16 sps:$4 sm:$0xff]  }
 0x7ea   :  { %14032 = vmatpush1.bf16.msra.mxu1 %v16377_v37  ;;  %13861 = vmatprep.subr.bf16.mxu0 %v16382_v1  ;;  %v16458_v37 = vld [vmem:[#allocation15 + $0x380] ss:$16 sps:$4 sm:$0xff]   ;;  %v16461_v1 = vld [vmem:[#allocation15 + $0x388] ss:$16 sps:$4 sm:$0xff]  }
 0x7eb   :  { %14033 = vmatprep.subr.bf16.mxu1 %v16385_v6  ;;  %v16466_v6 = vld [vmem:[#allocation15 + $0x3a4] ss:$16 sps:$4 sm:$0xff]  }
 0x7ed   :  { %13862 = vmatpush1.bf16.msra.mxu0 %v16380_v47  ;;  %v16469_v47 = vld [vmem:[#allocation15 + $0x3ac] ss:$16 sps:$4 sm:$0xff]  }
 0x7ee   :  { %14034 = vmatpush1.bf16.msra.mxu1 %v16383_v20  ;;  %13874 = vmatprep.subr.bf16.mxu0 %v16388_v2  ;;  %v16464_v20 = vld [vmem:[#allocation15 + $0x3a0] ss:$16 sps:$4 sm:$0xff]   ;;  %v16467_v2 = vld [vmem:[#allocation15 + $0x3a8] ss:$16 sps:$4 sm:$0xff]  }
 0x7ef   :  { %14046 = vmatprep.subr.bf16.mxu1 %v16391_v55  ;;  %v16472_v55 = vld [vmem:[#allocation15 + $0x3c4] ss:$16 sps:$4 sm:$0xff]  }
 0x7f0   :  { %13864 = vmatmul.mubr.bf16.vlgmr.msra.gmra.mrb[32].mxu0 %v17383_v15 }
 0x7f1   :  { %14036 = vmatmul.mubr.bf16.vlgmr.msra.gmra.mrb[32].mxu1 %v17383_v15  ;;  %13875 = vmatpush1.bf16.msra.mxu0 %v16386_v59  ;;  %v16409_v15 = vld [vmem:[#allocation15 + $0x26c] ss:$16 sps:$4 sm:$0xff]  }
 0x7f2   :  { %13906 = vmatprep.mubr.bf16.mxu0 %v17389_v46  ;;  %14047 = vmatpush1.bf16.msra.mxu1 %v16389_v4  ;;  %v16475_v59 = vld [vmem:[#allocation15 + $0x3cc] ss:$16 sps:$4 sm:$0xff]   ;;  %v16470_v4 = vld [vmem:[#allocation15 + $0x3c0] ss:$16 sps:$4 sm:$0xff]  }
 0x7f3   :  { %14078 = vmatprep.mubr.bf16.mxu1 %v17389_v46  ;;  %13876 = vmatprep.subr.bf16.mxu0 %v16394_v8  ;;  %v16410_v46 = vld [vmem:[#allocation15 + $0x280] ss:$16 sps:$4 sm:$0xff]   ;;  %v16473_v8 = vld [vmem:[#allocation15 + $0x3c8] ss:$16 sps:$4 sm:$0xff]  }
 0x7f4   :  { %14048 = vmatprep.subr.bf16.mxu1 %v16397_v10  ;;  %v16478_v10 = vld [vmem:[#allocation15 + $0x3e4] ss:$16 sps:$4 sm:$0xff]  }
 0x7f5   :  { %13877 = vmatpush1.bf16.msra.mxu0 %v16392_v40  ;;  %v16481_v40 = vld [vmem:[#allocation15 + $0x3ec] ss:$16 sps:$4 sm:$0xff]  }
 0x7f6   :  { %14049 = vmatpush1.bf16.msra.mxu1 %v16395_v0  ;;  %13878 = vmatprep.subr.bf16.mxu0 %v16400_v51  ;;  %v16476_v0 = vld [vmem:[#allocation15 + $0x3e0] ss:$16 sps:$4 sm:$0xff]   ;;  %v16479_v51 = vld [vmem:[#allocation15 + $0x3e8] ss:$16 sps:$4 sm:$0xff]  }
 0x7f7   :  { %14050 = vmatprep.subr.bf16.mxu1 %v16403_v44  ;;  %v16484_v44 = vld [vmem:[#allocation15 + $0x404] ss:$16 sps:$4 sm:$0xff]  }
 0x7f9   :  { %13879 = vmatpush1.bf16.msra.mxu0 %v16398_v43  ;;  %v16487_v43 = vld [vmem:[#allocation15 + $0x40c] ss:$16 sps:$4 sm:$0xff]  }
 0x7fa   :  { %14051 = vmatpush1.bf16.msra.mxu1 %v16401_v11  ;;  %13880 = vmatprep.subr.bf16.mxu0 %v16406_v12  ;;  %v16482_v11 = vld [vmem:[#allocation15 + $0x400] ss:$16 sps:$4 sm:$0xff]   ;;  %v16485_v12 = vld [vmem:[#allocation15 + $0x408] ss:$16 sps:$4 sm:$0xff]  }
 0x7fb   :  { %14052 = vmatprep.subr.bf16.mxu1 %v16409_v15  ;;  %v16490_v15 = vld [vmem:[#allocation15 + $0x424] ss:$16 sps:$4 sm:$0xff]  }
 0x7fd   :  { %13881 = vmatpush1.bf16.msra.mxu0 %v16404_v17  ;;  %v16493_v17 = vld [vmem:[#allocation15 + $0x42c] ss:$16 sps:$4 sm:$0xff]  }
 0x7fe   :  { %14053 = vmatpush1.bf16.msra.mxu1 %v16407_v18  ;;  %13882 = vmatprep.subr.bf16.mxu0 %v16412_v22  ;;  %v16488_v18 = vld [vmem:[#allocation15 + $0x420] ss:$16 sps:$4 sm:$0xff]   ;;  %v16491_v22 = vld [vmem:[#allocation15 + $0x428] ss:$16 sps:$4 sm:$0xff]  }
 0x7ff   :  { %14054 = vmatprep.subr.bf16.mxu1 %v16415_v25  ;;  %v16496_v25 = vld [vmem:[#allocation15 + $0x444] ss:$16 sps:$4 sm:$0xff]  }
 0x801   :  { %13883 = vmatpush1.bf16.msra.mxu0 %v16410_v46  ;;  %v16499_v46 = vld [vmem:[#allocation15 + $0x44c] ss:$16 sps:$4 sm:$0xff]  }
 0x802   :  { %14055 = vmatpush1.bf16.msra.mxu1 %v16413_v24  ;;  %13884 = vmatprep.subr.bf16.mxu0 %v16418_v52  ;;  %v16494_v24 = vld [vmem:[#allocation15 + $0x440] ss:$16 sps:$4 sm:$0xff]   ;;  %v16497_v52 = vld [vmem:[#allocation15 + $0x448] ss:$16 sps:$4 sm:$0xff]  }
 0x803   :  { %14056 = vmatprep.subr.bf16.mxu1 %v16421_v23  ;;  %v16502_v23 = vld [vmem:[#allocation15 + $0x464] ss:$16 sps:$4 sm:$0xff]  }
 0x805   :  { %13885 = vmatpush1.bf16.msra.mxu0 %v16416_v3  ;;  %v16505_v3 = vld [vmem:[#allocation15 + $0x46c] ss:$16 sps:$4 sm:$0xff]  }
 0x806   :  { %14057 = vmatpush1.bf16.msra.mxu1 %v16419_v27  ;;  %13886 = vmatprep.subr.bf16.mxu0 %v16424_v13  ;;  %v16500_v27 = vld [vmem:[#allocation15 + $0x460] ss:$16 sps:$4 sm:$0xff]   ;;  %v16508_v13 = vld [vmem:[#allocation15 + $0x484] ss:$16 sps:$4 sm:$0xff]  }
 0x807   :  { %14058 = vmatprep.subr.bf16.mxu1 %v16427_v30  ;;  %v16511_v30 = vld [vmem:[#allocation15 + $0x48c] ss:$16 sps:$4 sm:$0xff]  }
 0x809   :  { %13887 = vmatpush1.bf16.msra.mxu0 %v16422_v33  ;;  %v16506_v33 = vld [vmem:[#allocation15 + $0x480] ss:$16 sps:$4 sm:$0xff]  }
 0x80a   :  { %14059 = vmatpush1.bf16.msra.mxu1 %v16425_v45  ;;  %13888 = vmatprep.subr.bf16.mxu0 %v16430_v31  ;;  %v16509_v45 = vld [vmem:[#allocation15 + $0x488] ss:$16 sps:$4 sm:$0xff]   ;;  %v16514_v31 = vld [vmem:[#allocation15 + $0x4a4] ss:$16 sps:$4 sm:$0xff]  }
 0x80b   :  { %14060 = vmatprep.subr.bf16.mxu1 %v16433_v29  ;;  %v16517_v29 = vld [vmem:[#allocation15 + $0x4ac] ss:$16 sps:$4 sm:$0xff]  }
 0x80d   :  { %13889 = vmatpush1.bf16.msra.mxu0 %v16428_v35  ;;  %v16512_v35 = vld [vmem:[#allocation15 + $0x4a0] ss:$16 sps:$4 sm:$0xff]  }
 0x80e   :  { %14061 = vmatpush1.bf16.msra.mxu1 %v16431_v39  ;;  %13890 = vmatprep.subr.bf16.mxu0 %v16436_v5  ;;  %v16515_v39 = vld [vmem:[#allocation15 + $0x4a8] ss:$16 sps:$4 sm:$0xff]   ;;  %v16520_v5 = vld [vmem:[#allocation15 + $0x4c4] ss:$16 sps:$4 sm:$0xff]  }
 0x80f   :  { %14062 = vmatprep.subr.bf16.mxu1 %v16439_v41  ;;  %v16523_v41 = vld [vmem:[#allocation15 + $0x4cc] ss:$16 sps:$4 sm:$0xff]  }
 0x811   :  { %13891 = vmatpush1.bf16.msra.mxu0 %v16434_v38  ;;  %v16518_v38 = vld [vmem:[#allocation15 + $0x4c0] ss:$16 sps:$4 sm:$0xff]  }
 0x812   :  { %14063 = vmatpush1.bf16.msra.mxu1 %v16437_v42  ;;  %13892 = vmatprep.subr.bf16.mxu0 %v16442_v48  ;;  %v16521_v42 = vld [vmem:[#allocation15 + $0x4c8] ss:$16 sps:$4 sm:$0xff]   ;;  %v16526_v48 = vld [vmem:[#allocation15 + $0x4e4] ss:$16 sps:$4 sm:$0xff]  }
 0x813   :  { %14064 = vmatprep.subr.bf16.mxu1 %v16445_v49  ;;  %v16529_v49 = vld [vmem:[#allocation15 + $0x4ec] ss:$16 sps:$4 sm:$0xff]  }
 0x815   :  { %13893 = vmatpush1.bf16.msra.mxu0 %v16440_v50  ;;  %v16524_v50 = vld [vmem:[#allocation15 + $0x4e0] ss:$16 sps:$4 sm:$0xff]  }
 0x816   :  { %14065 = vmatpush1.bf16.msra.mxu1 %v16443_v53  ;;  %13894 = vmatprep.subr.bf16.mxu0 %v16448_v26  ;;  %v16527_v53 = vld [vmem:[#allocation15 + $0x4e8] ss:$16 sps:$4 sm:$0xff]   ;;  %v16532_v26 = vld [vmem:[#allocation15 + $0x504] ss:$16 sps:$4 sm:$0xff]  }
 0x817   :  { %14066 = vmatprep.subr.bf16.mxu1 %v16451_v28  ;;  %v16535_v28 = vld [vmem:[#allocation15 + $0x50c] ss:$16 sps:$4 sm:$0xff]  }
 0x819   :  { %13895 = vmatpush1.bf16.msra.mxu0 %v16446_v54  ;;  %v16530_v54 = vld [vmem:[#allocation15 + $0x500] ss:$16 sps:$4 sm:$0xff]  }
 0x81a   :  { %14067 = vmatpush1.bf16.msra.mxu1 %v16449_v56  ;;  %13896 = vmatprep.subr.bf16.mxu0 %v16454_v57  ;;  %v16533_v56 = vld [vmem:[#allocation15 + $0x508] ss:$16 sps:$4 sm:$0xff]   ;;  %v16538_v57 = vld [vmem:[#allocation15 + $0x524] ss:$16 sps:$4 sm:$0xff]  }
 0x81b   :  { %14068 = vmatprep.subr.bf16.mxu1 %v16457_v58  ;;  %v16541_v58 = vld [vmem:[#allocation15 + $0x52c] ss:$16 sps:$4 sm:$0xff]  }
 0x81d   :  { %13897 = vmatpush1.bf16.msra.mxu0 %v16452_v60  ;;  %v16536_v60 = vld [vmem:[#allocation15 + $0x520] ss:$16 sps:$4 sm:$0xff]  }
 0x81e   :  { %14069 = vmatpush1.bf16.msra.mxu1 %v16455_v61  ;;  %13898 = vmatprep.subr.bf16.mxu0 %v16460_v63  ;;  %v16539_v61 = vld [vmem:[#allocation15 + $0x528] ss:$16 sps:$4 sm:$0xff]   ;;  %v16544_v63 = vld [vmem:[#allocation15 + $0x544] ss:$16 sps:$4 sm:$0xff]  }
 0x81f   :  { %14070 = vmatprep.subr.bf16.mxu1 %v16463_v34  ;;  %v16547_v34 = vld [vmem:[#allocation15 + $0x54c] ss:$16 sps:$4 sm:$0xff]  }
 0x821   :  { %13899 = vmatpush1.bf16.msra.mxu0 %v16458_v37  ;;  %v16542_v37 = vld [vmem:[#allocation15 + $0x540] ss:$16 sps:$4 sm:$0xff]  }
 0x822   :  { %14071 = vmatpush1.bf16.msra.mxu1 %v16461_v1  ;;  %13900 = vmatprep.subr.bf16.mxu0 %v16466_v6  ;;  %v16545_v1 = vld [vmem:[#allocation15 + $0x548] ss:$16 sps:$4 sm:$0xff]   ;;  %v16550_v6 = vld [vmem:[#allocation15 + $0x564] ss:$16 sps:$4 sm:$0xff]  }
 0x823   :  { %14072 = vmatprep.subr.bf16.mxu1 %v16469_v47  ;;  %v16553_v47 = vld [vmem:[#allocation15 + $0x56c] ss:$16 sps:$4 sm:$0xff]  }
 0x825   :  { %13901 = vmatpush1.bf16.msra.mxu0 %v16464_v20  ;;  %v16548_v20 = vld [vmem:[#allocation15 + $0x560] ss:$16 sps:$4 sm:$0xff]  }
 0x826   :  { %14073 = vmatpush1.bf16.msra.mxu1 %v16467_v2  ;;  %13902 = vmatprep.subr.bf16.mxu0 %v16472_v55  ;;  %v16551_v2 = vld [vmem:[#allocation15 + $0x568] ss:$16 sps:$4 sm:$0xff]   ;;  %v16556_v55 = vld [vmem:[#allocation15 + $0x584] ss:$16 sps:$4 sm:$0xff]  }
 0x827   :  { %14074 = vmatprep.subr.bf16.mxu1 %v16475_v59  ;;  %v16559_v59 = vld [vmem:[#allocation15 + $0x58c] ss:$16 sps:$4 sm:$0xff]  }
 0x829   :  { %13903 = vmatpush1.bf16.msra.mxu0 %v16470_v4  ;;  %v16554_v4 = vld [vmem:[#allocation15 + $0x580] ss:$16 sps:$4 sm:$0xff]  }
 0x82a   :  { %14075 = vmatpush1.bf16.msra.mxu1 %v16473_v8  ;;  %13904 = vmatprep.subr.bf16.mxu0 %v16478_v10  ;;  %v16557_v8 = vld [vmem:[#allocation15 + $0x588] ss:$16 sps:$4 sm:$0xff]   ;;  %v16562_v10 = vld [vmem:[#allocation15 + $0x5a4] ss:$16 sps:$4 sm:$0xff]  }
 0x82b   :  { %14076 = vmatprep.subr.bf16.mxu1 %v16481_v40  ;;  %v16565_v40 = vld [vmem:[#allocation15 + $0x5ac] ss:$16 sps:$4 sm:$0xff]  }
 0x82d   :  { %13905 = vmatpush1.bf16.msra.mxu0 %v16476_v0  ;;  %v16560_v0 = vld [vmem:[#allocation15 + $0x5a0] ss:$16 sps:$4 sm:$0xff]  }
 0x82e   :  { %14077 = vmatpush1.bf16.msra.mxu1 %v16479_v51  ;;  %13917 = vmatprep.subr.bf16.mxu0 %v16484_v44  ;;  %v16563_v51 = vld [vmem:[#allocation15 + $0x5a8] ss:$16 sps:$4 sm:$0xff]   ;;  %v16568_v44 = vld [vmem:[#allocation15 + $0x5c4] ss:$16 sps:$4 sm:$0xff]  }
 0x82f   :  { %14089 = vmatprep.subr.bf16.mxu1 %v16487_v43  ;;  %v16571_v43 = vld [vmem:[#allocation15 + $0x5cc] ss:$16 sps:$4 sm:$0xff]  }
 0x830   :  { %13907 = vmatmul.mubr.bf16.vlgmr.msra.gmra.mrb[32].mxu0 %v17385_v62 }
 0x831   :  { %14079 = vmatmul.mubr.bf16.vlgmr.msra.gmra.mrb[32].mxu1 %v17385_v62  ;;  %13918 = vmatpush1.bf16.msra.mxu0 %v16482_v11  ;;  %v16503_v62 = vld [vmem:[#allocation15 + $0x468] ss:$16 sps:$4 sm:$0xff]   ;;  %v16566_v11 = vld [vmem:[#allocation15 + $0x5c0] ss:$16 sps:$4 sm:$0xff]  }
 0x832   :  { %14090 = vmatpush1.bf16.msra.mxu1 %v16485_v12  ;;  %13919 = vmatprep.subr.bf16.mxu0 %v16490_v15  ;;  %v16569_v12 = vld [vmem:[#allocation15 + $0x5c8] ss:$16 sps:$4 sm:$0xff]   ;;  %v16574_v15 = vld [vmem:[#allocation15 + $0x5e4] ss:$16 sps:$4 sm:$0xff]  }
 0x833   :  { %14091 = vmatprep.subr.bf16.mxu1 %v16493_v17  ;;  %v16577_v17 = vld [vmem:[#allocation15 + $0x5ec] ss:$16 sps:$4 sm:$0xff]  }
 0x835   :  { %13920 = vmatpush1.bf16.msra.mxu0 %v16488_v18  ;;  %v16572_v18 = vld [vmem:[#allocation15 + $0x5e0] ss:$16 sps:$4 sm:$0xff]  }
 0x836   :  { %14092 = vmatpush1.bf16.msra.mxu1 %v16491_v22  ;;  %13921 = vmatprep.subr.bf16.mxu0 %v16496_v25  ;;  %v16575_v22 = vld [vmem:[#allocation15 + $0x5e8] ss:$16 sps:$4 sm:$0xff]   ;;  %v16580_v25 = vld [vmem:[#allocation15 + $0x604] ss:$16 sps:$4 sm:$0xff]  }
 0x837   :  { %14093 = vmatprep.subr.bf16.mxu1 %v16499_v46  ;;  %v16583_v46 = vld [vmem:[#allocation15 + $0x60c] ss:$16 sps:$4 sm:$0xff]  }
 0x839   :  { %13922 = vmatpush1.bf16.msra.mxu0 %v16494_v24  ;;  %v16676_v24 = vld [vmem:[#allocation13] sm:$0xff] }
 0x83a   :  { %14094 = vmatpush1.bf16.msra.mxu1 %v16497_v52  ;;  %13923 = vmatprep.subr.bf16.mxu0 %v16502_v23  ;;  %v8980_v52 = vrot.slane %v16676_v24, %v17184_v32  ;;  %v8988_v23 = vrot.slane %v16676_v24, %v17198_v7 }
 0x83b   :  { %14095 = vmatprep.subr.bf16.mxu1 %v16505_v3  ;;  %v8984_v3 = vrot.slane %v16676_v24, %v17187_v36 }
 0x83d   :  { %13924 = vmatpush1.bf16.msra.mxu0 %v16500_v27  ;;  %v8992_v27 = vrot.slane %v16676_v24, %v17201_v9  ;;  %v16625_v24 = vld [vmem:[#allocation15 + $0x6ec] ss:$16 sps:$4 sm:$0xff]  }
 0x83e   :  { %14096 = vmatpush1.bf16.msra.mxu1 %v16503_v62  ;;  %13925 = vmatprep.subr.bf16.mxu0 %v16508_v13 }
 0x83f   :  { %14097 = vmatprep.subr.bf16.mxu1 %v16511_v30 }
 0x841   :  { %13926 = vmatpush1.bf16.msra.mxu0 %v16506_v33 }
 0x842   :  { %14098 = vmatpush1.bf16.msra.mxu1 %v16509_v45  ;;  %13927 = vmatprep.subr.bf16.mxu0 %v16514_v31 }
 0x843   :  { %14099 = vmatprep.subr.bf16.mxu1 %v16517_v29 }
 0x845   :  { %13928 = vmatpush1.bf16.msra.mxu0 %v16512_v35 }
 0x846   :  { %14100 = vmatpush1.bf16.msra.mxu1 %v16515_v39  ;;  %13929 = vmatprep.subr.bf16.mxu0 %v16520_v5 }
 0x847   :  { %14101 = vmatprep.subr.bf16.mxu1 %v16523_v41 }
 0x849   :  { %13930 = vmatpush1.bf16.msra.mxu0 %v16518_v38 }
 0x84a   :  { %14102 = vmatpush1.bf16.msra.mxu1 %v16521_v42  ;;  %13931 = vmatprep.subr.bf16.mxu0 %v16526_v48 }
 0x84b   :  { %14103 = vmatprep.subr.bf16.mxu1 %v16529_v49 }
 0x84d   :  { %13932 = vmatpush1.bf16.msra.mxu0 %v16524_v50 }
 0x84e   :  { %14104 = vmatpush1.bf16.msra.mxu1 %v16527_v53  ;;  %13933 = vmatprep.subr.bf16.mxu0 %v16532_v26 }
 0x84f   :  { %14105 = vmatprep.subr.bf16.mxu1 %v16535_v28 }
 0x851   :  { %13934 = vmatpush1.bf16.msra.mxu0 %v16530_v54 }
 0x852   :  { %14106 = vmatpush1.bf16.msra.mxu1 %v16533_v56  ;;  %13935 = vmatprep.subr.bf16.mxu0 %v16538_v57 }
 0x853   :  { %14107 = vmatprep.subr.bf16.mxu1 %v16541_v58 }
 0x855   :  { %13936 = vmatpush1.bf16.msra.mxu0 %v16536_v60  ;;  %v16578_v60 = vld [vmem:[#allocation15 + $0x600] ss:$16 sps:$4 sm:$0xff]  }
 0x856   :  { %14108 = vmatpush1.bf16.msra.mxu1 %v16539_v61  ;;  %13937 = vmatprep.subr.bf16.mxu0 %v16544_v63  ;;  %v16581_v61 = vld [vmem:[#allocation15 + $0x608] ss:$16 sps:$4 sm:$0xff]  }
 0x857   :  { %14109 = vmatprep.subr.bf16.mxu1 %v16547_v34  ;;  %v16586_v34 = vld [vmem:[#allocation15 + $0x624] ss:$16 sps:$4 sm:$0xff]  }
 0x859   :  { %13938 = vmatpush1.bf16.msra.mxu0 %v16542_v37  ;;  %v16589_v37 = vld [vmem:[#allocation15 + $0x62c] ss:$16 sps:$4 sm:$0xff]  }
 0x85a   :  { %14110 = vmatpush1.bf16.msra.mxu1 %v16545_v1  ;;  %13939 = vmatprep.subr.bf16.mxu0 %v16550_v6  ;;  %v16584_v1 = vld [vmem:[#allocation15 + $0x620] ss:$16 sps:$4 sm:$0xff]   ;;  %v16587_v6 = vld [vmem:[#allocation15 + $0x628] ss:$16 sps:$4 sm:$0xff]  }
 0x85b   :  { %14111 = vmatprep.subr.bf16.mxu1 %v16553_v47  ;;  %v16592_v47 = vld [vmem:[#allocation15 + $0x644] ss:$16 sps:$4 sm:$0xff]  }
 0x85d   :  { %13940 = vmatpush1.bf16.msra.mxu0 %v16548_v20  ;;  %v16595_v20 = vld [vmem:[#allocation15 + $0x64c] ss:$16 sps:$4 sm:$0xff]  }
 0x85e   :  { %14112 = vmatpush1.bf16.msra.mxu1 %v16551_v2  ;;  %13941 = vmatprep.subr.bf16.mxu0 %v16556_v55  ;;  %v16590_v2 = vld [vmem:[#allocation15 + $0x640] ss:$16 sps:$4 sm:$0xff]   ;;  %v16593_v55 = vld [vmem:[#allocation15 + $0x648] ss:$16 sps:$4 sm:$0xff]  }
 0x85f   :  { %14113 = vmatprep.subr.bf16.mxu1 %v16559_v59  ;;  %v16598_v59 = vld [vmem:[#allocation15 + $0x664] ss:$16 sps:$4 sm:$0xff]  }
 0x861   :  { %13942 = vmatpush1.bf16.msra.mxu0 %v16554_v4  ;;  %v16601_v4 = vld [vmem:[#allocation15 + $0x66c] ss:$16 sps:$4 sm:$0xff]  }
 0x862   :  { %14114 = vmatpush1.bf16.msra.mxu1 %v16557_v8  ;;  %13943 = vmatprep.subr.bf16.mxu0 %v16562_v10  ;;  %v16596_v8 = vld [vmem:[#allocation15 + $0x660] ss:$16 sps:$4 sm:$0xff]   ;;  %v16599_v10 = vld [vmem:[#allocation15 + $0x668] ss:$16 sps:$4 sm:$0xff]  }
 0x863   :  { %14115 = vmatprep.subr.bf16.mxu1 %v16565_v40  ;;  %v16604_v40 = vld [vmem:[#allocation15 + $0x684] ss:$16 sps:$4 sm:$0xff]  }
 0x865   :  { %13944 = vmatpush1.bf16.msra.mxu0 %v16560_v0  ;;  %v16607_v0 = vld [vmem:[#allocation15 + $0x68c] ss:$16 sps:$4 sm:$0xff]  }
 0x866   :  { %14116 = vmatpush1.bf16.msra.mxu1 %v16563_v51  ;;  %13945 = vmatprep.subr.bf16.mxu0 %v16568_v44  ;;  %v16602_v51 = vld [vmem:[#allocation15 + $0x680] ss:$16 sps:$4 sm:$0xff]   ;;  %v16605_v44 = vld [vmem:[#allocation15 + $0x688] ss:$16 sps:$4 sm:$0xff]  }
 0x867   :  { %14117 = vmatprep.subr.bf16.mxu1 %v16571_v43  ;;  %v16610_v43 = vld [vmem:[#allocation15 + $0x6a4] ss:$16 sps:$4 sm:$0xff]  }
 0x869   :  { %13946 = vmatpush1.bf16.msra.mxu0 %v16566_v11  ;;  %v16613_v11 = vld [vmem:[#allocation15 + $0x6ac] ss:$16 sps:$4 sm:$0xff]  }
 0x86a   :  { %14118 = vmatpush1.bf16.msra.mxu1 %v16569_v12  ;;  %13947 = vmatprep.subr.bf16.mxu0 %v16574_v15  ;;  %v16608_v12 = vld [vmem:[#allocation15 + $0x6a0] ss:$16 sps:$4 sm:$0xff]   ;;  %v16611_v15 = vld [vmem:[#allocation15 + $0x6a8] ss:$16 sps:$4 sm:$0xff]  }
 0x86b   :  { %14119 = vmatprep.subr.bf16.mxu1 %v16577_v17  ;;  %v16616_v17 = vld [vmem:[#allocation15 + $0x6c4] ss:$16 sps:$4 sm:$0xff]  }
 0x86d   :  { %13948 = vmatpush1.bf16.msra.mxu0 %v16572_v18  ;;  %v16619_v18 = vld [vmem:[#allocation15 + $0x6cc] ss:$16 sps:$4 sm:$0xff]  }
 0x86e   :  { %14120 = vmatpush1.bf16.msra.mxu1 %v16575_v22  ;;  %13960 = vmatprep.subr.bf16.mxu0 %v16580_v25  ;;  %v16614_v22 = vld [vmem:[#allocation15 + $0x6c0] ss:$16 sps:$4 sm:$0xff]   ;;  %v16617_v25 = vld [vmem:[#allocation15 + $0x6c8] ss:$16 sps:$4 sm:$0xff]  }
 0x86f   :  { %14132 = vmatprep.subr.bf16.mxu1 %v16583_v46  ;;  %v16622_v46 = vld [vmem:[#allocation15 + $0x6e4] ss:$16 sps:$4 sm:$0xff]  }
 0x883   :  { %v12068_v62 = vpop.f32.mrb[28].mxu0 }
 0x884   :  { %v16090_v13 = vadd.f32 %v12068_v62, %v8980_v52  ;;  %v12240_v30 = vpop.f32.mrb[28].mxu1  ;;  %v12070_v33 = vpop.f32.mrb[29].mxu0  ;;  %v16626_v62 = vld [vmem:[#allocation15 + $0x700] ss:$16 sps:$4 sm:$0xff]  }
 0x885   :  { %v16094_v45 = vadd.f32 %v12240_v30, %v8988_v23  ;;  %v16091_v31 = vadd.f32 %v12070_v33, %v8984_v3  ;;  %v12242_v29 = vpop.f32.mrb[29].mxu1  ;;  %v12072_v35 = vpop.f32.mrb[30].mxu0  ;;  %v16634_v30 = vld [vmem:[#allocation15 + $0x724] ss:$16 sps:$4 sm:$0xff]   ;;  %v16637_v33 = vld [vmem:[#allocation15 + $0x72c] ss:$16 sps:$4 sm:$0xff]  }
 0x886   :  { %v16095_v39 = vadd.f32 %v12242_v29, %v8992_v27  ;;  %v16092_v5 = vadd.f32 %v12072_v35, %v8980_v52  ;;  %v12244_v41 = vpop.f32.mrb[30].mxu1  ;;  %v12074_v38 = vpop.f32.mrb[31].mxu0  ;;  %v12253_v7 = vmax.f32 %v16090_v13, 0.0  ;;  %v16620_v52 = vld [vmem:[#allocation15 + $0x6e0] ss:$16 sps:$4 sm:$0xff]  }
 0x887   :  { %v16096_v42 = vadd.f32 %v12244_v41, %v8988_v23  ;;  %v16093_v32 = vadd.f32 %v12074_v38, %v8984_v3  ;;  %v12246_v48 = vpop.f32.mrb[31].mxu1  ;;  %v12255_v50 = vmax.f32 %v16094_v45, 0.0  ;;  %v12254_v9 = vmax.f32 %v16091_v31, 0.0  ;;  %v16623_v23 = vld [vmem:[#allocation15 + $0x6e8] ss:$16 sps:$4 sm:$0xff]  }
 0x888   :  { %v12261_v49 = vmax.f32 %v16092_v5, 0.0  ;;  %v16097_v36 = vadd.f32 %v12246_v48, %v8992_v27  ;;  %v12256_v28 = vmax.f32 %v16095_v39, 0.0  ;;  %v16628_v3 = vld [vmem:[#allocation15 + $0x704] ss:$16 sps:$4 sm:$0xff]   ;;  %v16631_v27 = vld [vmem:[#allocation15 + $0x70c] ss:$16 sps:$4 sm:$0xff]  }
 0x889   :  { %v12263_v53 = vmax.f32 %v16096_v42, 0.0  ;;  %v12262_v26 = vmax.f32 %v16093_v32, 0.0  ;;  %v16629_v13 = vld [vmem:[#allocation15 + $0x708] ss:$16 sps:$4 sm:$0xff]   ;;  %v16632_v45 = vld [vmem:[#allocation15 + $0x720] ss:$16 sps:$4 sm:$0xff]  }
 0x88a   :  { %v12269_v54 = vpack.c.bf16 %v12261_v49, %v12253_v7  ;;  %v12264_v56 = vmax.f32 %v16097_v36, 0.0  ;;  %v16635_v31 = vld [vmem:[#allocation15 + $0x728] ss:$16 sps:$4 sm:$0xff]   ;;  %v16640_v29 = vld [vmem:[#allocation15 + $0x744] ss:$16 sps:$4 sm:$0xff]  }
 0x88b   :  { %v17405_v57 = vpack.c.bf16 %v12263_v53, %v12255_v50  ;;  %v12270_v58 = vpack.c.bf16 %v12262_v26, %v12254_v9  ;;  %v16643_v35 = vld [vmem:[#allocation15 + $0x74c] ss:$16 sps:$4 sm:$0xff]   ;;  %v16638_v39 = vld [vmem:[#allocation15 + $0x740] ss:$16 sps:$4 sm:$0xff]   ;;  %v16641_v5 = vld [vmem:[#allocation15 + $0x748] ss:$16 sps:$4 sm:$0xff]  }
 0x88c   :  { %v12272_v63 = vpack.c.bf16 %v12264_v56, %v12256_v28  ;;  %v16646_v41 = vld [vmem:[#allocation15 + $0x764] ss:$16 sps:$4 sm:$0xff]   ;;  %v16649_v38 = vld [vmem:[#allocation15 + $0x76c] ss:$16 sps:$4 sm:$0xff]   ;;  %v16644_v42 = vld [vmem:[#allocation15 + $0x760] ss:$16 sps:$4 sm:$0xff]  }
 0x88d   :  { %13949 = vmatprep.mubr.bf16.mxu0 %v12270_v58  ;;  %14121 = vmatprep.mubr.bf16.mxu1 %v12270_v58  ;;  %v16647_v32 = vld [vmem:[#allocation15 + $0x768] ss:$16 sps:$4 sm:$0xff]   ;;  %v16652_v48 = vld [vmem:[#allocation15 + $0x784] ss:$16 sps:$4 sm:$0xff]   ;;  %v16655_v7 = vld [vmem:[#allocation15 + $0x78c] ss:$16 sps:$4 sm:$0xff]  }
 0x88e   :  { %13950 = vmatmul.mubr.bf16.vlgmr.msra.gmra.mrb[32].mxu0 %v12269_v54  ;;  %14122 = vmatmul.mubr.bf16.vlgmr.msra.gmra.mrb[32].mxu1 %v12269_v54  ;;  %v16650_v49 = vld [vmem:[#allocation15 + $0x780] ss:$16 sps:$4 sm:$0xff]   ;;  %v16653_v36 = vld [vmem:[#allocation15 + $0x788] ss:$16 sps:$4 sm:$0xff]   ;;  %v16658_v50 = vld [vmem:[#allocation15 + $0x7a4] ss:$16 sps:$4 sm:$0xff]  }
 0x88f   :  { %13961 = vmatpush1.bf16.msra.mxu0 %v16578_v60  ;;  %14133 = vmatpush1.bf16.msra.mxu1 %v16581_v61  ;;  %v16661_v9 = vld [vmem:[#allocation15 + $0x7ac] ss:$16 sps:$4 sm:$0xff]   ;;  %v16656_v53 = vld [vmem:[#allocation15 + $0x7a0] ss:$16 sps:$4 sm:$0xff]   ;;  %v16659_v26 = vld [vmem:[#allocation15 + $0x7a8] ss:$16 sps:$4 sm:$0xff]  }
 0x890   :  { %13992 = vmatprep.mubr.bf16.mxu0 %v12272_v63  ;;  %14164 = vmatprep.mubr.bf16.mxu1 %v12272_v63  ;;  %v16664_v28 = vld [vmem:[#allocation15 + $0x7c4] ss:$16 sps:$4 sm:$0xff]   ;;  %v16667_v54 = vld [vmem:[#allocation15 + $0x7cc] ss:$16 sps:$4 sm:$0xff]   ;;  %v16662_v56 = vld [vmem:[#allocation15 + $0x7c0] ss:$16 sps:$4 sm:$0xff]  }
 0x891   :  { %13962 = vmatprep.subr.bf16.mxu0 %v16586_v34  ;;  %14134 = vmatprep.subr.bf16.mxu1 %v16589_v37  ;;  %v16665_v58 = vld [vmem:[#allocation15 + $0x7c8] ss:$16 sps:$4 sm:$0xff]   ;;  %v16670_v60 = vld [vmem:[#allocation15 + $0x7e4] ss:$16 sps:$4 sm:$0xff]   ;;  %v16673_v61 = vld [vmem:[#allocation15 + $0x7ec] ss:$16 sps:$4 sm:$0xff]  }
 0x892   :  { %v16668_v63 = vld [vmem:[#allocation15 + $0x7e0] ss:$16 sps:$4 sm:$0xff]   ;;  %v16671_v34 = vld [vmem:[#allocation15 + $0x7e8] ss:$16 sps:$4 sm:$0xff]  }
 0x893   :  { %13963 = vmatpush1.bf16.msra.mxu0 %v16584_v1  ;;  %14135 = vmatpush1.bf16.msra.mxu1 %v16587_v6  ;;  %v12529_v37 = vld [vmem:[#allocation16] sm:$0xf] }
 0x894   :  { %13964 = vmatprep.subr.bf16.mxu0 %v16592_v47  ;;  %14136 = vmatprep.subr.bf16.mxu1 %v16595_v20  ;;  %v12534_v1 = vrot.slane %v12529_v37, %v17148_v14  ;;  %v12542_v6 = vrot.slane %v12529_v37, %v17160_v19  ;;  %v12538_v47 = vrot.slane %v12529_v37, %v17153_v16 }
 0x895   :  { %v12546_v20 = vrot.slane %v12529_v37, %v17163_v21 }
 0x897   :  { %13965 = vmatpush1.bf16.msra.mxu0 %v16590_v2  ;;  %14137 = vmatpush1.bf16.msra.mxu1 %v16593_v55 }
 0x898   :  { %13966 = vmatprep.subr.bf16.mxu0 %v16598_v59  ;;  %14138 = vmatprep.subr.bf16.mxu1 %v16601_v4 }
 0x89b   :  { %13967 = vmatpush1.bf16.msra.mxu0 %v16596_v8  ;;  %14139 = vmatpush1.bf16.msra.mxu1 %v16599_v10 }
 0x89c   :  { %13968 = vmatprep.subr.bf16.mxu0 %v16604_v40  ;;  %14140 = vmatprep.subr.bf16.mxu1 %v16607_v0 }
 0x89f   :  { %13969 = vmatpush1.bf16.msra.mxu0 %v16602_v51  ;;  %14141 = vmatpush1.bf16.msra.mxu1 %v16605_v44 }
 0x8a0   :  { %13970 = vmatprep.subr.bf16.mxu0 %v16610_v43  ;;  %14142 = vmatprep.subr.bf16.mxu1 %v16613_v11 }
 0x8a3   :  { %13971 = vmatpush1.bf16.msra.mxu0 %v16608_v12  ;;  %14143 = vmatpush1.bf16.msra.mxu1 %v16611_v15 }
 0x8a4   :  { %13972 = vmatprep.subr.bf16.mxu0 %v16616_v17  ;;  %14144 = vmatprep.subr.bf16.mxu1 %v16619_v18 }
 0x8a7   :  { %13973 = vmatpush1.bf16.msra.mxu0 %v16614_v22  ;;  %14145 = vmatpush1.bf16.msra.mxu1 %v16617_v25 }
 0x8a8   :  { %13974 = vmatprep.subr.bf16.mxu0 %v16622_v46  ;;  %14146 = vmatprep.subr.bf16.mxu1 %v16625_v24 }
 0x8ab   :  { %13975 = vmatpush1.bf16.msra.mxu0 %v16620_v52  ;;  %14147 = vmatpush1.bf16.msra.mxu1 %v16623_v23 }
 0x8ac   :  { %13976 = vmatprep.subr.bf16.mxu0 %v16628_v3  ;;  %14148 = vmatprep.subr.bf16.mxu1 %v16631_v27 }
 0x8af   :  { %13977 = vmatpush1.bf16.msra.mxu0 %v16626_v62  ;;  %14149 = vmatpush1.bf16.msra.mxu1 %v16629_v13 }
 0x8b0   :  { %13978 = vmatprep.subr.bf16.mxu0 %v16634_v30  ;;  %14150 = vmatprep.subr.bf16.mxu1 %v16637_v33 }
 0x8b3   :  { %13979 = vmatpush1.bf16.msra.mxu0 %v16632_v45  ;;  %14151 = vmatpush1.bf16.msra.mxu1 %v16635_v31 }
 0x8b4   :  { %13980 = vmatprep.subr.bf16.mxu0 %v16640_v29  ;;  %14152 = vmatprep.subr.bf16.mxu1 %v16643_v35 }
 0x8b7   :  { %13981 = vmatpush1.bf16.msra.mxu0 %v16638_v39  ;;  %14153 = vmatpush1.bf16.msra.mxu1 %v16641_v5 }
 0x8b8   :  { %13982 = vmatprep.subr.bf16.mxu0 %v16646_v41  ;;  %14154 = vmatprep.subr.bf16.mxu1 %v16649_v38 }
 0x8bb   :  { %13983 = vmatpush1.bf16.msra.mxu0 %v16644_v42  ;;  %14155 = vmatpush1.bf16.msra.mxu1 %v16647_v32 }
 0x8bc   :  { %13984 = vmatprep.subr.bf16.mxu0 %v16652_v48  ;;  %14156 = vmatprep.subr.bf16.mxu1 %v16655_v7 }
 0x8bf   :  { %13985 = vmatpush1.bf16.msra.mxu0 %v16650_v49  ;;  %14157 = vmatpush1.bf16.msra.mxu1 %v16653_v36 }
 0x8c0   :  { %13986 = vmatprep.subr.bf16.mxu0 %v16658_v50  ;;  %14158 = vmatprep.subr.bf16.mxu1 %v16661_v9 }
 0x8c3   :  { %13987 = vmatpush1.bf16.msra.mxu0 %v16656_v53  ;;  %14159 = vmatpush1.bf16.msra.mxu1 %v16659_v26 }
 0x8c4   :  { %13988 = vmatprep.subr.bf16.mxu0 %v16664_v28  ;;  %14160 = vmatprep.subr.bf16.mxu1 %v16667_v54 }
 0x8c7   :  { %13989 = vmatpush1.bf16.msra.mxu0 %v16662_v56  ;;  %14161 = vmatpush1.bf16.msra.mxu1 %v16665_v58 }
 0x8c8   :  { %13990 = vmatprep.subr.bf16.mxu0 %v16670_v60  ;;  %14162 = vmatprep.subr.bf16.mxu1 %v16673_v61 }
 0x8cb   :  { %13991 = vmatpush1.bf16.msra.mxu0 %v16668_v63  ;;  %14163 = vmatpush1.bf16.msra.mxu1 %v16671_v34 }
 0x8ce   :  { %13993 = vmatmul.mubr.bf16.vlgmr.msra.gmra.mrb[32].mxu0 %v17405_v57  ;;  %14165 = vmatmul.mubr.bf16.vlgmr.msra.gmra.mrb[32].mxu1 %v17405_v57 }
 0x9a1   :  { %v13994_v2 = vpop.f32.mrb[32].mxu0  ;;  %v14166_v55 = vpop.f32.mrb[32].mxu1 }
 0x9a2   :  { %v16098_v59 = vadd.f32 %v13994_v2, %v12534_v1  ;;  %v16102_v4 = vadd.f32 %v14166_v55, %v12542_v6  ;;  %v13996_v8 = vpop.f32.mrb[33].mxu0  ;;  %v14168_v10 = vpop.f32.mrb[33].mxu1 }
 0x9a3   :  { %v16099_v40 = vadd.f32 %v13996_v8, %v12538_v47  ;;  %v16103_v0 = vadd.f32 %v14168_v10, %v12546_v20  ;;  %v13998_v51 = vpop.f32.mrb[34].mxu0  ;;  %v14170_v44 = vpop.f32.mrb[34].mxu1 }
 0x9a4   :  { %14175 = vst [vmem:[%s17448_s11] sm:$0xff] %v16098_v59  ;;  %14177 = vst [vmem:[%s17448_s11 + $0x10] sm:$0xff] %v16102_v4  ;;  %v16100_v14 = vadd.f32 %v13998_v51, %v12534_v1  ;;  %v16104_v16 = vadd.f32 %v14170_v44, %v12542_v6  ;;  %v14000_v19 = vpop.f32.mrb[35].mxu0  ;;  %v14172_v21 = vpop.f32.mrb[35].mxu1 }
 0x9a5   :  { %14176 = vst [vmem:[%s17448_s11 + $0x8] sm:$0xff] %v16099_v40  ;;  %14178 = vst [vmem:[%s17448_s11 + $0x18] sm:$0xff] %v16103_v0  ;;  %v16101_v57 = vadd.f32 %v14000_v19, %v12538_v47  ;;  %v16105_v43 = vadd.f32 %v14172_v21, %v12546_v20 }
 0x9a6   :  { %14179 = vst [vmem:[%s17448_s11 + $0x20] sm:$0xff] %v16100_v14  ;;  %14181 = vst [vmem:[%s17448_s11 + $0x30] sm:$0xff] %v16104_v16 }
 0x9a7   :  { %14180 = vst [vmem:[%s17448_s11 + $0x28] sm:$0xff] %v16101_v57  ;;  %14182 = vst [vmem:[%s17448_s11 + $0x38] sm:$0xff] %v16105_v43 }
 0x9a8   :  { %14187 = vsyncpa [#allocation3], 1 }
 0x9a9   :  { %14188 = vsyncpa [#allocation5], 1 }
 0x9aa   :  { %14189 = vsyncpa [#allocation8], 1 }
 0x9ab   :  { %14190 = vsyncpa [#allocation11], 1 }
 0x9ac   :  { %14191 = vsyncpa [#allocation14], 1 }
 0x9ad   :  { %14192 = vsyncpa [#allocation17], 1 }

</bundles_post_ra>
